<compile_context>
chip_gen: v7x
topology: tpu7x:2x2x1
jax: 0.10.0
libtpu: 0.0.40
codegen_flags: <defaults>
</compile_context>

<pallas_src>
import functools

import jax
import jax.numpy as jnp
from jax.experimental import pallas as pl
from jax.experimental.pallas import tpu as pltpu


# ----------------------------- in-kernel helpers -----------------------------

def _bilinear_taps(n_in, n_out):
    # align_corners=True source taps (lo index, fractional weight) per output
    # position.  Pure-Python compile-time constants baked into the kernel.
    taps = []
    for o in range(n_out):
        if n_in == 1 or n_out == 1:
            taps.append((0, 0.0))
            continue
        src = o * (n_in - 1) / (n_out - 1)
        lo = min(int(src), n_in - 2)
        taps.append((lo, float(src - lo)))
    return tuple(taps)


def _bilinear_x2(x, h_taps, w_taps):
    # x: (H, W, C) VMEM value -> (Ho, Wo, C).  Statically unrolled lerps:
    # only static slices / scalar muls / adds / concats (channels lane-dense).
    rows = []
    for lo, f in h_taps:
        a = x[lo:lo + 1]                                    # (1, W, C)
        rows.append(a if f == 0.0 else (1.0 - f) * a + f * x[lo + 1:lo + 2])
    xh = jnp.concatenate(rows, axis=0)                      # (Ho, W, C)
    cols = []
    for lo, f in w_taps:
        a = xh[:, lo:lo + 1, :]                             # (Ho, 1, C)
        cols.append(a if f == 0.0 else (1.0 - f) * a + f * xh[:, lo + 1:lo + 2, :])
    return jnp.concatenate(cols, axis=1)                    # (Ho, Wo, C)


def _pad_hw(x, top, bot, left, right):
    # Zero-pad H/W of a (H, W, C) VMEM value (F.pad semantics).
    h, w, c = x.shape
    if left or right:
        parts = []
        if left:
            parts.append(jnp.zeros((h, left, c), x.dtype))
        parts.append(x)
        if right:
            parts.append(jnp.zeros((h, right, c), x.dtype))
        x = jnp.concatenate(parts, axis=1)
        w = w + left + right
    if top or bot:
        parts = []
        if top:
            parts.append(jnp.zeros((top, w, c), x.dtype))
        parts.append(x)
        if bot:
            parts.append(jnp.zeros((bot, w, c), x.dtype))
        x = jnp.concatenate(parts, axis=0)
    return x


def _maxpool2x2(x, hp, wp):
    # MaxPool2d(2) of a (H, W, C) VMEM value -> (hp, wp, C); floor-truncates.
    c = x.shape[-1]
    x = x[:2 * hp, :2 * wp, :]
    x = x.reshape(hp, 2, 2 * wp, c)
    x = jnp.maximum(x[:, 0], x[:, 1])                       # pool over H pairs
    x = x.reshape(hp, wp, 2, c)
    return jnp.max(x, axis=2)                               # pool over W pairs


# ----------------------------- Pallas kernels -----------------------------

def _front_head_kernel(x1_ref, x2_ref, w_ref, b_ref, o0_ref, o1_ref, o2_ref,
                       *, h_taps, w_taps, pad):
    # Fused: upsample(x1) + pad + cat([x2, x1]) + maxpool(2) + the three
    # branch-head 1x1 convs (BN folded) + ReLU.  Pooled tensor never hits HBM.
    _, Hp, Wp, half = o0_ref.shape

    xu = _bilinear_x2(x1_ref[0], h_taps, w_taps)            # (Ho, Wo, C1)
    xu = _pad_hw(xu, *pad)                                  # (H2, W2, C1)

    p2 = _maxpool2x2(x2_ref[0], Hp, Wp)                     # (Hp, Wp, C2)
    p1 = _maxpool2x2(xu, Hp, Wp)                            # (Hp, Wp, C1)
    xp = jnp.concatenate([p2, p1], axis=-1)                 # (Hp, Wp, Cin)
    cin = xp.shape[-1]

    # one wide matmul for the three 1x1 branch heads (better MXU N-fill)
    y = jnp.dot(xp.reshape(Hp * Wp, cin), w_ref[...],
                preferred_element_type=jnp.float32)
    y = jnp.maximum(y + b_ref[...], 0.0)                    # (Hp*Wp, 3*half)
    o0_ref[0] = y[:, 0 * half:1 * half].reshape(Hp, Wp, half).astype(o0_ref.dtype)
    o1_ref[0] = y[:, 1 * half:2 * half].reshape(Hp, Wp, half).astype(o1_ref.dtype)
    o2_ref[0] = y[:, 2 * half:3 * half].reshape(Hp, Wp, half).astype(o2_ref.dtype)


def _conv3x3_kernel(x_ref, w_ref, b_ref, o_ref):
    # 3x3 conv (stride 1, pad 1) + folded BN + ReLU.  Halo padding is done on
    # the VMEM tile; the 3 dx taps are folded into K so each dy is one matmul
    # with K = 3*Cin (3 matmuls instead of 9).
    _, H, W, Cin = x_ref.shape
    Cout = o_ref.shape[3]
    x = x_ref[0]
    zc = jnp.zeros((H, 1, Cin), x.dtype)
    x = jnp.concatenate([zc, x, zc], axis=1)                # (H, W+2, Cin)
    zr = jnp.zeros((1, W + 2, Cin), x.dtype)
    x = jnp.concatenate([zr, x, zr], axis=0)                # (H+2, W+2, Cin)

    acc = None
    for dy in range(3):
        rows = x[dy:dy + H]                                 # (H, W+2, Cin)
        taps = jnp.concatenate(
            [rows[:, 0:W], rows[:, 1:W + 1], rows[:, 2:W + 2]], axis=-1)
        part = jnp.dot(taps.reshape(H * W, 3 * Cin), w_ref[dy],
                       preferred_element_type=jnp.float32)
        acc = part if acc is None else acc + part
    y = jnp.maximum(acc + b_ref[...], 0.0)
    o_ref[0] = y.reshape(H, W, Cout).astype(o_ref.dtype)


def _final_kernel(x0_ref, xb1_ref, xb2_ref, w0_ref, w1_ref, w2_ref, b_ref,
                  o_ref, *, scale):
    # Final 1x1 conv over cat([x0, xb1, xb2]) as a sum of partial matmuls,
    # then out*scale and ReLU.  The concat never materializes in HBM.
    _, H, W, _ = x0_ref.shape
    Cout = o_ref.shape[3]

    def part(xr, wr):
        c = xr.shape[3]
        return jnp.dot(xr[0].reshape(H * W, c), wr[...],
                       preferred_element_type=jnp.float32)

    y = part(x0_ref, w0_ref) + part(xb1_ref, w1_ref) + part(xb2_ref, w2_ref)
    y = jnp.maximum(scale * (y + b_ref[...]), 0.0)
    o_ref[0] = y.reshape(H, W, Cout).astype(o_ref.dtype)


# ----------------------------- pallas_call wrappers -----------------------------

def _per_batch_spec(shape):
    _, h, w, c = shape
    return pl.BlockSpec((1, h, w, c), lambda n: (n, 0, 0, 0))


def _bcast_spec(shape):
    nd = len(shape)
    return pl.BlockSpec(tuple(shape), lambda n, _nd=nd: (0,) * _nd)


def front_and_branch_heads(x1_nhwc, x2_nhwc, w_head, b_head):
    N, H1, W1, _ = x1_nhwc.shape
    _, H2, W2, _ = x2_nhwc.shape
    Ho, Wo = 2 * H1, 2 * W1
    dY, dX = H2 - Ho, W2 - Wo
    assert dY >= 0 and dX >= 0, "skip connection must be >= upsampled input"
    Hp, Wp = H2 // 2, W2 // 2
    half = w_head.shape[1] // 3

    kernel = functools.partial(
        _front_head_kernel,
        h_taps=_bilinear_taps(H1, Ho),
        w_taps=_bilinear_taps(W1, Wo),
        pad=(dY // 2, dY - dY // 2, dX // 2, dX - dX // 2))

    out_sd = jax.ShapeDtypeStruct((N, Hp, Wp, half), x1_nhwc.dtype)
    out_spec = pl.BlockSpec((1, Hp, Wp, half), lambda n: (n, 0, 0, 0))
    return pl.pallas_call(
        kernel,
        grid=(N,),
        in_specs=[_per_batch_spec(x1_nhwc.shape), _per_batch_spec(x2_nhwc.shape),
                  _bcast_spec(w_head.shape), _bcast_spec(b_head.shape)],
        out_specs=(out_spec, out_spec, out_spec),
        out_shape=(out_sd, out_sd, out_sd),
        compiler_params=pltpu.CompilerParams(dimension_semantics=("parallel",)),
    )(x1_nhwc, x2_nhwc, w_head, b_head)


def conv3x3_bn_relu(x, w3, b):
    # x: (N, H, W, Cin) NHWC; w3: (3, 3*Cin, Cout); b: (1, Cout)
    N, H, W, _ = x.shape
    Cout = w3.shape[2]
    return pl.pallas_call(
        _conv3x3_kernel,
        grid=(N,),
        in_specs=[_per_batch_spec(x.shape), _bcast_spec(w3.shape),
                  _bcast_spec(b.shape)],
        out_specs=pl.BlockSpec((1, H, W, Cout), lambda n: (n, 0, 0, 0)),
        out_shape=jax.ShapeDtypeStruct((N, H, W, Cout), x.dtype),
        compiler_params=pltpu.CompilerParams(dimension_semantics=("parallel",)),
    )(x, w3, b)


def final_conv1x1(x0, xb1, xb2, w0, w1, w2, b, scale):
    N, H, W, _ = x0.shape
    Cout = w0.shape[1]
    kernel = functools.partial(_final_kernel, scale=float(scale))
    return pl.pallas_call(
        kernel,
        grid=(N,),
        in_specs=[_per_batch_spec(x0.shape), _per_batch_spec(xb1.shape),
                  _per_batch_spec(xb2.shape), _bcast_spec(w0.shape),
                  _bcast_spec(w1.shape), _bcast_spec(w2.shape),
                  _bcast_spec(b.shape)],
        out_specs=pl.BlockSpec((1, H, W, Cout), lambda n: (n, 0, 0, 0)),
        out_shape=jax.ShapeDtypeStruct((N, H, W, Cout), x0.dtype),
        compiler_params=pltpu.CompilerParams(dimension_semantics=("parallel",)),
    )(x0, xb1, xb2, w0, w1, w2, b)


# ----------------------------- parameters (deterministic, synthetic) -----------------------------

def _fold_bn(w_oihw, gamma, beta, mean, var, eps=1e-3):
    s = gamma / jnp.sqrt(var + eps)
    return w_oihw * s[:, None, None, None], beta - mean * s


def _init_basic_conv(key, cin, cout, k):
    kw, kg, kb, km, kv = jax.random.split(key, 5)
    fan = cin * k * k
    w = jax.random.normal(kw, (cout, cin, k, k), jnp.float32) * (fan ** -0.5)
    gamma = 1.0 + 0.1 * jax.random.normal(kg, (cout,), jnp.float32)
    beta = 0.1 * jax.random.normal(kb, (cout,), jnp.float32)
    mean = 0.1 * jax.random.normal(km, (cout,), jnp.float32)
    var = 0.5 + jax.random.uniform(kv, (cout,), jnp.float32)
    return _fold_bn(w, gamma, beta, mean, var)


def _pack_1x1(w, b):
    return w[:, :, 0, 0].T, b[None, :]                 # (Cin, Cout), (1, Cout)


def _pack_3x3(w, b):
    # (Cout, Cin, 3, 3) -> (ky, kx*Cin, Cout) so the dx taps live along K.
    cout, cin = w.shape[0], w.shape[1]
    return jnp.transpose(w, (2, 3, 1, 0)).reshape(3, 3 * cin, cout), b[None, :]


def init_uplayer_params(key, in_ch, out_ch):
    half = in_ch // 2
    ks = jax.random.split(key, 7)
    p = {}
    # branch-head 1x1 convs (branch0, branch1[0], branch2[0]) fused along Cout
    w0, b0 = _pack_1x1(*_init_basic_conv(ks[0], in_ch, half, 1))
    w1, b1 = _pack_1x1(*_init_basic_conv(ks[1], in_ch, half, 1))
    w2, b2 = _pack_1x1(*_init_basic_conv(ks[2], in_ch, half, 1))
    p["head_w"] = jnp.concatenate([w0, w1, w2], axis=1)       # (Cin, 3*half)
    p["head_b"] = jnp.concatenate([b0, b1, b2], axis=1)       # (1, 3*half)
    # 3x3 convs
    p["b1_1_w"], p["b1_1_b"] = _pack_3x3(*_init_basic_conv(ks[3], half, half, 3))
    c21 = half + in_ch
    p["b2_1_w"], p["b2_1_b"] = _pack_3x3(*_init_basic_conv(ks[4], half, c21, 3))
    c22 = 2 * in_ch
    p["b2_2_w"], p["b2_2_b"] = _pack_3x3(*_init_basic_conv(ks[5], c21, c22, 3))
    # final 1x1 conv (own bias, no BN), split by branch for the fused
    # concat-as-sum-of-matmuls formulation.
    kfw, kfb = jax.random.split(ks[6])
    cin_f = 3 * in_ch
    wf = jax.random.normal(kfw, (out_ch, cin_f, 1, 1), jnp.float32) * (cin_f ** -0.5)
    bf = 0.1 * jax.random.normal(kfb, (out_ch,), jnp.float32)
    wf2d, bf2d = _pack_1x1(wf, bf)                            # (3*in_ch, out_ch)
    p["final_w0"] = wf2d[:half]                               # rows for x0
    p["final_w1"] = wf2d[half:2 * half]                       # rows for xb1
    p["final_w2"] = wf2d[2 * half:]                           # rows for xb2
    p["final_b"] = bf2d
    return p


# ----------------------------- forward -----------------------------

@functools.partial(jax.jit, static_argnames=("scale",))
def uplayer_forward(x1_nchw, x2_nchw, params, scale=1.0):
    # NCHW <-> NHWC layout plumbing only at the graph edges.
    x1 = jnp.transpose(x1_nchw, (0, 2, 3, 1))
    x2 = jnp.transpose(x2_nchw, (0, 2, 3, 1))

    # kernel 1: upsample + pad + cat([x2, x1]) + maxpool + fused branch heads
    x0, t1, t2 = front_and_branch_heads(x1, x2, params["head_w"], params["head_b"])

    # kernels 2-4: the 3x3 conv chains of branch1 / branch2
    xb1 = conv3x3_bn_relu(t1, params["b1_1_w"], params["b1_1_b"])
    t = conv3x3_bn_relu(t2, params["b2_1_w"], params["b2_1_b"])
    xb2 = conv3x3_bn_relu(t, params["b2_2_w"], params["b2_2_b"])

    # kernel 5: cat([x0, xb1, xb2]) + final 1x1 conv + *scale + ReLU (fused)
    out = final_conv1x1(x0, xb1, xb2, params["final_w0"], params["final_w1"],
                        params["final_w2"], params["final_b"], scale)
    return jnp.transpose(out, (0, 3, 1, 2))


if __name__ == "__main__":
    key = jax.random.PRNGKey(0)
    in_ch, out_ch, N = 8, 8, 2
    k1, k2, kp = jax.random.split(key, 3)
    # x1: low-res decoder feature, x2: skip connection (channels sum to in_ch).
    x1 = jax.random.normal(k1, (N, in_ch // 2, 8, 8), jnp.float32)
    x2 = jax.random.normal(k2, (N, in_ch // 2, 16, 16), jnp.float32)
    params = init_uplayer_params(kp, in_ch, out_ch)

    out = uplayer_forward(x1, x2, params, scale=1.0)
    jax.block_until_ready(out)
    assert out.shape == (N, out_ch, 8, 8), out.shape
    print("KERNEL_OK")
</pallas_src>

<mosaic_0001>
module attributes {stable_mosaic.version = 11 : i64} {
  func.func @_conv3x3_kernel(%arg0: i32, %arg1: memref<1x8x8x4xf32, #tpu.memory_space<vmem>>, %arg2: memref<3x12x12xf32, #tpu.memory_space<vmem>>, %arg3: memref<1x12xf32, #tpu.memory_space<vmem>>, %arg4: memref<1x8x8x12xf32, #tpu.memory_space<vmem>>) attributes {dimension_semantics = [#tpu.dimension_semantics<parallel>], iteration_bounds = array<i64: 2>, scalar_prefetch = 0 : i64, scratch_operands = 0 : i64, tpu.core_type = #tpu.core_type<tc>, window_params = [{transform_indices = @transform_0, window_bounds = array<i64: 1, 8, 8, 4>}, {pipeline_mode = #tpu.pipeline_mode<synchronous>, transform_indices = @transform_1, window_bounds = array<i64: 3, 12, 12>}, {pipeline_mode = #tpu.pipeline_mode<synchronous>, transform_indices = @transform_2, window_bounds = array<i64: 1, 12>}, {transform_indices = @transform_3, window_bounds = array<i64: 1, 8, 8, 12>}]} {
    %c0 = arith.constant 0 : index
    %c0_0 = arith.constant 0 : index
    %c0_1 = arith.constant 0 : index
    %c0_2 = arith.constant 0 : index
    %0 = vector.load %arg1[%c0, %c0_0, %c0_1, %c0_2] : memref<1x8x8x4xf32, #tpu.memory_space<vmem>>, vector<1x8x8x4xf32>
    %1 = vector.shape_cast %0 : vector<1x8x8x4xf32> to vector<8x8x4xf32>
    %cst = arith.constant 0.000000e+00 : f32
    %2 = vector.broadcast %cst : f32 to vector<8x1x4xf32>
    %3 = tpu.concatenate %2, %1, %2 in 1 : vector<8x1x4xf32>, vector<8x8x4xf32>, vector<8x1x4xf32> -> vector<8x10x4xf32>
    %cst_3 = arith.constant 0.000000e+00 : f32
    %4 = vector.broadcast %cst_3 : f32 to vector<1x10x4xf32>
    %5 = tpu.concatenate %4, %3, %4 in 0 : vector<1x10x4xf32>, vector<8x10x4xf32>, vector<1x10x4xf32> -> vector<10x10x4xf32>
    %6 = vector.extract_strided_slice %5 {offsets = [0, 0, 0], sizes = [8, 10, 4], strides = [1, 1, 1]} : vector<10x10x4xf32> to vector<8x10x4xf32>
    %7 = vector.extract_strided_slice %6 {offsets = [0, 0, 0], sizes = [8, 8, 4], strides = [1, 1, 1]} : vector<8x10x4xf32> to vector<8x8x4xf32>
    %8 = vector.extract_strided_slice %6 {offsets = [0, 1, 0], sizes = [8, 8, 4], strides = [1, 1, 1]} : vector<8x10x4xf32> to vector<8x8x4xf32>
    %9 = vector.extract_strided_slice %6 {offsets = [0, 2, 0], sizes = [8, 8, 4], strides = [1, 1, 1]} : vector<8x10x4xf32> to vector<8x8x4xf32>
    %10 = tpu.concatenate %7, %8, %9 in 2 : vector<8x8x4xf32>, vector<8x8x4xf32>, vector<8x8x4xf32> -> vector<8x8x12xf32>
    %11 = vector.shape_cast %10 : vector<8x8x12xf32> to vector<64x12xf32>
    %c0_4 = arith.constant 0 : index
    %c0_5 = arith.constant 0 : index
    %c0_6 = arith.constant 0 : index
    %12 = vector.load %arg2[%c0_4, %c0_5, %c0_6] : memref<3x12x12xf32, #tpu.memory_space<vmem>>, vector<1x12x12xf32>
    %13 = vector.shape_cast %12 : vector<1x12x12xf32> to vector<12x12xf32>
    %cst_7 = arith.constant dense<0.000000e+00> : vector<64x12xf32>
    %14 = tpu.matmul %11, %13, %cst_7 {dimension_numbers = #tpu.dot_dimension_numbers<[1], [0], [0], [1], [0, 0, 1, 1], [], []>} : vector<64x12xf32>, vector<12x12xf32>, vector<64x12xf32> -> vector<64x12xf32>
    %15 = vector.extract_strided_slice %5 {offsets = [1, 0, 0], sizes = [8, 10, 4], strides = [1, 1, 1]} : vector<10x10x4xf32> to vector<8x10x4xf32>
    %16 = vector.extract_strided_slice %15 {offsets = [0, 0, 0], sizes = [8, 8, 4], strides = [1, 1, 1]} : vector<8x10x4xf32> to vector<8x8x4xf32>
    %17 = vector.extract_strided_slice %15 {offsets = [0, 1, 0], sizes = [8, 8, 4], strides = [1, 1, 1]} : vector<8x10x4xf32> to vector<8x8x4xf32>
    %18 = vector.extract_strided_slice %15 {offsets = [0, 2, 0], sizes = [8, 8, 4], strides = [1, 1, 1]} : vector<8x10x4xf32> to vector<8x8x4xf32>
    %19 = tpu.concatenate %16, %17, %18 in 2 : vector<8x8x4xf32>, vector<8x8x4xf32>, vector<8x8x4xf32> -> vector<8x8x12xf32>
    %20 = vector.shape_cast %19 : vector<8x8x12xf32> to vector<64x12xf32>
    %c1 = arith.constant 1 : index
    %c0_8 = arith.constant 0 : index
    %c0_9 = arith.constant 0 : index
    %21 = vector.load %arg2[%c1, %c0_8, %c0_9] : memref<3x12x12xf32, #tpu.memory_space<vmem>>, vector<1x12x12xf32>
    %22 = vector.shape_cast %21 : vector<1x12x12xf32> to vector<12x12xf32>
    %cst_10 = arith.constant dense<0.000000e+00> : vector<64x12xf32>
    %23 = tpu.matmul %20, %22, %cst_10 {dimension_numbers = #tpu.dot_dimension_numbers<[1], [0], [0], [1], [0, 0, 1, 1], [], []>} : vector<64x12xf32>, vector<12x12xf32>, vector<64x12xf32> -> vector<64x12xf32>
    %24 = arith.addf %14, %23 : vector<64x12xf32>
    %25 = vector.extract_strided_slice %5 {offsets = [2, 0, 0], sizes = [8, 10, 4], strides = [1, 1, 1]} : vector<10x10x4xf32> to vector<8x10x4xf32>
    %26 = vector.extract_strided_slice %25 {offsets = [0, 0, 0], sizes = [8, 8, 4], strides = [1, 1, 1]} : vector<8x10x4xf32> to vector<8x8x4xf32>
    %27 = vector.extract_strided_slice %25 {offsets = [0, 1, 0], sizes = [8, 8, 4], strides = [1, 1, 1]} : vector<8x10x4xf32> to vector<8x8x4xf32>
    %28 = vector.extract_strided_slice %25 {offsets = [0, 2, 0], sizes = [8, 8, 4], strides = [1, 1, 1]} : vector<8x10x4xf32> to vector<8x8x4xf32>
    %29 = tpu.concatenate %26, %27, %28 in 2 : vector<8x8x4xf32>, vector<8x8x4xf32>, vector<8x8x4xf32> -> vector<8x8x12xf32>
    %30 = vector.shape_cast %29 : vector<8x8x12xf32> to vector<64x12xf32>
    %c2 = arith.constant 2 : index
    %c0_11 = arith.constant 0 : index
    %c0_12 = arith.constant 0 : index
    %31 = vector.load %arg2[%c2, %c0_11, %c0_12] : memref<3x12x12xf32, #tpu.memory_space<vmem>>, vector<1x12x12xf32>
    %32 = vector.shape_cast %31 : vector<1x12x12xf32> to vector<12x12xf32>
    %cst_13 = arith.constant dense<0.000000e+00> : vector<64x12xf32>
    %33 = tpu.matmul %30, %32, %cst_13 {dimension_numbers = #tpu.dot_dimension_numbers<[1], [0], [0], [1], [0, 0, 1, 1], [], []>} : vector<64x12xf32>, vector<12x12xf32>, vector<64x12xf32> -> vector<64x12xf32>
    %34 = arith.addf %24, %33 : vector<64x12xf32>
    %c0_14 = arith.constant 0 : index
    %c0_15 = arith.constant 0 : index
    %35 = vector.load %arg3[%c0_14, %c0_15] : memref<1x12xf32, #tpu.memory_space<vmem>>, vector<1x12xf32>
    %36 = vector.broadcast %35 : vector<1x12xf32> to vector<64x12xf32>
    %37 = arith.addf %34, %36 : vector<64x12xf32>
    %cst_16 = arith.constant 0.000000e+00 : f32
    %38 = vector.broadcast %cst_16 : f32 to vector<64x12xf32>
    %39 = arith.maximumf %37, %38 : vector<64x12xf32>
    %40 = vector.shape_cast %39 : vector<64x12xf32> to vector<8x8x12xf32>
    %c0_17 = arith.constant 0 : index
    %c0_18 = arith.constant 0 : index
    %c0_19 = arith.constant 0 : index
    %c0_20 = arith.constant 0 : index
    %41 = vector.load %arg4[%c0_17, %c0_18, %c0_19, %c0_20] : memref<1x8x8x12xf32, #tpu.memory_space<vmem>>, vector<1x8x8x12xf32>
    %42 = vector.shape_cast %41 : vector<1x8x8x12xf32> to vector<8x8x12xf32>
    %43 = vector.shape_cast %40 : vector<8x8x12xf32> to vector<1x8x8x12xf32>
    tpu.vector_store %arg4[%c0_17, %c0_18, %c0_19, %c0_20], %43 {strides = array<i32>} : memref<1x8x8x12xf32, #tpu.memory_space<vmem>>, vector<1x8x8x12xf32>,
    return
  }
  func.func @transform_0(%arg0: i32) -> (i32, i32, i32, i32) {
    %c0_i32 = arith.constant 0 : i32
    %c0_i32_0 = arith.constant 0 : i32
    %c0_i32_1 = arith.constant 0 : i32
    %c0_i32_2 = arith.constant 0 : i32
    return %arg0, %c0_i32, %c0_i32_0, %c0_i32_1 : i32, i32, i32, i32
  }
  func.func @transform_1(%arg0: i32) -> (i32, i32, i32) {
    %c0_i32 = arith.constant 0 : i32
    %c0_i32_0 = arith.constant 0 : i32
    %c0_i32_1 = arith.constant 0 : i32
    %c0_i32_2 = arith.constant 0 : i32
    return %c0_i32, %c0_i32_0, %c0_i32_1 : i32, i32, i32
  }
  func.func @transform_2(%arg0: i32) -> (i32, i32) {
    %c0_i32 = arith.constant 0 : i32
    %c0_i32_0 = arith.constant 0 : i32
    %c0_i32_1 = arith.constant 0 : i32
    return %c0_i32, %c0_i32_0 : i32, i32
  }
  func.func @transform_3(%arg0: i32) -> (i32, i32, i32, i32) {
    %c0_i32 = arith.constant 0 : i32
    %c0_i32_0 = arith.constant 0 : i32
    %c0_i32_1 = arith.constant 0 : i32
    %c0_i32_2 = arith.constant 0 : i32
    return %arg0, %c0_i32, %c0_i32_0, %c0_i32_1 : i32, i32, i32, i32
  }
}

module attributes {stable_mosaic.version = 11 : i64} {
  func.func @_front_head_kernel(%arg0: i32, %arg1: memref<1x8x8x4xf32, #tpu.memory_space<vmem>>, %arg2: memref<1x16x16x4xf32, #tpu.memory_space<vmem>>, %arg3: memref<8x12xf32, #tpu.memory_space<vmem>>, %arg4: memref<1x12xf32, #tpu.memory_space<vmem>>, %arg5: memref<1x8x8x4xf32, #tpu.memory_space<vmem>>, %arg6: memref<1x8x8x4xf32, #tpu.memory_space<vmem>>, %arg7: memref<1x8x8x4xf32, #tpu.memory_space<vmem>>) attributes {dimension_semantics = [#tpu.dimension_semantics<parallel>], iteration_bounds = array<i64: 2>, scalar_prefetch = 0 : i64, scratch_operands = 0 : i64, tpu.core_type = #tpu.core_type<tc>, window_params = [{transform_indices = @transform_0, window_bounds = array<i64: 1, 8, 8, 4>}, {transform_indices = @transform_1, window_bounds = array<i64: 1, 16, 16, 4>}, {pipeline_mode = #tpu.pipeline_mode<synchronous>, transform_indices = @transform_2, window_bounds = array<i64: 8, 12>}, {pipeline_mode = #tpu.pipeline_mode<synchronous>, transform_indices = @transform_3, window_bounds = array<i64: 1, 12>}, {transform_indices = @transform_4, window_bounds = array<i64: 1, 8, 8, 4>}, {transform_indices = @transform_5, window_bounds = array<i64: 1, 8, 8, 4>}, {transform_indices = @transform_6, window_bounds = array<i64: 1, 8, 8, 4>}]} {
    %c0 = arith.constant 0 : index
    %c0_0 = arith.constant 0 : index
    %c0_1 = arith.constant 0 : index
    %c0_2 = arith.constant 0 : index
    %0 = vector.load %arg1[%c0, %c0_0, %c0_1, %c0_2] : memref<1x8x8x4xf32, #tpu.memory_space<vmem>>, vector<1x8x8x4xf32>
    %1 = vector.shape_cast %0 : vector<1x8x8x4xf32> to vector<8x8x4xf32>
    %2 = vector.extract_strided_slice %1 {offsets = [0, 0, 0], sizes = [1, 8, 4], strides = [1, 1, 1]} : vector<8x8x4xf32> to vector<1x8x4xf32>
    %3 = vector.extract_strided_slice %1 {offsets = [0, 0, 0], sizes = [1, 8, 4], strides = [1, 1, 1]} : vector<8x8x4xf32> to vector<1x8x4xf32>
    %cst = arith.constant 0.533333361 : f32
    %4 = vector.broadcast %cst : f32 to vector<1x8x4xf32>
    %5 = arith.mulf %4, %3 : vector<1x8x4xf32>
    %6 = vector.extract_strided_slice %1 {offsets = [1, 0, 0], sizes = [1, 8, 4], strides = [1, 1, 1]} : vector<8x8x4xf32> to vector<1x8x4xf32>
    %cst_3 = arith.constant 0.466666669 : f32
    %7 = vector.broadcast %cst_3 : f32 to vector<1x8x4xf32>
    %8 = arith.mulf %7, %6 : vector<1x8x4xf32>
    %9 = arith.addf %5, %8 : vector<1x8x4xf32>
    %10 = vector.extract_strided_slice %1 {offsets = [0, 0, 0], sizes = [1, 8, 4], strides = [1, 1, 1]} : vector<8x8x4xf32> to vector<1x8x4xf32>
    %cst_4 = arith.constant 0.0666666701 : f32
    %11 = vector.broadcast %cst_4 : f32 to vector<1x8x4xf32>
    %12 = arith.mulf %11, %10 : vector<1x8x4xf32>
    %13 = vector.extract_strided_slice %1 {offsets = [1, 0, 0], sizes = [1, 8, 4], strides = [1, 1, 1]} : vector<8x8x4xf32> to vector<1x8x4xf32>
    %cst_5 = arith.constant 0.933333337 : f32
    %14 = vector.broadcast %cst_5 : f32 to vector<1x8x4xf32>
    %15 = arith.mulf %14, %13 : vector<1x8x4xf32>
    %16 = arith.addf %12, %15 : vector<1x8x4xf32>
    %17 = vector.extract_strided_slice %1 {offsets = [1, 0, 0], sizes = [1, 8, 4], strides = [1, 1, 1]} : vector<8x8x4xf32> to vector<1x8x4xf32>
    %cst_6 = arith.constant 6.000000e-01 : f32
    %18 = vector.broadcast %cst_6 : f32 to vector<1x8x4xf32>
    %19 = arith.mulf %18, %17 : vector<1x8x4xf32>
    %20 = vector.extract_strided_slice %1 {offsets = [2, 0, 0], sizes = [1, 8, 4], strides = [1, 1, 1]} : vector<8x8x4xf32> to vector<1x8x4xf32>
    %cst_7 = arith.constant 4.000000e-01 : f32
    %21 = vector.broadcast %cst_7 : f32 to vector<1x8x4xf32>
    %22 = arith.mulf %21, %20 : vector<1x8x4xf32>
    %23 = arith.addf %19, %22 : vector<1x8x4xf32>
    %24 = vector.extract_strided_slice %1 {offsets = [1, 0, 0], sizes = [1, 8, 4], strides = [1, 1, 1]} : vector<8x8x4xf32> to vector<1x8x4xf32>
    %cst_8 = arith.constant 0.13333334 : f32
    %25 = vector.broadcast %cst_8 : f32 to vector<1x8x4xf32>
    %26 = arith.mulf %25, %24 : vector<1x8x4xf32>
    %27 = vector.extract_strided_slice %1 {offsets = [2, 0, 0], sizes = [1, 8, 4], strides = [1, 1, 1]} : vector<8x8x4xf32> to vector<1x8x4xf32>
    %cst_9 = arith.constant 0.866666674 : f32
    %28 = vector.broadcast %cst_9 : f32 to vector<1x8x4xf32>
    %29 = arith.mulf %28, %27 : vector<1x8x4xf32>
    %30 = arith.addf %26, %29 : vector<1x8x4xf32>
    %31 = vector.extract_strided_slice %1 {offsets = [2, 0, 0], sizes = [1, 8, 4], strides = [1, 1, 1]} : vector<8x8x4xf32> to vector<1x8x4xf32>
    %cst_10 = arith.constant 0.666666686 : f32
    %32 = vector.broadcast %cst_10 : f32 to vector<1x8x4xf32>
    %33 = arith.mulf %32, %31 : vector<1x8x4xf32>
    %34 = vector.extract_strided_slice %1 {offsets = [3, 0, 0], sizes = [1, 8, 4], strides = [1, 1, 1]} : vector<8x8x4xf32> to vector<1x8x4xf32>
    %cst_11 = arith.constant 0.333333343 : f32
    %35 = vector.broadcast %cst_11 : f32 to vector<1x8x4xf32>
    %36 = arith.mulf %35, %34 : vector<1x8x4xf32>
    %37 = arith.addf %33, %36 : vector<1x8x4xf32>
    %38 = vector.extract_strided_slice %1 {offsets = [2, 0, 0], sizes = [1, 8, 4], strides = [1, 1, 1]} : vector<8x8x4xf32> to vector<1x8x4xf32>
    %cst_12 = arith.constant 2.000000e-01 : f32
    %39 = vector.broadcast %cst_12 : f32 to vector<1x8x4xf32>
    %40 = arith.mulf %39, %38 : vector<1x8x4xf32>
    %41 = vector.extract_strided_slice %1 {offsets = [3, 0, 0], sizes = [1, 8, 4], strides = [1, 1, 1]} : vector<8x8x4xf32> to vector<1x8x4xf32>
    %cst_13 = arith.constant 8.000000e-01 : f32
    %42 = vector.broadcast %cst_13 : f32 to vector<1x8x4xf32>
    %43 = arith.mulf %42, %41 : vector<1x8x4xf32>
    %44 = arith.addf %40, %43 : vector<1x8x4xf32>
    %45 = vector.extract_strided_slice %1 {offsets = [3, 0, 0], sizes = [1, 8, 4], strides = [1, 1, 1]} : vector<8x8x4xf32> to vector<1x8x4xf32>
    %cst_14 = arith.constant 0.733333349 : f32
    %46 = vector.broadcast %cst_14 : f32 to vector<1x8x4xf32>
    %47 = arith.mulf %46, %45 : vector<1x8x4xf32>
    %48 = vector.extract_strided_slice %1 {offsets = [4, 0, 0], sizes = [1, 8, 4], strides = [1, 1, 1]} : vector<8x8x4xf32> to vector<1x8x4xf32>
    %cst_15 = arith.constant 0.266666681 : f32
    %49 = vector.broadcast %cst_15 : f32 to vector<1x8x4xf32>
    %50 = arith.mulf %49, %48 : vector<1x8x4xf32>
    %51 = arith.addf %47, %50 : vector<1x8x4xf32>
    %52 = vector.extract_strided_slice %1 {offsets = [3, 0, 0], sizes = [1, 8, 4], strides = [1, 1, 1]} : vector<8x8x4xf32> to vector<1x8x4xf32>
    %cst_16 = arith.constant 0.266666681 : f32
    %53 = vector.broadcast %cst_16 : f32 to vector<1x8x4xf32>
    %54 = arith.mulf %53, %52 : vector<1x8x4xf32>
    %55 = vector.extract_strided_slice %1 {offsets = [4, 0, 0], sizes = [1, 8, 4], strides = [1, 1, 1]} : vector<8x8x4xf32> to vector<1x8x4xf32>
    %cst_17 = arith.constant 0.733333349 : f32
    %56 = vector.broadcast %cst_17 : f32 to vector<1x8x4xf32>
    %57 = arith.mulf %56, %55 : vector<1x8x4xf32>
    %58 = arith.addf %54, %57 : vector<1x8x4xf32>
    %59 = vector.extract_strided_slice %1 {offsets = [4, 0, 0], sizes = [1, 8, 4], strides = [1, 1, 1]} : vector<8x8x4xf32> to vector<1x8x4xf32>
    %cst_18 = arith.constant 8.000000e-01 : f32
    %60 = vector.broadcast %cst_18 : f32 to vector<1x8x4xf32>
    %61 = arith.mulf %60, %59 : vector<1x8x4xf32>
    %62 = vector.extract_strided_slice %1 {offsets = [5, 0, 0], sizes = [1, 8, 4], strides = [1, 1, 1]} : vector<8x8x4xf32> to vector<1x8x4xf32>
    %cst_19 = arith.constant 2.000000e-01 : f32
    %63 = vector.broadcast %cst_19 : f32 to vector<1x8x4xf32>
    %64 = arith.mulf %63, %62 : vector<1x8x4xf32>
    %65 = arith.addf %61, %64 : vector<1x8x4xf32>
    %66 = vector.extract_strided_slice %1 {offsets = [4, 0, 0], sizes = [1, 8, 4], strides = [1, 1, 1]} : vector<8x8x4xf32> to vector<1x8x4xf32>
    %cst_20 = arith.constant 0.333333343 : f32
    %67 = vector.broadcast %cst_20 : f32 to vector<1x8x4xf32>
    %68 = arith.mulf %67, %66 : vector<1x8x4xf32>
    %69 = vector.extract_strided_slice %1 {offsets = [5, 0, 0], sizes = [1, 8, 4], strides = [1, 1, 1]} : vector<8x8x4xf32> to vector<1x8x4xf32>
    %cst_21 = arith.constant 0.666666686 : f32
    %70 = vector.broadcast %cst_21 : f32 to vector<1x8x4xf32>
    %71 = arith.mulf %70, %69 : vector<1x8x4xf32>
    %72 = arith.addf %68, %71 : vector<1x8x4xf32>
    %73 = vector.extract_strided_slice %1 {offsets = [5, 0, 0], sizes = [1, 8, 4], strides = [1, 1, 1]} : vector<8x8x4xf32> to vector<1x8x4xf32>
    %cst_22 = arith.constant 0.866666674 : f32
    %74 = vector.broadcast %cst_22 : f32 to vector<1x8x4xf32>
    %75 = arith.mulf %74, %73 : vector<1x8x4xf32>
    %76 = vector.extract_strided_slice %1 {offsets = [6, 0, 0], sizes = [1, 8, 4], strides = [1, 1, 1]} : vector<8x8x4xf32> to vector<1x8x4xf32>
    %cst_23 = arith.constant 0.13333334 : f32
    %77 = vector.broadcast %cst_23 : f32 to vector<1x8x4xf32>
    %78 = arith.mulf %77, %76 : vector<1x8x4xf32>
    %79 = arith.addf %75, %78 : vector<1x8x4xf32>
    %80 = vector.extract_strided_slice %1 {offsets = [5, 0, 0], sizes = [1, 8, 4], strides = [1, 1, 1]} : vector<8x8x4xf32> to vector<1x8x4xf32>
    %cst_24 = arith.constant 4.000000e-01 : f32
    %81 = vector.broadcast %cst_24 : f32 to vector<1x8x4xf32>
    %82 = arith.mulf %81, %80 : vector<1x8x4xf32>
    %83 = vector.extract_strided_slice %1 {offsets = [6, 0, 0], sizes = [1, 8, 4], strides = [1, 1, 1]} : vector<8x8x4xf32> to vector<1x8x4xf32>
    %cst_25 = arith.constant 6.000000e-01 : f32
    %84 = vector.broadcast %cst_25 : f32 to vector<1x8x4xf32>
    %85 = arith.mulf %84, %83 : vector<1x8x4xf32>
    %86 = arith.addf %82, %85 : vector<1x8x4xf32>
    %87 = vector.extract_strided_slice %1 {offsets = [6, 0, 0], sizes = [1, 8, 4], strides = [1, 1, 1]} : vector<8x8x4xf32> to vector<1x8x4xf32>
    %cst_26 = arith.constant 0.933333337 : f32
    %88 = vector.broadcast %cst_26 : f32 to vector<1x8x4xf32>
    %89 = arith.mulf %88, %87 : vector<1x8x4xf32>
    %90 = vector.extract_strided_slice %1 {offsets = [7, 0, 0], sizes = [1, 8, 4], strides = [1, 1, 1]} : vector<8x8x4xf32> to vector<1x8x4xf32>
    %cst_27 = arith.constant 0.0666666701 : f32
    %91 = vector.broadcast %cst_27 : f32 to vector<1x8x4xf32>
    %92 = arith.mulf %91, %90 : vector<1x8x4xf32>
    %93 = arith.addf %89, %92 : vector<1x8x4xf32>
    %94 = vector.extract_strided_slice %1 {offsets = [6, 0, 0], sizes = [1, 8, 4], strides = [1, 1, 1]} : vector<8x8x4xf32> to vector<1x8x4xf32>
    %cst_28 = arith.constant 0.466666669 : f32
    %95 = vector.broadcast %cst_28 : f32 to vector<1x8x4xf32>
    %96 = arith.mulf %95, %94 : vector<1x8x4xf32>
    %97 = vector.extract_strided_slice %1 {offsets = [7, 0, 0], sizes = [1, 8, 4], strides = [1, 1, 1]} : vector<8x8x4xf32> to vector<1x8x4xf32>
    %cst_29 = arith.constant 0.533333361 : f32
    %98 = vector.broadcast %cst_29 : f32 to vector<1x8x4xf32>
    %99 = arith.mulf %98, %97 : vector<1x8x4xf32>
    %100 = arith.addf %96, %99 : vector<1x8x4xf32>
    %101 = vector.extract_strided_slice %1 {offsets = [6, 0, 0], sizes = [1, 8, 4], strides = [1, 1, 1]} : vector<8x8x4xf32> to vector<1x8x4xf32>
    %cst_30 = arith.constant 0.000000e+00 : f32
    %102 = vector.broadcast %cst_30 : f32 to vector<1x8x4xf32>
    %103 = arith.mulf %102, %101 : vector<1x8x4xf32>
    %104 = vector.extract_strided_slice %1 {offsets = [7, 0, 0], sizes = [1, 8, 4], strides = [1, 1, 1]} : vector<8x8x4xf32> to vector<1x8x4xf32>
    %cst_31 = arith.constant 1.000000e+00 : f32
    %105 = vector.broadcast %cst_31 : f32 to vector<1x8x4xf32>
    %106 = arith.mulf %105, %104 : vector<1x8x4xf32>
    %107 = arith.addf %103, %106 : vector<1x8x4xf32>
    %108 = tpu.concatenate %2, %9, %16, %23, %30, %37, %44, %51, %58, %65, %72, %79, %86, %93, %100, %107 in 0 : vector<1x8x4xf32>, vector<1x8x4xf32>, vector<1x8x4xf32>, vector<1x8x4xf32>, vector<1x8x4xf32>, vector<1x8x4xf32>, vector<1x8x4xf32>, vector<1x8x4xf32>, vector<1x8x4xf32>, vector<1x8x4xf32>, vector<1x8x4xf32>, vector<1x8x4xf32>, vector<1x8x4xf32>, vector<1x8x4xf32>, vector<1x8x4xf32>, vector<1x8x4xf32> -> vector<16x8x4xf32>
    %109 = vector.extract_strided_slice %108 {offsets = [0, 0, 0], sizes = [16, 1, 4], strides = [1, 1, 1]} : vector<16x8x4xf32> to vector<16x1x4xf32>
    %110 = vector.extract_strided_slice %108 {offsets = [0, 0, 0], sizes = [16, 1, 4], strides = [1, 1, 1]} : vector<16x8x4xf32> to vector<16x1x4xf32>
    %cst_32 = arith.constant 0.533333361 : f32
    %111 = vector.broadcast %cst_32 : f32 to vector<16x1x4xf32>
    %112 = arith.mulf %111, %110 : vector<16x1x4xf32>
    %113 = vector.extract_strided_slice %108 {offsets = [0, 1, 0], sizes = [16, 1, 4], strides = [1, 1, 1]} : vector<16x8x4xf32> to vector<16x1x4xf32>
    %cst_33 = arith.constant 0.466666669 : f32
    %114 = vector.broadcast %cst_33 : f32 to vector<16x1x4xf32>
    %115 = arith.mulf %114, %113 : vector<16x1x4xf32>
    %116 = arith.addf %112, %115 : vector<16x1x4xf32>
    %117 = vector.extract_strided_slice %108 {offsets = [0, 0, 0], sizes = [16, 1, 4], strides = [1, 1, 1]} : vector<16x8x4xf32> to vector<16x1x4xf32>
    %cst_34 = arith.constant 0.0666666701 : f32
    %118 = vector.broadcast %cst_34 : f32 to vector<16x1x4xf32>
    %119 = arith.mulf %118, %117 : vector<16x1x4xf32>
    %120 = vector.extract_strided_slice %108 {offsets = [0, 1, 0], sizes = [16, 1, 4], strides = [1, 1, 1]} : vector<16x8x4xf32> to vector<16x1x4xf32>
    %cst_35 = arith.constant 0.933333337 : f32
    %121 = vector.broadcast %cst_35 : f32 to vector<16x1x4xf32>
    %122 = arith.mulf %121, %120 : vector<16x1x4xf32>
    %123 = arith.addf %119, %122 : vector<16x1x4xf32>
    %124 = vector.extract_strided_slice %108 {offsets = [0, 1, 0], sizes = [16, 1, 4], strides = [1, 1, 1]} : vector<16x8x4xf32> to vector<16x1x4xf32>
    %cst_36 = arith.constant 6.000000e-01 : f32
    %125 = vector.broadcast %cst_36 : f32 to vector<16x1x4xf32>
    %126 = arith.mulf %125, %124 : vector<16x1x4xf32>
    %127 = vector.extract_strided_slice %108 {offsets = [0, 2, 0], sizes = [16, 1, 4], strides = [1, 1, 1]} : vector<16x8x4xf32> to vector<16x1x4xf32>
    %cst_37 = arith.constant 4.000000e-01 : f32
    %128 = vector.broadcast %cst_37 : f32 to vector<16x1x4xf32>
    %129 = arith.mulf %128, %127 : vector<16x1x4xf32>
    %130 = arith.addf %126, %129 : vector<16x1x4xf32>
    %131 = vector.extract_strided_slice %108 {offsets = [0, 1, 0], sizes = [16, 1, 4], strides = [1, 1, 1]} : vector<16x8x4xf32> to vector<16x1x4xf32>
    %cst_38 = arith.constant 0.13333334 : f32
    %132 = vector.broadcast %cst_38 : f32 to vector<16x1x4xf32>
    %133 = arith.mulf %132, %131 : vector<16x1x4xf32>
    %134 = vector.extract_strided_slice %108 {offsets = [0, 2, 0], sizes = [16, 1, 4], strides = [1, 1, 1]} : vector<16x8x4xf32> to vector<16x1x4xf32>
    %cst_39 = arith.constant 0.866666674 : f32
    %135 = vector.broadcast %cst_39 : f32 to vector<16x1x4xf32>
    %136 = arith.mulf %135, %134 : vector<16x1x4xf32>
    %137 = arith.addf %133, %136 : vector<16x1x4xf32>
    %138 = vector.extract_strided_slice %108 {offsets = [0, 2, 0], sizes = [16, 1, 4], strides = [1, 1, 1]} : vector<16x8x4xf32> to vector<16x1x4xf32>
    %cst_40 = arith.constant 0.666666686 : f32
    %139 = vector.broadcast %cst_40 : f32 to vector<16x1x4xf32>
    %140 = arith.mulf %139, %138 : vector<16x1x4xf32>
    %141 = vector.extract_strided_slice %108 {offsets = [0, 3, 0], sizes = [16, 1, 4], strides = [1, 1, 1]} : vector<16x8x4xf32> to vector<16x1x4xf32>
    %cst_41 = arith.constant 0.333333343 : f32
    %142 = vector.broadcast %cst_41 : f32 to vector<16x1x4xf32>
    %143 = arith.mulf %142, %141 : vector<16x1x4xf32>
    %144 = arith.addf %140, %143 : vector<16x1x4xf32>
    %145 = vector.extract_strided_slice %108 {offsets = [0, 2, 0], sizes = [16, 1, 4], strides = [1, 1, 1]} : vector<16x8x4xf32> to vector<16x1x4xf32>
    %cst_42 = arith.constant 2.000000e-01 : f32
    %146 = vector.broadcast %cst_42 : f32 to vector<16x1x4xf32>
    %147 = arith.mulf %146, %145 : vector<16x1x4xf32>
    %148 = vector.extract_strided_slice %108 {offsets = [0, 3, 0], sizes = [16, 1, 4], strides = [1, 1, 1]} : vector<16x8x4xf32> to vector<16x1x4xf32>
    %cst_43 = arith.constant 8.000000e-01 : f32
    %149 = vector.broadcast %cst_43 : f32 to vector<16x1x4xf32>
    %150 = arith.mulf %149, %148 : vector<16x1x4xf32>
    %151 = arith.addf %147, %150 : vector<16x1x4xf32>
    %152 = vector.extract_strided_slice %108 {offsets = [0, 3, 0], sizes = [16, 1, 4], strides = [1, 1, 1]} : vector<16x8x4xf32> to vector<16x1x4xf32>
    %cst_44 = arith.constant 0.733333349 : f32
    %153 = vector.broadcast %cst_44 : f32 to vector<16x1x4xf32>
    %154 = arith.mulf %153, %152 : vector<16x1x4xf32>
    %155 = vector.extract_strided_slice %108 {offsets = [0, 4, 0], sizes = [16, 1, 4], strides = [1, 1, 1]} : vector<16x8x4xf32> to vector<16x1x4xf32>
    %cst_45 = arith.constant 0.266666681 : f32
    %156 = vector.broadcast %cst_45 : f32 to vector<16x1x4xf32>
    %157 = arith.mulf %156, %155 : vector<16x1x4xf32>
    %158 = arith.addf %154, %157 : vector<16x1x4xf32>
    %159 = vector.extract_strided_slice %108 {offsets = [0, 3, 0], sizes = [16, 1, 4], strides = [1, 1, 1]} : vector<16x8x4xf32> to vector<16x1x4xf32>
    %cst_46 = arith.constant 0.266666681 : f32
    %160 = vector.broadcast %cst_46 : f32 to vector<16x1x4xf32>
    %161 = arith.mulf %160, %159 : vector<16x1x4xf32>
    %162 = vector.extract_strided_slice %108 {offsets = [0, 4, 0], sizes = [16, 1, 4], strides = [1, 1, 1]} : vector<16x8x4xf32> to vector<16x1x4xf32>
    %cst_47 = arith.constant 0.733333349 : f32
    %163 = vector.broadcast %cst_47 : f32 to vector<16x1x4xf32>
    %164 = arith.mulf %163, %162 : vector<16x1x4xf32>
    %165 = arith.addf %161, %164 : vector<16x1x4xf32>
    %166 = vector.extract_strided_slice %108 {offsets = [0, 4, 0], sizes = [16, 1, 4], strides = [1, 1, 1]} : vector<16x8x4xf32> to vector<16x1x4xf32>
    %cst_48 = arith.constant 8.000000e-01 : f32
    %167 = vector.broadcast %cst_48 : f32 to vector<16x1x4xf32>
    %168 = arith.mulf %167, %166 : vector<16x1x4xf32>
    %169 = vector.extract_strided_slice %108 {offsets = [0, 5, 0], sizes = [16, 1, 4], strides = [1, 1, 1]} : vector<16x8x4xf32> to vector<16x1x4xf32>
    %cst_49 = arith.constant 2.000000e-01 : f32
    %170 = vector.broadcast %cst_49 : f32 to vector<16x1x4xf32>
    %171 = arith.mulf %170, %169 : vector<16x1x4xf32>
    %172 = arith.addf %168, %171 : vector<16x1x4xf32>
    %173 = vector.extract_strided_slice %108 {offsets = [0, 4, 0], sizes = [16, 1, 4], strides = [1, 1, 1]} : vector<16x8x4xf32> to vector<16x1x4xf32>
    %cst_50 = arith.constant 0.333333343 : f32
    %174 = vector.broadcast %cst_50 : f32 to vector<16x1x4xf32>
    %175 = arith.mulf %174, %173 : vector<16x1x4xf32>
    %176 = vector.extract_strided_slice %108 {offsets = [0, 5, 0], sizes = [16, 1, 4], strides = [1, 1, 1]} : vector<16x8x4xf32> to vector<16x1x4xf32>
    %cst_51 = arith.constant 0.666666686 : f32
    %177 = vector.broadcast %cst_51 : f32 to vector<16x1x4xf32>
    %178 = arith.mulf %177, %176 : vector<16x1x4xf32>
    %179 = arith.addf %175, %178 : vector<16x1x4xf32>
    %180 = vector.extract_strided_slice %108 {offsets = [0, 5, 0], sizes = [16, 1, 4], strides = [1, 1, 1]} : vector<16x8x4xf32> to vector<16x1x4xf32>
    %cst_52 = arith.constant 0.866666674 : f32
    %181 = vector.broadcast %cst_52 : f32 to vector<16x1x4xf32>
    %182 = arith.mulf %181, %180 : vector<16x1x4xf32>
    %183 = vector.extract_strided_slice %108 {offsets = [0, 6, 0], sizes = [16, 1, 4], strides = [1, 1, 1]} : vector<16x8x4xf32> to vector<16x1x4xf32>
    %cst_53 = arith.constant 0.13333334 : f32
    %184 = vector.broadcast %cst_53 : f32 to vector<16x1x4xf32>
    %185 = arith.mulf %184, %183 : vector<16x1x4xf32>
    %186 = arith.addf %182, %185 : vector<16x1x4xf32>
    %187 = vector.extract_strided_slice %108 {offsets = [0, 5, 0], sizes = [16, 1, 4], strides = [1, 1, 1]} : vector<16x8x4xf32> to vector<16x1x4xf32>
    %cst_54 = arith.constant 4.000000e-01 : f32
    %188 = vector.broadcast %cst_54 : f32 to vector<16x1x4xf32>
    %189 = arith.mulf %188, %187 : vector<16x1x4xf32>
    %190 = vector.extract_strided_slice %108 {offsets = [0, 6, 0], sizes = [16, 1, 4], strides = [1, 1, 1]} : vector<16x8x4xf32> to vector<16x1x4xf32>
    %cst_55 = arith.constant 6.000000e-01 : f32
    %191 = vector.broadcast %cst_55 : f32 to vector<16x1x4xf32>
    %192 = arith.mulf %191, %190 : vector<16x1x4xf32>
    %193 = arith.addf %189, %192 : vector<16x1x4xf32>
    %194 = vector.extract_strided_slice %108 {offsets = [0, 6, 0], sizes = [16, 1, 4], strides = [1, 1, 1]} : vector<16x8x4xf32> to vector<16x1x4xf32>
    %cst_56 = arith.constant 0.933333337 : f32
    %195 = vector.broadcast %cst_56 : f32 to vector<16x1x4xf32>
    %196 = arith.mulf %195, %194 : vector<16x1x4xf32>
    %197 = vector.extract_strided_slice %108 {offsets = [0, 7, 0], sizes = [16, 1, 4], strides = [1, 1, 1]} : vector<16x8x4xf32> to vector<16x1x4xf32>
    %cst_57 = arith.constant 0.0666666701 : f32
    %198 = vector.broadcast %cst_57 : f32 to vector<16x1x4xf32>
    %199 = arith.mulf %198, %197 : vector<16x1x4xf32>
    %200 = arith.addf %196, %199 : vector<16x1x4xf32>
    %201 = vector.extract_strided_slice %108 {offsets = [0, 6, 0], sizes = [16, 1, 4], strides = [1, 1, 1]} : vector<16x8x4xf32> to vector<16x1x4xf32>
    %cst_58 = arith.constant 0.466666669 : f32
    %202 = vector.broadcast %cst_58 : f32 to vector<16x1x4xf32>
    %203 = arith.mulf %202, %201 : vector<16x1x4xf32>
    %204 = vector.extract_strided_slice %108 {offsets = [0, 7, 0], sizes = [16, 1, 4], strides = [1, 1, 1]} : vector<16x8x4xf32> to vector<16x1x4xf32>
    %cst_59 = arith.constant 0.533333361 : f32
    %205 = vector.broadcast %cst_59 : f32 to vector<16x1x4xf32>
    %206 = arith.mulf %205, %204 : vector<16x1x4xf32>
    %207 = arith.addf %203, %206 : vector<16x1x4xf32>
    %208 = vector.extract_strided_slice %108 {offsets = [0, 6, 0], sizes = [16, 1, 4], strides = [1, 1, 1]} : vector<16x8x4xf32> to vector<16x1x4xf32>
    %cst_60 = arith.constant 0.000000e+00 : f32
    %209 = vector.broadcast %cst_60 : f32 to vector<16x1x4xf32>
    %210 = arith.mulf %209, %208 : vector<16x1x4xf32>
    %211 = vector.extract_strided_slice %108 {offsets = [0, 7, 0], sizes = [16, 1, 4], strides = [1, 1, 1]} : vector<16x8x4xf32> to vector<16x1x4xf32>
    %cst_61 = arith.constant 1.000000e+00 : f32
    %212 = vector.broadcast %cst_61 : f32 to vector<16x1x4xf32>
    %213 = arith.mulf %212, %211 : vector<16x1x4xf32>
    %214 = arith.addf %210, %213 : vector<16x1x4xf32>
    %215 = tpu.concatenate %109, %116, %123, %130, %137, %144, %151, %158, %165, %172, %179, %186, %193, %200, %207, %214 in 1 : vector<16x1x4xf32>, vector<16x1x4xf32>, vector<16x1x4xf32>, vector<16x1x4xf32>, vector<16x1x4xf32>, vector<16x1x4xf32>, vector<16x1x4xf32>, vector<16x1x4xf32>, vector<16x1x4xf32>, vector<16x1x4xf32>, vector<16x1x4xf32>, vector<16x1x4xf32>, vector<16x1x4xf32>, vector<16x1x4xf32>, vector<16x1x4xf32>, vector<16x1x4xf32> -> vector<16x16x4xf32>
    %c0_62 = arith.constant 0 : index
    %c0_63 = arith.constant 0 : index
    %c0_64 = arith.constant 0 : index
    %c0_65 = arith.constant 0 : index
    %216 = vector.load %arg2[%c0_62, %c0_63, %c0_64, %c0_65] : memref<1x16x16x4xf32, #tpu.memory_space<vmem>>, vector<1x16x16x4xf32>
    %217 = vector.shape_cast %216 : vector<1x16x16x4xf32> to vector<16x16x4xf32>
    %218 = vector.shape_cast %217 : vector<16x16x4xf32> to vector<8x2x16x4xf32>
    %219 = vector.extract_strided_slice %218 {offsets = [0, 0, 0, 0], sizes = [8, 1, 16, 4], strides = [1, 1, 1, 1]} : vector<8x2x16x4xf32> to vector<8x1x16x4xf32>
    %220 = vector.shape_cast %219 : vector<8x1x16x4xf32> to vector<8x16x4xf32>
    %221 = vector.extract_strided_slice %218 {offsets = [0, 1, 0, 0], sizes = [8, 1, 16, 4], strides = [1, 1, 1, 1]} : vector<8x2x16x4xf32> to vector<8x1x16x4xf32>
    %222 = vector.shape_cast %221 : vector<8x1x16x4xf32> to vector<8x16x4xf32>
    %223 = arith.maximumf %220, %222 : vector<8x16x4xf32>
    %224 = vector.shape_cast %223 : vector<8x16x4xf32> to vector<8x8x2x4xf32>
    %cst_66 = arith.constant dense<0xFF800000> : vector<8x8x4xf32>
    %225 = vector.multi_reduction <maximumf>, %224, %cst_66 [2] : vector<8x8x2x4xf32> to vector<8x8x4xf32>
    %226 = vector.shape_cast %215 : vector<16x16x4xf32> to vector<8x2x16x4xf32>
    %227 = vector.extract_strided_slice %226 {offsets = [0, 0, 0, 0], sizes = [8, 1, 16, 4], strides = [1, 1, 1, 1]} : vector<8x2x16x4xf32> to vector<8x1x16x4xf32>
    %228 = vector.shape_cast %227 : vector<8x1x16x4xf32> to vector<8x16x4xf32>
    %229 = vector.extract_strided_slice %226 {offsets = [0, 1, 0, 0], sizes = [8, 1, 16, 4], strides = [1, 1, 1, 1]} : vector<8x2x16x4xf32> to vector<8x1x16x4xf32>
    %230 = vector.shape_cast %229 : vector<8x1x16x4xf32> to vector<8x16x4xf32>
    %231 = arith.maximumf %228, %230 : vector<8x16x4xf32>
    %232 = vector.shape_cast %231 : vector<8x16x4xf32> to vector<8x8x2x4xf32>
    %cst_67 = arith.constant dense<0xFF800000> : vector<8x8x4xf32>
    %233 = vector.multi_reduction <maximumf>, %232, %cst_67 [2] : vector<8x8x2x4xf32> to vector<8x8x4xf32>
    %234 = tpu.concatenate %225, %233 in 2 : vector<8x8x4xf32>, vector<8x8x4xf32> -> vector<8x8x8xf32>
    %235 = vector.shape_cast %234 : vector<8x8x8xf32> to vector<64x8xf32>
    %c0_68 = arith.constant 0 : index
    %c0_69 = arith.constant 0 : index
    %236 = vector.load %arg3[%c0_68, %c0_69] : memref<8x12xf32, #tpu.memory_space<vmem>>, vector<8x12xf32>
    %cst_70 = arith.constant dense<0.000000e+00> : vector<64x12xf32>
    %237 = tpu.matmul %235, %236, %cst_70 {dimension_numbers = #tpu.dot_dimension_numbers<[1], [0], [0], [1], [0, 0, 1, 1], [], []>} : vector<64x8xf32>, vector<8x12xf32>, vector<64x12xf32> -> vector<64x12xf32>
    %c0_71 = arith.constant 0 : index
    %c0_72 = arith.constant 0 : index
    %238 = vector.load %arg4[%c0_71, %c0_72] : memref<1x12xf32, #tpu.memory_space<vmem>>, vector<1x12xf32>
    %239 = vector.broadcast %238 : vector<1x12xf32> to vector<64x12xf32>
    %240 = arith.addf %237, %239 : vector<64x12xf32>
    %cst_73 = arith.constant 0.000000e+00 : f32
    %241 = vector.broadcast %cst_73 : f32 to vector<64x12xf32>
    %242 = arith.maximumf %240, %241 : vector<64x12xf32>
    %243 = vector.extract_strided_slice %242 {offsets = [0, 0], sizes = [64, 4], strides = [1, 1]} : vector<64x12xf32> to vector<64x4xf32>
    %244 = vector.shape_cast %243 : vector<64x4xf32> to vector<8x8x4xf32>
    %c0_74 = arith.constant 0 : index
    %c0_75 = arith.constant 0 : index
    %c0_76 = arith.constant 0 : index
    %c0_77 = arith.constant 0 : index
    %245 = vector.load %arg5[%c0_74, %c0_75, %c0_76, %c0_77] : memref<1x8x8x4xf32, #tpu.memory_space<vmem>>, vector<1x8x8x4xf32>
    %246 = vector.shape_cast %245 : vector<1x8x8x4xf32> to vector<8x8x4xf32>
    %247 = vector.shape_cast %244 : vector<8x8x4xf32> to vector<1x8x8x4xf32>
    tpu.vector_store %arg5[%c0_74, %c0_75, %c0_76, %c0_77], %247 {strides = array<i32>} : memref<1x8x8x4xf32, #tpu.memory_space<vmem>>, vector<1x8x8x4xf32>,
    %248 = vector.extract_strided_slice %242 {offsets = [0, 4], sizes = [64, 4], strides = [1, 1]} : vector<64x12xf32> to vector<64x4xf32>
    %249 = vector.shape_cast %248 : vector<64x4xf32> to vector<8x8x4xf32>
    %c0_78 = arith.constant 0 : index
    %c0_79 = arith.constant 0 : index
    %c0_80 = arith.constant 0 : index
    %c0_81 = arith.constant 0 : index
    %250 = vector.load %arg6[%c0_78, %c0_79, %c0_80, %c0_81] : memref<1x8x8x4xf32, #tpu.memory_space<vmem>>, vector<1x8x8x4xf32>
    %251 = vector.shape_cast %250 : vector<1x8x8x4xf32> to vector<8x8x4xf32>
    %252 = vector.shape_cast %249 : vector<8x8x4xf32> to vector<1x8x8x4xf32>
    tpu.vector_store %arg6[%c0_78, %c0_79, %c0_80, %c0_81], %252 {strides = array<i32>} : memref<1x8x8x4xf32, #tpu.memory_space<vmem>>, vector<1x8x8x4xf32>,
    %253 = vector.extract_strided_slice %242 {offsets = [0, 8], sizes = [64, 4], strides = [1, 1]} : vector<64x12xf32> to vector<64x4xf32>
    %254 = vector.shape_cast %253 : vector<64x4xf32> to vector<8x8x4xf32>
    %c0_82 = arith.constant 0 : index
    %c0_83 = arith.constant 0 : index
    %c0_84 = arith.constant 0 : index
    %c0_85 = arith.constant 0 : index
    %255 = vector.load %arg7[%c0_82, %c0_83, %c0_84, %c0_85] : memref<1x8x8x4xf32, #tpu.memory_space<vmem>>, vector<1x8x8x4xf32>
    %256 = vector.shape_cast %255 : vector<1x8x8x4xf32> to vector<8x8x4xf32>
    %257 = vector.shape_cast %254 : vector<8x8x4xf32> to vector<1x8x8x4xf32>
    tpu.vector_store %arg7[%c0_82, %c0_83, %c0_84, %c0_85], %257 {strides = array<i32>} : memref<1x8x8x4xf32, #tpu.memory_space<vmem>>, vector<1x8x8x4xf32>,
    return
  }
  func.func @transform_0(%arg0: i32) -> (i32, i32, i32, i32) {
    %c0_i32 = arith.constant 0 : i32
    %c0_i32_0 = arith.constant 0 : i32
    %c0_i32_1 = arith.constant 0 : i32
    %c0_i32_2 = arith.constant 0 : i32
    return %arg0, %c0_i32, %c0_i32_0, %c0_i32_1 : i32, i32, i32, i32
  }
  func.func @transform_1(%arg0: i32) -> (i32, i32, i32, i32) {
    %c0_i32 = arith.constant 0 : i32
    %c0_i32_0 = arith.constant 0 : i32
    %c0_i32_1 = arith.constant 0 : i32
    %c0_i32_2 = arith.constant 0 : i32
    return %arg0, %c0_i32, %c0_i32_0, %c0_i32_1 : i32, i32, i32, i32
  }
  func.func @transform_2(%arg0: i32) -> (i32, i32) {
    %c0_i32 = arith.constant 0 : i32
    %c0_i32_0 = arith.constant 0 : i32
    %c0_i32_1 = arith.constant 0 : i32
    return %c0_i32, %c0_i32_0 : i32, i32
  }
  func.func @transform_3(%arg0: i32) -> (i32, i32) {
    %c0_i32 = arith.constant 0 : i32
    %c0_i32_0 = arith.constant 0 : i32
    %c0_i32_1 = arith.constant 0 : i32
    return %c0_i32, %c0_i32_0 : i32, i32
  }
  func.func @transform_4(%arg0: i32) -> (i32, i32, i32, i32) {
    %c0_i32 = arith.constant 0 : i32
    %c0_i32_0 = arith.constant 0 : i32
    %c0_i32_1 = arith.constant 0 : i32
    %c0_i32_2 = arith.constant 0 : i32
    return %arg0, %c0_i32, %c0_i32_0, %c0_i32_1 : i32, i32, i32, i32
  }
  func.func @transform_5(%arg0: i32) -> (i32, i32, i32, i32) {
    %c0_i32 = arith.constant 0 : i32
    %c0_i32_0 = arith.constant 0 : i32
    %c0_i32_1 = arith.constant 0 : i32
    %c0_i32_2 = arith.constant 0 : i32
    return %arg0, %c0_i32, %c0_i32_0, %c0_i32_1 : i32, i32, i32, i32
  }
  func.func @transform_6(%arg0: i32) -> (i32, i32, i32, i32) {
    %c0_i32 = arith.constant 0 : i32
    %c0_i32_0 = arith.constant 0 : i32
    %c0_i32_1 = arith.constant 0 : i32
    %c0_i32_2 = arith.constant 0 : i32
    return %arg0, %c0_i32, %c0_i32_0, %c0_i32_1 : i32, i32, i32, i32
  }
}

module attributes {stable_mosaic.version = 11 : i64} {
  func.func @_conv3x3_kernel(%arg0: i32, %arg1: memref<1x8x8x12xf32, #tpu.memory_space<vmem>>, %arg2: memref<3x36x16xf32, #tpu.memory_space<vmem>>, %arg3: memref<1x16xf32, #tpu.memory_space<vmem>>, %arg4: memref<1x8x8x16xf32, #tpu.memory_space<vmem>>) attributes {dimension_semantics = [#tpu.dimension_semantics<parallel>], iteration_bounds = array<i64: 2>, scalar_prefetch = 0 : i64, scratch_operands = 0 : i64, tpu.core_type = #tpu.core_type<tc>, window_params = [{transform_indices = @transform_0, window_bounds = array<i64: 1, 8, 8, 12>}, {pipeline_mode = #tpu.pipeline_mode<synchronous>, transform_indices = @transform_1, window_bounds = array<i64: 3, 36, 16>}, {pipeline_mode = #tpu.pipeline_mode<synchronous>, transform_indices = @transform_2, window_bounds = array<i64: 1, 16>}, {transform_indices = @transform_3, window_bounds = array<i64: 1, 8, 8, 16>}]} {
    %c0 = arith.constant 0 : index
    %c0_0 = arith.constant 0 : index
    %c0_1 = arith.constant 0 : index
    %c0_2 = arith.constant 0 : index
    %0 = vector.load %arg1[%c0, %c0_0, %c0_1, %c0_2] : memref<1x8x8x12xf32, #tpu.memory_space<vmem>>, vector<1x8x8x12xf32>
    %1 = vector.shape_cast %0 : vector<1x8x8x12xf32> to vector<8x8x12xf32>
    %cst = arith.constant 0.000000e+00 : f32
    %2 = vector.broadcast %cst : f32 to vector<8x1x12xf32>
    %3 = tpu.concatenate %2, %1, %2 in 1 : vector<8x1x12xf32>, vector<8x8x12xf32>, vector<8x1x12xf32> -> vector<8x10x12xf32>
    %cst_3 = arith.constant 0.000000e+00 : f32
    %4 = vector.broadcast %cst_3 : f32 to vector<1x10x12xf32>
    %5 = tpu.concatenate %4, %3, %4 in 0 : vector<1x10x12xf32>, vector<8x10x12xf32>, vector<1x10x12xf32> -> vector<10x10x12xf32>
    %6 = vector.extract_strided_slice %5 {offsets = [0, 0, 0], sizes = [8, 10, 12], strides = [1, 1, 1]} : vector<10x10x12xf32> to vector<8x10x12xf32>
    %7 = vector.extract_strided_slice %6 {offsets = [0, 0, 0], sizes = [8, 8, 12], strides = [1, 1, 1]} : vector<8x10x12xf32> to vector<8x8x12xf32>
    %8 = vector.extract_strided_slice %6 {offsets = [0, 1, 0], sizes = [8, 8, 12], strides = [1, 1, 1]} : vector<8x10x12xf32> to vector<8x8x12xf32>
    %9 = vector.extract_strided_slice %6 {offsets = [0, 2, 0], sizes = [8, 8, 12], strides = [1, 1, 1]} : vector<8x10x12xf32> to vector<8x8x12xf32>
    %10 = tpu.concatenate %7, %8, %9 in 2 : vector<8x8x12xf32>, vector<8x8x12xf32>, vector<8x8x12xf32> -> vector<8x8x36xf32>
    %11 = vector.shape_cast %10 : vector<8x8x36xf32> to vector<64x36xf32>
    %c0_4 = arith.constant 0 : index
    %c0_5 = arith.constant 0 : index
    %c0_6 = arith.constant 0 : index
    %12 = vector.load %arg2[%c0_4, %c0_5, %c0_6] : memref<3x36x16xf32, #tpu.memory_space<vmem>>, vector<1x36x16xf32>
    %13 = vector.shape_cast %12 : vector<1x36x16xf32> to vector<36x16xf32>
    %cst_7 = arith.constant dense<0.000000e+00> : vector<64x16xf32>
    %14 = tpu.matmul %11, %13, %cst_7 {dimension_numbers = #tpu.dot_dimension_numbers<[1], [0], [0], [1], [0, 0, 1, 1], [], []>} : vector<64x36xf32>, vector<36x16xf32>, vector<64x16xf32> -> vector<64x16xf32>
    %15 = vector.extract_strided_slice %5 {offsets = [1, 0, 0], sizes = [8, 10, 12], strides = [1, 1, 1]} : vector<10x10x12xf32> to vector<8x10x12xf32>
    %16 = vector.extract_strided_slice %15 {offsets = [0, 0, 0], sizes = [8, 8, 12], strides = [1, 1, 1]} : vector<8x10x12xf32> to vector<8x8x12xf32>
    %17 = vector.extract_strided_slice %15 {offsets = [0, 1, 0], sizes = [8, 8, 12], strides = [1, 1, 1]} : vector<8x10x12xf32> to vector<8x8x12xf32>
    %18 = vector.extract_strided_slice %15 {offsets = [0, 2, 0], sizes = [8, 8, 12], strides = [1, 1, 1]} : vector<8x10x12xf32> to vector<8x8x12xf32>
    %19 = tpu.concatenate %16, %17, %18 in 2 : vector<8x8x12xf32>, vector<8x8x12xf32>, vector<8x8x12xf32> -> vector<8x8x36xf32>
    %20 = vector.shape_cast %19 : vector<8x8x36xf32> to vector<64x36xf32>
    %c1 = arith.constant 1 : index
    %c0_8 = arith.constant 0 : index
    %c0_9 = arith.constant 0 : index
    %21 = vector.load %arg2[%c1, %c0_8, %c0_9] : memref<3x36x16xf32, #tpu.memory_space<vmem>>, vector<1x36x16xf32>
    %22 = vector.shape_cast %21 : vector<1x36x16xf32> to vector<36x16xf32>
    %cst_10 = arith.constant dense<0.000000e+00> : vector<64x16xf32>
    %23 = tpu.matmul %20, %22, %cst_10 {dimension_numbers = #tpu.dot_dimension_numbers<[1], [0], [0], [1], [0, 0, 1, 1], [], []>} : vector<64x36xf32>, vector<36x16xf32>, vector<64x16xf32> -> vector<64x16xf32>
    %24 = arith.addf %14, %23 : vector<64x16xf32>
    %25 = vector.extract_strided_slice %5 {offsets = [2, 0, 0], sizes = [8, 10, 12], strides = [1, 1, 1]} : vector<10x10x12xf32> to vector<8x10x12xf32>
    %26 = vector.extract_strided_slice %25 {offsets = [0, 0, 0], sizes = [8, 8, 12], strides = [1, 1, 1]} : vector<8x10x12xf32> to vector<8x8x12xf32>
    %27 = vector.extract_strided_slice %25 {offsets = [0, 1, 0], sizes = [8, 8, 12], strides = [1, 1, 1]} : vector<8x10x12xf32> to vector<8x8x12xf32>
    %28 = vector.extract_strided_slice %25 {offsets = [0, 2, 0], sizes = [8, 8, 12], strides = [1, 1, 1]} : vector<8x10x12xf32> to vector<8x8x12xf32>
    %29 = tpu.concatenate %26, %27, %28 in 2 : vector<8x8x12xf32>, vector<8x8x12xf32>, vector<8x8x12xf32> -> vector<8x8x36xf32>
    %30 = vector.shape_cast %29 : vector<8x8x36xf32> to vector<64x36xf32>
    %c2 = arith.constant 2 : index
    %c0_11 = arith.constant 0 : index
    %c0_12 = arith.constant 0 : index
    %31 = vector.load %arg2[%c2, %c0_11, %c0_12] : memref<3x36x16xf32, #tpu.memory_space<vmem>>, vector<1x36x16xf32>
    %32 = vector.shape_cast %31 : vector<1x36x16xf32> to vector<36x16xf32>
    %cst_13 = arith.constant dense<0.000000e+00> : vector<64x16xf32>
    %33 = tpu.matmul %30, %32, %cst_13 {dimension_numbers = #tpu.dot_dimension_numbers<[1], [0], [0], [1], [0, 0, 1, 1], [], []>} : vector<64x36xf32>, vector<36x16xf32>, vector<64x16xf32> -> vector<64x16xf32>
    %34 = arith.addf %24, %33 : vector<64x16xf32>
    %c0_14 = arith.constant 0 : index
    %c0_15 = arith.constant 0 : index
    %35 = vector.load %arg3[%c0_14, %c0_15] : memref<1x16xf32, #tpu.memory_space<vmem>>, vector<1x16xf32>
    %36 = vector.broadcast %35 : vector<1x16xf32> to vector<64x16xf32>
    %37 = arith.addf %34, %36 : vector<64x16xf32>
    %cst_16 = arith.constant 0.000000e+00 : f32
    %38 = vector.broadcast %cst_16 : f32 to vector<64x16xf32>
    %39 = arith.maximumf %37, %38 : vector<64x16xf32>
    %40 = vector.shape_cast %39 : vector<64x16xf32> to vector<8x8x16xf32>
    %c0_17 = arith.constant 0 : index
    %c0_18 = arith.constant 0 : index
    %c0_19 = arith.constant 0 : index
    %c0_20 = arith.constant 0 : index
    %41 = vector.load %arg4[%c0_17, %c0_18, %c0_19, %c0_20] : memref<1x8x8x16xf32, #tpu.memory_space<vmem>>, vector<1x8x8x16xf32>
    %42 = vector.shape_cast %41 : vector<1x8x8x16xf32> to vector<8x8x16xf32>
    %43 = vector.shape_cast %40 : vector<8x8x16xf32> to vector<1x8x8x16xf32>
    tpu.vector_store %arg4[%c0_17, %c0_18, %c0_19, %c0_20], %43 {strides = array<i32>} : memref<1x8x8x16xf32, #tpu.memory_space<vmem>>, vector<1x8x8x16xf32>,
    return
  }
  func.func @transform_0(%arg0: i32) -> (i32, i32, i32, i32) {
    %c0_i32 = arith.constant 0 : i32
    %c0_i32_0 = arith.constant 0 : i32
    %c0_i32_1 = arith.constant 0 : i32
    %c0_i32_2 = arith.constant 0 : i32
    return %arg0, %c0_i32, %c0_i32_0, %c0_i32_1 : i32, i32, i32, i32
  }
  func.func @transform_1(%arg0: i32) -> (i32, i32, i32) {
    %c0_i32 = arith.constant 0 : i32
    %c0_i32_0 = arith.constant 0 : i32
    %c0_i32_1 = arith.constant 0 : i32
    %c0_i32_2 = arith.constant 0 : i32
    return %c0_i32, %c0_i32_0, %c0_i32_1 : i32, i32, i32
  }
  func.func @transform_2(%arg0: i32) -> (i32, i32) {
    %c0_i32 = arith.constant 0 : i32
    %c0_i32_0 = arith.constant 0 : i32
    %c0_i32_1 = arith.constant 0 : i32
    return %c0_i32, %c0_i32_0 : i32, i32
  }
  func.func @transform_3(%arg0: i32) -> (i32, i32, i32, i32) {
    %c0_i32 = arith.constant 0 : i32
    %c0_i32_0 = arith.constant 0 : i32
    %c0_i32_1 = arith.constant 0 : i32
    %c0_i32_2 = arith.constant 0 : i32
    return %arg0, %c0_i32, %c0_i32_0, %c0_i32_1 : i32, i32, i32, i32
  }
}

module attributes {stable_mosaic.version = 11 : i64} {
  func.func @_conv3x3_kernel(%arg0: i32, %arg1: memref<1x8x8x4xf32, #tpu.memory_space<vmem>>, %arg2: memref<3x12x4xf32, #tpu.memory_space<vmem>>, %arg3: memref<1x4xf32, #tpu.memory_space<vmem>>, %arg4: memref<1x8x8x4xf32, #tpu.memory_space<vmem>>) attributes {dimension_semantics = [#tpu.dimension_semantics<parallel>], iteration_bounds = array<i64: 2>, scalar_prefetch = 0 : i64, scratch_operands = 0 : i64, tpu.core_type = #tpu.core_type<tc>, window_params = [{transform_indices = @transform_0, window_bounds = array<i64: 1, 8, 8, 4>}, {pipeline_mode = #tpu.pipeline_mode<synchronous>, transform_indices = @transform_1, window_bounds = array<i64: 3, 12, 4>}, {pipeline_mode = #tpu.pipeline_mode<synchronous>, transform_indices = @transform_2, window_bounds = array<i64: 1, 4>}, {transform_indices = @transform_3, window_bounds = array<i64: 1, 8, 8, 4>}]} {
    %c0 = arith.constant 0 : index
    %c0_0 = arith.constant 0 : index
    %c0_1 = arith.constant 0 : index
    %c0_2 = arith.constant 0 : index
    %0 = vector.load %arg1[%c0, %c0_0, %c0_1, %c0_2] : memref<1x8x8x4xf32, #tpu.memory_space<vmem>>, vector<1x8x8x4xf32>
    %1 = vector.shape_cast %0 : vector<1x8x8x4xf32> to vector<8x8x4xf32>
    %cst = arith.constant 0.000000e+00 : f32
    %2 = vector.broadcast %cst : f32 to vector<8x1x4xf32>
    %3 = tpu.concatenate %2, %1, %2 in 1 : vector<8x1x4xf32>, vector<8x8x4xf32>, vector<8x1x4xf32> -> vector<8x10x4xf32>
    %cst_3 = arith.constant 0.000000e+00 : f32
    %4 = vector.broadcast %cst_3 : f32 to vector<1x10x4xf32>
    %5 = tpu.concatenate %4, %3, %4 in 0 : vector<1x10x4xf32>, vector<8x10x4xf32>, vector<1x10x4xf32> -> vector<10x10x4xf32>
    %6 = vector.extract_strided_slice %5 {offsets = [0, 0, 0], sizes = [8, 10, 4], strides = [1, 1, 1]} : vector<10x10x4xf32> to vector<8x10x4xf32>
    %7 = vector.extract_strided_slice %6 {offsets = [0, 0, 0], sizes = [8, 8, 4], strides = [1, 1, 1]} : vector<8x10x4xf32> to vector<8x8x4xf32>
    %8 = vector.extract_strided_slice %6 {offsets = [0, 1, 0], sizes = [8, 8, 4], strides = [1, 1, 1]} : vector<8x10x4xf32> to vector<8x8x4xf32>
    %9 = vector.extract_strided_slice %6 {offsets = [0, 2, 0], sizes = [8, 8, 4], strides = [1, 1, 1]} : vector<8x10x4xf32> to vector<8x8x4xf32>
    %10 = tpu.concatenate %7, %8, %9 in 2 : vector<8x8x4xf32>, vector<8x8x4xf32>, vector<8x8x4xf32> -> vector<8x8x12xf32>
    %11 = vector.shape_cast %10 : vector<8x8x12xf32> to vector<64x12xf32>
    %c0_4 = arith.constant 0 : index
    %c0_5 = arith.constant 0 : index
    %c0_6 = arith.constant 0 : index
    %12 = vector.load %arg2[%c0_4, %c0_5, %c0_6] : memref<3x12x4xf32, #tpu.memory_space<vmem>>, vector<1x12x4xf32>
    %13 = vector.shape_cast %12 : vector<1x12x4xf32> to vector<12x4xf32>
    %cst_7 = arith.constant dense<0.000000e+00> : vector<64x4xf32>
    %14 = tpu.matmul %11, %13, %cst_7 {dimension_numbers = #tpu.dot_dimension_numbers<[1], [0], [0], [1], [0, 0, 1, 1], [], []>} : vector<64x12xf32>, vector<12x4xf32>, vector<64x4xf32> -> vector<64x4xf32>
    %15 = vector.extract_strided_slice %5 {offsets = [1, 0, 0], sizes = [8, 10, 4], strides = [1, 1, 1]} : vector<10x10x4xf32> to vector<8x10x4xf32>
    %16 = vector.extract_strided_slice %15 {offsets = [0, 0, 0], sizes = [8, 8, 4], strides = [1, 1, 1]} : vector<8x10x4xf32> to vector<8x8x4xf32>
    %17 = vector.extract_strided_slice %15 {offsets = [0, 1, 0], sizes = [8, 8, 4], strides = [1, 1, 1]} : vector<8x10x4xf32> to vector<8x8x4xf32>
    %18 = vector.extract_strided_slice %15 {offsets = [0, 2, 0], sizes = [8, 8, 4], strides = [1, 1, 1]} : vector<8x10x4xf32> to vector<8x8x4xf32>
    %19 = tpu.concatenate %16, %17, %18 in 2 : vector<8x8x4xf32>, vector<8x8x4xf32>, vector<8x8x4xf32> -> vector<8x8x12xf32>
    %20 = vector.shape_cast %19 : vector<8x8x12xf32> to vector<64x12xf32>
    %c1 = arith.constant 1 : index
    %c0_8 = arith.constant 0 : index
    %c0_9 = arith.constant 0 : index
    %21 = vector.load %arg2[%c1, %c0_8, %c0_9] : memref<3x12x4xf32, #tpu.memory_space<vmem>>, vector<1x12x4xf32>
    %22 = vector.shape_cast %21 : vector<1x12x4xf32> to vector<12x4xf32>
    %cst_10 = arith.constant dense<0.000000e+00> : vector<64x4xf32>
    %23 = tpu.matmul %20, %22, %cst_10 {dimension_numbers = #tpu.dot_dimension_numbers<[1], [0], [0], [1], [0, 0, 1, 1], [], []>} : vector<64x12xf32>, vector<12x4xf32>, vector<64x4xf32> -> vector<64x4xf32>
    %24 = arith.addf %14, %23 : vector<64x4xf32>
    %25 = vector.extract_strided_slice %5 {offsets = [2, 0, 0], sizes = [8, 10, 4], strides = [1, 1, 1]} : vector<10x10x4xf32> to vector<8x10x4xf32>
    %26 = vector.extract_strided_slice %25 {offsets = [0, 0, 0], sizes = [8, 8, 4], strides = [1, 1, 1]} : vector<8x10x4xf32> to vector<8x8x4xf32>
    %27 = vector.extract_strided_slice %25 {offsets = [0, 1, 0], sizes = [8, 8, 4], strides = [1, 1, 1]} : vector<8x10x4xf32> to vector<8x8x4xf32>
    %28 = vector.extract_strided_slice %25 {offsets = [0, 2, 0], sizes = [8, 8, 4], strides = [1, 1, 1]} : vector<8x10x4xf32> to vector<8x8x4xf32>
    %29 = tpu.concatenate %26, %27, %28 in 2 : vector<8x8x4xf32>, vector<8x8x4xf32>, vector<8x8x4xf32> -> vector<8x8x12xf32>
    %30 = vector.shape_cast %29 : vector<8x8x12xf32> to vector<64x12xf32>
    %c2 = arith.constant 2 : index
    %c0_11 = arith.constant 0 : index
    %c0_12 = arith.constant 0 : index
    %31 = vector.load %arg2[%c2, %c0_11, %c0_12] : memref<3x12x4xf32, #tpu.memory_space<vmem>>, vector<1x12x4xf32>
    %32 = vector.shape_cast %31 : vector<1x12x4xf32> to vector<12x4xf32>
    %cst_13 = arith.constant dense<0.000000e+00> : vector<64x4xf32>
    %33 = tpu.matmul %30, %32, %cst_13 {dimension_numbers = #tpu.dot_dimension_numbers<[1], [0], [0], [1], [0, 0, 1, 1], [], []>} : vector<64x12xf32>, vector<12x4xf32>, vector<64x4xf32> -> vector<64x4xf32>
    %34 = arith.addf %24, %33 : vector<64x4xf32>
    %c0_14 = arith.constant 0 : index
    %c0_15 = arith.constant 0 : index
    %35 = vector.load %arg3[%c0_14, %c0_15] : memref<1x4xf32, #tpu.memory_space<vmem>>, vector<1x4xf32>
    %36 = vector.broadcast %35 : vector<1x4xf32> to vector<64x4xf32>
    %37 = arith.addf %34, %36 : vector<64x4xf32>
    %cst_16 = arith.constant 0.000000e+00 : f32
    %38 = vector.broadcast %cst_16 : f32 to vector<64x4xf32>
    %39 = arith.maximumf %37, %38 : vector<64x4xf32>
    %40 = vector.shape_cast %39 : vector<64x4xf32> to vector<8x8x4xf32>
    %c0_17 = arith.constant 0 : index
    %c0_18 = arith.constant 0 : index
    %c0_19 = arith.constant 0 : index
    %c0_20 = arith.constant 0 : index
    %41 = vector.load %arg4[%c0_17, %c0_18, %c0_19, %c0_20] : memref<1x8x8x4xf32, #tpu.memory_space<vmem>>, vector<1x8x8x4xf32>
    %42 = vector.shape_cast %41 : vector<1x8x8x4xf32> to vector<8x8x4xf32>
    %43 = vector.shape_cast %40 : vector<8x8x4xf32> to vector<1x8x8x4xf32>
    tpu.vector_store %arg4[%c0_17, %c0_18, %c0_19, %c0_20], %43 {strides = array<i32>} : memref<1x8x8x4xf32, #tpu.memory_space<vmem>>, vector<1x8x8x4xf32>,
    return
  }
  func.func @transform_0(%arg0: i32) -> (i32, i32, i32, i32) {
    %c0_i32 = arith.constant 0 : i32
    %c0_i32_0 = arith.constant 0 : i32
    %c0_i32_1 = arith.constant 0 : i32
    %c0_i32_2 = arith.constant 0 : i32
    return %arg0, %c0_i32, %c0_i32_0, %c0_i32_1 : i32, i32, i32, i32
  }
  func.func @transform_1(%arg0: i32) -> (i32, i32, i32) {
    %c0_i32 = arith.constant 0 : i32
    %c0_i32_0 = arith.constant 0 : i32
    %c0_i32_1 = arith.constant 0 : i32
    %c0_i32_2 = arith.constant 0 : i32
    return %c0_i32, %c0_i32_0, %c0_i32_1 : i32, i32, i32
  }
  func.func @transform_2(%arg0: i32) -> (i32, i32) {
    %c0_i32 = arith.constant 0 : i32
    %c0_i32_0 = arith.constant 0 : i32
    %c0_i32_1 = arith.constant 0 : i32
    return %c0_i32, %c0_i32_0 : i32, i32
  }
  func.func @transform_3(%arg0: i32) -> (i32, i32, i32, i32) {
    %c0_i32 = arith.constant 0 : i32
    %c0_i32_0 = arith.constant 0 : i32
    %c0_i32_1 = arith.constant 0 : i32
    %c0_i32_2 = arith.constant 0 : i32
    return %arg0, %c0_i32, %c0_i32_0, %c0_i32_1 : i32, i32, i32, i32
  }
}

module attributes {stable_mosaic.version = 11 : i64} {
  func.func @_final_kernel(%arg0: i32, %arg1: memref<1x8x8x4xf32, #tpu.memory_space<vmem>>, %arg2: memref<1x8x8x4xf32, #tpu.memory_space<vmem>>, %arg3: memref<1x8x8x16xf32, #tpu.memory_space<vmem>>, %arg4: memref<4x8xf32, #tpu.memory_space<vmem>>, %arg5: memref<4x8xf32, #tpu.memory_space<vmem>>, %arg6: memref<16x8xf32, #tpu.memory_space<vmem>>, %arg7: memref<1x8xf32, #tpu.memory_space<vmem>>, %arg8: memref<1x8x8x8xf32, #tpu.memory_space<vmem>>) attributes {dimension_semantics = [#tpu.dimension_semantics<parallel>], iteration_bounds = array<i64: 2>, scalar_prefetch = 0 : i64, scratch_operands = 0 : i64, tpu.core_type = #tpu.core_type<tc>, window_params = [{transform_indices = @transform_0, window_bounds = array<i64: 1, 8, 8, 4>}, {transform_indices = @transform_1, window_bounds = array<i64: 1, 8, 8, 4>}, {transform_indices = @transform_2, window_bounds = array<i64: 1, 8, 8, 16>}, {pipeline_mode = #tpu.pipeline_mode<synchronous>, transform_indices = @transform_3, window_bounds = array<i64: 4, 8>}, {pipeline_mode = #tpu.pipeline_mode<synchronous>, transform_indices = @transform_4, window_bounds = array<i64: 4, 8>}, {pipeline_mode = #tpu.pipeline_mode<synchronous>, transform_indices = @transform_5, window_bounds = array<i64: 16, 8>}, {pipeline_mode = #tpu.pipeline_mode<synchronous>, transform_indices = @transform_6, window_bounds = array<i64: 1, 8>}, {transform_indices = @transform_7, window_bounds = array<i64: 1, 8, 8, 8>}]} {
    %c0 = arith.constant 0 : index
    %c0_0 = arith.constant 0 : index
    %c0_1 = arith.constant 0 : index
    %c0_2 = arith.constant 0 : index
    %0 = vector.load %arg1[%c0, %c0_0, %c0_1, %c0_2] : memref<1x8x8x4xf32, #tpu.memory_space<vmem>>, vector<1x8x8x4xf32>
    %1 = vector.shape_cast %0 : vector<1x8x8x4xf32> to vector<8x8x4xf32>
    %2 = vector.shape_cast %1 : vector<8x8x4xf32> to vector<64x4xf32>
    %c0_3 = arith.constant 0 : index
    %c0_4 = arith.constant 0 : index
    %3 = vector.load %arg4[%c0_3, %c0_4] : memref<4x8xf32, #tpu.memory_space<vmem>>, vector<4x8xf32>
    %cst = arith.constant dense<0.000000e+00> : vector<64x8xf32>
    %4 = tpu.matmul %2, %3, %cst {dimension_numbers = #tpu.dot_dimension_numbers<[1], [0], [0], [1], [0, 0, 1, 1], [], []>} : vector<64x4xf32>, vector<4x8xf32>, vector<64x8xf32> -> vector<64x8xf32>
    %c0_5 = arith.constant 0 : index
    %c0_6 = arith.constant 0 : index
    %c0_7 = arith.constant 0 : index
    %c0_8 = arith.constant 0 : index
    %5 = vector.load %arg2[%c0_5, %c0_6, %c0_7, %c0_8] : memref<1x8x8x4xf32, #tpu.memory_space<vmem>>, vector<1x8x8x4xf32>
    %6 = vector.shape_cast %5 : vector<1x8x8x4xf32> to vector<8x8x4xf32>
    %7 = vector.shape_cast %6 : vector<8x8x4xf32> to vector<64x4xf32>
    %c0_9 = arith.constant 0 : index
    %c0_10 = arith.constant 0 : index
    %8 = vector.load %arg5[%c0_9, %c0_10] : memref<4x8xf32, #tpu.memory_space<vmem>>, vector<4x8xf32>
    %cst_11 = arith.constant dense<0.000000e+00> : vector<64x8xf32>
    %9 = tpu.matmul %7, %8, %cst_11 {dimension_numbers = #tpu.dot_dimension_numbers<[1], [0], [0], [1], [0, 0, 1, 1], [], []>} : vector<64x4xf32>, vector<4x8xf32>, vector<64x8xf32> -> vector<64x8xf32>
    %10 = arith.addf %4, %9 : vector<64x8xf32>
    %c0_12 = arith.constant 0 : index
    %c0_13 = arith.constant 0 : index
    %c0_14 = arith.constant 0 : index
    %c0_15 = arith.constant 0 : index
    %11 = vector.load %arg3[%c0_12, %c0_13, %c0_14, %c0_15] : memref<1x8x8x16xf32, #tpu.memory_space<vmem>>, vector<1x8x8x16xf32>
    %12 = vector.shape_cast %11 : vector<1x8x8x16xf32> to vector<8x8x16xf32>
    %13 = vector.shape_cast %12 : vector<8x8x16xf32> to vector<64x16xf32>
    %c0_16 = arith.constant 0 : index
    %c0_17 = arith.constant 0 : index
    %14 = vector.load %arg6[%c0_16, %c0_17] : memref<16x8xf32, #tpu.memory_space<vmem>>, vector<16x8xf32>
    %cst_18 = arith.constant dense<0.000000e+00> : vector<64x8xf32>
    %15 = tpu.matmul %13, %14, %cst_18 {dimension_numbers = #tpu.dot_dimension_numbers<[1], [0], [0], [1], [0, 0, 1, 1], [], []>} : vector<64x16xf32>, vector<16x8xf32>, vector<64x8xf32> -> vector<64x8xf32>
    %16 = arith.addf %10, %15 : vector<64x8xf32>
    %c0_19 = arith.constant 0 : index
    %c0_20 = arith.constant 0 : index
    %17 = vector.load %arg7[%c0_19, %c0_20] : memref<1x8xf32, #tpu.memory_space<vmem>>, vector<1x8xf32>
    %18 = vector.broadcast %17 : vector<1x8xf32> to vector<64x8xf32>
    %19 = arith.addf %16, %18 : vector<64x8xf32>
    %cst_21 = arith.constant 1.000000e+00 : f32
    %20 = vector.broadcast %cst_21 : f32 to vector<64x8xf32>
    %21 = arith.mulf %20, %19 : vector<64x8xf32>
    %cst_22 = arith.constant 0.000000e+00 : f32
    %22 = vector.broadcast %cst_22 : f32 to vector<64x8xf32>
    %23 = arith.maximumf %21, %22 : vector<64x8xf32>
    %24 = vector.shape_cast %23 : vector<64x8xf32> to vector<8x8x8xf32>
    %c0_23 = arith.constant 0 : index
    %c0_24 = arith.constant 0 : index
    %c0_25 = arith.constant 0 : index
    %c0_26 = arith.constant 0 : index
    %25 = vector.load %arg8[%c0_23, %c0_24, %c0_25, %c0_26] : memref<1x8x8x8xf32, #tpu.memory_space<vmem>>, vector<1x8x8x8xf32>
    %26 = vector.shape_cast %25 : vector<1x8x8x8xf32> to vector<8x8x8xf32>
    %27 = vector.shape_cast %24 : vector<8x8x8xf32> to vector<1x8x8x8xf32>
    tpu.vector_store %arg8[%c0_23, %c0_24, %c0_25, %c0_26], %27 {strides = array<i32>} : memref<1x8x8x8xf32, #tpu.memory_space<vmem>>, vector<1x8x8x8xf32>,
    return
  }
  func.func @transform_0(%arg0: i32) -> (i32, i32, i32, i32) {
    %c0_i32 = arith.constant 0 : i32
    %c0_i32_0 = arith.constant 0 : i32
    %c0_i32_1 = arith.constant 0 : i32
    %c0_i32_2 = arith.constant 0 : i32
    return %arg0, %c0_i32, %c0_i32_0, %c0_i32_1 : i32, i32, i32, i32
  }
  func.func @transform_1(%arg0: i32) -> (i32, i32, i32, i32) {
    %c0_i32 = arith.constant 0 : i32
    %c0_i32_0 = arith.constant 0 : i32
    %c0_i32_1 = arith.constant 0 : i32
    %c0_i32_2 = arith.constant 0 : i32
    return %arg0, %c0_i32, %c0_i32_0, %c0_i32_1 : i32, i32, i32, i32
  }
  func.func @transform_2(%arg0: i32) -> (i32, i32, i32, i32) {
    %c0_i32 = arith.constant 0 : i32
    %c0_i32_0 = arith.constant 0 : i32
    %c0_i32_1 = arith.constant 0 : i32
    %c0_i32_2 = arith.constant 0 : i32
    return %arg0, %c0_i32, %c0_i32_0, %c0_i32_1 : i32, i32, i32, i32
  }
  func.func @transform_3(%arg0: i32) -> (i32, i32) {
    %c0_i32 = arith.constant 0 : i32
    %c0_i32_0 = arith.constant 0 : i32
    %c0_i32_1 = arith.constant 0 : i32
    return %c0_i32, %c0_i32_0 : i32, i32
  }
  func.func @transform_4(%arg0: i32) -> (i32, i32) {
    %c0_i32 = arith.constant 0 : i32
    %c0_i32_0 = arith.constant 0 : i32
    %c0_i32_1 = arith.constant 0 : i32
    return %c0_i32, %c0_i32_0 : i32, i32
  }
  func.func @transform_5(%arg0: i32) -> (i32, i32) {
    %c0_i32 = arith.constant 0 : i32
    %c0_i32_0 = arith.constant 0 : i32
    %c0_i32_1 = arith.constant 0 : i32
    return %c0_i32, %c0_i32_0 : i32, i32
  }
  func.func @transform_6(%arg0: i32) -> (i32, i32) {
    %c0_i32 = arith.constant 0 : i32
    %c0_i32_0 = arith.constant 0 : i32
    %c0_i32_1 = arith.constant 0 : i32
    return %c0_i32, %c0_i32_0 : i32, i32
  }
  func.func @transform_7(%arg0: i32) -> (i32, i32, i32, i32) {
    %c0_i32 = arith.constant 0 : i32
    %c0_i32_0 = arith.constant 0 : i32
    %c0_i32_1 = arith.constant 0 : i32
    %c0_i32_2 = arith.constant 0 : i32
    return %arg0, %c0_i32, %c0_i32_0, %c0_i32_1 : i32, i32, i32, i32
  }
}

</mosaic_0001>

<bundles_post_ra>
// kernel: uplayer_forward.7
= control target key start
LH: loop header
LB: loop body
LE: loop exit
PB: predicated region body
PF: predicated region fallthrough
CT: control target
= control target key end

     0   :  { %s1023_s12 = smov 0   ;;  %s1258_s0 = inlined_call_operand.vmem [shape: f32[2,8,8,4], index: 0, kind: input, shape index: {}]   ;;  %s1259_s1 = inlined_call_operand.vmem [shape: f32[3,12,12], index: 1, kind: input, shape index: {}]   ;;  %s1260_s2 = inlined_call_operand.vmem [shape: f32[1,12], index: 2, kind: input, shape index: {}]   ;;  %s1261_s3 = inlined_call_operand.vmem [shape: f32[2,8,8,12], index: 3, kind: output, shape index: {}]  }
   0x1 LB: > { %s820_s13 = sadd.s32 4294967295, %s997_s12   ;;  %p824_p0 = scmp.ge.s32.totalorder %s997_s12, 1  ;;  %s997_s12 = sphi %s1023_s12, %s13_s12  }
   0x2   : > { %p137_p1 = scmp.lt.s32.totalorder %s997_s12, 3 }
   0x4   : > { %p138_p2 = pnand %p824_p0, %p137_p1 }
   0x5   : > { %v999_v0 = vmov (!%p138_p2), 0.0   ;;  %p161_p3 = scmp.lt.s32.totalorder (!%p138_p2), %s820_s13, 1  ;;  %v349_v3 = vld [vmem:[%s1259_s1] sm:$0xff] (!%p138_p2)  ;;  %v350_v4 = vld [vmem:[%s1259_s1 + $0x8] sm:$0xf] (!%p138_p2)  ;;  %vm395_vm0 = vcmask (!%p138_p2), 1043456  }
   0x6   : > { %141 = sbr.rel (%p138_p2) target bundleno = 396 (0x18c), region = 32  ;;  %v284_v1 = vrot.slane (!%p138_p2), %v999_v0, 2  ;;  %v236_v2 = vrot.slane (!%p138_p2), %v999_v0, 1  ;;  %v829_v5 = vld [vmem:[%s1259_s1 + $0x10] sm:$0xff] (!%p138_p2)  ;;  %s1000_s20 = smov (!%p138_p2), 8   ;;  %vm1002_vm1 = vmmov (!%p138_p2), 1   ;;  %v1048_v7 = vpack.c.bf16 (!%p138_p2), %v350_v4, %v349_v3 }
   0x7   : > { %s1001_s21 = smov (!%p138_p2), 4   ;;  %vm1044_vm2 = vmpackc.low (!%p138_p2), %vm395_vm0, %vm1002_vm1  ;;  %v830_v8 = vld [vmem:[%s1259_s1 + $0x18] sm:$0xf] (!%p138_p2)  ;;  %vm203_vm3 = vcmask (!%p138_p2), 1040384   ;;  %vm235_vm4 = vcmask (!%p138_p2), 1046528   ;;  %vm283_vm5 = vcmask (!%p138_p2), 1045504  }
   0x8   : > { %307 = vrot.lane.b32.xlu1 (!%p138_p2), %v284_v1, %s1000_s20  ;;  %259 = vrot.lane.b32.xlu0 (!%p138_p2), %v236_v2, %s1001_s21  ;;  %v943_v9 = vpack.c.bf16 (!%p138_p2), %v830_v8, %v829_v5  ;;  %v849_v49 = vld [vmem:[%s1259_s1 + $0x20] sm:$0xff] (!%p138_p2)  ;;  %v850_v50 = vld [vmem:[%s1259_s1 + $0x28] sm:$0xf] (!%p138_p2)  ;;  %vm331_vm6 = vcmask (!%p138_p2), 31744   ;;  %vm340_vm7 = vcmask (!%p138_p2), 64512   ;;  %vm370_vm8 = vcmask (!%p138_p2), 97280  }
   0x9   : > { %951 = vmatprep.subr.msk.bf16.mxu0 (!%p138_p2), %vm1044_vm2, %v1048_v7  ;;  %v1129_v59 = vpack.c.bf16 (!%p138_p2), %v850_v50, %v849_v49 }
   0xa   : > { %945 = vmatprep.subr.msk.bf16.mxu1 (!%p138_p2), %vm1044_vm2, %v943_v9  ;;  %954 = vmatpush3.bf16.msk.msra.mxu0 (!%p138_p2), %vm1044_vm2, %v1048_v7 }
   0xb   : > { %948 = vmatpush3.bf16.msk.msra.mxu1 (!%p138_p2), %vm1044_vm2, %v943_v9  ;;  %957 = vmatprep.subr.msk.bf16.mxu0 (!%p138_p2), %vm1044_vm2, %v1129_v59 }
   0xc   : > { %961 = vmatprep.subr.msk.bf16.mxu1 (!%p138_p2), %vm1044_vm2, %v1048_v7 }
   0xd   : > { %s1265_s13 = smov (!%p161_p3, %s820_s13), 1 }
   0xe   : > { %s863_s24 = sshll.u32 %s1265_s13, 6 }
   0xf   : > { %s1062_s27 = scalar_lea.vmem %s1258_s0, %s863_s24  ;;  %s1237_s9 = scalar_lea.vmem %s1261_s3, %s863_s24 }
  0x10   : > { %v172_v10 = vld [vmem:[%s1062_s27 + $0x8] sm:$0xff]  ;;  %v171_v11 = vld [vmem:[%s1062_s27] sm:$0xff]  ;;  %v174_v12 = vld [vmem:[%s1062_s27 + $0x18] sm:$0xff] }
  0x11   : > { %v188_v13 = vrot.slane %v172_v10, 7  ;;  %v187_v14 = vrot.slane %v171_v11, 7  ;;  %v173_v15 = vld [vmem:[%s1062_s27 + $0x10] sm:$0xff]  ;;  %v190_v16 = vrot.slane %v174_v12, 7  ;;  %v176_v26 = vld [vmem:[%s1062_s27 + $0x28] sm:$0xff]  ;;  %v175_v35 = vld [vmem:[%s1062_s27 + $0x20] sm:$0xff] }
  0x12   : > { %v189_v17 = vrot.slane %v173_v15, 7  ;;  %v192_v38 = vrot.slane %v176_v26, 7  ;;  %v191_v45 = vrot.slane %v175_v35, 7  ;;  %v177_v58 = vld [vmem:[%s1062_s27 + $0x30] sm:$0xff]  ;;  %v178_v2 = vld [vmem:[%s1062_s27 + $0x38] sm:$0xff] }
  0x13   : > { %v1079_v18 = vsel %vm203_vm3, 0.0, %v188_v13  ;;  %v213_v19 = vsel %vm203_vm3, %v188_v13, 0.0  ;;  %v1083_v20 = vsel %vm203_vm3, 0.0, %v187_v14  ;;  %v212_v21 = vsel %vm203_vm3, %v187_v14, 0.0 }
  0x14   : > { %v241_v22 = vrot.slane %v1079_v18, 1  ;;  %v242_v23 = vrot.slane %v213_v19, 1  ;;  %v238_v24 = vrot.slane %v1083_v20, 1  ;;  %v239_v25 = vrot.slane %v212_v21, 1 }
  0x15   : > { %v289_v27 = vrot.slane %v1079_v18, 2  ;;  %v290_v28 = vrot.slane %v213_v19, 2  ;;  %v286_v29 = vrot.slane %v1083_v20, 2  ;;  %v287_v30 = vrot.slane %v212_v21, 2 }
  0x16   : > { %v243_v31 = vsel %vm235_vm4, %v241_v22, %v242_v23  ;;  %v240_v32 = vsel %vm235_vm4, %v238_v24, %v239_v25  ;;  %v1094_v33 = vsel %vm203_vm3, 0.0, %v190_v16  ;;  %v215_v34 = vsel %vm203_vm3, %v190_v16, 0.0 }
  0x17   : > { %263 = vrot.lane.b32.xlu1 %v243_v31, %s1001_s21  ;;  %261 = vrot.lane.b32.xlu0 %v240_v32, %s1001_s21  ;;  %v247_v36 = vrot.slane %v1094_v33, 1  ;;  %v248_v37 = vrot.slane %v215_v34, 1  ;;  %v291_v39 = vsel %vm283_vm5, %v289_v27, %v290_v28  ;;  %v288_v40 = vsel %vm283_vm5, %v286_v29, %v287_v30 }
  0x18   : > { %v1104_v41 = vsel %vm203_vm3, 0.0, %v189_v17  ;;  %v214_v42 = vsel %vm203_vm3, %v189_v17, 0.0  ;;  %v295_v47 = vrot.slane %v1094_v33, 2  ;;  %v296_v48 = vrot.slane %v215_v34, 2 }
  0x19   : > { %v244_v43 = vrot.slane %v1104_v41, 1  ;;  %v245_v44 = vrot.slane %v214_v42, 1  ;;  %v249_v46 = vsel %vm235_vm4, %v247_v36, %v248_v37  ;;  %v292_v52 = vrot.slane %v1104_v41, 2 }
  0x1a   : > { %v293_v53 = vrot.slane %v214_v42, 2  ;;  %v1121_v54 = vsel %vm203_vm3, 0.0, %v192_v38  ;;  %v217_v55 = vsel %vm203_vm3, %v192_v38, 0.0  ;;  %v1125_v56 = vsel %vm203_vm3, 0.0, %v191_v45 }
  0x1b   : > { %311 = vrot.lane.b32.xlu1 %v291_v39, %s1000_s20  ;;  %309 = vrot.lane.b32.xlu0 %v288_v40, %s1000_s20  ;;  %v246_v51 = vsel %vm235_vm4, %v244_v43, %v245_v44  ;;  %v216_v57 = vsel %vm203_vm3, %v191_v45, 0.0  ;;  %v297_v60 = vsel %vm283_vm5, %v295_v47, %v296_v48  ;;  %v253_v61 = vrot.slane %v1121_v54, 1 }
  0x1c   : > { %v294_v62 = vsel %vm283_vm5, %v292_v52, %v293_v53  ;;  %v254_v63 = vrot.slane %v217_v55, 1  ;;  %v250_v0 = vrot.slane %v1125_v56, 1  ;;  %v251_v1 = vrot.slane %v216_v57, 1 }
  0x1d   : > { %v193_v3 = vrot.slane %v177_v58, 7  ;;  %v301_v4 = vrot.slane %v1121_v54, 2  ;;  %v302_v5 = vrot.slane %v217_v55, 2  ;;  %v298_v8 = vrot.slane %v1125_v56, 2 }
  0x1e   : > { %v299_v9 = vrot.slane %v216_v57, 2  ;;  %v194_v10 = vrot.slane %v178_v2, 7  ;;  %v255_v11 = vsel %vm235_vm4, %v253_v61, %v254_v63  ;;  %v252_v12 = vsel %vm235_vm4, %v250_v0, %v251_v1 }
  0x1f   : > { %267 = vrot.lane.b32.xlu1 %v249_v46, %s1001_s21  ;;  %265 = vrot.lane.b32.xlu0 %v246_v51, %s1001_s21  ;;  %v1148_v13 = vsel %vm203_vm3, 0.0, %v193_v3  ;;  %v218_v14 = vsel %vm203_vm3, %v193_v3, 0.0  ;;  %v303_v15 = vsel %vm283_vm5, %v301_v4, %v302_v5 }
  0x20   : > { %v300_v16 = vsel %vm283_vm5, %v298_v8, %v299_v9  ;;  %v1156_v17 = vsel %vm203_vm3, 0.0, %v194_v10  ;;  %v256_v19 = vrot.slane %v1148_v13, 1  ;;  %v257_v21 = vrot.slane %v218_v14, 1  ;;  %v860_v8 = vld [vmem:[%s1260_s2] ss:$0 sm:$0xff] }
  0x21   : > { %v304_v22 = vrot.slane %v1148_v13, 2  ;;  %v305_v23 = vrot.slane %v218_v14, 2  ;;  %v219_v24 = vsel %vm203_vm3, %v194_v10, 0.0  ;;  %v353_v25 = vrot.slane %v1156_v17, 1 }
  0x22   : > { %v359_v26 = vrot.slane %v1156_v17, 2  ;;  %v258_v27 = vsel %vm235_vm4, %v256_v19, %v257_v21  ;;  %v354_v29 = vrot.slane %v219_v24, 1  ;;  %v360_v30 = vrot.slane %v219_v24, 2 }
  0x23   : > { %315 = vrot.lane.b32.xlu1 %v297_v60, %s1000_s20  ;;  %313 = vrot.lane.b32.xlu0 %v294_v62, %s1000_s20  ;;  %v306_v28 = vsel %vm283_vm5, %v304_v22, %v305_v23 }
  0x24   : > { %v355_v31 = vsel %vm235_vm4, %v353_v25, %v354_v29  ;;  %v361_v32 = vsel %vm283_vm5, %v359_v26, %v360_v30 }
  0x27   : > { %271 = vrot.lane.b32.xlu1 %v255_v11, %s1001_s21  ;;  %269 = vrot.lane.b32.xlu0 %v252_v12, %s1001_s21 }
  0x2b   : > { %319 = vrot.lane.b32.xlu1 %v303_v15, %s1000_s20  ;;  %317 = vrot.lane.b32.xlu0 %v300_v16, %s1000_s20 }
  0x2f   : > { %273 = vrot.lane.b32.xlu0 %v258_v27, %s1001_s21  ;;  %321 = vrot.lane.b32.xlu1 %v306_v28, %s1000_s20 }
  0x33   : > { %356 = vrot.lane.b32.xlu0 %v355_v31, %s1001_s21  ;;  %362 = vrot.lane.b32.xlu1 %v361_v32, %s1000_s20 }
  0x7a   : > { %v308_v34 = vpop.permute.xlu1 %307  ;;  %v260_v35 = vpop.permute.xlu0 %259 }
  0x7b   : > { %v332_v36 = vsel %vm331_vm6, 0.0, %v260_v35 }
  0x7c   : > { %v341_v37 = vsel %vm340_vm7, %v332_v36, %v308_v34 }
  0x7d   : > { %915 = vmatprep.mubr.msk.f32.mxu0 %vm370_vm8, %v341_v37 }
  0x89   : > { %v264_v38 = vpop.permute.xlu1 %263  ;;  %v262_v39 = vpop.permute.xlu0 %261 }
  0x8a   : > { %v334_v40 = vsel %vm331_vm6, %v1079_v18, %v264_v38  ;;  %v333_v42 = vsel %vm331_vm6, %v1083_v20, %v262_v39 }
  0x8d   : > { %v312_v43 = vpop.permute.xlu1 %311  ;;  %v310_v44 = vpop.permute.xlu0 %309 }
  0x8e   : > { %v343_v45 = vsel %vm340_vm7, %v334_v40, %v312_v43  ;;  %v342_v46 = vsel %vm340_vm7, %v333_v42, %v310_v44 }
  0x8f   : > { %899 = vmatprep.mubr.msk.f32.mxu1 %vm370_vm8, %v342_v46  ;;  %916 = vmatmul.mubr.msk.f32.vlgmr.msra.gmra.mrb[0].mxu0 %vm370_vm8, %v342_v46 }
  0x90   : > { %900 = vmatmul.mubr.msk.f32.vlgmr.msra.gmra.mrb[0].mxu1 %vm370_vm8, %v343_v45  ;;  %918 = vmatprep.mubr.msk.f32.mxu0 %vm370_vm8, %v343_v45 }
  0x91   : > { %v268_v47 = vpop.permute.xlu1 %267  ;;  %v266_v48 = vpop.permute.xlu0 %265  ;;  %960 = vmatpush3.bf16.msk.msra.mxu0 %vm1044_vm2, %v1129_v59  ;;  %962 = vmatpush3.bf16.msk.msra.mxu1 %vm1044_vm2, %v1048_v7 }
  0x92   : > { %v336_v18 = vsel %vm331_vm6, %v1094_v33, %v268_v47  ;;  %v335_v20 = vsel %vm331_vm6, %v1104_v41, %v266_v48 }
  0x95   : > { %v316_v49 = vpop.permute.xlu1 %315  ;;  %v314_v50 = vpop.permute.xlu0 %313 }
  0x96   : > { %v345_v51 = vsel %vm340_vm7, %v336_v18, %v316_v49  ;;  %v344_v52 = vsel %vm340_vm7, %v335_v20, %v314_v50 }
  0x97   : > { %902 = vmatprep.mubr.msk.f32.mxu1 %vm370_vm8, %v344_v52  ;;  %919 = vmatmul.mubr.msk.f32.gmra.mrb[2].mxu0 %vm370_vm8, %v344_v52 }
  0x98   : > { %903 = vmatmul.mubr.msk.f32.gmra.mrb[2].mxu1 %vm370_vm8, %v345_v51  ;;  %931 = vmatprep.mubr.msk.f32.mxu0 %vm370_vm8, %v343_v45 }
  0x99   : > { %v272_v6 = vpop.permute.xlu1 %271  ;;  %v270_v7 = vpop.permute.xlu0 %269 }
  0x9a   : > { %v338_v33 = vsel %vm331_vm6, %v1121_v54, %v272_v6  ;;  %v337_v41 = vsel %vm331_vm6, %v1125_v56, %v270_v7 }
  0x9b   : > { %932 = vmatmul.mubr.msk.f32.vlgmr.msra.gmra.mrb[0].mxu0 %vm370_vm8, %v344_v52 }
  0x9c   : > { %934 = vmatprep.mubr.msk.f32.mxu0 %vm370_vm8, %v345_v51 }
  0x9d   : > { %v320_v53 = vpop.permute.xlu1 %319  ;;  %v318_v55 = vpop.permute.xlu0 %317 }
  0x9e   : > { %v347_v57 = vsel %vm340_vm7, %v338_v33, %v320_v53  ;;  %v346_v58 = vsel %vm340_vm7, %v337_v41, %v318_v55 }
  0x9f   : > { %905 = vmatprep.mubr.msk.f32.mxu1 %vm370_vm8, %v346_v58  ;;  %935 = vmatmul.mubr.msk.f32.gmra.mrb[2].mxu0 %vm370_vm8, %v346_v58 }
  0xa0   : > { %906 = vmatmul.mubr.msk.f32.gmra.mrb[4].mxu1 %vm370_vm8, %v347_v57  ;;  %937 = vmatprep.mubr.msk.f32.mxu0 %vm370_vm8, %v347_v57 }
  0xa1   : > { %v274_v59 = vpop.permute.xlu0 %273  ;;  %v322_v60 = vpop.permute.xlu1 %321 }
  0xa2   : > { %v339_v54 = vsel %vm331_vm6, %v1148_v13, %v274_v59 }
  0xa3   : > { %v348_v56 = vsel %vm340_vm7, %v339_v54, %v322_v60 }
  0xa4   : > { %908 = vmatprep.mubr.msk.f32.mxu1 %vm370_vm8, %v348_v56  ;;  %938 = vmatmul.mubr.msk.f32.gmra.mrb[4].mxu0 %vm370_vm8, %v348_v56 }
  0xa5   : > { %v357_v61 = vpop.permute.xlu0 %356  ;;  %v363_v62 = vpop.permute.xlu1 %362 }
  0xa6   : > { %v365_v63 = vsel %vm331_vm6, %v1156_v17, %v357_v61 }
  0xa7   : > { %v366_v0 = vsel %vm340_vm7, %v365_v63, %v363_v62 }
  0xa8   : > { %909 = vmatmul.mubr.msk.f32.gmra.mrb[6].mxu1 %vm370_vm8, %v366_v0  ;;  %940 = vmatprep.mubr.msk.f32.mxu0 %vm370_vm8, %v366_v0 }
  0xa9   : > { %921 = vmatprep.mubr.msk.f32.mxu1 %vm370_vm8, %v345_v51  ;;  %941 = vmatmul.mubr.msk.f32.gmra.mrb[6].mxu0 %vm370_vm8, %v341_v37 }
  0xac   : > { %922 = vmatmul.mubr.msk.f32.vlgmr.msra.gmra.mrb[4].mxu1 %vm370_vm8, %v346_v58 }
  0xad   : > { %924 = vmatprep.mubr.msk.f32.mxu1 %vm370_vm8, %v347_v57 }
  0xb0   : > { %925 = vmatmul.mubr.msk.f32.gmra.mrb[6].mxu1 %vm370_vm8, %v348_v56 }
 0x163   : > { %v901_v1 = vpop.f32.mrb[0].mxu1 }
 0x164   : > { %v465_v2 = vpop.f32.mrb[1].mxu1 }
 0x16b   : > { %v904_v3 = vpop.f32.mrb[2].mxu1 }
 0x16c   : > { %v475_v4 = vpop.f32.mrb[3].mxu1 }
 0x16e   : > { %v933_v5 = vpop.f32.mrb[0].mxu0 }
 0x16f   : > { %v963_v9 = vadd.f32 %v933_v5, %v901_v1  ;;  %v687_v10 = vpop.f32.mrb[1].mxu0 }
 0x170   : > { %v964_v11 = vadd.f32 %v687_v10, %v465_v2 }
 0x171   : > { %v742_v12 = vadd.f32 %v963_v9, %v860_v8 }
 0x172   : > { %v741_v13 = vadd.f32 %v964_v11, %v860_v8  ;;  %v936_v14 = vpop.f32.mrb[2].mxu0 }
 0x173   : > { %v750_v15 = vmax.f32 %v742_v12, 0.0  ;;  %v965_v16 = vadd.f32 %v936_v14, %v904_v3  ;;  %v697_v17 = vpop.f32.mrb[3].mxu0 }
 0x174   : > { %v749_v19 = vmax.f32 %v741_v13, 0.0  ;;  %v966_v21 = vadd.f32 %v697_v17, %v475_v4 }
 0x175   : > { %758 = vst.msk [vmem:[%s1237_s9 + $0x8] sm:$0xff] %vm370_vm8, %v750_v15  ;;  %v744_v22 = vadd.f32 %v965_v16, %v860_v8 }
 0x176   : > { %757 = vst.msk [vmem:[%s1237_s9] sm:$0xff] %vm370_vm8, %v749_v19  ;;  %v743_v23 = vadd.f32 %v966_v21, %v860_v8 }
 0x177   : > { %v752_v24 = vmax.f32 %v744_v22, 0.0  ;;  %v939_v25 = vpop.f32.mrb[4].mxu0 }
 0x178   : > { %v751_v26 = vmax.f32 %v743_v23, 0.0  ;;  %v707_v27 = vpop.f32.mrb[5].mxu0 }
 0x179   : > { %760 = vst.msk [vmem:[%s1237_s9 + $0x18] sm:$0xff] %vm370_vm8, %v752_v24 }
 0x17a   : > { %759 = vst.msk [vmem:[%s1237_s9 + $0x10] sm:$0xff] %vm370_vm8, %v751_v26 }
 0x17c   : > { %v942_v28 = vpop.f32.mrb[6].mxu0 }
 0x17d   : > { %v717_v29 = vpop.f32.mrb[7].mxu0 }
 0x17f   : > { %v923_v30 = vpop.f32.mrb[4].mxu1 }
 0x180   : > { %v967_v31 = vadd.f32 %v939_v25, %v923_v30  ;;  %v596_v32 = vpop.f32.mrb[5].mxu1 }
 0x181   : > { %v968_v34 = vadd.f32 %v707_v27, %v596_v32 }
 0x182   : > { %v746_v35 = vadd.f32 %v967_v31, %v860_v8 }
 0x183   : > { %v745_v36 = vadd.f32 %v968_v34, %v860_v8  ;;  %v926_v37 = vpop.f32.mrb[6].mxu1 }
 0x184   : > { %v754_v38 = vmax.f32 %v746_v35, 0.0  ;;  %v969_v39 = vadd.f32 %v942_v28, %v926_v37  ;;  %v606_v40 = vpop.f32.mrb[7].mxu1 }
 0x185   : > { %v753_v42 = vmax.f32 %v745_v36, 0.0  ;;  %v970_v43 = vadd.f32 %v717_v29, %v606_v40 }
 0x186   : > { %762 = vst.msk [vmem:[%s1237_s9 + $0x28] sm:$0xff] %vm370_vm8, %v754_v38  ;;  %v748_v44 = vadd.f32 %v969_v39, %v860_v8 }
 0x187   : > { %761 = vst.msk [vmem:[%s1237_s9 + $0x20] sm:$0xff] %vm370_vm8, %v753_v42  ;;  %v747_v45 = vadd.f32 %v970_v43, %v860_v8 }
 0x188   : > { %v756_v46 = vmax.f32 %v748_v44, 0.0 }
 0x189   : > { %v755_v47 = vmax.f32 %v747_v45, 0.0 }
 0x18a   : > { %764 = vst.msk [vmem:[%s1237_s9 + $0x38] sm:$0xff] %vm370_vm8, %v756_v46 }
 0x18b   : > { %763 = vst.msk [vmem:[%s1237_s9 + $0x30] sm:$0xff] %vm370_vm8, %v755_v47 }
 0x18c PF: > { %s13_s12 = sadd.s32 1, %s997_s12  }
 0x18d   : > { %p10_p4 = scmp.ge.s32.totalorder %s13_s12, 4  }
 0x18f   :  { %12 = sbr.rel (!%p10_p4) target bundleno = 1 (0x1), region = 64 }

// kernel: uplayer_forward.8
= control target key start
LH: loop header
LB: loop body
LE: loop exit
PB: predicated region body
PF: predicated region fallthrough
CT: control target
= control target key end

     0   :  { %s1074_s12 = smov 0   ;;  %s1324_s0 = inlined_call_operand.vmem [shape: f32[2,8,8,12], index: 0, kind: input, shape index: {}]   ;;  %s1325_s1 = inlined_call_operand.vmem [shape: f32[3,36,16], index: 1, kind: input, shape index: {}]   ;;  %s1326_s2 = inlined_call_operand.vmem [shape: f32[1,16], index: 2, kind: input, shape index: {}]   ;;  %s1327_s3 = inlined_call_operand.vmem [shape: f32[2,8,8,16], index: 3, kind: output, shape index: {}]  }
   0x1 LB: > { %s830_s13 = sadd.s32 4294967295, %s1049_s12   ;;  %p834_p0 = scmp.ge.s32.totalorder %s1049_s12, 1  ;;  %s1049_s12 = sphi %s1074_s12, %s13_s12  }
   0x2   : > { %p137_p1 = scmp.lt.s32.totalorder %s1049_s12, 3 }
   0x4   : > { %p138_p2 = pnand %p834_p0, %p137_p1 }
   0x5   : > { %v1051_v0 = vmov (!%p138_p2), 0.0   ;;  %p161_p3 = scmp.lt.s32.totalorder (!%p138_p2), %s830_s13, 1  ;;  %v349_v3 = vld [vmem:[%s1325_s1] sm:$0xff] (!%p138_p2)  ;;  %v350_v4 = vld [vmem:[%s1325_s1 + $0x8] sm:$0xff] (!%p138_p2)  ;;  %v840_v7 = vld [vmem:[%s1325_s1 + $0x30] sm:$0xff] (!%p138_p2)  ;;  %s1052_s24 = smov (!%p138_p2), 24  }
   0x6   : > { %141 = sbr.rel (%p138_p2) target bundleno = 396 (0x18c), region = 32  ;;  %v284_v1 = vrot.slane (!%p138_p2), %v1051_v0, 2  ;;  %v236_v2 = vrot.slane (!%p138_p2), %v1051_v0, 1  ;;  %v994_v5 = vpack.c.bf16 (!%p138_p2), %v350_v4, %v349_v3  ;;  %v839_v6 = vld [vmem:[%s1325_s1 + $0x28] sm:$0xff] (!%p138_p2)  ;;  %v351_v8 = vld [vmem:[%s1325_s1 + $0x10] sm:$0xff] (!%p138_p2)  ;;  %s1053_s25 = smov (!%p138_p2), 12  }
   0x7   : > { %v986_v9 = vpack.c.bf16 (!%p138_p2), %v840_v7, %v839_v6  ;;  %v352_v10 = vld [vmem:[%s1325_s1 + $0x18] sm:$0xff] (!%p138_p2)  ;;  %v842_v13 = vld [vmem:[%s1325_s1 + $0x40] sm:$0xff] (!%p138_p2)  ;;  %vm203_vm0 = vcmask (!%p138_p2), 1040384   ;;  %vm401_vm1 = vcmask (!%p138_p2), 1043456   ;;  %v843_v22 = vld [vmem:[%s1325_s1 + $0x48] sm:$0xf] (!%p138_p2) }
   0x8   : > { %307 = vrot.lane.b32.xlu1 (!%p138_p2), %v284_v1, %s1052_s24  ;;  %259 = vrot.lane.b32.xlu0 (!%p138_p2), %v236_v2, %s1053_s25  ;;  %v841_v11 = vld [vmem:[%s1325_s1 + $0x38] sm:$0xff] (!%p138_p2)  ;;  %v998_v12 = vpack.c.bf16 (!%p138_p2), %v352_v10, %v351_v8  ;;  %v353_v15 = vld [vmem:[%s1325_s1 + $0x20] sm:$0xf] (!%p138_p2)  ;;  %vm235_vm2 = vcmask (!%p138_p2), 1046528   ;;  %vm283_vm3 = vcmask (!%p138_p2), 1045504   ;;  %vm331_vm4 = vcmask (!%p138_p2), 97280  }
   0x9   : > { %995 = vmatprep.subr.bf16.mxu0 (!%p138_p2), %v994_v5  ;;  %987 = vmatprep.subr.bf16.mxu1 (!%p138_p2), %v986_v9  ;;  %v990_v14 = vpack.c.bf16 (!%p138_p2), %v842_v13, %v841_v11  ;;  %v862_v56 = vld [vmem:[%s1325_s1 + $0x50] sm:$0xff] (!%p138_p2)  ;;  %v863_v57 = vld [vmem:[%s1325_s1 + $0x58] sm:$0xff] (!%p138_p2)  ;;  %vm340_vm5 = vcmask (!%p138_p2), 195584   ;;  %vm376_vm6 = vcmask (!%p138_p2), 293888   ;;  %vm766_vm7 = vcmask (!%p138_p2), 130048  }
   0xa   : > { %997 = vmatpush3.bf16.msra.mxu0 (!%p138_p2), %v994_v5  ;;  %989 = vmatpush3.bf16.msra.mxu1 (!%p138_p2), %v986_v9  ;;  %v1183_v2 = vpack.c.bf16 (!%p138_p2), %v863_v57, %v862_v56 }
   0xb   : > { %999 = vmatprep.subr.bf16.mxu0 (!%p138_p2), %v998_v12  ;;  %991 = vmatprep.subr.bf16.mxu1 (!%p138_p2), %v990_v14 }
   0xd   : > { %s1329_s13 = smov (!%p161_p3, %s830_s13), 1 }
   0xe   : > { %s879_s5 = sshll.u32 %s1329_s13, 6  ;;  %1001 = vmatpush3.bf16.msra.mxu0 %v998_v12  ;;  %993 = vmatpush3.bf16.msra.mxu1 %v990_v14 }
   0xf   : > { %s1116_s8 = scalar_lea.vmem %s1324_s0, %s879_s5  ;;  %950 = vmatprep.subr.msk.mxu0 %vm401_vm1, %v353_v15  ;;  %928 = vmatprep.subr.msk.mxu1 %vm401_vm1, %v843_v22  ;;  %s1303_s29 = scalar_lea.vmem %s1327_s3, %s879_s5 }
  0x10   : > { %v172_v16 = vld [vmem:[%s1116_s8 + $0x8] sm:$0xff]  ;;  %v171_v17 = vld [vmem:[%s1116_s8] sm:$0xff]  ;;  %v174_v18 = vld [vmem:[%s1116_s8 + $0x18] sm:$0xff] }
  0x11   : > { %v188_v19 = vrot.slane %v172_v16, 7  ;;  %v187_v20 = vrot.slane %v171_v17, 7  ;;  %v173_v21 = vld [vmem:[%s1116_s8 + $0x10] sm:$0xff]  ;;  %v190_v23 = vrot.slane %v174_v18, 7  ;;  %v176_v33 = vld [vmem:[%s1116_s8 + $0x28] sm:$0xff]  ;;  %v175_v42 = vld [vmem:[%s1116_s8 + $0x20] sm:$0xff] }
  0x12   : > { %v189_v24 = vrot.slane %v173_v21, 7  ;;  %951 = vmatpush3.msk.msra.mxu0 %vm401_vm1, %v353_v15  ;;  %v192_v45 = vrot.slane %v176_v33, 7  ;;  %929 = vmatpush3.msk.msra.mxu1 %vm401_vm1, %v843_v22  ;;  %v191_v52 = vrot.slane %v175_v42, 7  ;;  %v177_v1 = vld [vmem:[%s1116_s8 + $0x30] sm:$0xff]  ;;  %v178_v9 = vld [vmem:[%s1116_s8 + $0x38] sm:$0xff] }
  0x13   : > { %v1129_v25 = vsel %vm203_vm0, 0.0, %v188_v19  ;;  %v213_v26 = vsel %vm203_vm0, %v188_v19, 0.0  ;;  %v1133_v27 = vsel %vm203_vm0, 0.0, %v187_v20  ;;  %v212_v28 = vsel %vm203_vm0, %v187_v20, 0.0  ;;  %1003 = vmatprep.subr.bf16.mxu0 %v1183_v2  ;;  %1010 = vmatprep.subr.bf16.mxu1 %v1183_v2 }
  0x14   : > { %v241_v29 = vrot.slane %v1129_v25, 1  ;;  %v242_v30 = vrot.slane %v213_v26, 1  ;;  %v238_v31 = vrot.slane %v1133_v27, 1  ;;  %v239_v32 = vrot.slane %v212_v28, 1 }
  0x15   : > { %v289_v34 = vrot.slane %v1129_v25, 2  ;;  %v290_v35 = vrot.slane %v213_v26, 2  ;;  %v286_v36 = vrot.slane %v1133_v27, 2  ;;  %v287_v37 = vrot.slane %v212_v28, 2 }
  0x16   : > { %v243_v38 = vsel %vm235_vm2, %v241_v29, %v242_v30  ;;  %v240_v39 = vsel %vm235_vm2, %v238_v31, %v239_v32  ;;  %v1146_v40 = vsel %vm203_vm0, 0.0, %v190_v23  ;;  %v215_v41 = vsel %vm203_vm0, %v190_v23, 0.0 }
  0x17   : > { %263 = vrot.lane.b32.xlu1 %v243_v38, %s1053_s25  ;;  %261 = vrot.lane.b32.xlu0 %v240_v39, %s1053_s25  ;;  %v247_v43 = vrot.slane %v1146_v40, 1  ;;  %v248_v44 = vrot.slane %v215_v41, 1  ;;  %v291_v46 = vsel %vm283_vm3, %v289_v34, %v290_v35  ;;  %v288_v47 = vsel %vm283_vm3, %v286_v36, %v287_v37 }
  0x18   : > { %v1157_v48 = vsel %vm203_vm0, 0.0, %v189_v24  ;;  %v214_v49 = vsel %vm203_vm0, %v189_v24, 0.0  ;;  %v295_v54 = vrot.slane %v1146_v40, 2  ;;  %v296_v55 = vrot.slane %v215_v41, 2 }
  0x19   : > { %v244_v50 = vrot.slane %v1157_v48, 1  ;;  %v245_v51 = vrot.slane %v214_v49, 1  ;;  %v249_v53 = vsel %vm235_vm2, %v247_v43, %v248_v44  ;;  %v292_v59 = vrot.slane %v1157_v48, 2 }
  0x1a   : > { %v293_v60 = vrot.slane %v214_v49, 2  ;;  %v1175_v61 = vsel %vm203_vm0, 0.0, %v192_v45  ;;  %v217_v62 = vsel %vm203_vm0, %v192_v45, 0.0  ;;  %v1179_v63 = vsel %vm203_vm0, 0.0, %v191_v52  ;;  %v864_v45 = vld [vmem:[%s1325_s1 + $0x60] sm:$0xff] }
  0x1b   : > { %311 = vrot.lane.b32.xlu1 %v291_v46, %s1052_s24  ;;  %309 = vrot.lane.b32.xlu0 %v288_v47, %s1052_s24  ;;  %v246_v58 = vsel %vm235_vm2, %v244_v50, %v245_v51  ;;  %v216_v0 = vsel %vm203_vm0, %v191_v52, 0.0  ;;  %v297_v3 = vsel %vm283_vm3, %v295_v54, %v296_v55  ;;  %v253_v4 = vrot.slane %v1175_v61, 1  ;;  %v865_v46 = vld [vmem:[%s1325_s1 + $0x68] sm:$0xff] }
  0x1c   : > { %v294_v5 = vsel %vm283_vm3, %v292_v59, %v293_v60  ;;  %v254_v6 = vrot.slane %v217_v62, 1  ;;  %v250_v7 = vrot.slane %v1179_v63, 1  ;;  %v251_v8 = vrot.slane %v216_v0, 1 }
  0x1d   : > { %v193_v10 = vrot.slane %v177_v1, 7  ;;  %v301_v11 = vrot.slane %v1175_v61, 2  ;;  %v302_v12 = vrot.slane %v217_v62, 2  ;;  %v298_v13 = vrot.slane %v1179_v63, 2 }
  0x1e   : > { %v299_v14 = vrot.slane %v216_v0, 2  ;;  %v194_v15 = vrot.slane %v178_v9, 7  ;;  %v255_v16 = vsel %vm235_vm2, %v253_v4, %v254_v6  ;;  %v252_v17 = vsel %vm235_vm2, %v250_v7, %v251_v8 }
  0x1f   : > { %267 = vrot.lane.b32.xlu1 %v249_v53, %s1053_s25  ;;  %265 = vrot.lane.b32.xlu0 %v246_v58, %s1053_s25  ;;  %v1201_v18 = vsel %vm203_vm0, 0.0, %v193_v10  ;;  %v218_v19 = vsel %vm203_vm0, %v193_v10, 0.0  ;;  %v303_v20 = vsel %vm283_vm3, %v301_v11, %v302_v12  ;;  %v1006_v54 = vpack.c.bf16 %v865_v46, %v864_v45 }
  0x20   : > { %v300_v21 = vsel %vm283_vm3, %v298_v13, %v299_v14  ;;  %v1209_v22 = vsel %vm203_vm0, 0.0, %v194_v15  ;;  %v256_v23 = vrot.slane %v1201_v18, 1  ;;  %v257_v24 = vrot.slane %v218_v19, 1 }
  0x21   : > { %v304_v26 = vrot.slane %v1201_v18, 2  ;;  %v305_v28 = vrot.slane %v218_v19, 2  ;;  %v219_v29 = vsel %vm203_vm0, %v194_v15, 0.0  ;;  %v356_v30 = vrot.slane %v1209_v22, 1 }
  0x22   : > { %v362_v31 = vrot.slane %v1209_v22, 2  ;;  %v258_v32 = vsel %vm235_vm2, %v256_v23, %v257_v24  ;;  %v357_v34 = vrot.slane %v219_v29, 1  ;;  %v363_v35 = vrot.slane %v219_v29, 2 }
  0x23   : > { %315 = vrot.lane.b32.xlu1 %v297_v3, %s1052_s24  ;;  %313 = vrot.lane.b32.xlu0 %v294_v5, %s1052_s24  ;;  %v306_v33 = vsel %vm283_vm3, %v304_v26, %v305_v28  ;;  %v876_v28 = vld [vmem:[%s1326_s2] ss:$0 sm:$0xff] }
  0x24   : > { %v358_v36 = vsel %vm235_vm2, %v356_v30, %v357_v34  ;;  %v364_v37 = vsel %vm283_vm3, %v362_v31, %v363_v35 }
  0x27   : > { %271 = vrot.lane.b32.xlu1 %v255_v16, %s1053_s25  ;;  %269 = vrot.lane.b32.xlu0 %v252_v17, %s1053_s25 }
  0x2b   : > { %319 = vrot.lane.b32.xlu1 %v303_v20, %s1052_s24  ;;  %317 = vrot.lane.b32.xlu0 %v300_v21, %s1052_s24 }
  0x2f   : > { %273 = vrot.lane.b32.xlu0 %v258_v32, %s1053_s25  ;;  %321 = vrot.lane.b32.xlu1 %v306_v33, %s1052_s24 }
  0x33   : > { %359 = vrot.lane.b32.xlu0 %v358_v36, %s1053_s25  ;;  %365 = vrot.lane.b32.xlu1 %v364_v37, %s1052_s24 }
  0x7a   : > { %v308_v38 = vpop.permute.xlu1 %307  ;;  %v260_v39 = vpop.permute.xlu0 %259 }
  0x7b   : > { %v332_v41 = vsel %vm331_vm4, 0.0, %v260_v39 }
  0x7c   : > { %v1228_v42 = vsel %vm340_vm5, %v332_v41, %v308_v38 }
  0x7d   : > { %952 = vmatprep.mubr.msk.f32.mxu0 %vm376_vm6, %v1228_v42 }
  0x89   : > { %v264_v43 = vpop.permute.xlu1 %263  ;;  %v262_v44 = vpop.permute.xlu0 %261 }
  0x8a   : > { %v334_v47 = vsel %vm331_vm4, %v1129_v25, %v264_v43  ;;  %v333_v49 = vsel %vm331_vm4, %v1133_v27, %v262_v44  ;;  %v866_v27 = vld [vmem:[%s1325_s1 + $0x70] sm:$0xf] }
  0x8d   : > { %v312_v50 = vpop.permute.xlu1 %311  ;;  %v310_v51 = vpop.permute.xlu0 %309 }
  0x8e   : > { %v343_v52 = vsel %vm340_vm5, %v334_v47, %v312_v50  ;;  %v342_v53 = vsel %vm340_vm5, %v333_v49, %v310_v51 }
  0x8f   : > { %930 = vmatprep.mubr.msk.f32.mxu1 %vm376_vm6, %v342_v53  ;;  %953 = vmatmul.mubr.msk.f32.vlgmr.msra.gmra.mrb[0].mxu0 %vm376_vm6, %v342_v53 }
  0x90   : > { %931 = vmatmul.mubr.msk.f32.vlgmr.msra.gmra.mrb[0].mxu1 %vm376_vm6, %v343_v52  ;;  %955 = vmatprep.mubr.msk.f32.mxu0 %vm376_vm6, %v343_v52 }
  0x91   : > { %v268_v55 = vpop.permute.xlu1 %267  ;;  %v266_v25 = vpop.permute.xlu0 %265  ;;  %1005 = vmatpush3.bf16.msra.mxu0 %v1183_v2  ;;  %1013 = vmatpush3.bf16.msra.mxu1 %v1183_v2 }
  0x92   : > { %1007 = vmatprep.subr.bf16.mxu0 %v1006_v54  ;;  %1011 = vmatprep.subr.bf16.mxu1 %v1006_v54  ;;  %v336_v56 = vsel %vm331_vm4, %v1146_v40, %v268_v55  ;;  %v335_v57 = vsel %vm331_vm4, %v1157_v48, %v266_v25 }
  0x95   : > { %v316_v58 = vpop.permute.xlu1 %315  ;;  %v314_v59 = vpop.permute.xlu0 %313  ;;  %1009 = vmatpush3.bf16.msra.mxu0 %v1006_v54  ;;  %1014 = vmatpush3.bf16.msra.mxu1 %v1006_v54 }
  0x96   : > { %v345_v60 = vsel %vm340_vm5, %v336_v56, %v316_v58  ;;  %v344_v62 = vsel %vm340_vm5, %v335_v57, %v314_v59  ;;  %972 = vmatprep.subr.msk.mxu0 %vm401_vm1, %v866_v27  ;;  %1012 = vmatprep.subr.msk.mxu1 %vm401_vm1, %v866_v27 }
  0x97   : > { %933 = vmatprep.mubr.msk.f32.mxu1 %vm376_vm6, %v344_v62  ;;  %956 = vmatmul.mubr.msk.f32.gmra.mrb[2].mxu0 %vm376_vm6, %v344_v62 }
  0x98   : > { %934 = vmatmul.mubr.msk.f32.gmra.mrb[2].mxu1 %vm376_vm6, %v345_v60  ;;  %958 = vmatprep.mubr.msk.f32.mxu0 %vm376_vm6, %v345_v60 }
  0x99   : > { %v272_v40 = vpop.permute.xlu1 %271  ;;  %v270_v48 = vpop.permute.xlu0 %269  ;;  %973 = vmatpush3.msk.msra.mxu0 %vm401_vm1, %v866_v27  ;;  %1015 = vmatpush3.msk.msra.mxu1 %vm401_vm1, %v866_v27 }
  0x9a   : > { %v338_v0 = vsel %vm331_vm4, %v1175_v61, %v272_v40  ;;  %v337_v1 = vsel %vm331_vm4, %v1179_v63, %v270_v48 }
  0x9d   : > { %v320_v2 = vpop.permute.xlu1 %319  ;;  %v318_v3 = vpop.permute.xlu0 %317 }
  0x9e   : > { %v347_v4 = vsel %vm340_vm5, %v338_v0, %v320_v2  ;;  %v346_v5 = vsel %vm340_vm5, %v337_v1, %v318_v3 }
  0x9f   : > { %936 = vmatprep.mubr.msk.f32.mxu1 %vm376_vm6, %v346_v5  ;;  %959 = vmatmul.mubr.msk.f32.gmra.mrb[4].mxu0 %vm376_vm6, %v346_v5 }
  0xa0   : > { %937 = vmatmul.mubr.msk.f32.gmra.mrb[4].mxu1 %vm376_vm6, %v347_v4  ;;  %961 = vmatprep.mubr.msk.f32.mxu0 %vm376_vm6, %v347_v4 }
  0xa1   : > { %v274_v6 = vpop.permute.xlu0 %273  ;;  %v322_v7 = vpop.permute.xlu1 %321 }
  0xa2   : > { %v339_v61 = vsel %vm331_vm4, %v1201_v18, %v274_v6 }
  0xa3   : > { %v348_v63 = vsel %vm340_vm5, %v339_v61, %v322_v7 }
  0xa4   : > { %939 = vmatprep.mubr.msk.f32.mxu1 %vm376_vm6, %v348_v63  ;;  %962 = vmatmul.mubr.msk.f32.gmra.mrb[6].mxu0 %vm376_vm6, %v348_v63 }
  0xa5   : > { %974 = vmatprep.mubr.msk.f32.mxu0 %vm376_vm6, %v343_v52  ;;  %v360_v8 = vpop.permute.xlu0 %359  ;;  %v366_v9 = vpop.permute.xlu1 %365 }
  0xa6   : > { %v368_v10 = vsel %vm331_vm4, %v1209_v22, %v360_v8 }
  0xa7   : > { %v369_v11 = vsel %vm340_vm5, %v368_v10, %v366_v9 }
  0xa8   : > { %940 = vmatmul.mubr.msk.f32.gmra.mrb[6].mxu1 %vm376_vm6, %v369_v11  ;;  %975 = vmatmul.mubr.msk.f32.vlgmr.msra.gmra.mrb[0].mxu0 %vm376_vm6, %v344_v62 }
  0xa9   : > { %977 = vmatprep.mubr.msk.f32.mxu0 %vm376_vm6, %v345_v60  ;;  %980 = vmatprep.mubr.msk.f32.mxu1 %vm376_vm6, %v347_v4 }
  0xac   : > { %978 = vmatmul.mubr.msk.f32.gmra.mrb[2].mxu0 %vm376_vm6, %v346_v5  ;;  %981 = vmatmul.mubr.msk.f32.vlgmr.msra.gmra.mrb[8].mxu1 %vm376_vm6, %v348_v63 }
  0xad   : > { %983 = vmatprep.mubr.msk.f32.mxu1 %vm376_vm6, %v369_v11 }
  0xb0   : > { %984 = vmatmul.mubr.msk.f32.gmra.mrb[10].mxu1 %vm376_vm6, %v1228_v42 }
 0x163   : > { %v932_v12 = vpop.f32.mrb[0].mxu1 }
 0x164   : > { %v471_v13 = vpop.f32.mrb[1].mxu1 }
 0x16b   : > { %v935_v14 = vpop.f32.mrb[2].mxu1 }
 0x16c   : > { %v481_v15 = vpop.f32.mrb[3].mxu1 }
 0x172   : > { %v960_v16 = vpop.f32.mrb[4].mxu0 }
 0x173   : > { %v938_v17 = vpop.f32.mrb[4].mxu1  ;;  %v602_v18 = vpop.f32.mrb[5].mxu0 }
 0x174   : > { %v608_v19 = vadd.f32 %v960_v16, %v938_v17  ;;  %v491_v20 = vpop.f32.mrb[5].mxu1 }
 0x175   : > { %v603_v21 = vadd.f32 %v602_v18, %v491_v20 }
 0x177   : > { %v963_v22 = vpop.f32.mrb[6].mxu0 }
 0x178   : > { %v612_v23 = vpop.f32.mrb[7].mxu0 }
 0x17b   : > { %v941_v24 = vpop.f32.mrb[6].mxu1  ;;  %v976_v26 = vpop.f32.mrb[0].mxu0 }
 0x17c   : > { %v618_v29 = vadd.f32 %v963_v22, %v941_v24  ;;  %v1016_v30 = vadd.f32 %v976_v26, %v932_v12  ;;  %v501_v31 = vpop.f32.mrb[7].mxu1  ;;  %v696_v32 = vpop.f32.mrb[1].mxu0 }
 0x17d   : > { %v613_v33 = vadd.f32 %v612_v23, %v501_v31  ;;  %v1017_v34 = vadd.f32 %v696_v32, %v471_v13 }
 0x17e   : > { %v751_v35 = vadd.f32 %v1016_v30, %v876_v28 }
 0x17f   : > { %v750_v36 = vadd.f32 %v1017_v34, %v876_v28  ;;  %v979_v37 = vpop.f32.mrb[2].mxu0  ;;  %v982_v38 = vpop.f32.mrb[8].mxu1 }
 0x180   : > { %v759_v39 = vmax.f32 %v751_v35, 0.0  ;;  %v1018_v41 = vadd.f32 %v979_v37, %v935_v14  ;;  %v740_v42 = vadd.f32 %v982_v38, %v608_v19  ;;  %v706_v43 = vpop.f32.mrb[3].mxu0  ;;  %v716_v44 = vpop.f32.mrb[9].mxu1 }
 0x181   : > { %v758_v45 = vmax.f32 %v750_v36, 0.0  ;;  %v1019_v46 = vadd.f32 %v706_v43, %v481_v15  ;;  %v739_v47 = vadd.f32 %v716_v44, %v603_v21 }
 0x182   : > { %768 = vst.msk [vmem:[%s1303_s29 + $0x8] sm:$0xff] %vm766_vm7, %v759_v39  ;;  %v753_v49 = vadd.f32 %v1018_v41, %v876_v28  ;;  %v755_v50 = vadd.f32 %v876_v28, %v740_v42 }
 0x183   : > { %767 = vst.msk [vmem:[%s1303_s29] sm:$0xff] %vm766_vm7, %v758_v45  ;;  %v752_v51 = vadd.f32 %v1019_v46, %v876_v28  ;;  %v754_v52 = vadd.f32 %v876_v28, %v739_v47  ;;  %v985_v53 = vpop.f32.mrb[10].mxu1 }
 0x184   : > { %v761_v54 = vmax.f32 %v753_v49, 0.0  ;;  %v763_v55 = vmax.f32 %v755_v50, 0.0  ;;  %v742_v25 = vadd.f32 %v985_v53, %v618_v29  ;;  %v726_v27 = vpop.f32.mrb[11].mxu1 }
 0x185   : > { %v760_v56 = vmax.f32 %v752_v51, 0.0  ;;  %v762_v57 = vmax.f32 %v754_v52, 0.0  ;;  %v741_v58 = vadd.f32 %v726_v27, %v613_v33 }
 0x186   : > { %770 = vst.msk [vmem:[%s1303_s29 + $0x18] sm:$0xff] %vm766_vm7, %v761_v54  ;;  %772 = vst.msk [vmem:[%s1303_s29 + $0x28] sm:$0xff] %vm766_vm7, %v763_v55  ;;  %v757_v59 = vadd.f32 %v876_v28, %v742_v25 }
 0x187   : > { %769 = vst.msk [vmem:[%s1303_s29 + $0x10] sm:$0xff] %vm766_vm7, %v760_v56  ;;  %771 = vst.msk [vmem:[%s1303_s29 + $0x20] sm:$0xff] %vm766_vm7, %v762_v57  ;;  %v756_v60 = vadd.f32 %v876_v28, %v741_v58 }
 0x188   : > { %v765_v62 = vmax.f32 %v757_v59, 0.0 }
 0x189   : > { %v764_v40 = vmax.f32 %v756_v60, 0.0 }
 0x18a   : > { %774 = vst.msk [vmem:[%s1303_s29 + $0x38] sm:$0xff] %vm766_vm7, %v765_v62 }
 0x18b   : > { %773 = vst.msk [vmem:[%s1303_s29 + $0x30] sm:$0xff] %vm766_vm7, %v764_v40 }
 0x18c PF: > { %s13_s12 = sadd.s32 1, %s1049_s12  }
 0x18d   : > { %p10_p4 = scmp.ge.s32.totalorder %s13_s12, 4  }
 0x18f   :  { %12 = sbr.rel (!%p10_p4) target bundleno = 1 (0x1), region = 64 }

// kernel: uplayer_forward.6
= control target key start
LH: loop header
LB: loop body
LE: loop exit
PB: predicated region body
PF: predicated region fallthrough
CT: control target
= control target key end

     0   :  { %s1023_s12 = smov 0   ;;  %s1258_s0 = inlined_call_operand.vmem [shape: f32[2,8,8,4], index: 0, kind: input, shape index: {}]   ;;  %s1259_s1 = inlined_call_operand.vmem [shape: f32[3,12,4], index: 1, kind: input, shape index: {}]   ;;  %s1260_s2 = inlined_call_operand.vmem [shape: f32[1,4], index: 2, kind: input, shape index: {}]   ;;  %s1261_s3 = inlined_call_operand.vmem [shape: f32[2,8,8,4], index: 3, kind: output, shape index: {}]  }
   0x1 LB: > { %s820_s13 = sadd.s32 4294967295, %s997_s12   ;;  %p824_p0 = scmp.ge.s32.totalorder %s997_s12, 1  ;;  %s997_s12 = sphi %s1023_s12, %s13_s12  }
   0x2   : > { %p137_p1 = scmp.lt.s32.totalorder %s997_s12, 3 }
   0x4   : > { %p138_p2 = pnand %p824_p0, %p137_p1 }
   0x5   : > { %v999_v0 = vmov (!%p138_p2), 0.0   ;;  %p161_p3 = scmp.lt.s32.totalorder (!%p138_p2), %s820_s13, 1  ;;  %v349_v3 = vld [vmem:[%s1259_s1] sm:$0xff] (!%p138_p2)  ;;  %v350_v4 = vld [vmem:[%s1259_s1 + $0x8] sm:$0xf] (!%p138_p2)  ;;  %vm395_vm0 = vcmask (!%p138_p2), 1043456  }
   0x6   : > { %141 = sbr.rel (%p138_p2) target bundleno = 396 (0x18c), region = 32  ;;  %v284_v1 = vrot.slane (!%p138_p2), %v999_v0, 2  ;;  %v236_v2 = vrot.slane (!%p138_p2), %v999_v0, 1  ;;  %v829_v5 = vld [vmem:[%s1259_s1 + $0x10] sm:$0xff] (!%p138_p2)  ;;  %s1000_s20 = smov (!%p138_p2), 8   ;;  %vm1002_vm1 = vmmov (!%p138_p2), 1   ;;  %v1048_v7 = vpack.c.bf16 (!%p138_p2), %v350_v4, %v349_v3 }
   0x7   : > { %s1001_s21 = smov (!%p138_p2), 4   ;;  %vm1044_vm2 = vmpackc.low (!%p138_p2), %vm395_vm0, %vm1002_vm1  ;;  %v830_v8 = vld [vmem:[%s1259_s1 + $0x18] sm:$0xf] (!%p138_p2)  ;;  %vm203_vm3 = vcmask (!%p138_p2), 1040384   ;;  %vm235_vm4 = vcmask (!%p138_p2), 1046528   ;;  %vm283_vm5 = vcmask (!%p138_p2), 1045504  }
   0x8   : > { %307 = vrot.lane.b32.xlu1 (!%p138_p2), %v284_v1, %s1000_s20  ;;  %259 = vrot.lane.b32.xlu0 (!%p138_p2), %v236_v2, %s1001_s21  ;;  %v943_v9 = vpack.c.bf16 (!%p138_p2), %v830_v8, %v829_v5  ;;  %v849_v49 = vld [vmem:[%s1259_s1 + $0x20] sm:$0xff] (!%p138_p2)  ;;  %v850_v50 = vld [vmem:[%s1259_s1 + $0x28] sm:$0xf] (!%p138_p2)  ;;  %vm331_vm6 = vcmask (!%p138_p2), 31744   ;;  %vm340_vm7 = vcmask (!%p138_p2), 64512   ;;  %vm370_vm8 = vcmask (!%p138_p2), 97280  }
   0x9   : > { %951 = vmatprep.subr.msk.bf16.mxu0 (!%p138_p2), %vm1044_vm2, %v1048_v7  ;;  %v1129_v59 = vpack.c.bf16 (!%p138_p2), %v850_v50, %v849_v49 }
   0xa   : > { %945 = vmatprep.subr.msk.bf16.mxu1 (!%p138_p2), %vm1044_vm2, %v943_v9  ;;  %954 = vmatpush3.bf16.msk.msra.mxu0 (!%p138_p2), %vm1044_vm2, %v1048_v7 }
   0xb   : > { %948 = vmatpush3.bf16.msk.msra.mxu1 (!%p138_p2), %vm1044_vm2, %v943_v9  ;;  %957 = vmatprep.subr.msk.bf16.mxu0 (!%p138_p2), %vm1044_vm2, %v1129_v59 }
   0xc   : > { %961 = vmatprep.subr.msk.bf16.mxu1 (!%p138_p2), %vm1044_vm2, %v1048_v7 }
   0xd   : > { %s1265_s13 = smov (!%p161_p3, %s820_s13), 1 }
   0xe   : > { %s863_s24 = sshll.u32 %s1265_s13, 6 }
   0xf   : > { %s1062_s27 = scalar_lea.vmem %s1258_s0, %s863_s24  ;;  %s1237_s9 = scalar_lea.vmem %s1261_s3, %s863_s24 }
  0x10   : > { %v172_v10 = vld [vmem:[%s1062_s27 + $0x8] sm:$0xff]  ;;  %v171_v11 = vld [vmem:[%s1062_s27] sm:$0xff]  ;;  %v174_v12 = vld [vmem:[%s1062_s27 + $0x18] sm:$0xff] }
  0x11   : > { %v188_v13 = vrot.slane %v172_v10, 7  ;;  %v187_v14 = vrot.slane %v171_v11, 7  ;;  %v173_v15 = vld [vmem:[%s1062_s27 + $0x10] sm:$0xff]  ;;  %v190_v16 = vrot.slane %v174_v12, 7  ;;  %v176_v26 = vld [vmem:[%s1062_s27 + $0x28] sm:$0xff]  ;;  %v175_v35 = vld [vmem:[%s1062_s27 + $0x20] sm:$0xff] }
  0x12   : > { %v189_v17 = vrot.slane %v173_v15, 7  ;;  %v192_v38 = vrot.slane %v176_v26, 7  ;;  %v191_v45 = vrot.slane %v175_v35, 7  ;;  %v177_v58 = vld [vmem:[%s1062_s27 + $0x30] sm:$0xff]  ;;  %v178_v2 = vld [vmem:[%s1062_s27 + $0x38] sm:$0xff] }
  0x13   : > { %v1079_v18 = vsel %vm203_vm3, 0.0, %v188_v13  ;;  %v213_v19 = vsel %vm203_vm3, %v188_v13, 0.0  ;;  %v1083_v20 = vsel %vm203_vm3, 0.0, %v187_v14  ;;  %v212_v21 = vsel %vm203_vm3, %v187_v14, 0.0 }
  0x14   : > { %v241_v22 = vrot.slane %v1079_v18, 1  ;;  %v242_v23 = vrot.slane %v213_v19, 1  ;;  %v238_v24 = vrot.slane %v1083_v20, 1  ;;  %v239_v25 = vrot.slane %v212_v21, 1 }
  0x15   : > { %v289_v27 = vrot.slane %v1079_v18, 2  ;;  %v290_v28 = vrot.slane %v213_v19, 2  ;;  %v286_v29 = vrot.slane %v1083_v20, 2  ;;  %v287_v30 = vrot.slane %v212_v21, 2 }
  0x16   : > { %v243_v31 = vsel %vm235_vm4, %v241_v22, %v242_v23  ;;  %v240_v32 = vsel %vm235_vm4, %v238_v24, %v239_v25  ;;  %v1094_v33 = vsel %vm203_vm3, 0.0, %v190_v16  ;;  %v215_v34 = vsel %vm203_vm3, %v190_v16, 0.0 }
  0x17   : > { %263 = vrot.lane.b32.xlu1 %v243_v31, %s1001_s21  ;;  %261 = vrot.lane.b32.xlu0 %v240_v32, %s1001_s21  ;;  %v247_v36 = vrot.slane %v1094_v33, 1  ;;  %v248_v37 = vrot.slane %v215_v34, 1  ;;  %v291_v39 = vsel %vm283_vm5, %v289_v27, %v290_v28  ;;  %v288_v40 = vsel %vm283_vm5, %v286_v29, %v287_v30 }
  0x18   : > { %v1104_v41 = vsel %vm203_vm3, 0.0, %v189_v17  ;;  %v214_v42 = vsel %vm203_vm3, %v189_v17, 0.0  ;;  %v295_v47 = vrot.slane %v1094_v33, 2  ;;  %v296_v48 = vrot.slane %v215_v34, 2 }
  0x19   : > { %v244_v43 = vrot.slane %v1104_v41, 1  ;;  %v245_v44 = vrot.slane %v214_v42, 1  ;;  %v249_v46 = vsel %vm235_vm4, %v247_v36, %v248_v37  ;;  %v292_v52 = vrot.slane %v1104_v41, 2 }
  0x1a   : > { %v293_v53 = vrot.slane %v214_v42, 2  ;;  %v1121_v54 = vsel %vm203_vm3, 0.0, %v192_v38  ;;  %v217_v55 = vsel %vm203_vm3, %v192_v38, 0.0  ;;  %v1125_v56 = vsel %vm203_vm3, 0.0, %v191_v45 }
  0x1b   : > { %311 = vrot.lane.b32.xlu1 %v291_v39, %s1000_s20  ;;  %309 = vrot.lane.b32.xlu0 %v288_v40, %s1000_s20  ;;  %v246_v51 = vsel %vm235_vm4, %v244_v43, %v245_v44  ;;  %v216_v57 = vsel %vm203_vm3, %v191_v45, 0.0  ;;  %v297_v60 = vsel %vm283_vm5, %v295_v47, %v296_v48  ;;  %v253_v61 = vrot.slane %v1121_v54, 1 }
  0x1c   : > { %v294_v62 = vsel %vm283_vm5, %v292_v52, %v293_v53  ;;  %v254_v63 = vrot.slane %v217_v55, 1  ;;  %v250_v0 = vrot.slane %v1125_v56, 1  ;;  %v251_v1 = vrot.slane %v216_v57, 1 }
  0x1d   : > { %v193_v3 = vrot.slane %v177_v58, 7  ;;  %v301_v4 = vrot.slane %v1121_v54, 2  ;;  %v302_v5 = vrot.slane %v217_v55, 2  ;;  %v298_v8 = vrot.slane %v1125_v56, 2 }
  0x1e   : > { %v299_v9 = vrot.slane %v216_v57, 2  ;;  %v194_v10 = vrot.slane %v178_v2, 7  ;;  %v255_v11 = vsel %vm235_vm4, %v253_v61, %v254_v63  ;;  %v252_v12 = vsel %vm235_vm4, %v250_v0, %v251_v1 }
  0x1f   : > { %267 = vrot.lane.b32.xlu1 %v249_v46, %s1001_s21  ;;  %265 = vrot.lane.b32.xlu0 %v246_v51, %s1001_s21  ;;  %v1148_v13 = vsel %vm203_vm3, 0.0, %v193_v3  ;;  %v218_v14 = vsel %vm203_vm3, %v193_v3, 0.0  ;;  %v303_v15 = vsel %vm283_vm5, %v301_v4, %v302_v5 }
  0x20   : > { %v300_v16 = vsel %vm283_vm5, %v298_v8, %v299_v9  ;;  %v1156_v17 = vsel %vm203_vm3, 0.0, %v194_v10  ;;  %v256_v19 = vrot.slane %v1148_v13, 1  ;;  %v257_v21 = vrot.slane %v218_v14, 1  ;;  %v860_v8 = vld [vmem:[%s1260_s2] ss:$0 sm:$0xff] }
  0x21   : > { %v304_v22 = vrot.slane %v1148_v13, 2  ;;  %v305_v23 = vrot.slane %v218_v14, 2  ;;  %v219_v24 = vsel %vm203_vm3, %v194_v10, 0.0  ;;  %v353_v25 = vrot.slane %v1156_v17, 1 }
  0x22   : > { %v359_v26 = vrot.slane %v1156_v17, 2  ;;  %v258_v27 = vsel %vm235_vm4, %v256_v19, %v257_v21  ;;  %v354_v29 = vrot.slane %v219_v24, 1  ;;  %v360_v30 = vrot.slane %v219_v24, 2 }
  0x23   : > { %315 = vrot.lane.b32.xlu1 %v297_v60, %s1000_s20  ;;  %313 = vrot.lane.b32.xlu0 %v294_v62, %s1000_s20  ;;  %v306_v28 = vsel %vm283_vm5, %v304_v22, %v305_v23 }
  0x24   : > { %v355_v31 = vsel %vm235_vm4, %v353_v25, %v354_v29  ;;  %v361_v32 = vsel %vm283_vm5, %v359_v26, %v360_v30 }
  0x27   : > { %271 = vrot.lane.b32.xlu1 %v255_v11, %s1001_s21  ;;  %269 = vrot.lane.b32.xlu0 %v252_v12, %s1001_s21 }
  0x2b   : > { %319 = vrot.lane.b32.xlu1 %v303_v15, %s1000_s20  ;;  %317 = vrot.lane.b32.xlu0 %v300_v16, %s1000_s20 }
  0x2f   : > { %273 = vrot.lane.b32.xlu0 %v258_v27, %s1001_s21  ;;  %321 = vrot.lane.b32.xlu1 %v306_v28, %s1000_s20 }
  0x33   : > { %356 = vrot.lane.b32.xlu0 %v355_v31, %s1001_s21  ;;  %362 = vrot.lane.b32.xlu1 %v361_v32, %s1000_s20 }
  0x7a   : > { %v308_v34 = vpop.permute.xlu1 %307  ;;  %v260_v35 = vpop.permute.xlu0 %259 }
  0x7b   : > { %v332_v36 = vsel %vm331_vm6, 0.0, %v260_v35 }
  0x7c   : > { %v341_v37 = vsel %vm340_vm7, %v332_v36, %v308_v34 }
  0x7d   : > { %915 = vmatprep.mubr.msk.f32.mxu0 %vm370_vm8, %v341_v37 }
  0x89   : > { %v264_v38 = vpop.permute.xlu1 %263  ;;  %v262_v39 = vpop.permute.xlu0 %261 }
  0x8a   : > { %v334_v40 = vsel %vm331_vm6, %v1079_v18, %v264_v38  ;;  %v333_v42 = vsel %vm331_vm6, %v1083_v20, %v262_v39 }
  0x8d   : > { %v312_v43 = vpop.permute.xlu1 %311  ;;  %v310_v44 = vpop.permute.xlu0 %309 }
  0x8e   : > { %v343_v45 = vsel %vm340_vm7, %v334_v40, %v312_v43  ;;  %v342_v46 = vsel %vm340_vm7, %v333_v42, %v310_v44 }
  0x8f   : > { %899 = vmatprep.mubr.msk.f32.mxu1 %vm370_vm8, %v342_v46  ;;  %916 = vmatmul.mubr.msk.f32.vlgmr.msra.gmra.mrb[0].mxu0 %vm370_vm8, %v342_v46 }
  0x90   : > { %900 = vmatmul.mubr.msk.f32.vlgmr.msra.gmra.mrb[0].mxu1 %vm370_vm8, %v343_v45  ;;  %918 = vmatprep.mubr.msk.f32.mxu0 %vm370_vm8, %v343_v45 }
  0x91   : > { %v268_v47 = vpop.permute.xlu1 %267  ;;  %v266_v48 = vpop.permute.xlu0 %265  ;;  %960 = vmatpush3.bf16.msk.msra.mxu0 %vm1044_vm2, %v1129_v59  ;;  %962 = vmatpush3.bf16.msk.msra.mxu1 %vm1044_vm2, %v1048_v7 }
  0x92   : > { %v336_v18 = vsel %vm331_vm6, %v1094_v33, %v268_v47  ;;  %v335_v20 = vsel %vm331_vm6, %v1104_v41, %v266_v48 }
  0x95   : > { %v316_v49 = vpop.permute.xlu1 %315  ;;  %v314_v50 = vpop.permute.xlu0 %313 }
  0x96   : > { %v345_v51 = vsel %vm340_vm7, %v336_v18, %v316_v49  ;;  %v344_v52 = vsel %vm340_vm7, %v335_v20, %v314_v50 }
  0x97   : > { %902 = vmatprep.mubr.msk.f32.mxu1 %vm370_vm8, %v344_v52  ;;  %919 = vmatmul.mubr.msk.f32.gmra.mrb[2].mxu0 %vm370_vm8, %v344_v52 }
  0x98   : > { %903 = vmatmul.mubr.msk.f32.gmra.mrb[2].mxu1 %vm370_vm8, %v345_v51  ;;  %931 = vmatprep.mubr.msk.f32.mxu0 %vm370_vm8, %v343_v45 }
  0x99   : > { %v272_v6 = vpop.permute.xlu1 %271  ;;  %v270_v7 = vpop.permute.xlu0 %269 }
  0x9a   : > { %v338_v33 = vsel %vm331_vm6, %v1121_v54, %v272_v6  ;;  %v337_v41 = vsel %vm331_vm6, %v1125_v56, %v270_v7 }
  0x9b   : > { %932 = vmatmul.mubr.msk.f32.vlgmr.msra.gmra.mrb[0].mxu0 %vm370_vm8, %v344_v52 }
  0x9c   : > { %934 = vmatprep.mubr.msk.f32.mxu0 %vm370_vm8, %v345_v51 }
  0x9d   : > { %v320_v53 = vpop.permute.xlu1 %319  ;;  %v318_v55 = vpop.permute.xlu0 %317 }
  0x9e   : > { %v347_v57 = vsel %vm340_vm7, %v338_v33, %v320_v53  ;;  %v346_v58 = vsel %vm340_vm7, %v337_v41, %v318_v55 }
  0x9f   : > { %905 = vmatprep.mubr.msk.f32.mxu1 %vm370_vm8, %v346_v58  ;;  %935 = vmatmul.mubr.msk.f32.gmra.mrb[2].mxu0 %vm370_vm8, %v346_v58 }
  0xa0   : > { %906 = vmatmul.mubr.msk.f32.gmra.mrb[4].mxu1 %vm370_vm8, %v347_v57  ;;  %937 = vmatprep.mubr.msk.f32.mxu0 %vm370_vm8, %v347_v57 }
  0xa1   : > { %v274_v59 = vpop.permute.xlu0 %273  ;;  %v322_v60 = vpop.permute.xlu1 %321 }
  0xa2   : > { %v339_v54 = vsel %vm331_vm6, %v1148_v13, %v274_v59 }
  0xa3   : > { %v348_v56 = vsel %vm340_vm7, %v339_v54, %v322_v60 }
  0xa4   : > { %908 = vmatprep.mubr.msk.f32.mxu1 %vm370_vm8, %v348_v56  ;;  %938 = vmatmul.mubr.msk.f32.gmra.mrb[4].mxu0 %vm370_vm8, %v348_v56 }
  0xa5   : > { %v357_v61 = vpop.permute.xlu0 %356  ;;  %v363_v62 = vpop.permute.xlu1 %362 }
  0xa6   : > { %v365_v63 = vsel %vm331_vm6, %v1156_v17, %v357_v61 }
  0xa7   : > { %v366_v0 = vsel %vm340_vm7, %v365_v63, %v363_v62 }
  0xa8   : > { %909 = vmatmul.mubr.msk.f32.gmra.mrb[6].mxu1 %vm370_vm8, %v366_v0  ;;  %940 = vmatprep.mubr.msk.f32.mxu0 %vm370_vm8, %v366_v0 }
  0xa9   : > { %921 = vmatprep.mubr.msk.f32.mxu1 %vm370_vm8, %v345_v51  ;;  %941 = vmatmul.mubr.msk.f32.gmra.mrb[6].mxu0 %vm370_vm8, %v341_v37 }
  0xac   : > { %922 = vmatmul.mubr.msk.f32.vlgmr.msra.gmra.mrb[4].mxu1 %vm370_vm8, %v346_v58 }
  0xad   : > { %924 = vmatprep.mubr.msk.f32.mxu1 %vm370_vm8, %v347_v57 }
  0xb0   : > { %925 = vmatmul.mubr.msk.f32.gmra.mrb[6].mxu1 %vm370_vm8, %v348_v56 }
 0x163   : > { %v901_v1 = vpop.f32.mrb[0].mxu1 }
 0x164   : > { %v465_v2 = vpop.f32.mrb[1].mxu1 }
 0x16b   : > { %v904_v3 = vpop.f32.mrb[2].mxu1 }
 0x16c   : > { %v475_v4 = vpop.f32.mrb[3].mxu1 }
 0x16e   : > { %v933_v5 = vpop.f32.mrb[0].mxu0 }
 0x16f   : > { %v963_v9 = vadd.f32 %v933_v5, %v901_v1  ;;  %v687_v10 = vpop.f32.mrb[1].mxu0 }
 0x170   : > { %v964_v11 = vadd.f32 %v687_v10, %v465_v2 }
 0x171   : > { %v742_v12 = vadd.f32 %v963_v9, %v860_v8 }
 0x172   : > { %v741_v13 = vadd.f32 %v964_v11, %v860_v8  ;;  %v936_v14 = vpop.f32.mrb[2].mxu0 }
 0x173   : > { %v750_v15 = vmax.f32 %v742_v12, 0.0  ;;  %v965_v16 = vadd.f32 %v936_v14, %v904_v3  ;;  %v697_v17 = vpop.f32.mrb[3].mxu0 }
 0x174   : > { %v749_v19 = vmax.f32 %v741_v13, 0.0  ;;  %v966_v21 = vadd.f32 %v697_v17, %v475_v4 }
 0x175   : > { %758 = vst.msk [vmem:[%s1237_s9 + $0x8] sm:$0xff] %vm331_vm6, %v750_v15  ;;  %v744_v22 = vadd.f32 %v965_v16, %v860_v8 }
 0x176   : > { %757 = vst.msk [vmem:[%s1237_s9] sm:$0xff] %vm331_vm6, %v749_v19  ;;  %v743_v23 = vadd.f32 %v966_v21, %v860_v8 }
 0x177   : > { %v752_v24 = vmax.f32 %v744_v22, 0.0  ;;  %v939_v25 = vpop.f32.mrb[4].mxu0 }
 0x178   : > { %v751_v26 = vmax.f32 %v743_v23, 0.0  ;;  %v707_v27 = vpop.f32.mrb[5].mxu0 }
 0x179   : > { %760 = vst.msk [vmem:[%s1237_s9 + $0x18] sm:$0xff] %vm331_vm6, %v752_v24 }
 0x17a   : > { %759 = vst.msk [vmem:[%s1237_s9 + $0x10] sm:$0xff] %vm331_vm6, %v751_v26 }
 0x17c   : > { %v942_v28 = vpop.f32.mrb[6].mxu0 }
 0x17d   : > { %v717_v29 = vpop.f32.mrb[7].mxu0 }
 0x17f   : > { %v923_v30 = vpop.f32.mrb[4].mxu1 }
 0x180   : > { %v967_v31 = vadd.f32 %v939_v25, %v923_v30  ;;  %v596_v32 = vpop.f32.mrb[5].mxu1 }
 0x181   : > { %v968_v34 = vadd.f32 %v707_v27, %v596_v32 }
 0x182   : > { %v746_v35 = vadd.f32 %v967_v31, %v860_v8 }
 0x183   : > { %v745_v36 = vadd.f32 %v968_v34, %v860_v8  ;;  %v926_v37 = vpop.f32.mrb[6].mxu1 }
 0x184   : > { %v754_v38 = vmax.f32 %v746_v35, 0.0  ;;  %v969_v39 = vadd.f32 %v942_v28, %v926_v37  ;;  %v606_v40 = vpop.f32.mrb[7].mxu1 }
 0x185   : > { %v753_v42 = vmax.f32 %v745_v36, 0.0  ;;  %v970_v43 = vadd.f32 %v717_v29, %v606_v40 }
 0x186   : > { %762 = vst.msk [vmem:[%s1237_s9 + $0x28] sm:$0xff] %vm331_vm6, %v754_v38  ;;  %v748_v44 = vadd.f32 %v969_v39, %v860_v8 }
 0x187   : > { %761 = vst.msk [vmem:[%s1237_s9 + $0x20] sm:$0xff] %vm331_vm6, %v753_v42  ;;  %v747_v45 = vadd.f32 %v970_v43, %v860_v8 }
 0x188   : > { %v756_v46 = vmax.f32 %v748_v44, 0.0 }
 0x189   : > { %v755_v47 = vmax.f32 %v747_v45, 0.0 }
 0x18a   : > { %764 = vst.msk [vmem:[%s1237_s9 + $0x38] sm:$0xff] %vm331_vm6, %v756_v46 }
 0x18b   : > { %763 = vst.msk [vmem:[%s1237_s9 + $0x30] sm:$0xff] %vm331_vm6, %v755_v47 }
 0x18c PF: > { %s13_s12 = sadd.s32 1, %s997_s12  }
 0x18d   : > { %p10_p4 = scmp.ge.s32.totalorder %s13_s12, 4  }
 0x18f   :  { %12 = sbr.rel (!%p10_p4) target bundleno = 1 (0x1), region = 64 }

// kernel: uplayer_forward.9
= control target key start
LH: loop header
LB: loop body
LE: loop exit
PB: predicated region body
PF: predicated region fallthrough
CT: control target
= control target key end

     0   :  { %s1058_s24 = smov 0   ;;  %s1180_s0 = inlined_call_operand.vmem [shape: f32[2,8,8,4], index: 0, kind: input, shape index: {}]   ;;  %s1181_s1 = inlined_call_operand.vmem [shape: f32[2,8,8,4], index: 1, kind: input, shape index: {}]   ;;  %s1182_s2 = inlined_call_operand.vmem [shape: f32[2,8,8,16], index: 2, kind: input, shape index: {}]   ;;  %s1183_s3 = inlined_call_operand.vmem [shape: f32[4,8], index: 3, kind: input, shape index: {}]   ;;  %s1184_s4 = inlined_call_operand.vmem [shape: f32[4,8], index: 4, kind: input, shape index: {}]   ;;  %s1185_s5 = inlined_call_operand.vmem [shape: f32[16,8], index: 5, kind: input, shape index: {}]   ;;  %s1186_s6 = inlined_call_operand.vmem [shape: f32[1,8], index: 6, kind: input, shape index: {}]   ;;  %s1187_s7 = inlined_call_operand.vmem [shape: f32[2,8,8,8], index: 7, kind: output, shape index: {}]  }
   0x1 LB: > { %s862_s25 = sadd.s32 4294967295, %s1016_s24   ;;  %p866_p0 = scmp.ge.s32.totalorder %s1016_s24, 1  ;;  %s1016_s24 = sphi %s1058_s24, %s17_s24  }
   0x2   : > { %p257_p1 = scmp.lt.s32.totalorder %s1016_s24, 3 }
   0x4   : > { %p258_p2 = pnand %p866_p0, %p257_p1 }
   0x5   : > { %v336_v0 = vld [vmem:[%s1184_s4] sm:$0xf] (!%p258_p2)  ;;  %vm362_vm0 = vcmask (!%p258_p2), 1043456   ;;  %p299_p3 = scmp.lt.s32.totalorder (!%p258_p2), %s862_s25, 1  ;;  %v612_v3 = vld [vmem:[%s1185_s5 + $0x8] sm:$0xff] (!%p258_p2)  ;;  %vm337_vm1 = vcmask (!%p258_p2), 31744  }
   0x6   : > { %261 = sbr.rel (%p258_p2) target bundleno = 259 (0x103), region = 48  ;;  %v327_v1 = vld [vmem:[%s1183_s3] sm:$0xf] (!%p258_p2)  ;;  %936 = vmatprep.subr.msk.mxu1 (!%p258_p2), %vm362_vm0, %v336_v0  ;;  %vm613_vm2 = vcmask (!%p258_p2), 130048   ;;  %vm774_vm3 = vcmask (!%p258_p2), 64512  }
   0x7   : > { %950 = vmatprep.subr.msk.mxu0 (!%p258_p2), %vm362_vm0, %v327_v1  ;;  %v611_v2 = vld [vmem:[%s1185_s5] sm:$0xff] (!%p258_p2)  ;;  %937 = vmatpush3.msk.msra.mxu1 (!%p258_p2), %vm362_vm0, %v336_v0 }
   0x8   : > { %951 = vmatpush3.msk.msra.mxu0 (!%p258_p2), %vm362_vm0, %v327_v1  ;;  %v980_v4 = vpack.c.bf16 (!%p258_p2), %v612_v3, %v611_v2  ;;  %984 = vmatprep.subr.msk.mxu1 (!%p258_p2), %vm362_vm0, %v327_v1  ;;  %v901_v34 = vld [vmem:[%s1186_s6] ss:$0 sm:$0xff] (!%p258_p2) }
   0xa   : > { %981 = vmatprep.subr.bf16.mxu0 (!%p258_p2), %v980_v4 }
   0xd   : > { %s1189_s25 = smov (!%p299_p3, %s862_s25), 1 }
   0xe   : > { %s1083_s11 = sshll.u32 %s1189_s25, 6 }
   0xf   : > { %s1089_s14 = scalar_lea.vmem %s1181_s1, %s1083_s11  ;;  %s1095_s17 = scalar_lea.vmem %s1180_s0, %s1083_s11 }
  0x10   : > { %v328_v5 = vld [vmem:[%s1089_s14] sm:$0xff]  ;;  %v329_v7 = vld [vmem:[%s1089_s14 + $0x8] sm:$0xff]  ;;  %v330_v9 = vld [vmem:[%s1089_s14 + $0x10] sm:$0xff]  ;;  %s1109_s20 = scalar_lea.vmem %s1182_s2, %s1083_s11  ;;  %s1159_s26 = scalar_lea.vmem %s1187_s7, %s1083_s11 }
  0x11   : > { %v319_v6 = vld [vmem:[%s1095_s17] sm:$0xff]  ;;  %938 = vmatprep.mubr.msk.f32.mxu1 %vm337_vm1, %v328_v5  ;;  %v320_v8 = vld [vmem:[%s1095_s17 + $0x8] sm:$0xff]  ;;  %v321_v10 = vld [vmem:[%s1095_s17 + $0x10] sm:$0xff] }
  0x12   : > { %952 = vmatprep.mubr.msk.f32.mxu0 %vm337_vm1, %v319_v6  ;;  %939 = vmatmul.mubr.msk.f32.vlgmr.msra.gmra.mrb[0].mxu1 %vm337_vm1, %v329_v7  ;;  %v331_v11 = vld [vmem:[%s1089_s14 + $0x18] sm:$0xff]  ;;  %v332_v13 = vld [vmem:[%s1089_s14 + $0x20] sm:$0xff]  ;;  %v333_v15 = vld [vmem:[%s1089_s14 + $0x28] sm:$0xff] }
  0x13   : > { %953 = vmatmul.mubr.msk.f32.vlgmr.msra.gmra.mrb[0].mxu0 %vm337_vm1, %v320_v8  ;;  %985 = vmatpush3.msk.msra.mxu1 %vm362_vm0, %v327_v1  ;;  %v322_v12 = vld [vmem:[%s1095_s17 + $0x18] sm:$0xff]  ;;  %v603_v14 = vld [vmem:[%s1109_s20] sm:$0xff]  ;;  %v604_v16 = vld [vmem:[%s1109_s20 + $0x8] sm:$0xff] }
  0x14   : > { %983 = vmatpush3.bf16.msra.mxu0 %v980_v4  ;;  %941 = vmatprep.mubr.msk.f32.mxu1 %vm337_vm1, %v330_v9  ;;  %v334_v17 = vld [vmem:[%s1089_s14 + $0x30] sm:$0xff]  ;;  %v335_v19 = vld [vmem:[%s1089_s14 + $0x38] sm:$0xff]  ;;  %v323_v21 = vld [vmem:[%s1095_s17 + $0x20] sm:$0xff] }
  0x15   : > { %955 = vmatprep.mubr.msk.f32.mxu0 %vm337_vm1, %v321_v10  ;;  %v605_v18 = vld [vmem:[%s1109_s20 + $0x10] sm:$0xff]  ;;  %v606_v20 = vld [vmem:[%s1109_s20 + $0x18] sm:$0xff]  ;;  %v607_v22 = vld [vmem:[%s1109_s20 + $0x20] sm:$0xff] }
  0x16   : > { %942 = vmatmul.mubr.msk.f32.gmra.mrb[2].mxu1 %vm337_vm1, %v331_v11  ;;  %v324_v23 = vld [vmem:[%s1095_s17 + $0x28] sm:$0xff]  ;;  %v325_v25 = vld [vmem:[%s1095_s17 + $0x30] sm:$0xff]  ;;  %v326_v27 = vld [vmem:[%s1095_s17 + $0x38] sm:$0xff] }
  0x17   : > { %956 = vmatmul.mubr.msk.f32.gmra.mrb[2].mxu0 %vm337_vm1, %v322_v12  ;;  %944 = vmatprep.mubr.msk.f32.mxu1 %vm337_vm1, %v332_v13  ;;  %v608_v24 = vld [vmem:[%s1109_s20 + $0x28] sm:$0xff]  ;;  %v609_v26 = vld [vmem:[%s1109_s20 + $0x30] sm:$0xff]  ;;  %v610_v28 = vld [vmem:[%s1109_s20 + $0x38] sm:$0xff] }
  0x18   : > { %968 = vmatprep.mubr.msk.f32.mxu0 %vm613_vm2, %v603_v14 }
  0x1a   : > { %945 = vmatmul.mubr.msk.f32.gmra.mrb[4].mxu1 %vm337_vm1, %v333_v15 }
  0x1b   : > { %969 = vmatmul.mubr.msk.f32.vlgmr.msra.gmra.mrb[0].mxu0 %vm613_vm2, %v604_v16  ;;  %947 = vmatprep.mubr.msk.f32.mxu1 %vm337_vm1, %v334_v17 }
  0x1c   : > { %971 = vmatprep.mubr.msk.f32.mxu0 %vm613_vm2, %v605_v18 }
  0x1e   : > { %948 = vmatmul.mubr.msk.f32.gmra.mrb[6].mxu1 %vm337_vm1, %v335_v19 }
  0x1f   : > { %972 = vmatmul.mubr.msk.f32.gmra.mrb[2].mxu0 %vm613_vm2, %v606_v20  ;;  %958 = vmatprep.mubr.msk.f32.mxu1 %vm337_vm1, %v323_v21 }
  0x20   : > { %974 = vmatprep.mubr.msk.f32.mxu0 %vm613_vm2, %v607_v22 }
  0x22   : > { %959 = vmatmul.mubr.msk.f32.vlgmr.msra.gmra.mrb[4].mxu1 %vm337_vm1, %v324_v23 }
  0x23   : > { %975 = vmatmul.mubr.msk.f32.gmra.mrb[4].mxu0 %vm613_vm2, %v608_v24  ;;  %961 = vmatprep.mubr.msk.f32.mxu1 %vm337_vm1, %v325_v25 }
  0x24   : > { %977 = vmatprep.mubr.msk.f32.mxu0 %vm613_vm2, %v609_v26 }
  0x26   : > { %962 = vmatmul.mubr.msk.f32.gmra.mrb[6].mxu1 %vm337_vm1, %v326_v27 }
  0x27   : > { %978 = vmatmul.mubr.msk.f32.gmra.mrb[6].mxu0 %vm613_vm2, %v610_v28 }
  0xe5   : > { %v940_v29 = vpop.f32.mrb[0].mxu1 }
  0xe6   : > { %v432_v30 = vpop.f32.mrb[1].mxu1 }
  0xe9   : > { %v943_v31 = vpop.f32.mrb[2].mxu1 }
  0xea   : > { %v442_v32 = vpop.f32.mrb[3].mxu1 }
  0xee   : > { %v970_v33 = vpop.f32.mrb[0].mxu0 }
  0xef   : > { %v986_v35 = vadd.f32 %v970_v33, %v940_v29  ;;  %v704_v36 = vpop.f32.mrb[1].mxu0 }
  0xf0   : > { %v987_v37 = vadd.f32 %v704_v36, %v432_v30 }
  0xf1   : > { %v759_v38 = vadd.f32 %v986_v35, %v901_v34 }
  0xf2   : > { %v758_v39 = vadd.f32 %v987_v37, %v901_v34  ;;  %v973_v40 = vpop.f32.mrb[2].mxu0 }
  0xf3   : > { %v767_v41 = vmax.f32 %v759_v38, 0.0  ;;  %v988_v42 = vadd.f32 %v973_v40, %v943_v31  ;;  %v714_v43 = vpop.f32.mrb[3].mxu0 }
  0xf4   : > { %v766_v44 = vmax.f32 %v758_v39, 0.0  ;;  %v989_v45 = vadd.f32 %v714_v43, %v442_v32 }
  0xf5   : > { %776 = vst.msk [vmem:[%s1159_s26 + $0x8] sm:$0xff] %vm774_vm3, %v767_v41  ;;  %v761_v46 = vadd.f32 %v988_v42, %v901_v34  ;;  %v960_v48 = vpop.f32.mrb[4].mxu1 }
  0xf6   : > { %775 = vst.msk [vmem:[%s1159_s26] sm:$0xff] %vm774_vm3, %v766_v44  ;;  %v760_v47 = vadd.f32 %v989_v45, %v901_v34  ;;  %v976_v49 = vpop.f32.mrb[4].mxu0  ;;  %v584_v52 = vpop.f32.mrb[5].mxu1 }
  0xf7   : > { %v769_v50 = vmax.f32 %v761_v46, 0.0  ;;  %v990_v51 = vadd.f32 %v976_v49, %v960_v48  ;;  %v724_v53 = vpop.f32.mrb[5].mxu0 }
  0xf8   : > { %v768_v54 = vmax.f32 %v760_v47, 0.0  ;;  %v991_v55 = vadd.f32 %v724_v53, %v584_v52 }
  0xf9   : > { %778 = vst.msk [vmem:[%s1159_s26 + $0x18] sm:$0xff] %vm774_vm3, %v769_v50  ;;  %v763_v56 = vadd.f32 %v990_v51, %v901_v34  ;;  %v963_v58 = vpop.f32.mrb[6].mxu1 }
  0xfa   : > { %777 = vst.msk [vmem:[%s1159_s26 + $0x10] sm:$0xff] %vm774_vm3, %v768_v54  ;;  %v762_v57 = vadd.f32 %v991_v55, %v901_v34  ;;  %v979_v59 = vpop.f32.mrb[6].mxu0  ;;  %v594_v62 = vpop.f32.mrb[7].mxu1 }
  0xfb   : > { %v771_v60 = vmax.f32 %v763_v56, 0.0  ;;  %v992_v61 = vadd.f32 %v979_v59, %v963_v58  ;;  %v734_v63 = vpop.f32.mrb[7].mxu0 }
  0xfc   : > { %v770_v0 = vmax.f32 %v762_v57, 0.0  ;;  %v993_v1 = vadd.f32 %v734_v63, %v594_v62 }
  0xfd   : > { %780 = vst.msk [vmem:[%s1159_s26 + $0x28] sm:$0xff] %vm774_vm3, %v771_v60  ;;  %v765_v2 = vadd.f32 %v992_v61, %v901_v34 }
  0xfe   : > { %779 = vst.msk [vmem:[%s1159_s26 + $0x20] sm:$0xff] %vm774_vm3, %v770_v0  ;;  %v764_v3 = vadd.f32 %v993_v1, %v901_v34 }
  0xff   : > { %v773_v4 = vmax.f32 %v765_v2, 0.0 }
 0x100   : > { %v772_v5 = vmax.f32 %v764_v3, 0.0 }
 0x101   : > { %782 = vst.msk [vmem:[%s1159_s26 + $0x38] sm:$0xff] %vm774_vm3, %v773_v4 }
 0x102   : > { %781 = vst.msk [vmem:[%s1159_s26 + $0x30] sm:$0xff] %vm774_vm3, %v772_v5 }
 0x103 PF: > { %s17_s24 = sadd.s32 1, %s1016_s24  }
 0x104   : > { %p14_p4 = scmp.ge.s32.totalorder %s17_s24, 4  }
 0x106   :  { %16 = sbr.rel (!%p14_p4) target bundleno = 1 (0x1), region = 84 }

// kernel: uplayer_forward.5
= control target key start
LH: loop header
LB: loop body
LE: loop exit
PB: predicated region body
PF: predicated region fallthrough
CT: control target
= control target key end

     0   :  { %s4877_s21 = smov 0   ;;  %s6757_s0 = inlined_call_operand.vmem [shape: f32[2,8,8,4], index: 0, kind: input, shape index: {}]   ;;  %s6758_s1 = inlined_call_operand.vmem [shape: f32[2,16,16,4], index: 1, kind: input, shape index: {}]   ;;  %s6759_s2 = inlined_call_operand.vmem [shape: f32[8,12], index: 2, kind: input, shape index: {}]   ;;  %s6760_s3 = inlined_call_operand.vmem [shape: f32[1,12], index: 3, kind: input, shape index: {}]   ;;  %s6761_s4 = inlined_call_operand.vmem [shape: f32[2,8,8,4], index: 4, kind: output, shape index: {0}]   ;;  %s6762_s5 = inlined_call_operand.vmem [shape: f32[2,8,8,4], index: 5, kind: output, shape index: {1}]   ;;  %s6763_s6 = inlined_call_operand.vmem [shape: f32[2,8,8,4], index: 6, kind: output, shape index: {2}]  }
   0x1 LB: > { %s4762_s22 = sadd.s32 4294967295, %s4836_s21   ;;  %p4766_p0 = scmp.ge.s32.totalorder %s4836_s21, 1  ;;  %s4836_s21 = sphi %s4877_s21, %s17_s21  }
   0x2   : > { %p227_p1 = scmp.lt.s32.totalorder %s4836_s21, 3 }
   0x4   : > { %p228_p2 = pnand %p4766_p0, %p227_p1 }
   0x6   : > { %231 = sbr.rel (%p228_p2) target bundleno = 974 (0x3ce), region = 36 }
   0xd   : > { %p272_p3 = scmp.lt.s32.totalorder %s4762_s22, 1  ;;  %v4838_v0 = vmov 1983009808   ;;  %v2518_v2 = vlaneseq  ;;  %vm2219_vm0 = vcmask 1040384   ;;  %vm2236_vm1 = vcmask 1041408   ;;  %s4839_s27 = smov 4  }
   0xe   : > { %v2516_v1 = vunpack.c.l.s4 %v4838_v0  ;;  %vm2253_vm2 = vcmask 1042432   ;;  %vm2270_vm3 = vcmask 1043456   ;;  %vm2287_vm4 = vcmask 1044480   ;;  %s4840_s15 = smov 124   ;;  %s4841_s16 = smov 120  }
   0xf   : > { %s6796_s22 = smov (!%p272_p3, %s4762_s22), 1  ;;  %v2519_v6 = vshrl.u32 %v2518_v2, 7  ;;  %vm2304_vm5 = vcmask 1045504   ;;  %vm2321_vm6 = vcmask 1046528   ;;  %vm2850_vm7 = vcmask 25600  }
  0x10   : > { %s4888_s23 = sshll.u32 %s6796_s22, 6  ;;  %v2517_v5 = vunpack.c.0.s8 %v2516_v1  ;;  %vm4179_vm8 = vcmask 1041409   ;;  %vm4181_vm9 = vcmask 1042434   ;;  %vm4183_vm10 = vcmask 1043459   ;;  %s4789_s30 = sshll.u32 %s6796_s22, 8 }
  0x11   : > { %s4894_s26 = scalar_lea.vmem %s6757_s0, %s4888_s23  ;;  %vm4185_vm11 = vcmask 1044484   ;;  %vm4187_vm12 = vcmask 1045509   ;;  %vm4189_vm13 = vcmask 1046534   ;;  %vm4191_vm14 = vcmask 1047559   ;;  %s6375_s9 = scalar_lea.vmem %s6758_s1, %s4789_s30 }
  0x12   : > { %v4897_v3 = vld [vmem:[%s4894_s26] sm:$0xff]  ;;  %v298_v4 = vld [vmem:[%s4894_s26 + $0x8] sm:$0xff]  ;;  %v299_v8 = vld [vmem:[%s4894_s26 + $0x10] sm:$0xff]  ;;  %v4913_v20 = vsub.s32 %v2517_v5, %v2519_v6  ;;  %vm4394_vm15 = vcmask 31744   ;;  %s6686_s14 = scalar_lea.vmem %s6761_s4, %s4888_s23  ;;  %s6714_s19 = scalar_lea.vmem %s6762_s5, %s4888_s23 }
  0x13   : > { %v4901_v7 = vmul.f32 0.53333336, %v4897_v3  ;;  %v300_v9 = vld [vmem:[%s4894_s26 + $0x18] sm:$0xff]  ;;  %v301_v10 = vld [vmem:[%s4894_s26 + $0x20] sm:$0xff]  ;;  %v306_v11 = vmul.f32 0.46666667, %v298_v4  ;;  %s296_s24 = scalar_lea.vmem %s6763_s6, %s4888_s23 }
  0x14   : > { %v4907_v12 = vmul.f32 0.0, %v4897_v3  ;;  %v302_v13 = vld [vmem:[%s4894_s26 + $0x28] sm:$0xff]  ;;  %v4911_v14 = vmul.f32 0.06666667, %v4897_v3  ;;  %v309_v15 = vmul.f32 0.93333334, %v298_v4 }
  0x15   : > { %v311_v16 = vmul.f32 0.6, %v298_v4  ;;  %v314_v17 = vmul.f32 0.13333334, %v298_v4  ;;  %v315_v18 = vmul.f32 0.8666667, %v299_v8  ;;  %v4916_v21 = vadd.f32 %v306_v11, %v4901_v7 }
  0x16   : > { %v317_v19 = vmul.f32 0.6666667, %v299_v8  ;;  %v312_v22 = vmul.f32 0.4, %v299_v8  ;;  %v318_v23 = vmul.f32 0.33333334, %v300_v9  ;;  %v4925_v35 = vadd.f32 %v309_v15, %v4911_v14 }
  0x17   : > { %v320_v24 = vmul.f32 0.2, %v299_v8  ;;  %v4918_v25 = vadd.f32 %v315_v18, %v314_v17  ;;  %v321_v26 = vmul.f32 0.8, %v300_v9  ;;  %v323_v27 = vmul.f32 0.73333335, %v300_v9 }
  0x18   : > { %v324_v28 = vmul.f32 0.26666668, %v301_v10  ;;  %v4920_v29 = vadd.f32 %v318_v23, %v317_v19  ;;  %v326_v30 = vmul.f32 0.26666668, %v300_v9  ;;  %v327_v31 = vmul.f32 0.73333335, %v301_v10 }
  0x19   : > { %6773 = vst [vmem:[#allocation2_spill] sm:$0xff] %v4918_v25  ;;  %v329_v32 = vmul.f32 0.8, %v301_v10  ;;  %v303_v33 = vld [vmem:[%s4894_s26 + $0x30] sm:$0xff]  ;;  %v304_v34 = vld [vmem:[%s4894_s26 + $0x38] sm:$0xff]  ;;  %v4927_v36 = vadd.f32 %v321_v26, %v320_v24  ;;  %v4931_v39 = vadd.f32 %v312_v22, %v311_v16 }
  0x1a   : > { %6774 = vst [vmem:[#allocation3_spill] sm:$0xff] %v4920_v29  ;;  %v4929_v37 = vadd.f32 %v324_v28, %v323_v27  ;;  %v330_v38 = vmul.f32 0.2, %v302_v13  ;;  %v332_v40 = vmul.f32 0.33333334, %v301_v10  ;;  %v4935_v43 = vadd.f32 %v327_v31, %v326_v30 }
  0x1b   : > { %6775 = vst [vmem:[#allocation4_spill] sm:$0xff] %v4927_v36  ;;  %v333_v41 = vmul.f32 0.6666667, %v302_v13  ;;  %v4933_v42 = vmul.f32 0.8666667, %v302_v13  ;;  %v347_v53 = vmul.f32 0.0, %v303_v33 }
  0x1c   : > { %6776 = vst [vmem:[#allocation5_spill] sm:$0xff] %v4929_v37  ;;  %v338_v44 = vmul.f32 0.4, %v302_v13  ;;  %v339_v45 = vmul.f32 0.6, %v303_v33  ;;  %v4937_v47 = vadd.f32 %v330_v38, %v329_v32 }
  0x1d   : > { %6777 = vst [vmem:[#allocation6_spill] sm:$0xff] %v4933_v42  ;;  %v341_v46 = vmul.f32 0.93333334, %v303_v33  ;;  %v4939_v48 = vmul.f32 0.13333334, %v303_v33  ;;  %v4959_v60 = vadd.f32 %v347_v53, %v304_v34  ;;  %v4983_v9 = vadd.f32 %v333_v41, %v332_v40 }
  0x1e   : > { %v342_v49 = vmul.f32 0.06666667, %v304_v34  ;;  %v344_v50 = vmul.f32 0.46666667, %v303_v33  ;;  %v4941_v51 = vadd.f32 %v339_v45, %v338_v44  ;;  %v345_v52 = vmul.f32 0.53333336, %v304_v34 }
  0x1f   : > { %6778 = vst [vmem:[#allocation7_spill] sm:$0xff] %v4939_v48  ;;  %v4944_v54 = vmul.f32 0.53333336, %v4916_v21  ;;  %v4949_v56 = vmul.f32 0.46666667, %v4897_v3  ;;  %6782 = vst [vmem:[#allocation11_spill] sm:$0xff] %v4959_v60 }
  0x20   : > { %6779 = vst [vmem:[#allocation8_spill] sm:$0xff] %v4941_v51  ;;  %v4946_v55 = vadd.f32 %v342_v49, %v341_v46  ;;  %v4952_v57 = vmul.f32 0.46666667, %v4916_v21  ;;  %v4955_v58 = vmul.f32 0.06666667, %v4916_v21  ;;  %v4957_v59 = vadd.f32 %v345_v52, %v344_v50  ;;  %6783 = vst [vmem:[#allocation12_spill] sm:$0xff] %v4983_v9 }
  0x21   : > { %v4962_v61 = vmul.f32 0.93333334, %v4897_v3  ;;  %v4965_v62 = vmul.f32 0.93333334, %v4916_v21  ;;  %v396_v63 = vrot.slane %v4949_v56, 1 }
  0x22   : > { %6780 = vst [vmem:[#allocation9_spill] sm:$0xff] %v4946_v55  ;;  %6781 = vst [vmem:[#allocation10_spill] sm:$0xff] %v4957_v59  ;;  %v397_v0 = vrot.slane %v4952_v57, 1  ;;  %v4970_v1 = vmul.f32 0.6, %v4897_v3 }
  0x23   : > { %v4973_v2 = vmul.f32 0.6, %v4916_v21  ;;  %v491_v4 = vrot.slane %v4962_v61, 1  ;;  %v492_v5 = vrot.slane %v4965_v62, 1  ;;  %v4978_v6 = vmul.f32 0.4, %v4897_v3 }
  0x24   : > { %v4981_v8 = vmul.f32 0.4, %v4916_v21  ;;  %v4986_v10 = vadd.f32 %v396_v63, %v4901_v7  ;;  %v4989_v11 = vadd.f32 %v397_v0, %v4944_v54  ;;  %v635_v13 = vmul.f32 0.13333334, %v4897_v3 }
  0x25   : > { %v4993_v15 = vadd.f32 %v491_v4, %v4911_v14  ;;  %v587_v16 = vrot.slane %v4978_v6, 1  ;;  %v636_v18 = vmul.f32 0.13333334, %v4916_v21  ;;  %v4999_v19 = vadd.f32 %v492_v5, %v4955_v58 }
  0x26   : > { %v588_v17 = vrot.slane %v4981_v8, 1  ;;  %v651_v22 = vmul.f32 0.8666667, %v4897_v3  ;;  %v652_v23 = vmul.f32 0.8666667, %v4916_v21 }
  0x27   : > { %v731_v24 = vmul.f32 0.6666667, %v4897_v3  ;;  %v5005_v26 = vadd.f32 %v587_v16, %v4970_v1  ;;  %v732_v28 = vmul.f32 0.6666667, %v4916_v21  ;;  %v747_v30 = vmul.f32 0.33333334, %v4897_v3 }
  0x28   : > { %v5008_v27 = vadd.f32 %v588_v17, %v4973_v2  ;;  %v683_v31 = vrot.slane %v651_v22, 1  ;;  %v684_v32 = vrot.slane %v652_v23, 1  ;;  %v748_v33 = vmul.f32 0.33333334, %v4916_v21 }
  0x29   : > { %v827_v34 = vmul.f32 0.2, %v4897_v3  ;;  %v779_v38 = vrot.slane %v747_v30, 1  ;;  %v828_v40 = vmul.f32 0.2, %v4916_v21  ;;  %v1163_v44 = vrot.slane %v731_v24, 1 }
  0x2a   : > { %v843_v41 = vmul.f32 0.8, %v4897_v3  ;;  %v5016_v45 = vadd.f32 %v683_v31, %v635_v13  ;;  %v5018_v46 = vadd.f32 %v684_v32, %v636_v18  ;;  %v780_v49 = vrot.slane %v748_v33, 1 }
  0x2b   : > { %v844_v50 = vmul.f32 0.8, %v4916_v21  ;;  %v5021_v52 = vadd.f32 %v779_v38, %v731_v24  ;;  %v923_v63 = vmul.f32 0.73333335, %v4897_v3  ;;  %v924_v0 = vmul.f32 0.73333335, %v4916_v21 }
  0x2c   : > { %v875_v53 = vrot.slane %v843_v41, 1  ;;  %v5025_v4 = vadd.f32 %v780_v49, %v732_v28  ;;  %v939_v16 = vmul.f32 0.26666668, %v4897_v3  ;;  %v940_v17 = vmul.f32 0.26666668, %v4916_v21 }
  0x2d   : > { %v876_v5 = vrot.slane %v844_v50, 1  ;;  %v1035_v32 = vrot.slane %v923_v63, 1  ;;  %v1036_v60 = vrot.slane %v924_v0, 1  ;;  %v1099_v59 = vrot.slane %v827_v34, 1 }
  0x2e   : > { %v5029_v31 = vadd.f32 %v875_v53, %v827_v34  ;;  %v971_v24 = vrot.slane %v939_v16, 1  ;;  %v972_v38 = vrot.slane %v940_v17, 1  ;;  %v1100_v36 = vrot.slane %v828_v40, 1 }
  0x2f   : > { %v5031_v37 = vadd.f32 %v876_v5, %v828_v40  ;;  %v5033_v55 = vadd.f32 %v1035_v32, %v939_v16  ;;  %v5035_v51 = vadd.f32 %v1036_v60, %v940_v17  ;;  %v5037_v49 = vadd.f32 %v1099_v59, %v843_v41 }
  0x30   : > { %v1164_v29 = vrot.slane %v732_v28, 1  ;;  %v5039_v25 = vadd.f32 %v971_v24, %v923_v63  ;;  %v5041_v9 = vadd.f32 %v972_v38, %v924_v0  ;;  %v5043_v53 = vadd.f32 %v1100_v36, %v844_v50 }
  0x31   : > { %v5045_v48 = vadd.f32 %v1163_v44, %v747_v30  ;;  %v1227_v5 = vrot.slane %v635_v13, 1  ;;  %v1228_v42 = vrot.slane %v636_v18, 1  ;;  %v1291_v40 = vrot.slane %v4970_v1, 1 }
  0x32   : > { %v5047_v34 = vadd.f32 %v1164_v29, %v748_v33  ;;  %v1292_v60 = vrot.slane %v4973_v2, 1  ;;  %v1355_v59 = vrot.slane %v4911_v14, 1  ;;  %v1356_v28 = vrot.slane %v4955_v58, 1 }
  0x33   : > { %v1419_v41 = vrot.slane %v4901_v7, 1  ;;  %v5054_v63 = vadd.f32 %v1227_v5, %v651_v22  ;;  %v5056_v36 = vadd.f32 %v1228_v42, %v652_v23  ;;  %v5059_v29 = vadd.f32 %v1291_v40, %v4978_v6 }
  0x34   : > { %v1420_v13 = vrot.slane %v4944_v54, 1  ;;  %v5063_v1 = vadd.f32 %v1292_v60, %v4981_v8  ;;  %v5066_v14 = vadd.f32 %v1355_v59, %v4962_v61  ;;  %v5069_v58 = vadd.f32 %v1356_v28, %v4965_v62 }
  0x35   : > { %v5072_v7 = vadd.f32 %v1419_v41, %v4949_v56  ;;  %v1468_v2 = vmul.f32 0.0, %v4916_v21  ;;  %v1499_v54 = vrot.slane %v4897_v3, 1  ;;  %v1500_v6 = vrot.slane %v4916_v21, 1 }
  0x36   : > { %v5075_v42 = vadd.f32 %v1420_v13, %v4952_v57  ;;  %v1563_v61 = vrot.slane %v4986_v10, 7  ;;  %v1564_v8 = vrot.slane %v4989_v11, 7  ;;  %v1611_v62 = vrot.slane %v4993_v15, 6 }
  0x37   : > { %v1612_v56 = vrot.slane %v4999_v19, 6  ;;  %v1531_v18 = vadd.f32 %v1499_v54, %v4907_v12  ;;  %v1532_v57 = vadd.f32 %v1500_v6, %v1468_v2  ;;  %v1659_v22 = vrot.slane %v5005_v26, 6 }
  0x38   : > { %v1660_v23 = vrot.slane %v5008_v27, 6  ;;  %v1707_v30 = vrot.slane %v5016_v45, 5  ;;  %v1708_v33 = vrot.slane %v5018_v46, 5  ;;  %v1755_v10 = vrot.slane %v5021_v52, 5 }
  0x39   : > { %v1756_v11 = vrot.slane %v5025_v4, 5  ;;  %v1803_v15 = vrot.slane %v5029_v31, 4  ;;  %v1804_v19 = vrot.slane %v5031_v37, 4  ;;  %v1851_v12 = vrot.slane %v5039_v25, 4 }
  0x3a   : > { %v1852_v26 = vrot.slane %v5041_v9, 4  ;;  %v1899_v27 = vrot.slane %v5033_v55, 3  ;;  %v1900_v44 = vrot.slane %v5035_v51, 3  ;;  %v1947_v45 = vrot.slane %v5037_v49, 3 }
  0x3b   : > { %v1948_v46 = vrot.slane %v5043_v53, 3  ;;  %v1995_v50 = vrot.slane %v5045_v48, 2  ;;  %v1996_v52 = vrot.slane %v5047_v34, 2  ;;  %v2043_v0 = vrot.slane %v5054_v63, 2 }
  0x3c   : > { %v2044_v37 = vrot.slane %v5056_v36, 2  ;;  %v2091_v25 = vrot.slane %v5059_v29, 1  ;;  %v2092_v9 = vrot.slane %v5063_v1, 1  ;;  %v2139_v55 = vrot.slane %v5066_v14, 1 }
  0x3d   : > { %v2140_v51 = vrot.slane %v5069_v58, 1  ;;  %v2187_v4 = vrot.slane %v1531_v18, 7  ;;  %v2188_v16 = vrot.slane %v1532_v57, 7  ;;  %v2220_v17 = vsel %vm2219_vm0, %v4897_v3, %v1563_v61 }
  0x3e   : > { %v2221_v48 = vsel %vm2219_vm0, %v4916_v21, %v1564_v8  ;;  %v2237_v31 = vsel %vm2236_vm1, %v2220_v17, %v1611_v62  ;;  %v2338_v24 = vsel %vm2219_vm0, %v1899_v27, %v1947_v45  ;;  %v2339_v38 = vsel %vm2219_vm0, %v1900_v44, %v1948_v46 }
  0x3f   : > { %v2238_v32 = vsel %vm2236_vm1, %v2221_v48, %v1612_v56  ;;  %v2254_v49 = vsel %vm2253_vm2, %v2237_v31, %v1659_v22  ;;  %v2354_v34 = vsel %vm2236_vm1, %v2338_v24, %v1995_v50  ;;  %v2355_v3 = vsel %vm2236_vm1, %v2339_v38, %v1996_v52 }
  0x40   : > { %v2255_v53 = vsel %vm2253_vm2, %v2238_v32, %v1660_v23  ;;  %v2271_v5 = vsel %vm2270_vm3, %v2254_v49, %v1707_v30  ;;  %v2370_v40 = vsel %vm2253_vm2, %v2354_v34, %v2043_v0  ;;  %v2371_v60 = vsel %vm2253_vm2, %v2355_v3, %v2044_v37 }
  0x41   : > { %v2272_v21 = vsel %vm2270_vm3, %v2255_v53, %v1708_v33  ;;  %v2288_v59 = vsel %vm2287_vm4, %v2271_v5, %v1755_v10  ;;  %v2386_v41 = vsel %vm2270_vm3, %v2370_v40, %v2091_v25  ;;  %v2387_v63 = vsel %vm2270_vm3, %v2371_v60, %v2092_v9 }
  0x42   : > { %v2289_v28 = vsel %vm2287_vm4, %v2272_v21, %v1756_v11  ;;  %v2305_v36 = vsel %vm2304_vm5, %v2288_v59, %v1803_v15  ;;  %v2402_v13 = vsel %vm2287_vm4, %v2386_v41, %v2139_v55  ;;  %v2403_v1 = vsel %vm2287_vm4, %v2387_v63, %v2140_v51 }
  0x43   : > { %v2306_v29 = vsel %vm2304_vm5, %v2289_v28, %v1804_v19  ;;  %v2322_v14 = vsel %vm2321_vm6, %v2305_v36, %v1851_v12  ;;  %v2418_v2 = vsel %vm2304_vm5, %v2402_v13, %v5072_v7  ;;  %v2419_v54 = vsel %vm2304_vm5, %v2403_v1, %v5075_v42 }
  0x44   : > { %v2323_v58 = vsel %vm2321_vm6, %v2306_v29, %v1852_v26  ;;  %v2434_v6 = vsel %vm2321_vm6, %v2418_v2, %v2187_v4  ;;  %v2435_v61 = vsel %vm2321_vm6, %v2419_v54, %v2188_v16  ;;  %v5140_v62 = vmul.f32 0.53333336, %v4925_v35 }
  0x45   : > { %v3299_v8 = vmax.f32 %v2322_v14, %v2323_v58  ;;  %v3300_v56 = vmax.f32 %v2434_v6, %v2435_v61  ;;  %v5143_v18 = vmul.f32 0.53333336, %v4931_v39  ;;  %v5146_v57 = vmul.f32 0.46666667, %v4925_v35 }
  0x46   : > { %v5149_v7 = vmul.f32 0.46666667, %v4931_v39  ;;  %v5153_v23 = vmul.f32 0.06666667, %v4925_v35  ;;  %v5156_v30 = vmul.f32 0.06666667, %v4931_v39 }
  0x47   : > { %v3331_v22 = vcombine.high %v3299_v8, %v3299_v8  ;;  %v3338_v42 = vrot.slane %v3299_v8, %v4913_v20  ;;  %v3348_v33 = vcombine.high %v3300_v56, %v3300_v56  ;;  %v3355_v10 = vrot.slane %v3300_v56, %v4913_v20 }
  0x48   : > { %v398_v11 = vrot.slane %v5146_v57, 1  ;;  %v399_v15 = vrot.slane %v5149_v7, 1  ;;  %v5164_v27 = vmul.f32 0.93333334, %v4925_v35 }
  0x49   : > { %v3345_v19 = vrot.slane %v3331_v22, %v4913_v20  ;;  %v3346_v12 = vcombine.high %v3338_v42, %v3338_v42  ;;  %v3667_v26 = vsel %vm2850_vm7, %v3338_v42, -inf  ;;  %v3362_v44 = vrot.slane %v3348_v33, %v4913_v20 }
  0x4a   : > { %v3363_v45 = vcombine.high %v3355_v10, %v3355_v10  ;;  %v3668_v46 = vrot.slane %v3667_v26, 4  ;;  %v3695_v50 = vsel %vm2850_vm7, %v3355_v10, -inf }
  0x4b   : > { %v3347_v52 = vcombine.high %v3345_v19, %v3345_v19  ;;  %v3674_v0 = vsel %vm2850_vm7, %v3346_v12, -inf  ;;  %v3681_v37 = vsel %vm2850_vm7, %v3345_v19, -inf  ;;  %v3696_v25 = vrot.slane %v3695_v50, 4 }
  0x4c   : > { %v3364_v9 = vcombine.high %v3362_v44, %v3362_v44  ;;  %v3669_v55 = vmax.f32 %v3667_v26, %v3668_v46  ;;  %v3675_v51 = vrot.slane %v3674_v0, 4  ;;  %v3682_v4 = vrot.slane %v3681_v37, 4 }
  0x4d   : > { %v3688_v16 = vsel %vm2850_vm7, %v3347_v52, -inf  ;;  %v3697_v17 = vmax.f32 %v3695_v50, %v3696_v25  ;;  %v3702_v48 = vsel %vm2850_vm7, %v3363_v45, -inf  ;;  %v3709_v31 = vsel %vm2850_vm7, %v3362_v44, -inf }
  0x4e   : > { %v3670_v32 = vrot.slane %v3669_v55, 2  ;;  %v3676_v24 = vmax.f32 %v3674_v0, %v3675_v51  ;;  %v3683_v38 = vmax.f32 %v3681_v37, %v3682_v4  ;;  %v3689_v49 = vrot.slane %v3688_v16, 4 }
  0x4f   : > { %v3698_v53 = vrot.slane %v3697_v17, 2  ;;  %v3703_v34 = vrot.slane %v3702_v48, 4  ;;  %v3710_v3 = vrot.slane %v3709_v31, 4  ;;  %v3716_v5 = vsel %vm2850_vm7, %v3364_v9, -inf }
  0x50   : > { %v3671_v21 = vmax.f32 %v3669_v55, %v3670_v32  ;;  %v3677_v40 = vrot.slane %v3676_v24, 2  ;;  %v3684_v60 = vrot.slane %v3683_v38, 2  ;;  %v3690_v59 = vmax.f32 %v3688_v16, %v3689_v49 }
  0x51   : > { %v3699_v28 = vmax.f32 %v3697_v17, %v3698_v53  ;;  %v3704_v41 = vmax.f32 %v3702_v48, %v3703_v34  ;;  %v3711_v63 = vmax.f32 %v3709_v31, %v3710_v3  ;;  %v3717_v36 = vrot.slane %v3716_v5, 4 }
  0x52   : > { %v3672_v29 = vrot.slane %v3671_v21, 1  ;;  %v3678_v13 = vmax.f32 %v3676_v24, %v3677_v40  ;;  %v3685_v1 = vmax.f32 %v3683_v38, %v3684_v60  ;;  %v3691_v14 = vrot.slane %v3690_v59, 2 }
  0x53   : > { %v3700_v58 = vrot.slane %v3699_v28, 1  ;;  %v3705_v2 = vrot.slane %v3704_v41, 2  ;;  %v3712_v54 = vrot.slane %v3711_v63, 2  ;;  %v3718_v6 = vmax.f32 %v3716_v5, %v3717_v36 }
  0x54   : > { %v3673_v61 = vmax.f32 %v3671_v21, %v3672_v29  ;;  %v3679_v8 = vrot.slane %v3678_v13, 1  ;;  %v3686_v56 = vrot.slane %v3685_v1, 1  ;;  %v3692_v22 = vmax.f32 %v3690_v59, %v3691_v14 }
  0x55   : > { %v3701_v42 = vmax.f32 %v3699_v28, %v3700_v58  ;;  %v3706_v33 = vmax.f32 %v3704_v41, %v3705_v2  ;;  %v3713_v10 = vmax.f32 %v3711_v63, %v3712_v54  ;;  %v3719_v19 = vrot.slane %v3718_v6, 2 }
  0x56   : > { %v3680_v12 = vmax.f32 %v3678_v13, %v3679_v8  ;;  %v3687_v26 = vmax.f32 %v3685_v1, %v3686_v56  ;;  %v3693_v44 = vrot.slane %v3692_v22, 1  ;;  %v5177_v45 = vadd.f32 %v398_v11, %v5140_v62 }
  0x57   : > { %v3707_v46 = vrot.slane %v3706_v33, 1  ;;  %v3714_v50 = vrot.slane %v3713_v10, 1  ;;  %v3720_v52 = vmax.f32 %v3718_v6, %v3719_v19  ;;  %v5182_v0 = vadd.f32 %v399_v15, %v5143_v18 }
  0x58   : > { %v3694_v37 = vmax.f32 %v3692_v22, %v3693_v44  ;;  %v4314_v25 = vsel %vm4179_vm8, %v3680_v12, %v3673_v61  ;;  %v5186_v9 = vmul.f32 0.93333334, %v4931_v39  ;;  %v493_v55 = vrot.slane %v5164_v27, 1 }
  0x59   : > { %v3708_v51 = vmax.f32 %v3706_v33, %v3707_v46  ;;  %v3715_v4 = vmax.f32 %v3713_v10, %v3714_v50  ;;  %v3721_v11 = vrot.slane %v3720_v52, 1  ;;  %v4315_v16 = vsel %vm4181_vm9, %v3687_v26, %v4314_v25 }
  0x5a   : > { %v4316_v17 = vsel %vm4183_vm10, %v3694_v37, %v4315_v16  ;;  %v494_v48 = vrot.slane %v5186_v9, 1  ;;  %v5193_v15 = vadd.f32 %v493_v55, %v5153_v23  ;;  %v5196_v31 = vmul.f32 0.6, %v4925_v35 }
  0x5b   : > { %v3722_v32 = vmax.f32 %v3720_v52, %v3721_v11  ;;  %v4317_v24 = vsel %vm4185_vm11, %v3701_v42, %v4316_v17  ;;  %v5200_v38 = vmul.f32 0.6, %v4931_v39  ;;  %v5203_v49 = vmul.f32 0.4, %v4925_v35 }
  0x5c   : > { %v4318_v53 = vsel %vm4187_vm12, %v3708_v51, %v4317_v24  ;;  %v5207_v34 = vadd.f32 %v494_v48, %v5156_v30  ;;  %v558_v3 = vmul.f32 0.4, %v4931_v39  ;;  %v637_v5 = vmul.f32 0.13333334, %v4925_v35 }
  0x5d   : > { %v4319_v21 = vsel %vm4189_vm13, %v3715_v4, %v4318_v53  ;;  %v589_v40 = vrot.slane %v5203_v49, 1  ;;  %v638_v60 = vmul.f32 0.13333334, %v4931_v39  ;;  %v653_v59 = vmul.f32 0.8666667, %v4925_v35 }
  0x5e   : > { %v4320_v28 = vsel %vm4191_vm14, %v3722_v32, %v4319_v21  ;;  %v590_v41 = vrot.slane %v558_v3, 1  ;;  %v654_v63 = vmul.f32 0.8666667, %v4931_v39  ;;  %v733_v36 = vmul.f32 0.6666667, %v4925_v35 }
  0x5f   : > { %4370 = vrot.lane.b32.xlu0 %v4320_v28, %s4839_s27  ;;  %v5220_v29 = vadd.f32 %v589_v40, %v5196_v31  ;;  %v685_v13 = vrot.slane %v653_v59, 1  ;;  %v734_v1 = vmul.f32 0.6666667, %v4931_v39  ;;  %v749_v14 = vmul.f32 0.33333334, %v4925_v35 }
  0x60   : > { %v5225_v58 = vadd.f32 %v590_v41, %v5200_v38  ;;  %v686_v2 = vrot.slane %v654_v63, 1  ;;  %v750_v54 = vmul.f32 0.33333334, %v4931_v39  ;;  %v829_v6 = vmul.f32 0.2, %v4925_v35 }
  0x61   : > { %v5229_v61 = vadd.f32 %v685_v13, %v637_v5  ;;  %v781_v8 = vrot.slane %v749_v14, 1  ;;  %v830_v56 = vmul.f32 0.2, %v4931_v39  ;;  %v845_v22 = vmul.f32 0.8, %v4925_v35 }
  0x62   : > { %v5233_v42 = vadd.f32 %v686_v2, %v638_v60  ;;  %v782_v33 = vrot.slane %v750_v54, 1  ;;  %v846_v10 = vmul.f32 0.8, %v4931_v39  ;;  %v925_v19 = vmul.f32 0.73333335, %v4925_v35 }
  0x63   : > { %v5237_v12 = vadd.f32 %v781_v8, %v733_v36  ;;  %v877_v26 = vrot.slane %v845_v22, 1  ;;  %v926_v44 = vmul.f32 0.73333335, %v4931_v39  ;;  %v941_v46 = vmul.f32 0.26666668, %v4925_v35 }
  0x64   : > { %v5241_v50 = vadd.f32 %v782_v33, %v734_v1  ;;  %v878_v52 = vrot.slane %v846_v10, 1  ;;  %v942_v37 = vmul.f32 0.26666668, %v4931_v39  ;;  %v1037_v25 = vrot.slane %v925_v19, 1 }
  0x65   : > { %v5244_v55 = vadd.f32 %v877_v26, %v829_v6  ;;  %v973_v51 = vrot.slane %v941_v46, 1  ;;  %v1038_v4 = vrot.slane %v926_v44, 1  ;;  %v1101_v11 = vrot.slane %v829_v6, 1 }
  0x66   : > { %v5246_v16 = vadd.f32 %v878_v52, %v830_v56  ;;  %v974_v17 = vrot.slane %v942_v37, 1  ;;  %v5248_v48 = vadd.f32 %v1037_v25, %v941_v46  ;;  %v1102_v32 = vrot.slane %v830_v56, 1 }
  0x67   : > { %v5250_v24 = vadd.f32 %v973_v51, %v925_v19  ;;  %v5252_v53 = vadd.f32 %v1038_v4, %v942_v37  ;;  %v1133_v21 = vadd.f32 %v1101_v11, %v845_v22  ;;  %v1165_v40 = vrot.slane %v733_v36, 1 }
  0x68   : > { %v5254_v28 = vadd.f32 %v974_v17, %v926_v44  ;;  %v1134_v41 = vadd.f32 %v1102_v32, %v846_v10  ;;  %v1166_v13 = vrot.slane %v734_v1, 1  ;;  %v1229_v2 = vrot.slane %v637_v5, 1 }
  0x69   : > { %v1197_v8 = vadd.f32 %v1165_v40, %v749_v14  ;;  %v1230_v33 = vrot.slane %v638_v60, 1  ;;  %v1293_v6 = vrot.slane %v5196_v31, 1  ;;  %v1294_v26 = vrot.slane %v5200_v38, 1 }
  0x6a   : > { %v1198_v46 = vadd.f32 %v1166_v13, %v750_v54  ;;  %v1261_v52 = vadd.f32 %v1229_v2, %v653_v59  ;;  %v1357_v56 = vrot.slane %v5153_v23, 1  ;;  %v1358_v19 = vrot.slane %v5156_v30, 1 }
  0x6b   : > { %v1262_v37 = vadd.f32 %v1230_v33, %v654_v63  ;;  %v1325_v36 = vadd.f32 %v1293_v6, %v5203_v49  ;;  %v1326_v22 = vadd.f32 %v1294_v26, %v558_v3  ;;  %v1421_v10 = vrot.slane %v5140_v62, 1 }
  0x6c   : > { %v1389_v5 = vadd.f32 %v1357_v56, %v5164_v27  ;;  %v1390_v60 = vadd.f32 %v1358_v19, %v5186_v9  ;;  %v1422_v31 = vrot.slane %v5143_v18, 1  ;;  %v1469_v38 = vmul.f32 0.0, %v4925_v35 }
  0x6d   : > { %v1453_v59 = vadd.f32 %v1421_v10, %v5146_v57  ;;  %v1470_v23 = vmul.f32 0.0, %v4931_v39  ;;  %v1501_v30 = vrot.slane %v4925_v35, 1  ;;  %v1502_v63 = vrot.slane %v4931_v39, 1 }
  0x6e   : > { %v1454_v49 = vadd.f32 %v1422_v31, %v5149_v7  ;;  %v1565_v62 = vrot.slane %v5177_v45, 7  ;;  %v1566_v27 = vrot.slane %v5182_v0, 7  ;;  %v1613_v9 = vrot.slane %v5193_v15, 6 }
  0x6f   : > { %v1533_v3 = vadd.f32 %v1501_v30, %v1469_v38  ;;  %v1534_v18 = vadd.f32 %v1502_v63, %v1470_v23  ;;  %v1614_v1 = vrot.slane %v5207_v34, 6  ;;  %v1661_v57 = vrot.slane %v5220_v29, 6 }
  0x70   : > { %v1662_v14 = vrot.slane %v5225_v58, 6  ;;  %v1709_v54 = vrot.slane %v5229_v61, 5  ;;  %v1710_v44 = vrot.slane %v5233_v42, 5  ;;  %v1757_v7 = vrot.slane %v5237_v12, 5 }
  0x71   : > { %v1758_v45 = vrot.slane %v5241_v50, 5  ;;  %v1805_v0 = vrot.slane %v5244_v55, 4  ;;  %v1806_v15 = vrot.slane %v5246_v16, 4  ;;  %v1853_v25 = vrot.slane %v5250_v24, 4 }
  0x72   : > { %v1854_v34 = vrot.slane %v5254_v28, 4  ;;  %v1901_v29 = vrot.slane %v5248_v48, 3  ;;  %v1902_v58 = vrot.slane %v5252_v53, 3  ;;  %v1949_v51 = vrot.slane %v1133_v21, 3 }
  0x73   : > { %v1950_v61 = vrot.slane %v1134_v41, 3  ;;  %v1997_v4 = vrot.slane %v1197_v8, 2  ;;  %v1998_v42 = vrot.slane %v1198_v46, 2  ;;  %v2045_v11 = vrot.slane %v1261_v52, 2 }
  0x74   : > { %v2046_v12 = vrot.slane %v1262_v37, 2  ;;  %v2093_v17 = vrot.slane %v1325_v36, 1  ;;  %v2094_v50 = vrot.slane %v1326_v22, 1  ;;  %v2141_v32 = vrot.slane %v1389_v5, 1 }
  0x75   : > { %v2142_v55 = vrot.slane %v1390_v60, 1  ;;  %v2189_v40 = vrot.slane %v1533_v3, 7  ;;  %v2190_v16 = vrot.slane %v1534_v18, 7  ;;  %v2222_v24 = vsel %vm2219_vm0, %v4925_v35, %v1565_v62  ;;  %v6785_v18 = vld [vmem:[#allocation7_spill] sm:$0xff] }
  0x76   : > { %v2223_v48 = vsel %vm2219_vm0, %v4931_v39, %v1566_v27  ;;  %v2239_v53 = vsel %vm2236_vm1, %v2222_v24, %v1613_v9  ;;  %v2340_v21 = vsel %vm2219_vm0, %v1901_v29, %v1949_v51  ;;  %v2341_v28 = vsel %vm2219_vm0, %v1902_v58, %v1950_v61 }
  0x77   : > { %v2240_v41 = vsel %vm2236_vm1, %v2223_v48, %v1614_v1  ;;  %v2256_v13 = vsel %vm2253_vm2, %v2239_v53, %v1661_v57  ;;  %v2356_v2 = vsel %vm2236_vm1, %v2340_v21, %v1997_v4  ;;  %v2357_v8 = vsel %vm2236_vm1, %v2341_v28, %v1998_v42 }
  0x78   : > { %v2257_v33 = vsel %vm2253_vm2, %v2240_v41, %v1662_v14  ;;  %v2273_v35 = vsel %vm2270_vm3, %v2256_v13, %v1709_v54  ;;  %v2372_v39 = vsel %vm2253_vm2, %v2356_v2, %v2045_v11  ;;  %v2373_v6 = vsel %vm2253_vm2, %v2357_v8, %v2046_v12 }
  0x79   : > { %v2274_v26 = vsel %vm2270_vm3, %v2257_v33, %v1710_v44  ;;  %v2290_v46 = vsel %vm2287_vm4, %v2273_v35, %v1757_v7  ;;  %v2388_v52 = vsel %vm2270_vm3, %v2372_v39, %v2093_v17  ;;  %v2389_v56 = vsel %vm2270_vm3, %v2373_v6, %v2094_v50 }
  0x7a   : > { %v2291_v19 = vsel %vm2287_vm4, %v2274_v26, %v1758_v45  ;;  %v2307_v37 = vsel %vm2304_vm5, %v2290_v46, %v1805_v0  ;;  %v2404_v36 = vsel %vm2287_vm4, %v2388_v52, %v2141_v32  ;;  %v2405_v22 = vsel %vm2287_vm4, %v2389_v56, %v2142_v55 }
  0x7b   : > { %v2308_v10 = vsel %vm2304_vm5, %v2291_v19, %v1806_v15  ;;  %v2324_v5 = vsel %vm2321_vm6, %v2307_v37, %v1853_v25  ;;  %v2420_v60 = vsel %vm2304_vm5, %v2404_v36, %v1453_v59  ;;  %v2421_v31 = vsel %vm2304_vm5, %v2405_v22, %v1454_v49  ;;  %v6784_v59 = vld [vmem:[#allocation6_spill] sm:$0xff] }
  0x7c   : > { %v2325_v38 = vsel %vm2321_vm6, %v2308_v10, %v1854_v34  ;;  %v2436_v23 = vsel %vm2321_vm6, %v2420_v60, %v2189_v40  ;;  %v2437_v30 = vsel %vm2321_vm6, %v2421_v31, %v2190_v16  ;;  %v5318_v63 = vmul.f32 0.53333336, %v4935_v43 }
  0x7d   : > { %v3301_v62 = vmax.f32 %v2324_v5, %v2325_v38  ;;  %v3302_v27 = vmax.f32 %v2436_v23, %v2437_v30  ;;  %v5321_v9 = vmul.f32 0.53333336, %v4937_v47  ;;  %v5324_v3 = vmul.f32 0.46666667, %v4935_v43 }
  0x7e   : > { %v5328_v49 = vadd.f32 %v6785_v18, %v6784_v59  ;;  %v5331_v1 = vmul.f32 0.46666667, %v4937_v47  ;;  %v5334_v57 = vmul.f32 0.06666667, %v4935_v43  ;;  %v5337_v14 = vmul.f32 0.06666667, %v4937_v47 }
  0x7f   : > { %v3365_v54 = vcombine.high %v3301_v62, %v3301_v62  ;;  %v3372_v44 = vrot.slane %v3301_v62, %v4913_v20  ;;  %v3382_v7 = vcombine.high %v3302_v27, %v3302_v27  ;;  %v3389_v45 = vrot.slane %v3302_v27, %v4913_v20 }
  0x80   : > { %v404_v0 = vrot.slane %v5324_v3, 1  ;;  %v405_v15 = vrot.slane %v5331_v1, 1  ;;  %v5344_v25 = vmul.f32 0.93333334, %v4935_v43  ;;  %v5347_v34 = vmul.f32 0.93333334, %v4937_v47 }
  0x81   : > { %v3379_v29 = vrot.slane %v3365_v54, %v4913_v20  ;;  %v3380_v58 = vcombine.high %v3372_v44, %v3372_v44  ;;  %v3396_v51 = vrot.slane %v3382_v7, %v4913_v20  ;;  %v3397_v61 = vcombine.high %v3389_v45, %v3389_v45 }
  0x82   : > { %v3723_v4 = vsel %vm2850_vm7, %v3372_v44, -inf  ;;  %v3751_v42 = vsel %vm2850_vm7, %v3389_v45, -inf  ;;  %v5354_v11 = vadd.f32 %v404_v0, %v5318_v63  ;;  %v5357_v12 = vadd.f32 %v405_v15, %v5321_v9 }
  0x83   : > { %v3381_v17 = vcombine.high %v3379_v29, %v3379_v29  ;;  %v3398_v50 = vcombine.high %v3396_v51, %v3396_v51  ;;  %v3724_v32 = vrot.slane %v3723_v4, 4  ;;  %v3730_v55 = vsel %vm2850_vm7, %v3380_v58, -inf }
  0x84   : > { %v3731_v40 = vrot.slane %v3730_v55, 4  ;;  %v3737_v16 = vsel %vm2850_vm7, %v3379_v29, -inf  ;;  %v3752_v24 = vrot.slane %v3751_v42, 4  ;;  %v3758_v48 = vsel %vm2850_vm7, %v3397_v61, -inf }
  0x85   : > { %v3725_v53 = vmax.f32 %v3723_v4, %v3724_v32  ;;  %v3738_v21 = vrot.slane %v3737_v16, 4  ;;  %v3744_v28 = vsel %vm2850_vm7, %v3381_v17, -inf  ;;  %v3759_v41 = vrot.slane %v3758_v48, 4 }
  0x86   : > { %v3732_v13 = vmax.f32 %v3730_v55, %v3731_v40  ;;  %v3745_v2 = vrot.slane %v3744_v28, 4  ;;  %v3753_v8 = vmax.f32 %v3751_v42, %v3752_v24  ;;  %v3765_v33 = vsel %vm2850_vm7, %v3396_v51, -inf }
  0x87   : > { %v3726_v35 = vrot.slane %v3725_v53, 2  ;;  %v3739_v39 = vmax.f32 %v3737_v16, %v3738_v21  ;;  %v3760_v6 = vmax.f32 %v3758_v48, %v3759_v41  ;;  %v3766_v26 = vrot.slane %v3765_v33, 4 }
  0x88   : > { %v3733_v46 = vrot.slane %v3732_v13, 2  ;;  %v3746_v52 = vmax.f32 %v3744_v28, %v3745_v2  ;;  %v3754_v56 = vrot.slane %v3753_v8, 2  ;;  %v3772_v19 = vsel %vm2850_vm7, %v3398_v50, -inf }
  0x89   : > { %v3727_v37 = vmax.f32 %v3725_v53, %v3726_v35  ;;  %v3740_v36 = vrot.slane %v3739_v39, 2  ;;  %v3761_v22 = vrot.slane %v3760_v6, 2  ;;  %v3767_v10 = vmax.f32 %v3765_v33, %v3766_v26 }
  0x8a   : > { %v3734_v5 = vmax.f32 %v3732_v13, %v3733_v46  ;;  %v3747_v60 = vrot.slane %v3746_v52, 2  ;;  %v3755_v31 = vmax.f32 %v3753_v8, %v3754_v56  ;;  %v3773_v38 = vrot.slane %v3772_v19, 4 }
  0x8b   : > { %v3728_v23 = vrot.slane %v3727_v37, 1  ;;  %v3741_v30 = vmax.f32 %v3739_v39, %v3740_v36  ;;  %v3762_v62 = vmax.f32 %v3760_v6, %v3761_v22  ;;  %v3768_v27 = vrot.slane %v3767_v10, 2 }
  0x8c   : > { %v3735_v59 = vrot.slane %v3734_v5, 1  ;;  %v3748_v18 = vmax.f32 %v3746_v52, %v3747_v60  ;;  %v3756_v54 = vrot.slane %v3755_v31, 1  ;;  %v3774_v44 = vmax.f32 %v3772_v19, %v3773_v38 }
  0x8d   : > { %v3729_v7 = vmax.f32 %v3727_v37, %v3728_v23  ;;  %v3742_v45 = vrot.slane %v3741_v30, 1  ;;  %v3763_v0 = vrot.slane %v3762_v62, 1  ;;  %v3769_v15 = vmax.f32 %v3767_v10, %v3768_v27 }
  0x8e   : > { %v3736_v29 = vmax.f32 %v3734_v5, %v3735_v59  ;;  %v3749_v58 = vrot.slane %v3748_v18, 1  ;;  %v3757_v51 = vmax.f32 %v3755_v31, %v3756_v54  ;;  %v3775_v61 = vrot.slane %v3774_v44, 2 }
  0x8f   : > { %v3743_v4 = vmax.f32 %v3741_v30, %v3742_v45  ;;  %v3764_v42 = vmax.f32 %v3762_v62, %v3763_v0  ;;  %v3770_v17 = vrot.slane %v3769_v15, 1  ;;  %v499_v50 = vrot.slane %v5344_v25, 1 }
  0x90   : > { %v3750_v32 = vmax.f32 %v3748_v18, %v3749_v58  ;;  %v3776_v55 = vmax.f32 %v3774_v44, %v3775_v61  ;;  %v4321_v40 = vsel %vm4179_vm8, %v3736_v29, %v3729_v7  ;;  %v500_v16 = vrot.slane %v5347_v34, 1 }
  0x91   : > { %v3771_v24 = vmax.f32 %v3769_v15, %v3770_v17  ;;  %v4322_v48 = vsel %vm4181_vm9, %v3743_v4, %v4321_v40  ;;  %v5370_v53 = vadd.f32 %v499_v50, %v5334_v57  ;;  %v5373_v21 = vmul.f32 0.6, %v4935_v43 }
  0x92   : > { %v3777_v28 = vrot.slane %v3776_v55, 1  ;;  %v4323_v41 = vsel %vm4183_vm10, %v3750_v32, %v4322_v48  ;;  %v5377_v13 = vadd.f32 %v500_v16, %v5337_v14  ;;  %v5380_v2 = vmul.f32 0.6, %v4937_v47 }
  0x93   : > { %v4324_v8 = vsel %vm4185_vm11, %v3757_v51, %v4323_v41  ;;  %v563_v33 = vmul.f32 0.4, %v4935_v43  ;;  %v5385_v35 = vmul.f32 0.4, %v4937_v47  ;;  %v643_v39 = vmul.f32 0.13333334, %v4935_v43 }
  0x94   : > { %v3778_v6 = vmax.f32 %v3776_v55, %v3777_v28  ;;  %v4325_v26 = vsel %vm4187_vm12, %v3764_v42, %v4324_v8  ;;  %v644_v46 = vmul.f32 0.13333334, %v4937_v47  ;;  %v659_v52 = vmul.f32 0.8666667, %v4935_v43 }
  0x95   : > { %v4326_v56 = vsel %vm4189_vm13, %v3771_v24, %v4325_v26  ;;  %v595_v19 = vrot.slane %v563_v33, 1  ;;  %v596_v37 = vrot.slane %v5385_v35, 1  ;;  %v660_v36 = vmul.f32 0.8666667, %v4937_v47 }
  0x96   : > { %v4327_v22 = vsel %vm4191_vm14, %v3778_v6, %v4326_v56  ;;  %v691_v10 = vrot.slane %v659_v52, 1  ;;  %v739_v5 = vmul.f32 0.6666667, %v4935_v43  ;;  %v740_v60 = vmul.f32 0.6666667, %v4937_v47 }
  0x97   : > { %4372 = vrot.lane.b32.xlu1 %v4327_v22, %s4839_s27  ;;  %v5399_v31 = vadd.f32 %v595_v19, %v5373_v21  ;;  %v5402_v38 = vadd.f32 %v596_v37, %v5380_v2  ;;  %v692_v23 = vrot.slane %v660_v36, 1  ;;  %v755_v30 = vmul.f32 0.33333334, %v4935_v43 }
  0x98   : > { %v5405_v62 = vadd.f32 %v691_v10, %v643_v39  ;;  %v756_v27 = vmul.f32 0.33333334, %v4937_v47  ;;  %v835_v59 = vmul.f32 0.2, %v4935_v43  ;;  %v836_v18 = vmul.f32 0.2, %v4937_v47 }
  0x99   : > { %v5410_v54 = vadd.f32 %v692_v23, %v644_v46  ;;  %v787_v44 = vrot.slane %v755_v30, 1  ;;  %v851_v7 = vmul.f32 0.8, %v4935_v43  ;;  %v852_v45 = vmul.f32 0.8, %v4937_v47 }
  0x9a   : > { %v788_v0 = vrot.slane %v756_v27, 1  ;;  %v931_v15 = vmul.f32 0.73333335, %v4935_v43  ;;  %v932_v29 = vmul.f32 0.73333335, %v4937_v47  ;;  %v1107_v58 = vrot.slane %v835_v59, 1 }
  0x9b   : > { %v5416_v51 = vadd.f32 %v787_v44, %v739_v5  ;;  %v883_v61 = vrot.slane %v851_v7, 1  ;;  %v884_v4 = vrot.slane %v852_v45, 1  ;;  %v947_v42 = vmul.f32 0.26666668, %v4935_v43 }
  0x9c   : > { %v5419_v17 = vadd.f32 %v788_v0, %v740_v60  ;;  %v948_v50 = vmul.f32 0.26666668, %v4937_v47  ;;  %v1043_v32 = vrot.slane %v931_v15, 1  ;;  %v1044_v55 = vrot.slane %v932_v29, 1 }
  0x9d   : > { %v5422_v40 = vadd.f32 %v883_v61, %v835_v59  ;;  %v5424_v16 = vadd.f32 %v884_v4, %v836_v18  ;;  %v979_v24 = vrot.slane %v947_v42, 1  ;;  %v1108_v48 = vrot.slane %v836_v18, 1 }
  0x9e   : > { %v980_v28 = vrot.slane %v948_v50, 1  ;;  %v5426_v41 = vadd.f32 %v1043_v32, %v947_v42  ;;  %v5428_v8 = vadd.f32 %v1044_v55, %v948_v50  ;;  %v1139_v6 = vadd.f32 %v1107_v58, %v851_v7 }
  0x9f   : > { %v5430_v26 = vadd.f32 %v979_v24, %v931_v15  ;;  %v5432_v56 = vadd.f32 %v1108_v48, %v852_v45  ;;  %v1171_v19 = vrot.slane %v739_v5, 1  ;;  %v1172_v37 = vrot.slane %v740_v60, 1 }
  0xa0   : > { %v5434_v22 = vadd.f32 %v980_v28, %v932_v29  ;;  %v1235_v10 = vrot.slane %v643_v39, 1  ;;  %v1236_v23 = vrot.slane %v644_v46, 1  ;;  %v1299_v59 = vrot.slane %v5373_v21, 1 }
  0xa1   : > { %v1203_v44 = vadd.f32 %v1171_v19, %v755_v30  ;;  %v1204_v18 = vadd.f32 %v1172_v37, %v756_v27  ;;  %v1300_v0 = vrot.slane %v5380_v2, 1  ;;  %v1363_v61 = vrot.slane %v5334_v57, 1 }
  0xa2   : > { %v1267_v4 = vadd.f32 %v1235_v10, %v659_v52  ;;  %v1268_v7 = vadd.f32 %v1236_v23, %v660_v36  ;;  %v1331_v15 = vadd.f32 %v1299_v59, %v563_v33  ;;  %v1364_v45 = vrot.slane %v5337_v14, 1 }
  0xa3   : > { %v1332_v5 = vadd.f32 %v1300_v0, %v5385_v35  ;;  %v1395_v60 = vadd.f32 %v1363_v61, %v5344_v25  ;;  %v1427_v39 = vrot.slane %v5318_v63, 1  ;;  %v1428_v46 = vrot.slane %v5321_v9, 1 }
  0xa4   : > { %v1396_v21 = vadd.f32 %v1364_v45, %v5347_v34  ;;  %v1475_v30 = vmul.f32 0.0, %v4935_v43  ;;  %v1476_v2 = vmul.f32 0.0, %v4937_v47  ;;  %v1507_v57 = vrot.slane %v4935_v43, 1 }
  0xa5   : > { %v1459_v33 = vadd.f32 %v1427_v39, %v5324_v3  ;;  %v1460_v14 = vadd.f32 %v1428_v46, %v5331_v1  ;;  %v1508_v35 = vrot.slane %v4937_v47, 1  ;;  %v1571_v25 = vrot.slane %v5354_v11, 7 }
  0xa6   : > { %v1539_v52 = vadd.f32 %v1507_v57, %v1475_v30  ;;  %v1572_v63 = vrot.slane %v5357_v12, 7  ;;  %v1619_v9 = vrot.slane %v5370_v53, 6  ;;  %v1620_v34 = vrot.slane %v5377_v13, 6 }
  0xa7   : > { %v1540_v36 = vadd.f32 %v1508_v35, %v1476_v2  ;;  %v1667_v27 = vrot.slane %v5399_v31, 6  ;;  %v1668_v29 = vrot.slane %v5402_v38, 6  ;;  %v1715_v3 = vrot.slane %v5405_v62, 5  ;;  %v6786_v35 = vld [vmem:[#allocation12_spill] sm:$0xff] }
  0xa8   : > { %v1716_v1 = vrot.slane %v5410_v54, 5  ;;  %v1763_v58 = vrot.slane %v5416_v51, 5  ;;  %v1764_v11 = vrot.slane %v5419_v17, 5  ;;  %v1811_v42 = vrot.slane %v5422_v40, 4 }
  0xa9   : > { %v1812_v12 = vrot.slane %v5424_v16, 4  ;;  %v1859_v53 = vrot.slane %v5430_v26, 4  ;;  %v1860_v13 = vrot.slane %v5434_v22, 4  ;;  %v1907_v31 = vrot.slane %v5426_v41, 3 }
  0xaa   : > { %v1908_v38 = vrot.slane %v5428_v8, 3  ;;  %v1955_v50 = vrot.slane %v1139_v6, 3  ;;  %v1956_v62 = vrot.slane %v5432_v56, 3  ;;  %v2003_v54 = vrot.slane %v1203_v44, 2 }
  0xab   : > { %v2004_v32 = vrot.slane %v1204_v18, 2  ;;  %v2051_v51 = vrot.slane %v1267_v4, 2  ;;  %v2052_v55 = vrot.slane %v1268_v7, 2  ;;  %v2099_v17 = vrot.slane %v1331_v15, 1 }
  0xac   : > { %v2100_v24 = vrot.slane %v1332_v5, 1  ;;  %v2147_v40 = vrot.slane %v1395_v60, 1  ;;  %v2148_v48 = vrot.slane %v1396_v21, 1  ;;  %v2195_v16 = vrot.slane %v1539_v52, 7 }
  0xad   : > { %v2196_v28 = vrot.slane %v1540_v36, 7  ;;  %v2228_v26 = vsel %vm2219_vm0, %v4935_v43, %v1571_v25  ;;  %v2229_v41 = vsel %vm2219_vm0, %v4937_v47, %v1572_v63  ;;  %v2346_v8 = vsel %vm2219_vm0, %v1907_v31, %v1955_v50 }
  0xae   : > { %v2245_v6 = vsel %vm2236_vm1, %v2228_v26, %v1619_v9  ;;  %v2246_v56 = vsel %vm2236_vm1, %v2229_v41, %v1620_v34  ;;  %v2347_v19 = vsel %vm2219_vm0, %v1908_v38, %v1956_v62  ;;  %v2362_v37 = vsel %vm2236_vm1, %v2346_v8, %v2003_v54 }
  0xaf   : > { %v2262_v22 = vsel %vm2253_vm2, %v2245_v6, %v1667_v27  ;;  %v2263_v10 = vsel %vm2253_vm2, %v2246_v56, %v1668_v29  ;;  %v2363_v23 = vsel %vm2236_vm1, %v2347_v19, %v2004_v32  ;;  %v2378_v43 = vsel %vm2253_vm2, %v2362_v37, %v2051_v51 }
  0xb0   : > { %v2279_v47 = vsel %vm2270_vm3, %v2262_v22, %v1715_v3  ;;  %v2280_v59 = vsel %vm2270_vm3, %v2263_v10, %v1716_v1  ;;  %v2379_v44 = vsel %vm2253_vm2, %v2363_v23, %v2052_v55  ;;  %v2394_v18 = vsel %vm2270_vm3, %v2378_v43, %v2099_v17 }
  0xb1   : > { %v2296_v0 = vsel %vm2287_vm4, %v2279_v47, %v1763_v58  ;;  %v2297_v61 = vsel %vm2287_vm4, %v2280_v59, %v1764_v11  ;;  %v2395_v4 = vsel %vm2270_vm3, %v2379_v44, %v2100_v24  ;;  %v2410_v7 = vsel %vm2287_vm4, %v2394_v18, %v2147_v40 }
  0xb2   : > { %v2313_v15 = vsel %vm2304_vm5, %v2296_v0, %v1811_v42  ;;  %v2314_v45 = vsel %vm2304_vm5, %v2297_v61, %v1812_v12  ;;  %v2411_v5 = vsel %vm2287_vm4, %v2395_v4, %v2148_v48  ;;  %v2426_v60 = vsel %vm2304_vm5, %v2410_v7, %v1459_v33 }
  0xb3   : > { %v2330_v39 = vsel %vm2321_vm6, %v2313_v15, %v1859_v53  ;;  %v2331_v46 = vsel %vm2321_vm6, %v2314_v45, %v1860_v13  ;;  %v2427_v21 = vsel %vm2304_vm5, %v2411_v5, %v1460_v14  ;;  %v2442_v30 = vsel %vm2321_vm6, %v2426_v60, %v2195_v16 }
  0xb4   : > { %v2443_v2 = vsel %vm2321_vm6, %v2427_v21, %v2196_v28  ;;  %v3307_v57 = vmax.f32 %v2330_v39, %v2331_v46  ;;  %v5499_v25 = vmul.f32 0.53333336, %v6786_v35  ;;  %v5502_v52 = vmul.f32 0.53333336, %v5328_v49 }
  0xb5   : > { %v3308_v63 = vmax.f32 %v2442_v30, %v2443_v2  ;;  %v5505_v33 = vmul.f32 0.46666667, %v6786_v35  ;;  %v5508_v9 = vmul.f32 0.46666667, %v5328_v49  ;;  %v5511_v14 = vmul.f32 0.06666667, %v6786_v35 }
  0xb6   : > { %v3467_v34 = vcombine.high %v3307_v57, %v3307_v57  ;;  %v3474_v36 = vrot.slane %v3307_v57, %v4913_v20  ;;  %v5515_v27 = vmul.f32 0.06666667, %v5328_v49  ;;  %v5518_v29 = vmul.f32 0.93333334, %v6786_v35 }
  0xb7   : > { %v3484_v3 = vcombine.high %v3308_v63, %v3308_v63  ;;  %v3491_v1 = vrot.slane %v3308_v63, %v4913_v20  ;;  %v406_v58 = vrot.slane %v5505_v33, 1  ;;  %v407_v11 = vrot.slane %v5508_v9, 1 }
  0xb8   : > { %v3481_v42 = vrot.slane %v3467_v34, %v4913_v20  ;;  %v3482_v12 = vcombine.high %v3474_v36, %v3474_v36  ;;  %v3891_v53 = vsel %vm2850_vm7, %v3474_v36, -inf  ;;  %v5526_v13 = vmul.f32 0.93333334, %v5328_v49 }
  0xb9   : > { %v3498_v31 = vrot.slane %v3484_v3, %v4913_v20  ;;  %v3499_v38 = vcombine.high %v3491_v1, %v3491_v1  ;;  %v3892_v50 = vrot.slane %v3891_v53, 4  ;;  %v3919_v62 = vsel %vm2850_vm7, %v3491_v1, -inf }
  0xba   : > { %v3483_v54 = vcombine.high %v3481_v42, %v3481_v42  ;;  %v3898_v32 = vsel %vm2850_vm7, %v3482_v12, -inf  ;;  %v3905_v51 = vsel %vm2850_vm7, %v3481_v42, -inf  ;;  %v3920_v55 = vrot.slane %v3919_v62, 4 }
  0xbb   : > { %v3500_v17 = vcombine.high %v3498_v31, %v3498_v31  ;;  %v3893_v24 = vmax.f32 %v3891_v53, %v3892_v50  ;;  %v3899_v40 = vrot.slane %v3898_v32, 4  ;;  %v3906_v48 = vrot.slane %v3905_v51, 4 }
  0xbc   : > { %v3912_v16 = vsel %vm2850_vm7, %v3483_v54, -inf  ;;  %v3921_v28 = vmax.f32 %v3919_v62, %v3920_v55  ;;  %v3926_v26 = vsel %vm2850_vm7, %v3499_v38, -inf  ;;  %v3933_v41 = vsel %vm2850_vm7, %v3498_v31, -inf }
  0xbd   : > { %v3894_v8 = vrot.slane %v3893_v24, 2  ;;  %v3900_v6 = vmax.f32 %v3898_v32, %v3899_v40  ;;  %v3907_v56 = vmax.f32 %v3905_v51, %v3906_v48  ;;  %v3913_v19 = vrot.slane %v3912_v16, 4 }
  0xbe   : > { %v3922_v37 = vrot.slane %v3921_v28, 2  ;;  %v3927_v22 = vrot.slane %v3926_v26, 4  ;;  %v3934_v10 = vrot.slane %v3933_v41, 4  ;;  %v3940_v23 = vsel %vm2850_vm7, %v3500_v17, -inf }
  0xbf   : > { %v3895_v43 = vmax.f32 %v3893_v24, %v3894_v8  ;;  %v3901_v47 = vrot.slane %v3900_v6, 2  ;;  %v3908_v59 = vrot.slane %v3907_v56, 2  ;;  %v3914_v44 = vmax.f32 %v3912_v16, %v3913_v19 }
  0xc0   : > { %v3923_v18 = vmax.f32 %v3921_v28, %v3922_v37  ;;  %v3928_v0 = vmax.f32 %v3926_v26, %v3927_v22  ;;  %v3935_v61 = vmax.f32 %v3933_v41, %v3934_v10  ;;  %v3941_v4 = vrot.slane %v3940_v23, 4 }
  0xc1   : > { %v3896_v7 = vrot.slane %v3895_v43, 1  ;;  %v3902_v15 = vmax.f32 %v3900_v6, %v3901_v47  ;;  %v3909_v45 = vmax.f32 %v3907_v56, %v3908_v59  ;;  %v3915_v5 = vrot.slane %v3914_v44, 2 }
  0xc2   : > { %v3924_v60 = vrot.slane %v3923_v18, 1  ;;  %v3929_v39 = vrot.slane %v3928_v0, 2  ;;  %v3936_v46 = vrot.slane %v3935_v61, 2  ;;  %v3942_v21 = vmax.f32 %v3940_v23, %v3941_v4 }
  0xc3   : > { %v3897_v30 = vmax.f32 %v3895_v43, %v3896_v7  ;;  %v3903_v2 = vrot.slane %v3902_v15, 1  ;;  %v3910_v57 = vrot.slane %v3909_v45, 1  ;;  %v3916_v63 = vmax.f32 %v3914_v44, %v3915_v5 }
  0xc4   : > { %v3925_v34 = vmax.f32 %v3923_v18, %v3924_v60  ;;  %v3930_v36 = vmax.f32 %v3928_v0, %v3929_v39  ;;  %v3937_v3 = vmax.f32 %v3935_v61, %v3936_v46  ;;  %v3943_v1 = vrot.slane %v3942_v21, 2 }
  0xc5   : > { %v3904_v42 = vmax.f32 %v3902_v15, %v3903_v2  ;;  %v3911_v12 = vmax.f32 %v3909_v45, %v3910_v57  ;;  %v3917_v53 = vrot.slane %v3916_v63, 1  ;;  %v5537_v31 = vadd.f32 %v406_v58, %v5499_v25 }
  0xc6   : > { %v3931_v38 = vrot.slane %v3930_v36, 1  ;;  %v3938_v50 = vrot.slane %v3937_v3, 1  ;;  %v3944_v62 = vmax.f32 %v3942_v21, %v3943_v1  ;;  %v5540_v54 = vadd.f32 %v407_v11, %v5502_v52 }
  0xc7   : > { %v3918_v32 = vmax.f32 %v3916_v63, %v3917_v53  ;;  %v4342_v51 = vsel %vm4179_vm8, %v3904_v42, %v3897_v30  ;;  %v501_v55 = vrot.slane %v5518_v29, 1  ;;  %v502_v17 = vrot.slane %v5526_v13, 1 }
  0xc8   : > { %v3932_v24 = vmax.f32 %v3930_v36, %v3931_v38  ;;  %v3939_v40 = vmax.f32 %v3937_v3, %v3938_v50  ;;  %v3945_v48 = vrot.slane %v3944_v62, 1  ;;  %v4343_v16 = vsel %vm4181_vm9, %v3911_v12, %v4342_v51 }
  0xc9   : > { %v4344_v58 = vsel %vm4183_vm10, %v3918_v32, %v4343_v16  ;;  %v5548_v28 = vadd.f32 %v501_v55, %v5511_v14  ;;  %v5551_v11 = vadd.f32 %v502_v17, %v5515_v27  ;;  %v5554_v26 = vmul.f32 0.6, %v6786_v35 }
  0xca   : > { %v3946_v41 = vmax.f32 %v3944_v62, %v3945_v48  ;;  %v4345_v8 = vsel %vm4185_vm11, %v3925_v34, %v4344_v58  ;;  %v5558_v6 = vmul.f32 0.6, %v5328_v49  ;;  %v565_v56 = vmul.f32 0.4, %v6786_v35 }
  0xcb   : > { %v4346_v19 = vsel %vm4187_vm12, %v3932_v24, %v4345_v8  ;;  %v566_v37 = vmul.f32 0.4, %v5328_v49  ;;  %v645_v22 = vmul.f32 0.13333334, %v6786_v35  ;;  %v646_v10 = vmul.f32 0.13333334, %v5328_v49 }
  0xcc   : > { %v4347_v23 = vsel %vm4189_vm13, %v3939_v40, %v4346_v19  ;;  %v597_v43 = vrot.slane %v565_v56, 1  ;;  %v661_v47 = vmul.f32 0.8666667, %v6786_v35  ;;  %v662_v59 = vmul.f32 0.8666667, %v5328_v49 }
  0xcd   : > { %v4348_v44 = vsel %vm4191_vm14, %v3946_v41, %v4347_v23  ;;  %v598_v18 = vrot.slane %v566_v37, 1  ;;  %v741_v0 = vmul.f32 0.6666667, %v6786_v35  ;;  %v742_v61 = vmul.f32 0.6666667, %v5328_v49 }
  0xce   : > { %4378 = vrot.lane.b32.xlu0 %v4348_v44, %s4839_s27  ;;  %v5573_v4 = vadd.f32 %v597_v43, %v5554_v26  ;;  %v693_v7 = vrot.slane %v661_v47, 1  ;;  %v694_v15 = vrot.slane %v662_v59, 1  ;;  %v757_v45 = vmul.f32 0.33333334, %v6786_v35 }
  0xcf   : > { %v5577_v5 = vadd.f32 %v598_v18, %v5558_v6  ;;  %v758_v60 = vmul.f32 0.33333334, %v5328_v49  ;;  %v837_v39 = vmul.f32 0.2, %v6786_v35  ;;  %v838_v46 = vmul.f32 0.2, %v5328_v49 }
  0xd0   : > { %v5582_v21 = vadd.f32 %v693_v7, %v645_v22  ;;  %v5584_v30 = vadd.f32 %v694_v15, %v646_v10  ;;  %v789_v2 = vrot.slane %v757_v45, 1  ;;  %v853_v57 = vmul.f32 0.8, %v6786_v35 }
  0xd1   : > { %v790_v63 = vrot.slane %v758_v60, 1  ;;  %v854_v34 = vmul.f32 0.8, %v5328_v49  ;;  %v933_v36 = vmul.f32 0.73333335, %v6786_v35  ;;  %v1109_v3 = vrot.slane %v837_v39, 1 }
  0xd2   : > { %v5589_v1 = vadd.f32 %v789_v2, %v741_v0  ;;  %v885_v42 = vrot.slane %v853_v57, 1  ;;  %v934_v12 = vmul.f32 0.73333335, %v5328_v49  ;;  %v949_v53 = vmul.f32 0.26666668, %v6786_v35 }
  0xd3   : > { %v5593_v38 = vadd.f32 %v790_v63, %v742_v61  ;;  %v886_v50 = vrot.slane %v854_v34, 1  ;;  %v950_v62 = vmul.f32 0.26666668, %v5328_v49  ;;  %v1045_v32 = vrot.slane %v933_v36, 1 }
  0xd4   : > { %v5596_v51 = vadd.f32 %v885_v42, %v837_v39  ;;  %v981_v55 = vrot.slane %v949_v53, 1  ;;  %v1046_v17 = vrot.slane %v934_v12, 1  ;;  %v1110_v24 = vrot.slane %v838_v46, 1 }
  0xd5   : > { %v5598_v40 = vadd.f32 %v886_v50, %v838_v46  ;;  %v982_v48 = vrot.slane %v950_v62, 1  ;;  %v5600_v16 = vadd.f32 %v1045_v32, %v949_v53  ;;  %v5602_v58 = vadd.f32 %v1109_v3, %v853_v57 }
  0xd6   : > { %v5604_v41 = vadd.f32 %v981_v55, %v933_v36  ;;  %v5606_v8 = vadd.f32 %v1046_v17, %v950_v62  ;;  %v5608_v19 = vadd.f32 %v1110_v24, %v854_v34  ;;  %v1173_v23 = vrot.slane %v741_v0, 1 }
  0xd7   : > { %v5610_v43 = vadd.f32 %v982_v48, %v934_v12  ;;  %v1174_v44 = vrot.slane %v742_v61, 1  ;;  %v1237_v18 = vrot.slane %v645_v22, 1  ;;  %v1238_v7 = vrot.slane %v646_v10, 1 }
  0xd8   : > { %v1205_v15 = vadd.f32 %v1173_v23, %v757_v45  ;;  %v1301_v39 = vrot.slane %v5554_v26, 1  ;;  %v1302_v46 = vrot.slane %v5558_v6, 1  ;;  %v1365_v2 = vrot.slane %v5511_v14, 1 }
  0xd9   : > { %v1206_v57 = vadd.f32 %v1174_v44, %v758_v60  ;;  %v1269_v63 = vadd.f32 %v1237_v18, %v661_v47  ;;  %v1270_v36 = vadd.f32 %v1238_v7, %v662_v59  ;;  %v1366_v3 = vrot.slane %v5515_v27, 1 }
  0xda   : > { %v1333_v34 = vadd.f32 %v1301_v39, %v565_v56  ;;  %v1334_v42 = vadd.f32 %v1302_v46, %v566_v37  ;;  %v1397_v0 = vadd.f32 %v1365_v2, %v5518_v29  ;;  %v1429_v61 = vrot.slane %v5499_v25, 1 }
  0xdb   : > { %v1398_v22 = vadd.f32 %v1366_v3, %v5526_v13  ;;  %v1430_v10 = vrot.slane %v5502_v52, 1  ;;  %v1477_v26 = vmul.f32 0.0, %v6786_v35  ;;  %v1478_v6 = vmul.f32 0.0, %v5328_v49 }
  0xdc   : > { %v1461_v14 = vadd.f32 %v1429_v61, %v5505_v33  ;;  %v1509_v47 = vrot.slane %v6786_v35, 1  ;;  %v1510_v27 = vrot.slane %v5328_v49, 1  ;;  %v1573_v56 = vrot.slane %v5537_v31, 7 }
  0xdd   : > { %v1462_v29 = vadd.f32 %v1430_v10, %v5508_v9  ;;  %v1574_v25 = vrot.slane %v5540_v54, 7  ;;  %v1621_v13 = vrot.slane %v5548_v28, 6  ;;  %v1622_v52 = vrot.slane %v5551_v11, 6 }
  0xde   : > { %v1541_v37 = vadd.f32 %v1509_v47, %v1477_v26  ;;  %v1542_v59 = vadd.f32 %v1510_v27, %v1478_v6  ;;  %v1669_v45 = vrot.slane %v5573_v4, 6  ;;  %v1670_v33 = vrot.slane %v5577_v5, 6  ;;  %v6787_v47 = vld [vmem:[#allocation2_spill] sm:$0xff] }
  0xdf   : > { %v1717_v60 = vrot.slane %v5582_v21, 5  ;;  %v1718_v12 = vrot.slane %v5584_v30, 5  ;;  %v1765_v31 = vrot.slane %v5589_v1, 5  ;;  %v1766_v9 = vrot.slane %v5593_v38, 5 }
  0xe0   : > { %v1813_v54 = vrot.slane %v5596_v51, 4  ;;  %v1814_v28 = vrot.slane %v5598_v40, 4  ;;  %v1861_v11 = vrot.slane %v5604_v41, 4  ;;  %v1862_v53 = vrot.slane %v5610_v43, 4 }
  0xe1   : > { %v1909_v4 = vrot.slane %v5600_v16, 3  ;;  %v1910_v5 = vrot.slane %v5606_v8, 3  ;;  %v1957_v21 = vrot.slane %v5602_v58, 3  ;;  %v1958_v30 = vrot.slane %v5608_v19, 3 }
  0xe2   : > { %v2005_v50 = vrot.slane %v1205_v15, 2  ;;  %v2006_v1 = vrot.slane %v1206_v57, 2  ;;  %v2053_v62 = vrot.slane %v1269_v63, 2  ;;  %v2054_v38 = vrot.slane %v1270_v36, 2 }
  0xe3   : > { %v2101_v32 = vrot.slane %v1333_v34, 1  ;;  %v2102_v51 = vrot.slane %v1334_v42, 1  ;;  %v2149_v55 = vrot.slane %v1397_v0, 1  ;;  %v2150_v17 = vrot.slane %v1398_v22, 1 }
  0xe4   : > { %v2197_v24 = vrot.slane %v1541_v37, 7  ;;  %v2198_v40 = vrot.slane %v1542_v59, 7  ;;  %v2230_v48 = vsel %vm2219_vm0, %v6786_v35, %v1573_v56  ;;  %v2231_v16 = vsel %vm2219_vm0, %v5328_v49, %v1574_v25  ;;  %v6788_v25 = vld [vmem:[#allocation3_spill] sm:$0xff] }
  0xe5   : > { %v2247_v58 = vsel %vm2236_vm1, %v2230_v48, %v1621_v13  ;;  %v2248_v41 = vsel %vm2236_vm1, %v2231_v16, %v1622_v52  ;;  %v2348_v8 = vsel %vm2219_vm0, %v1909_v4, %v1957_v21  ;;  %v2349_v19 = vsel %vm2219_vm0, %v1910_v5, %v1958_v30 }
  0xe6   : > { %v2264_v23 = vsel %vm2253_vm2, %v2247_v58, %v1669_v45  ;;  %v2265_v43 = vsel %vm2253_vm2, %v2248_v41, %v1670_v33  ;;  %v2364_v44 = vsel %vm2236_vm1, %v2348_v8, %v2005_v50  ;;  %v2365_v18 = vsel %vm2236_vm1, %v2349_v19, %v2006_v1 }
  0xe7   : > { %v2281_v35 = vsel %vm2270_vm3, %v2264_v23, %v1717_v60  ;;  %v2282_v49 = vsel %vm2270_vm3, %v2265_v43, %v1718_v12  ;;  %v2380_v7 = vsel %vm2253_vm2, %v2364_v44, %v2053_v62  ;;  %v2381_v15 = vsel %vm2253_vm2, %v2365_v18, %v2054_v38 }
  0xe8   : > { %v2298_v39 = vsel %vm2287_vm4, %v2281_v35, %v1765_v31  ;;  %v2299_v46 = vsel %vm2287_vm4, %v2282_v49, %v1766_v9  ;;  %v2396_v2 = vsel %vm2270_vm3, %v2380_v7, %v2101_v32  ;;  %v2397_v57 = vsel %vm2270_vm3, %v2381_v15, %v2102_v51 }
  0xe9   : > { %v2315_v63 = vsel %vm2304_vm5, %v2298_v39, %v1813_v54  ;;  %v2316_v36 = vsel %vm2304_vm5, %v2299_v46, %v1814_v28  ;;  %v2412_v3 = vsel %vm2287_vm4, %v2396_v2, %v2149_v55  ;;  %v2413_v34 = vsel %vm2287_vm4, %v2397_v57, %v2150_v17 }
  0xea   : > { %v2332_v42 = vsel %vm2321_vm6, %v2315_v63, %v1861_v11  ;;  %v2333_v0 = vsel %vm2321_vm6, %v2316_v36, %v1862_v53  ;;  %v2428_v61 = vsel %vm2304_vm5, %v2412_v3, %v1461_v14  ;;  %v2429_v22 = vsel %vm2304_vm5, %v2413_v34, %v1462_v29 }
  0xeb   : > { %v2444_v10 = vsel %vm2321_vm6, %v2428_v61, %v2197_v24  ;;  %v2445_v26 = vsel %vm2321_vm6, %v2429_v22, %v2198_v40  ;;  %v3309_v6 = vmax.f32 %v2332_v42, %v2333_v0  ;;  %v5675_v27 = vmul.f32 0.53333336, %v6787_v47 }
  0xec   : > { %v3310_v56 = vmax.f32 %v2444_v10, %v2445_v26  ;;  %v5678_v13 = vmul.f32 0.53333336, %v6788_v25  ;;  %v5681_v52 = vmul.f32 0.46666667, %v6787_v47  ;;  %v5684_v37 = vmul.f32 0.46666667, %v6788_v25 }
  0xed   : > { %v3501_v14 = vcombine.high %v3309_v6, %v3309_v6  ;;  %v3508_v29 = vrot.slane %v3309_v6, %v4913_v20  ;;  %v5688_v59 = vmul.f32 0.06666667, %v6787_v47  ;;  %v5691_v45 = vmul.f32 0.06666667, %v6788_v25 }
  0xee   : > { %v3518_v33 = vcombine.high %v3310_v56, %v3310_v56  ;;  %v3525_v60 = vrot.slane %v3310_v56, %v4913_v20  ;;  %v400_v12 = vrot.slane %v5681_v52, 1  ;;  %v401_v31 = vrot.slane %v5684_v37, 1 }
  0xef   : > { %v3515_v9 = vrot.slane %v3501_v14, %v4913_v20  ;;  %v3516_v54 = vcombine.high %v3508_v29, %v3508_v29  ;;  %v3947_v28 = vsel %vm2850_vm7, %v3508_v29, -inf  ;;  %v5699_v11 = vmul.f32 0.93333334, %v6787_v47 }
  0xf0   : > { %v3532_v53 = vrot.slane %v3518_v33, %v4913_v20  ;;  %v3533_v4 = vcombine.high %v3525_v60, %v3525_v60  ;;  %v3948_v5 = vrot.slane %v3947_v28, 4  ;;  %v3975_v21 = vsel %vm2850_vm7, %v3525_v60, -inf }
  0xf1   : > { %v3517_v30 = vcombine.high %v3515_v9, %v3515_v9  ;;  %v3954_v50 = vsel %vm2850_vm7, %v3516_v54, -inf  ;;  %v3961_v1 = vsel %vm2850_vm7, %v3515_v9, -inf  ;;  %v3976_v62 = vrot.slane %v3975_v21, 4 }
  0xf2   : > { %v3534_v38 = vcombine.high %v3532_v53, %v3532_v53  ;;  %v3949_v32 = vmax.f32 %v3947_v28, %v3948_v5  ;;  %v3955_v51 = vrot.slane %v3954_v50, 4  ;;  %v3962_v55 = vrot.slane %v3961_v1, 4 }
  0xf3   : > { %v3968_v17 = vsel %vm2850_vm7, %v3517_v30, -inf  ;;  %v3977_v24 = vmax.f32 %v3975_v21, %v3976_v62  ;;  %v3982_v40 = vsel %vm2850_vm7, %v3533_v4, -inf  ;;  %v3989_v48 = vsel %vm2850_vm7, %v3532_v53, -inf }
  0xf4   : > { %v3950_v16 = vrot.slane %v3949_v32, 2  ;;  %v3956_v58 = vmax.f32 %v3954_v50, %v3955_v51  ;;  %v3963_v41 = vmax.f32 %v3961_v1, %v3962_v55  ;;  %v3969_v8 = vrot.slane %v3968_v17, 4 }
  0xf5   : > { %v3978_v19 = vrot.slane %v3977_v24, 2  ;;  %v3983_v23 = vrot.slane %v3982_v40, 4  ;;  %v3990_v43 = vrot.slane %v3989_v48, 4  ;;  %v3996_v44 = vsel %vm2850_vm7, %v3534_v38, -inf }
  0xf6   : > { %v3951_v18 = vmax.f32 %v3949_v32, %v3950_v16  ;;  %v3957_v35 = vrot.slane %v3956_v58, 2  ;;  %v3964_v49 = vrot.slane %v3963_v41, 2  ;;  %v3970_v7 = vmax.f32 %v3968_v17, %v3969_v8 }
  0xf7   : > { %v3979_v15 = vmax.f32 %v3977_v24, %v3978_v19  ;;  %v3984_v39 = vmax.f32 %v3982_v40, %v3983_v23  ;;  %v3991_v46 = vmax.f32 %v3989_v48, %v3990_v43  ;;  %v3997_v2 = vrot.slane %v3996_v44, 4 }
  0xf8   : > { %v3952_v57 = vrot.slane %v3951_v18, 1  ;;  %v3958_v63 = vmax.f32 %v3956_v58, %v3957_v35  ;;  %v3965_v36 = vmax.f32 %v3963_v41, %v3964_v49  ;;  %v3971_v3 = vrot.slane %v3970_v7, 2 }
  0xf9   : > { %v3980_v34 = vrot.slane %v3979_v15, 1  ;;  %v3985_v42 = vrot.slane %v3984_v39, 2  ;;  %v3992_v0 = vrot.slane %v3991_v46, 2  ;;  %v3998_v61 = vmax.f32 %v3996_v44, %v3997_v2 }
  0xfa   : > { %v3953_v22 = vmax.f32 %v3951_v18, %v3952_v57  ;;  %v3959_v10 = vrot.slane %v3958_v63, 1  ;;  %v3966_v26 = vrot.slane %v3965_v36, 1  ;;  %v3972_v6 = vmax.f32 %v3970_v7, %v3971_v3 }
  0xfb   : > { %v3981_v56 = vmax.f32 %v3979_v15, %v3980_v34  ;;  %v3986_v14 = vmax.f32 %v3984_v39, %v3985_v42  ;;  %v3993_v29 = vmax.f32 %v3991_v46, %v3992_v0  ;;  %v3999_v33 = vrot.slane %v3998_v61, 2 }
  0xfc   : > { %v3960_v60 = vmax.f32 %v3958_v63, %v3959_v10  ;;  %v3967_v9 = vmax.f32 %v3965_v36, %v3966_v26  ;;  %v3973_v54 = vrot.slane %v3972_v6, 1  ;;  %v5710_v28 = vadd.f32 %v400_v12, %v5675_v27 }
  0xfd   : > { %v3987_v53 = vrot.slane %v3986_v14, 1  ;;  %v3994_v4 = vrot.slane %v3993_v29, 1  ;;  %v4000_v5 = vmax.f32 %v3998_v61, %v3999_v33  ;;  %v5713_v21 = vadd.f32 %v401_v31, %v5678_v13 }
  0xfe   : > { %v3974_v30 = vmax.f32 %v3972_v6, %v3973_v54  ;;  %v4349_v50 = vsel %vm4179_vm8, %v3960_v60, %v3953_v22  ;;  %v5717_v1 = vmul.f32 0.93333334, %v6788_v25  ;;  %v495_v62 = vrot.slane %v5699_v11, 1 }
  0xff   : > { %v3988_v38 = vmax.f32 %v3986_v14, %v3987_v53  ;;  %v3995_v32 = vmax.f32 %v3993_v29, %v3994_v4  ;;  %v4001_v51 = vrot.slane %v4000_v5, 1  ;;  %v4350_v12 = vsel %vm4181_vm9, %v3967_v9, %v4349_v50 }
 0x100   : > { %v4351_v55 = vsel %vm4183_vm10, %v3974_v30, %v4350_v12  ;;  %v496_v17 = vrot.slane %v5717_v1, 1  ;;  %v5724_v31 = vadd.f32 %v495_v62, %v5688_v59  ;;  %v5727_v24 = vmul.f32 0.6, %v6787_v47 }
 0x101   : > { %v4002_v40 = vmax.f32 %v4000_v5, %v4001_v51  ;;  %v4352_v48 = vsel %vm4185_vm11, %v3981_v56, %v4351_v55  ;;  %v5731_v16 = vmul.f32 0.6, %v6788_v25  ;;  %v5734_v58 = vmul.f32 0.4, %v6787_v47 }
 0x102   : > { %v4353_v41 = vsel %vm4187_vm12, %v3988_v38, %v4352_v48  ;;  %v5738_v8 = vadd.f32 %v496_v17, %v5691_v45  ;;  %v560_v19 = vmul.f32 0.4, %v6788_v25  ;;  %v639_v23 = vmul.f32 0.13333334, %v6787_v47 }
 0x103   : > { %v4354_v43 = vsel %vm4189_vm13, %v3995_v32, %v4353_v41  ;;  %v591_v44 = vrot.slane %v5734_v58, 1  ;;  %v640_v18 = vmul.f32 0.13333334, %v6788_v25  ;;  %v655_v35 = vmul.f32 0.8666667, %v6787_v47 }
 0x104   : > { %v4355_v49 = vsel %vm4191_vm14, %v4002_v40, %v4354_v43  ;;  %v592_v7 = vrot.slane %v560_v19, 1  ;;  %v656_v15 = vmul.f32 0.8666667, %v6788_v25  ;;  %v735_v39 = vmul.f32 0.6666667, %v6787_v47 }
 0x105   : > { %4380 = vrot.lane.b32.xlu1 %v4355_v49, %s4839_s27  ;;  %v5751_v46 = vadd.f32 %v591_v44, %v5727_v24  ;;  %v687_v2 = vrot.slane %v655_v35, 1  ;;  %v736_v57 = vmul.f32 0.6666667, %v6788_v25  ;;  %v751_v63 = vmul.f32 0.33333334, %v6787_v47 }
 0x106   : > { %v5756_v36 = vadd.f32 %v592_v7, %v5731_v16  ;;  %v688_v3 = vrot.slane %v656_v15, 1  ;;  %v752_v34 = vmul.f32 0.33333334, %v6788_v25  ;;  %v831_v42 = vmul.f32 0.2, %v6787_v47 }
 0x107   : > { %v5760_v0 = vadd.f32 %v687_v2, %v639_v23  ;;  %v783_v61 = vrot.slane %v751_v63, 1  ;;  %v832_v22 = vmul.f32 0.2, %v6788_v25  ;;  %v847_v10 = vmul.f32 0.8, %v6787_v47 }
 0x108   : > { %v5764_v26 = vadd.f32 %v688_v3, %v640_v18  ;;  %v784_v6 = vrot.slane %v752_v34, 1  ;;  %v848_v56 = vmul.f32 0.8, %v6788_v25  ;;  %v927_v14 = vmul.f32 0.73333335, %v6787_v47 }
 0x109   : > { %v5768_v29 = vadd.f32 %v783_v61, %v735_v39  ;;  %v879_v33 = vrot.slane %v847_v10, 1  ;;  %v928_v60 = vmul.f32 0.73333335, %v6788_v25  ;;  %v943_v9 = vmul.f32 0.26666668, %v6787_v47 }
 0x10a   : > { %v5772_v54 = vadd.f32 %v784_v6, %v736_v57  ;;  %v880_v53 = vrot.slane %v848_v56, 1  ;;  %v944_v4 = vmul.f32 0.26666668, %v6788_v25  ;;  %v1039_v5 = vrot.slane %v927_v14, 1 }
 0x10b   : > { %v5775_v30 = vadd.f32 %v879_v33, %v831_v42  ;;  %v975_v50 = vrot.slane %v943_v9, 1  ;;  %v1040_v62 = vrot.slane %v928_v60, 1  ;;  %v1103_v38 = vrot.slane %v831_v42, 1 }
 0x10c   : > { %v5777_v32 = vadd.f32 %v880_v53, %v832_v22  ;;  %v976_v51 = vrot.slane %v944_v4, 1  ;;  %v5779_v12 = vadd.f32 %v1039_v5, %v943_v9  ;;  %v1104_v55 = vrot.slane %v832_v22, 1 }
 0x10d   : > { %v5781_v17 = vadd.f32 %v975_v50, %v927_v14  ;;  %v5783_v40 = vadd.f32 %v1040_v62, %v944_v4  ;;  %v1135_v48 = vadd.f32 %v1103_v38, %v847_v10  ;;  %v1167_v41 = vrot.slane %v735_v39, 1 }
 0x10e   : > { %v5785_v43 = vadd.f32 %v976_v51, %v928_v60  ;;  %v1136_v44 = vadd.f32 %v1104_v55, %v848_v56  ;;  %v1168_v49 = vrot.slane %v736_v57, 1  ;;  %v1231_v7 = vrot.slane %v639_v23, 1 }
 0x10f   : > { %v1199_v2 = vadd.f32 %v1167_v41, %v751_v63  ;;  %v1232_v3 = vrot.slane %v640_v18, 1  ;;  %v1295_v42 = vrot.slane %v5727_v24, 1  ;;  %v1296_v61 = vrot.slane %v5731_v16, 1 }
 0x110   : > { %v1200_v6 = vadd.f32 %v1168_v49, %v752_v34  ;;  %v1263_v33 = vadd.f32 %v1231_v7, %v655_v35  ;;  %v1359_v22 = vrot.slane %v5688_v59, 1  ;;  %v1360_v14 = vrot.slane %v5691_v45, 1 }
 0x111   : > { %v1264_v9 = vadd.f32 %v1232_v3, %v656_v15  ;;  %v1327_v39 = vadd.f32 %v1295_v42, %v5734_v58  ;;  %v1328_v10 = vadd.f32 %v1296_v61, %v560_v19  ;;  %v1423_v56 = vrot.slane %v5675_v27, 1 }
 0x112   : > { %v1391_v23 = vadd.f32 %v1359_v22, %v5699_v11  ;;  %v1392_v18 = vadd.f32 %v1360_v14, %v5717_v1  ;;  %v1424_v24 = vrot.slane %v5678_v13, 1  ;;  %v1471_v16 = vmul.f32 0.0, %v6787_v47 }
 0x113   : > { %v1455_v35 = vadd.f32 %v1423_v56, %v5681_v52  ;;  %v1472_v59 = vmul.f32 0.0, %v6788_v25  ;;  %v1503_v45 = vrot.slane %v6787_v47, 1  ;;  %v1504_v15 = vrot.slane %v6788_v25, 1 }
 0x114   : > { %v1456_v58 = vadd.f32 %v1424_v24, %v5684_v37  ;;  %v1567_v27 = vrot.slane %v5710_v28, 7  ;;  %v1568_v11 = vrot.slane %v5713_v21, 7  ;;  %v1615_v1 = vrot.slane %v5724_v31, 6 }
 0x115   : > { %v1535_v19 = vadd.f32 %v1503_v45, %v1471_v16  ;;  %v1536_v13 = vadd.f32 %v1504_v15, %v1472_v59  ;;  %v1616_v57 = vrot.slane %v5738_v8, 6  ;;  %v1663_v52 = vrot.slane %v5751_v46, 6  ;;  %v6789_v59 = vld [vmem:[#allocation8_spill] sm:$0xff] }
 0x116   : > { %v1664_v63 = vrot.slane %v5756_v36, 6  ;;  %v1711_v34 = vrot.slane %v5760_v0, 5  ;;  %v1712_v60 = vrot.slane %v5764_v26, 5  ;;  %v1759_v37 = vrot.slane %v5768_v29, 5 }
 0x117   : > { %v1760_v28 = vrot.slane %v5772_v54, 5  ;;  %v1807_v21 = vrot.slane %v5775_v30, 4  ;;  %v1808_v31 = vrot.slane %v5777_v32, 4  ;;  %v1855_v53 = vrot.slane %v5781_v17, 4 }
 0x118   : > { %v1856_v8 = vrot.slane %v5785_v43, 4  ;;  %v1903_v46 = vrot.slane %v5779_v12, 3  ;;  %v1904_v36 = vrot.slane %v5783_v40, 3  ;;  %v1951_v4 = vrot.slane %v1135_v48, 3 }
 0x119   : > { %v1952_v0 = vrot.slane %v1136_v44, 3  ;;  %v1999_v5 = vrot.slane %v1199_v2, 2  ;;  %v2000_v26 = vrot.slane %v1200_v6, 2  ;;  %v2047_v50 = vrot.slane %v1263_v33, 2 }
 0x11a   : > { %v2048_v29 = vrot.slane %v1264_v9, 2  ;;  %v2095_v62 = vrot.slane %v1327_v39, 1  ;;  %v2096_v54 = vrot.slane %v1328_v10, 1  ;;  %v2143_v38 = vrot.slane %v1391_v23, 1 }
 0x11b   : > { %v2144_v30 = vrot.slane %v1392_v18, 1  ;;  %v2191_v51 = vrot.slane %v1535_v19, 7  ;;  %v2192_v32 = vrot.slane %v1536_v13, 7  ;;  %v2224_v55 = vsel %vm2219_vm0, %v6787_v47, %v1567_v27 }
 0x11c   : > { %v2225_v12 = vsel %vm2219_vm0, %v6788_v25, %v1568_v11  ;;  %v2241_v17 = vsel %vm2236_vm1, %v2224_v55, %v1615_v1  ;;  %v2342_v40 = vsel %vm2219_vm0, %v1903_v46, %v1951_v4  ;;  %v2343_v48 = vsel %vm2219_vm0, %v1904_v36, %v1952_v0  ;;  %v6790_v11 = vld [vmem:[#allocation9_spill] sm:$0xff] }
 0x11d   : > { %v2242_v41 = vsel %vm2236_vm1, %v2225_v12, %v1616_v57  ;;  %v2258_v43 = vsel %vm2253_vm2, %v2241_v17, %v1663_v52  ;;  %v2358_v44 = vsel %vm2236_vm1, %v2342_v40, %v1999_v5  ;;  %v2359_v49 = vsel %vm2236_vm1, %v2343_v48, %v2000_v26 }
 0x11e   : > { %v2259_v7 = vsel %vm2253_vm2, %v2242_v41, %v1664_v63  ;;  %v2275_v47 = vsel %vm2270_vm3, %v2258_v43, %v1711_v34  ;;  %v2374_v25 = vsel %vm2253_vm2, %v2358_v44, %v2047_v50  ;;  %v2375_v2 = vsel %vm2253_vm2, %v2359_v49, %v2048_v29 }
 0x11f   : > { %v2276_v3 = vsel %vm2270_vm3, %v2259_v7, %v1712_v60  ;;  %v2292_v42 = vsel %vm2287_vm4, %v2275_v47, %v1759_v37  ;;  %v2390_v61 = vsel %vm2270_vm3, %v2374_v25, %v2095_v62  ;;  %v2391_v6 = vsel %vm2270_vm3, %v2375_v2, %v2096_v54 }
 0x120   : > { %v2293_v33 = vsel %vm2287_vm4, %v2276_v3, %v1760_v28  ;;  %v2309_v22 = vsel %vm2304_vm5, %v2292_v42, %v1807_v21  ;;  %v2406_v14 = vsel %vm2287_vm4, %v2390_v61, %v2143_v38  ;;  %v2407_v9 = vsel %vm2287_vm4, %v2391_v6, %v2144_v30 }
 0x121   : > { %v2310_v39 = vsel %vm2304_vm5, %v2293_v33, %v1808_v31  ;;  %v2326_v10 = vsel %vm2321_vm6, %v2309_v22, %v1855_v53  ;;  %v2422_v56 = vsel %vm2304_vm5, %v2406_v14, %v1455_v35  ;;  %v2423_v23 = vsel %vm2304_vm5, %v2407_v9, %v1456_v58 }
 0x122   : > { %v2327_v18 = vsel %vm2321_vm6, %v2310_v39, %v1856_v8  ;;  %v2438_v24 = vsel %vm2321_vm6, %v2422_v56, %v2191_v51  ;;  %v2439_v16 = vsel %vm2321_vm6, %v2423_v23, %v2192_v32  ;;  %v5849_v45 = vmul.f32 0.53333336, %v6789_v59 }
 0x123   : > { %v3303_v15 = vmax.f32 %v2326_v10, %v2327_v18  ;;  %v3304_v27 = vmax.f32 %v2438_v24, %v2439_v16  ;;  %v5852_v1 = vmul.f32 0.53333336, %v6790_v11  ;;  %v5855_v19 = vmul.f32 0.46666667, %v6789_v59 }
 0x124   : > { %v5858_v35 = vmul.f32 0.46666667, %v6790_v11  ;;  %v5861_v58 = vmul.f32 0.06666667, %v6789_v59  ;;  %v5864_v13 = vmul.f32 0.06666667, %v6790_v11 }
 0x125   : > { %v3399_v57 = vcombine.high %v3303_v15, %v3303_v15  ;;  %v3406_v52 = vrot.slane %v3303_v15, %v4913_v20  ;;  %v3416_v63 = vcombine.high %v3304_v27, %v3304_v27  ;;  %v3423_v34 = vrot.slane %v3304_v27, %v4913_v20 }
 0x126   : > { %v408_v60 = vrot.slane %v5855_v19, 1  ;;  %v409_v37 = vrot.slane %v5858_v35, 1  ;;  %v5871_v28 = vmul.f32 0.93333334, %v6789_v59  ;;  %v5874_v21 = vmul.f32 0.93333334, %v6790_v11 }
 0x127   : > { %v3413_v31 = vrot.slane %v3399_v57, %v4913_v20  ;;  %v3414_v53 = vcombine.high %v3406_v52, %v3406_v52  ;;  %v3430_v8 = vrot.slane %v3416_v63, %v4913_v20  ;;  %v3431_v46 = vcombine.high %v3423_v34, %v3423_v34 }
 0x128   : > { %v3779_v36 = vsel %vm2850_vm7, %v3406_v52, -inf  ;;  %v3807_v4 = vsel %vm2850_vm7, %v3423_v34, -inf  ;;  %v5881_v0 = vadd.f32 %v408_v60, %v5849_v45  ;;  %v5884_v5 = vadd.f32 %v409_v37, %v5852_v1 }
 0x129   : > { %v3415_v26 = vcombine.high %v3413_v31, %v3413_v31  ;;  %v3432_v50 = vcombine.high %v3430_v8, %v3430_v8  ;;  %v3780_v29 = vrot.slane %v3779_v36, 4  ;;  %v3786_v62 = vsel %vm2850_vm7, %v3414_v53, -inf }
 0x12a   : > { %v3787_v54 = vrot.slane %v3786_v62, 4  ;;  %v3793_v38 = vsel %vm2850_vm7, %v3413_v31, -inf  ;;  %v3808_v30 = vrot.slane %v3807_v4, 4  ;;  %v3814_v51 = vsel %vm2850_vm7, %v3431_v46, -inf }
 0x12b   : > { %v3781_v32 = vmax.f32 %v3779_v36, %v3780_v29  ;;  %v3794_v55 = vrot.slane %v3793_v38, 4  ;;  %v3800_v12 = vsel %vm2850_vm7, %v3415_v26, -inf  ;;  %v3815_v17 = vrot.slane %v3814_v51, 4 }
 0x12c   : > { %v3788_v40 = vmax.f32 %v3786_v62, %v3787_v54  ;;  %v3801_v48 = vrot.slane %v3800_v12, 4  ;;  %v3809_v41 = vmax.f32 %v3807_v4, %v3808_v30  ;;  %v3821_v43 = vsel %vm2850_vm7, %v3430_v8, -inf }
 0x12d   : > { %v3782_v44 = vrot.slane %v3781_v32, 2  ;;  %v3795_v49 = vmax.f32 %v3793_v38, %v3794_v55  ;;  %v3816_v7 = vmax.f32 %v3814_v51, %v3815_v17  ;;  %v3822_v47 = vrot.slane %v3821_v43, 4 }
 0x12e   : > { %v3789_v25 = vrot.slane %v3788_v40, 2  ;;  %v3802_v2 = vmax.f32 %v3800_v12, %v3801_v48  ;;  %v3810_v3 = vrot.slane %v3809_v41, 2  ;;  %v3828_v42 = vsel %vm2850_vm7, %v3432_v50, -inf }
 0x12f   : > { %v3783_v61 = vmax.f32 %v3781_v32, %v3782_v44  ;;  %v3796_v6 = vrot.slane %v3795_v49, 2  ;;  %v3817_v33 = vrot.slane %v3816_v7, 2  ;;  %v3823_v22 = vmax.f32 %v3821_v43, %v3822_v47 }
 0x130   : > { %v3790_v14 = vmax.f32 %v3788_v40, %v3789_v25  ;;  %v3803_v9 = vrot.slane %v3802_v2, 2  ;;  %v3811_v39 = vmax.f32 %v3809_v41, %v3810_v3  ;;  %v3829_v10 = vrot.slane %v3828_v42, 4 }
 0x131   : > { %v3784_v56 = vrot.slane %v3783_v61, 1  ;;  %v3797_v23 = vmax.f32 %v3795_v49, %v3796_v6  ;;  %v3818_v18 = vmax.f32 %v3816_v7, %v3817_v33  ;;  %v3824_v24 = vrot.slane %v3823_v22, 2 }
 0x132   : > { %v3791_v16 = vrot.slane %v3790_v14, 1  ;;  %v3804_v15 = vmax.f32 %v3802_v2, %v3803_v9  ;;  %v3812_v27 = vrot.slane %v3811_v39, 1  ;;  %v3830_v57 = vmax.f32 %v3828_v42, %v3829_v10 }
 0x133   : > { %v3785_v52 = vmax.f32 %v3783_v61, %v3784_v56  ;;  %v3798_v63 = vrot.slane %v3797_v23, 1  ;;  %v3819_v34 = vrot.slane %v3818_v18, 1  ;;  %v3825_v60 = vmax.f32 %v3823_v22, %v3824_v24 }
 0x134   : > { %v3792_v37 = vmax.f32 %v3790_v14, %v3791_v16  ;;  %v3805_v31 = vrot.slane %v3804_v15, 1  ;;  %v3813_v53 = vmax.f32 %v3811_v39, %v3812_v27  ;;  %v3831_v8 = vrot.slane %v3830_v57, 2 }
 0x135   : > { %v3799_v46 = vmax.f32 %v3797_v23, %v3798_v63  ;;  %v3820_v36 = vmax.f32 %v3818_v18, %v3819_v34  ;;  %v3826_v4 = vrot.slane %v3825_v60, 1  ;;  %v503_v26 = vrot.slane %v5871_v28, 1 }
 0x136   : > { %v3806_v50 = vmax.f32 %v3804_v15, %v3805_v31  ;;  %v3832_v29 = vmax.f32 %v3830_v57, %v3831_v8  ;;  %v4328_v62 = vsel %vm4179_vm8, %v3792_v37, %v3785_v52  ;;  %v504_v54 = vrot.slane %v5874_v21, 1 }
 0x137   : > { %v3827_v38 = vmax.f32 %v3825_v60, %v3826_v4  ;;  %v4329_v30 = vsel %vm4181_vm9, %v3799_v46, %v4328_v62  ;;  %v5897_v51 = vadd.f32 %v503_v26, %v5861_v58  ;;  %v5900_v32 = vmul.f32 0.6, %v6789_v59 }
 0x138   : > { %v3833_v55 = vrot.slane %v3832_v29, 1  ;;  %v4330_v12 = vsel %vm4183_vm10, %v3806_v50, %v4329_v30  ;;  %v5904_v17 = vadd.f32 %v504_v54, %v5864_v13  ;;  %v5907_v40 = vmul.f32 0.6, %v6790_v11 }
 0x139   : > { %v4331_v48 = vsel %vm4185_vm11, %v3813_v53, %v4330_v12  ;;  %v567_v41 = vmul.f32 0.4, %v6789_v59  ;;  %v5912_v43 = vmul.f32 0.4, %v6790_v11  ;;  %v647_v44 = vmul.f32 0.13333334, %v6789_v59 }
 0x13a   : > { %v3834_v49 = vmax.f32 %v3832_v29, %v3833_v55  ;;  %v4332_v7 = vsel %vm4187_vm12, %v3820_v36, %v4331_v48  ;;  %v648_v47 = vmul.f32 0.13333334, %v6790_v11  ;;  %v663_v25 = vmul.f32 0.8666667, %v6789_v59 }
 0x13b   : > { %v4333_v2 = vsel %vm4189_vm13, %v3827_v38, %v4332_v7  ;;  %v599_v3 = vrot.slane %v567_v41, 1  ;;  %v600_v42 = vrot.slane %v5912_v43, 1  ;;  %v664_v61 = vmul.f32 0.8666667, %v6790_v11 }
 0x13c   : > { %v4334_v6 = vsel %vm4191_vm14, %v3834_v49, %v4333_v2  ;;  %v695_v33 = vrot.slane %v663_v25, 1  ;;  %v743_v22 = vmul.f32 0.6666667, %v6789_v59  ;;  %v744_v14 = vmul.f32 0.6666667, %v6790_v11 }
 0x13d   : > { %4374 = vrot.lane.b32.xlu0 %v4334_v6, %s4839_s27  ;;  %v5926_v9 = vadd.f32 %v599_v3, %v5900_v32  ;;  %v5929_v39 = vadd.f32 %v600_v42, %v5907_v40  ;;  %v696_v10 = vrot.slane %v664_v61, 1  ;;  %v759_v56 = vmul.f32 0.33333334, %v6789_v59 }
 0x13e   : > { %v5932_v23 = vadd.f32 %v695_v33, %v647_v44  ;;  %v760_v18 = vmul.f32 0.33333334, %v6790_v11  ;;  %v839_v24 = vmul.f32 0.2, %v6789_v59  ;;  %v840_v16 = vmul.f32 0.2, %v6790_v11 }
 0x13f   : > { %v5937_v15 = vadd.f32 %v696_v10, %v648_v47  ;;  %v791_v27 = vrot.slane %v759_v56, 1  ;;  %v855_v57 = vmul.f32 0.8, %v6789_v59  ;;  %v856_v52 = vmul.f32 0.8, %v6790_v11 }
 0x140   : > { %v792_v63 = vrot.slane %v760_v18, 1  ;;  %v935_v34 = vmul.f32 0.73333335, %v6789_v59  ;;  %v936_v60 = vmul.f32 0.73333335, %v6790_v11  ;;  %v1111_v37 = vrot.slane %v839_v24, 1 }
 0x141   : > { %v5943_v31 = vadd.f32 %v791_v27, %v743_v22  ;;  %v887_v53 = vrot.slane %v855_v57, 1  ;;  %v888_v8 = vrot.slane %v856_v52, 1  ;;  %v951_v46 = vmul.f32 0.26666668, %v6789_v59 }
 0x142   : > { %v5946_v36 = vadd.f32 %v792_v63, %v744_v14  ;;  %v952_v4 = vmul.f32 0.26666668, %v6790_v11  ;;  %v1047_v26 = vrot.slane %v935_v34, 1  ;;  %v1048_v50 = vrot.slane %v936_v60, 1 }
 0x143   : > { %v5949_v29 = vadd.f32 %v887_v53, %v839_v24  ;;  %v5951_v62 = vadd.f32 %v888_v8, %v840_v16  ;;  %v983_v54 = vrot.slane %v951_v46, 1  ;;  %v1112_v38 = vrot.slane %v840_v16, 1 }
 0x144   : > { %v984_v30 = vrot.slane %v952_v4, 1  ;;  %v5953_v55 = vadd.f32 %v1047_v26, %v951_v46  ;;  %v5955_v12 = vadd.f32 %v1048_v50, %v952_v4  ;;  %v1143_v48 = vadd.f32 %v1111_v37, %v855_v57 }
 0x145   : > { %v5957_v49 = vadd.f32 %v983_v54, %v935_v34  ;;  %v5959_v7 = vadd.f32 %v1112_v38, %v856_v52  ;;  %v1175_v2 = vrot.slane %v743_v22, 1  ;;  %v1176_v3 = vrot.slane %v744_v14, 1 }
 0x146   : > { %v5961_v42 = vadd.f32 %v984_v30, %v936_v60  ;;  %v1239_v6 = vrot.slane %v647_v44, 1  ;;  %v1240_v33 = vrot.slane %v648_v47, 1  ;;  %v1303_v10 = vrot.slane %v5900_v32, 1 }
 0x147   : > { %v1207_v24 = vadd.f32 %v1175_v2, %v759_v56  ;;  %v1208_v16 = vadd.f32 %v1176_v3, %v760_v18  ;;  %v1304_v27 = vrot.slane %v5907_v40, 1  ;;  %v1367_v63 = vrot.slane %v5861_v58, 1 }
 0x148   : > { %v1271_v53 = vadd.f32 %v1239_v6, %v663_v25  ;;  %v1272_v57 = vadd.f32 %v1240_v33, %v664_v61  ;;  %v1335_v34 = vadd.f32 %v1303_v10, %v567_v41  ;;  %v1368_v52 = vrot.slane %v5864_v13, 1 }
 0x149   : > { %v1336_v22 = vadd.f32 %v1304_v27, %v5912_v43  ;;  %v1399_v14 = vadd.f32 %v1367_v63, %v5871_v28  ;;  %v1431_v44 = vrot.slane %v5849_v45, 1  ;;  %v1432_v47 = vrot.slane %v5852_v1, 1 }
 0x14a   : > { %v1400_v32 = vadd.f32 %v1368_v52, %v5874_v21  ;;  %v1479_v56 = vmul.f32 0.0, %v6789_v59  ;;  %v1480_v40 = vmul.f32 0.0, %v6790_v11  ;;  %v1511_v58 = vrot.slane %v6789_v59, 1 }
 0x14b   : > { %v1463_v41 = vadd.f32 %v1431_v44, %v5855_v19  ;;  %v1464_v13 = vadd.f32 %v1432_v47, %v5858_v35  ;;  %v1512_v43 = vrot.slane %v6790_v11, 1  ;;  %v1575_v28 = vrot.slane %v5881_v0, 7 }
 0x14c   : > { %v1543_v25 = vadd.f32 %v1511_v58, %v1479_v56  ;;  %v1576_v45 = vrot.slane %v5884_v5, 7  ;;  %v1623_v1 = vrot.slane %v5897_v51, 6  ;;  %v1624_v21 = vrot.slane %v5904_v17, 6  ;;  %v6791_v58 = vld [vmem:[#allocation4_spill] sm:$0xff] }
 0x14d   : > { %v1544_v61 = vadd.f32 %v1512_v43, %v1480_v40  ;;  %v1671_v18 = vrot.slane %v5926_v9, 6  ;;  %v1672_v60 = vrot.slane %v5929_v39, 6  ;;  %v1719_v19 = vrot.slane %v5932_v23, 5 }
 0x14e   : > { %v1720_v35 = vrot.slane %v5937_v15, 5  ;;  %v1767_v37 = vrot.slane %v5943_v31, 5  ;;  %v1768_v0 = vrot.slane %v5946_v36, 5  ;;  %v1815_v8 = vrot.slane %v5949_v29, 4 }
 0x14f   : > { %v1816_v5 = vrot.slane %v5951_v62, 4  ;;  %v1863_v51 = vrot.slane %v5957_v49, 4  ;;  %v1864_v17 = vrot.slane %v5961_v42, 4  ;;  %v1911_v9 = vrot.slane %v5953_v55, 3 }
 0x150   : > { %v1912_v39 = vrot.slane %v5955_v12, 3  ;;  %v1959_v46 = vrot.slane %v1143_v48, 3  ;;  %v1960_v23 = vrot.slane %v5959_v7, 3  ;;  %v2007_v15 = vrot.slane %v1207_v24, 2 }
 0x151   : > { %v2008_v4 = vrot.slane %v1208_v16, 2  ;;  %v2055_v31 = vrot.slane %v1271_v53, 2  ;;  %v2056_v26 = vrot.slane %v1272_v57, 2  ;;  %v2103_v36 = vrot.slane %v1335_v34, 1 }
 0x152   : > { %v2104_v50 = vrot.slane %v1336_v22, 1  ;;  %v2151_v29 = vrot.slane %v1399_v14, 1  ;;  %v2152_v54 = vrot.slane %v1400_v32, 1  ;;  %v2199_v62 = vrot.slane %v1543_v25, 7 }
 0x153   : > { %v2200_v38 = vrot.slane %v1544_v61, 7  ;;  %v2232_v30 = vsel %vm2219_vm0, %v6789_v59, %v1575_v28  ;;  %v2233_v55 = vsel %vm2219_vm0, %v6790_v11, %v1576_v45  ;;  %v2350_v12 = vsel %vm2219_vm0, %v1911_v9, %v1959_v46  ;;  %v6792_v28 = vld [vmem:[#allocation5_spill] sm:$0xff] }
 0x154   : > { %v2249_v48 = vsel %vm2236_vm1, %v2232_v30, %v1623_v1  ;;  %v2250_v49 = vsel %vm2236_vm1, %v2233_v55, %v1624_v21  ;;  %v2351_v7 = vsel %vm2219_vm0, %v1912_v39, %v1960_v23  ;;  %v2366_v2 = vsel %vm2236_vm1, %v2350_v12, %v2007_v15 }
 0x155   : > { %v2266_v3 = vsel %vm2253_vm2, %v2249_v48, %v1671_v18  ;;  %v2267_v42 = vsel %vm2253_vm2, %v2250_v49, %v1672_v60  ;;  %v2367_v6 = vsel %vm2236_vm1, %v2351_v7, %v2008_v4  ;;  %v2382_v59 = vsel %vm2253_vm2, %v2366_v2, %v2055_v31  ;;  %v4403_v2 = vld [vmem:[%s6759_s2] sm:$0xff] }
 0x156   : > { %v2283_v11 = vsel %vm2270_vm3, %v2266_v3, %v1719_v19  ;;  %v2284_v33 = vsel %vm2270_vm3, %v2267_v42, %v1720_v35  ;;  %v2383_v10 = vsel %vm2253_vm2, %v2367_v6, %v2056_v26  ;;  %v2398_v24 = vsel %vm2270_vm3, %v2382_v59, %v2103_v36  ;;  %4802 = vmatprep.subr.mxu0 %v4403_v2 }
 0x157   : > { %v2300_v16 = vsel %vm2287_vm4, %v2283_v11, %v1767_v37  ;;  %v2301_v27 = vsel %vm2287_vm4, %v2284_v33, %v1768_v0  ;;  %v2399_v63 = vsel %vm2270_vm3, %v2383_v10, %v2104_v50  ;;  %v2414_v53 = vsel %vm2287_vm4, %v2398_v24, %v2151_v29  ;;  %4816 = vmatprep.subr.mxu1 %v4403_v2 }
 0x158   : > { %v2317_v57 = vsel %vm2304_vm5, %v2300_v16, %v1815_v8  ;;  %v2318_v34 = vsel %vm2304_vm5, %v2301_v27, %v1816_v5  ;;  %v2415_v52 = vsel %vm2287_vm4, %v2399_v63, %v2152_v54  ;;  %v2430_v22 = vsel %vm2304_vm5, %v2414_v53, %v1463_v41  ;;  %4803 = vmatpush3.msra.mxu0 %v4403_v2 }
 0x159   : > { %v2334_v14 = vsel %vm2321_vm6, %v2317_v57, %v1863_v51  ;;  %v2335_v44 = vsel %vm2321_vm6, %v2318_v34, %v1864_v17  ;;  %v2431_v47 = vsel %vm2304_vm5, %v2415_v52, %v1464_v13  ;;  %v2446_v32 = vsel %vm2321_vm6, %v2430_v22, %v2199_v62  ;;  %4817 = vmatpush3.msra.mxu1 %v4403_v2 }
 0x15a   : > { %v2447_v56 = vsel %vm2321_vm6, %v2431_v47, %v2200_v38  ;;  %v3311_v40 = vmax.f32 %v2334_v14, %v2335_v44  ;;  %v6026_v43 = vmul.f32 0.53333336, %v6791_v58  ;;  %v6029_v25 = vmul.f32 0.53333336, %v6792_v28 }
 0x15b   : > { %v3312_v45 = vmax.f32 %v2446_v32, %v2447_v56  ;;  %v6032_v41 = vmul.f32 0.46666667, %v6791_v58  ;;  %v6035_v1 = vmul.f32 0.46666667, %v6792_v28  ;;  %v6038_v13 = vmul.f32 0.06666667, %v6791_v58 }
 0x15c   : > { %v3535_v21 = vcombine.high %v3311_v40, %v3311_v40  ;;  %v3542_v61 = vrot.slane %v3311_v40, %v4913_v20  ;;  %v6042_v18 = vmul.f32 0.06666667, %v6792_v28  ;;  %v6045_v60 = vmul.f32 0.93333334, %v6791_v58 }
 0x15d   : > { %v3552_v19 = vcombine.high %v3312_v45, %v3312_v45  ;;  %v3559_v35 = vrot.slane %v3312_v45, %v4913_v20  ;;  %v402_v37 = vrot.slane %v6032_v41, 1  ;;  %v403_v0 = vrot.slane %v6035_v1, 1 }
 0x15e   : > { %v3549_v8 = vrot.slane %v3535_v21, %v4913_v20  ;;  %v3550_v5 = vcombine.high %v3542_v61, %v3542_v61  ;;  %v4003_v51 = vsel %vm2850_vm7, %v3542_v61, -inf  ;;  %v6053_v17 = vmul.f32 0.93333334, %v6792_v28 }
 0x15f   : > { %v3566_v9 = vrot.slane %v3552_v19, %v4913_v20  ;;  %v3567_v39 = vcombine.high %v3559_v35, %v3559_v35  ;;  %v4004_v46 = vrot.slane %v4003_v51, 4  ;;  %v4031_v23 = vsel %vm2850_vm7, %v3559_v35, -inf }
 0x160   : > { %v3551_v15 = vcombine.high %v3549_v8, %v3549_v8  ;;  %v4010_v4 = vsel %vm2850_vm7, %v3550_v5, -inf  ;;  %v4017_v31 = vsel %vm2850_vm7, %v3549_v8, -inf  ;;  %v4032_v26 = vrot.slane %v4031_v23, 4 }
 0x161   : > { %v3568_v36 = vcombine.high %v3566_v9, %v3566_v9  ;;  %v4005_v50 = vmax.f32 %v4003_v51, %v4004_v46  ;;  %v4011_v29 = vrot.slane %v4010_v4, 4  ;;  %v4018_v54 = vrot.slane %v4017_v31, 4 }
 0x162   : > { %v4024_v62 = vsel %vm2850_vm7, %v3551_v15, -inf  ;;  %v4033_v38 = vmax.f32 %v4031_v23, %v4032_v26  ;;  %v4038_v30 = vsel %vm2850_vm7, %v3567_v39, -inf  ;;  %v4045_v55 = vsel %vm2850_vm7, %v3566_v9, -inf }
 0x163   : > { %v4006_v12 = vrot.slane %v4005_v50, 2  ;;  %v4012_v48 = vmax.f32 %v4010_v4, %v4011_v29  ;;  %v4019_v49 = vmax.f32 %v4017_v31, %v4018_v54  ;;  %v4025_v7 = vrot.slane %v4024_v62, 4 }
 0x164   : > { %v4034_v3 = vrot.slane %v4033_v38, 2  ;;  %v4039_v42 = vrot.slane %v4038_v30, 4  ;;  %v4046_v6 = vrot.slane %v4045_v55, 4  ;;  %v4052_v59 = vsel %vm2850_vm7, %v3568_v36, -inf }
 0x165   : > { %v4007_v11 = vmax.f32 %v4005_v50, %v4006_v12  ;;  %v4013_v33 = vrot.slane %v4012_v48, 2  ;;  %v4020_v10 = vrot.slane %v4019_v49, 2  ;;  %v4026_v24 = vmax.f32 %v4024_v62, %v4025_v7 }
 0x166   : > { %v4035_v16 = vmax.f32 %v4033_v38, %v4034_v3  ;;  %v4040_v27 = vmax.f32 %v4038_v30, %v4039_v42  ;;  %v4047_v63 = vmax.f32 %v4045_v55, %v4046_v6  ;;  %v4053_v53 = vrot.slane %v4052_v59, 4 }
 0x167   : > { %v4008_v57 = vrot.slane %v4007_v11, 1  ;;  %v4014_v34 = vmax.f32 %v4012_v48, %v4013_v33  ;;  %v4021_v52 = vmax.f32 %v4019_v49, %v4020_v10  ;;  %v4027_v22 = vrot.slane %v4026_v24, 2 }
 0x168   : > { %v4036_v14 = vrot.slane %v4035_v16, 1  ;;  %v4041_v44 = vrot.slane %v4040_v27, 2  ;;  %v4048_v47 = vrot.slane %v4047_v63, 2  ;;  %v4054_v32 = vmax.f32 %v4052_v59, %v4053_v53 }
 0x169   : > { %v4009_v56 = vmax.f32 %v4007_v11, %v4008_v57  ;;  %v4015_v40 = vrot.slane %v4014_v34, 1  ;;  %v4022_v45 = vrot.slane %v4021_v52, 1  ;;  %v4028_v21 = vmax.f32 %v4026_v24, %v4027_v22 }
 0x16a   : > { %v4037_v61 = vmax.f32 %v4035_v16, %v4036_v14  ;;  %v4042_v19 = vmax.f32 %v4040_v27, %v4041_v44  ;;  %v4049_v35 = vmax.f32 %v4047_v63, %v4048_v47  ;;  %v4055_v8 = vrot.slane %v4054_v32, 2 }
 0x16b   : > { %v4016_v5 = vmax.f32 %v4014_v34, %v4015_v40  ;;  %v4023_v51 = vmax.f32 %v4021_v52, %v4022_v45  ;;  %v4029_v9 = vrot.slane %v4028_v21, 1  ;;  %v6067_v39 = vadd.f32 %v402_v37, %v6026_v43 }
 0x16c   : > { %v4043_v46 = vrot.slane %v4042_v19, 1  ;;  %v4050_v23 = vrot.slane %v4049_v35, 1  ;;  %v4056_v15 = vmax.f32 %v4054_v32, %v4055_v8  ;;  %v6072_v4 = vadd.f32 %v403_v0, %v6029_v25 }
 0x16d   : > { %v4030_v31 = vmax.f32 %v4028_v21, %v4029_v9  ;;  %v4356_v26 = vsel %vm4179_vm8, %v4016_v5, %v4009_v56  ;;  %v497_v36 = vrot.slane %v6045_v60, 1  ;;  %v498_v50 = vrot.slane %v6053_v17, 1 }
 0x16e   : > { %v4044_v29 = vmax.f32 %v4042_v19, %v4043_v46  ;;  %v4051_v54 = vmax.f32 %v4049_v35, %v4050_v23  ;;  %v4057_v62 = vrot.slane %v4056_v15, 1  ;;  %v4357_v37 = vsel %vm4181_vm9, %v4023_v51, %v4356_v26 }
 0x16f   : > { %v4358_v38 = vsel %vm4183_vm10, %v4030_v31, %v4357_v37  ;;  %v6080_v30 = vadd.f32 %v497_v36, %v6038_v13  ;;  %v6083_v0 = vadd.f32 %v498_v50, %v6042_v18  ;;  %v6086_v55 = vmul.f32 0.6, %v6791_v58 }
 0x170   : > { %v4058_v12 = vmax.f32 %v4056_v15, %v4057_v62  ;;  %v4359_v48 = vsel %vm4185_vm11, %v4037_v61, %v4358_v38  ;;  %v6090_v49 = vmul.f32 0.6, %v6792_v28  ;;  %v561_v7 = vmul.f32 0.4, %v6791_v58 }
 0x171   : > { %v4360_v2 = vsel %vm4187_vm12, %v4044_v29, %v4359_v48  ;;  %v562_v3 = vmul.f32 0.4, %v6792_v28  ;;  %v641_v42 = vmul.f32 0.13333334, %v6791_v58  ;;  %v642_v6 = vmul.f32 0.13333334, %v6792_v28 }
 0x172   : > { %v4361_v59 = vsel %vm4189_vm13, %v4051_v54, %v4360_v2  ;;  %v593_v11 = vrot.slane %v561_v7, 1  ;;  %v657_v33 = vmul.f32 0.8666667, %v6791_v58  ;;  %v658_v10 = vmul.f32 0.8666667, %v6792_v28 }
 0x173   : > { %v4362_v24 = vsel %vm4191_vm14, %v4058_v12, %v4361_v59  ;;  %v594_v16 = vrot.slane %v562_v3, 1  ;;  %v737_v27 = vmul.f32 0.6666667, %v6791_v58  ;;  %v738_v63 = vmul.f32 0.6666667, %v6792_v28 }
 0x174   : > { %4382 = vrot.lane.b32.xlu1 %v4362_v24, %s4839_s27  ;;  %v6105_v53 = vadd.f32 %v593_v11, %v6086_v55  ;;  %v689_v57 = vrot.slane %v657_v33, 1  ;;  %v690_v34 = vrot.slane %v658_v10, 1  ;;  %v753_v52 = vmul.f32 0.33333334, %v6791_v58 }
 0x175   : > { %v6109_v22 = vadd.f32 %v594_v16, %v6090_v49  ;;  %v754_v14 = vmul.f32 0.33333334, %v6792_v28  ;;  %v833_v44 = vmul.f32 0.2, %v6791_v58  ;;  %v834_v47 = vmul.f32 0.2, %v6792_v28 }
 0x176   : > { %v6114_v32 = vadd.f32 %v689_v57, %v641_v42  ;;  %v6116_v56 = vadd.f32 %v690_v34, %v642_v6  ;;  %v785_v40 = vrot.slane %v753_v52, 1  ;;  %v849_v45 = vmul.f32 0.8, %v6791_v58 }
 0x177   : > { %v786_v21 = vrot.slane %v754_v14, 1  ;;  %v850_v61 = vmul.f32 0.8, %v6792_v28  ;;  %v929_v19 = vmul.f32 0.73333335, %v6791_v58  ;;  %v1105_v35 = vrot.slane %v833_v44, 1 }
 0x178   : > { %v6121_v8 = vadd.f32 %v785_v40, %v737_v27  ;;  %v881_v5 = vrot.slane %v849_v45, 1  ;;  %v930_v51 = vmul.f32 0.73333335, %v6792_v28  ;;  %v945_v9 = vmul.f32 0.26666668, %v6791_v58 }
 0x179   : > { %v6125_v46 = vadd.f32 %v786_v21, %v738_v63  ;;  %v882_v23 = vrot.slane %v850_v61, 1  ;;  %v946_v15 = vmul.f32 0.26666668, %v6792_v28  ;;  %v1041_v31 = vrot.slane %v929_v19, 1 }
 0x17a   : > { %v6128_v26 = vadd.f32 %v881_v5, %v833_v44  ;;  %v977_v36 = vrot.slane %v945_v9, 1  ;;  %v1042_v50 = vrot.slane %v930_v51, 1  ;;  %v1106_v29 = vrot.slane %v834_v47, 1 }
 0x17b   : > { %v6130_v54 = vadd.f32 %v882_v23, %v834_v47  ;;  %v978_v62 = vrot.slane %v946_v15, 1  ;;  %v6132_v37 = vadd.f32 %v1041_v31, %v945_v9  ;;  %v6134_v38 = vadd.f32 %v1105_v35, %v849_v45 }
 0x17c   : > { %v6136_v12 = vadd.f32 %v977_v36, %v929_v19  ;;  %v6138_v48 = vadd.f32 %v1042_v50, %v946_v15  ;;  %v6140_v2 = vadd.f32 %v1106_v29, %v850_v61  ;;  %v1169_v59 = vrot.slane %v737_v27, 1 }
 0x17d   : > { %v6142_v11 = vadd.f32 %v978_v62, %v930_v51  ;;  %v1170_v24 = vrot.slane %v738_v63, 1  ;;  %v1233_v16 = vrot.slane %v641_v42, 1  ;;  %v1234_v57 = vrot.slane %v642_v6, 1 }
 0x17e   : > { %v1201_v34 = vadd.f32 %v1169_v59, %v753_v52  ;;  %v1297_v44 = vrot.slane %v6086_v55, 1  ;;  %v1298_v47 = vrot.slane %v6090_v49, 1  ;;  %v1361_v40 = vrot.slane %v6038_v13, 1 }
 0x17f   : > { %v1202_v45 = vadd.f32 %v1170_v24, %v754_v14  ;;  %v1265_v21 = vadd.f32 %v1233_v16, %v657_v33  ;;  %v1266_v19 = vadd.f32 %v1234_v57, %v658_v10  ;;  %v1362_v35 = vrot.slane %v6042_v18, 1 }
 0x180   : > { %v1329_v61 = vadd.f32 %v1297_v44, %v561_v7  ;;  %v1330_v5 = vadd.f32 %v1298_v47, %v562_v3  ;;  %v1393_v27 = vadd.f32 %v1361_v40, %v6045_v60  ;;  %v1425_v63 = vrot.slane %v6026_v43, 1 }
 0x181   : > { %v1394_v42 = vadd.f32 %v1362_v35, %v6053_v17  ;;  %v1426_v6 = vrot.slane %v6029_v25, 1  ;;  %v1473_v55 = vmul.f32 0.0, %v6791_v58  ;;  %v1474_v49 = vmul.f32 0.0, %v6792_v28 }
 0x182   : > { %v1457_v13 = vadd.f32 %v1425_v63, %v6032_v41  ;;  %v1505_v33 = vrot.slane %v6791_v58, 1  ;;  %v1506_v18 = vrot.slane %v6792_v28, 1  ;;  %v1569_v7 = vrot.slane %v6067_v39, 7 }
 0x183   : > { %v1458_v60 = vadd.f32 %v1426_v6, %v6035_v1  ;;  %v1570_v43 = vrot.slane %v6072_v4, 7  ;;  %v1617_v17 = vrot.slane %v6080_v30, 6  ;;  %v1618_v25 = vrot.slane %v6083_v0, 6 }
 0x184   : > { %v1537_v3 = vadd.f32 %v1505_v33, %v1473_v55  ;;  %v1538_v10 = vadd.f32 %v1506_v18, %v1474_v49  ;;  %v1665_v52 = vrot.slane %v6105_v53, 6  ;;  %v1666_v41 = vrot.slane %v6109_v22, 6  ;;  %v6793_v33 = vld [vmem:[#allocation10_spill] sm:$0xff] }
 0x185   : > { %v1713_v14 = vrot.slane %v6114_v32, 5  ;;  %v1714_v51 = vrot.slane %v6116_v56, 5  ;;  %v1761_v39 = vrot.slane %v6121_v8, 5  ;;  %v1762_v1 = vrot.slane %v6125_v46, 5 }
 0x186   : > { %v1809_v4 = vrot.slane %v6128_v26, 4  ;;  %v1810_v30 = vrot.slane %v6130_v54, 4  ;;  %v1857_v0 = vrot.slane %v6136_v12, 4  ;;  %v1858_v9 = vrot.slane %v6142_v11, 4 }
 0x187   : > { %v1905_v53 = vrot.slane %v6132_v37, 3  ;;  %v1906_v22 = vrot.slane %v6138_v48, 3  ;;  %v1953_v32 = vrot.slane %v6134_v38, 3  ;;  %v1954_v56 = vrot.slane %v6140_v2, 3 }
 0x188   : > { %v2001_v23 = vrot.slane %v1201_v34, 2  ;;  %v2002_v8 = vrot.slane %v1202_v45, 2  ;;  %v2049_v15 = vrot.slane %v1265_v21, 2  ;;  %v2050_v46 = vrot.slane %v1266_v19, 2 }
 0x189   : > { %v2097_v31 = vrot.slane %v1329_v61, 1  ;;  %v2098_v26 = vrot.slane %v1330_v5, 1  ;;  %v2145_v36 = vrot.slane %v1393_v27, 1  ;;  %v2146_v50 = vrot.slane %v1394_v42, 1 }
 0x18a   : > { %v2193_v29 = vrot.slane %v1537_v3, 7  ;;  %v2194_v54 = vrot.slane %v1538_v10, 7  ;;  %v2226_v62 = vsel %vm2219_vm0, %v6791_v58, %v1569_v7  ;;  %v2227_v37 = vsel %vm2219_vm0, %v6792_v28, %v1570_v43  ;;  %v6794_v43 = vld [vmem:[#allocation11_spill] sm:$0xff] }
 0x18b   : > { %v2243_v38 = vsel %vm2236_vm1, %v2226_v62, %v1617_v17  ;;  %v2244_v12 = vsel %vm2236_vm1, %v2227_v37, %v1618_v25  ;;  %v2344_v48 = vsel %vm2219_vm0, %v1905_v53, %v1953_v32  ;;  %v2345_v2 = vsel %vm2219_vm0, %v1906_v22, %v1954_v56 }
 0x18c   : > { %v2260_v59 = vsel %vm2253_vm2, %v2243_v38, %v1665_v52  ;;  %v2261_v11 = vsel %vm2253_vm2, %v2244_v12, %v1666_v41  ;;  %v2360_v24 = vsel %vm2236_vm1, %v2344_v48, %v2001_v23  ;;  %v2361_v16 = vsel %vm2236_vm1, %v2345_v2, %v2002_v8 }
 0x18d   : > { %v2277_v58 = vsel %vm2270_vm3, %v2260_v59, %v1713_v14  ;;  %v2278_v28 = vsel %vm2270_vm3, %v2261_v11, %v1714_v51  ;;  %v2376_v57 = vsel %vm2253_vm2, %v2360_v24, %v2049_v15  ;;  %v2377_v34 = vsel %vm2253_vm2, %v2361_v16, %v2050_v46 }
 0x18e   : > { %v2294_v44 = vsel %vm2287_vm4, %v2277_v58, %v1761_v39  ;;  %v2295_v47 = vsel %vm2287_vm4, %v2278_v28, %v1762_v1  ;;  %v2392_v40 = vsel %vm2270_vm3, %v2376_v57, %v2097_v31  ;;  %v2393_v45 = vsel %vm2270_vm3, %v2377_v34, %v2098_v26 }
 0x18f   : > { %v2311_v21 = vsel %vm2304_vm5, %v2294_v44, %v1809_v4  ;;  %v2312_v19 = vsel %vm2304_vm5, %v2295_v47, %v1810_v30  ;;  %v2408_v35 = vsel %vm2287_vm4, %v2392_v40, %v2145_v36  ;;  %v2409_v61 = vsel %vm2287_vm4, %v2393_v45, %v2146_v50 }
 0x190   : > { %v2328_v5 = vsel %vm2321_vm6, %v2311_v21, %v1857_v0  ;;  %v2329_v27 = vsel %vm2321_vm6, %v2312_v19, %v1858_v9  ;;  %v2424_v63 = vsel %vm2304_vm5, %v2408_v35, %v1457_v13  ;;  %v2425_v42 = vsel %vm2304_vm5, %v2409_v61, %v1458_v60 }
 0x191   : > { %v2440_v6 = vsel %vm2321_vm6, %v2424_v63, %v2193_v29  ;;  %v2441_v55 = vsel %vm2321_vm6, %v2425_v42, %v2194_v54  ;;  %v3305_v49 = vmax.f32 %v2328_v5, %v2329_v27  ;;  %v6207_v18 = vmul.f32 0.53333336, %v6793_v33 }
 0x192   : > { %v3306_v7 = vmax.f32 %v2440_v6, %v2441_v55  ;;  %v6210_v17 = vmul.f32 0.53333336, %v6794_v43  ;;  %v6213_v25 = vmul.f32 0.46666667, %v6793_v33  ;;  %v6216_v3 = vmul.f32 0.46666667, %v6794_v43 }
 0x193   : > { %v3433_v13 = vcombine.high %v3305_v49, %v3305_v49  ;;  %v3440_v60 = vrot.slane %v3305_v49, %v4913_v20  ;;  %v6220_v10 = vmul.f32 0.06666667, %v6793_v33  ;;  %v6223_v52 = vmul.f32 0.06666667, %v6794_v43 }
 0x194   : > { %v3450_v41 = vcombine.high %v3306_v7, %v3306_v7  ;;  %v3457_v14 = vrot.slane %v3306_v7, %v4913_v20  ;;  %v410_v51 = vrot.slane %v6213_v25, 1  ;;  %v411_v39 = vrot.slane %v6216_v3, 1 }
 0x195   : > { %v3447_v1 = vrot.slane %v3433_v13, %v4913_v20  ;;  %v3448_v4 = vcombine.high %v3440_v60, %v3440_v60  ;;  %v3835_v30 = vsel %vm2850_vm7, %v3440_v60, -inf  ;;  %v6231_v0 = vmul.f32 0.93333334, %v6793_v33 }
 0x196   : > { %v3464_v9 = vrot.slane %v3450_v41, %v4913_v20  ;;  %v3465_v53 = vcombine.high %v3457_v14, %v3457_v14  ;;  %v3836_v22 = vrot.slane %v3835_v30, 4  ;;  %v3863_v32 = vsel %vm2850_vm7, %v3457_v14, -inf }
 0x197   : > { %v3449_v56 = vcombine.high %v3447_v1, %v3447_v1  ;;  %v3842_v23 = vsel %vm2850_vm7, %v3448_v4, -inf  ;;  %v3849_v8 = vsel %vm2850_vm7, %v3447_v1, -inf  ;;  %v3864_v15 = vrot.slane %v3863_v32, 4 }
 0x198   : > { %v3466_v46 = vcombine.high %v3464_v9, %v3464_v9  ;;  %v3837_v31 = vmax.f32 %v3835_v30, %v3836_v22  ;;  %v3843_v26 = vrot.slane %v3842_v23, 4  ;;  %v3850_v36 = vrot.slane %v3849_v8, 4 }
 0x199   : > { %v3856_v50 = vsel %vm2850_vm7, %v3449_v56, -inf  ;;  %v3865_v29 = vmax.f32 %v3863_v32, %v3864_v15  ;;  %v3870_v54 = vsel %vm2850_vm7, %v3465_v53, -inf  ;;  %v3877_v62 = vsel %vm2850_vm7, %v3464_v9, -inf }
 0x19a   : > { %v3838_v37 = vrot.slane %v3837_v31, 2  ;;  %v3844_v38 = vmax.f32 %v3842_v23, %v3843_v26  ;;  %v3851_v12 = vmax.f32 %v3849_v8, %v3850_v36  ;;  %v3857_v48 = vrot.slane %v3856_v50, 4 }
 0x19b   : > { %v3866_v2 = vrot.slane %v3865_v29, 2  ;;  %v3871_v59 = vrot.slane %v3870_v54, 4  ;;  %v3878_v11 = vrot.slane %v3877_v62, 4  ;;  %v3884_v24 = vsel %vm2850_vm7, %v3466_v46, -inf }
 0x19c   : > { %v3839_v16 = vmax.f32 %v3837_v31, %v3838_v37  ;;  %v3845_v58 = vrot.slane %v3844_v38, 2  ;;  %v3852_v28 = vrot.slane %v3851_v12, 2  ;;  %v3858_v57 = vmax.f32 %v3856_v50, %v3857_v48 }
 0x19d   : > { %v3867_v34 = vmax.f32 %v3865_v29, %v3866_v2  ;;  %v3872_v44 = vmax.f32 %v3870_v54, %v3871_v59  ;;  %v3879_v47 = vmax.f32 %v3877_v62, %v3878_v11  ;;  %v3885_v40 = vrot.slane %v3884_v24, 4 }
 0x19e   : > { %v3840_v45 = vrot.slane %v3839_v16, 1  ;;  %v3846_v21 = vmax.f32 %v3844_v38, %v3845_v58  ;;  %v3853_v19 = vmax.f32 %v3851_v12, %v3852_v28  ;;  %v3859_v35 = vrot.slane %v3858_v57, 2 }
 0x19f   : > { %v3868_v61 = vrot.slane %v3867_v34, 1  ;;  %v3873_v5 = vrot.slane %v3872_v44, 2  ;;  %v3880_v27 = vrot.slane %v3879_v47, 2  ;;  %v3886_v63 = vmax.f32 %v3884_v24, %v3885_v40 }
 0x1a0   : > { %v3841_v42 = vmax.f32 %v3839_v16, %v3840_v45  ;;  %v3847_v6 = vrot.slane %v3846_v21, 1  ;;  %v3854_v55 = vrot.slane %v3853_v19, 1  ;;  %v3860_v49 = vmax.f32 %v3858_v57, %v3859_v35 }
 0x1a1   : > { %v3869_v7 = vmax.f32 %v3867_v34, %v3868_v61  ;;  %v3874_v13 = vmax.f32 %v3872_v44, %v3873_v5  ;;  %v3881_v60 = vmax.f32 %v3879_v47, %v3880_v27  ;;  %v3887_v41 = vrot.slane %v3886_v63, 2 }
 0x1a2   : > { %v3848_v14 = vmax.f32 %v3846_v21, %v3847_v6  ;;  %v3855_v1 = vmax.f32 %v3853_v19, %v3854_v55  ;;  %v3861_v4 = vrot.slane %v3860_v49, 1  ;;  %v6242_v30 = vadd.f32 %v410_v51, %v6207_v18 }
 0x1a3   : > { %v3875_v9 = vrot.slane %v3874_v13, 1  ;;  %v3882_v53 = vrot.slane %v3881_v60, 1  ;;  %v3888_v22 = vmax.f32 %v3886_v63, %v3887_v41  ;;  %v6245_v32 = vadd.f32 %v411_v39, %v6210_v17 }
 0x1a4   : > { %v3862_v56 = vmax.f32 %v3860_v49, %v3861_v4  ;;  %v4335_v23 = vsel %vm4179_vm8, %v3848_v14, %v3841_v42  ;;  %v6249_v8 = vmul.f32 0.93333334, %v6794_v43  ;;  %v505_v15 = vrot.slane %v6231_v0, 1 }
 0x1a5   : > { %v3876_v46 = vmax.f32 %v3874_v13, %v3875_v9  ;;  %v3883_v31 = vmax.f32 %v3881_v60, %v3882_v53  ;;  %v3889_v26 = vrot.slane %v3888_v22, 1  ;;  %v4336_v51 = vsel %vm4181_vm9, %v3855_v1, %v4335_v23 }
 0x1a6   : > { %v4337_v36 = vsel %vm4183_vm10, %v3862_v56, %v4336_v51  ;;  %v506_v50 = vrot.slane %v6249_v8, 1  ;;  %v6256_v39 = vadd.f32 %v505_v15, %v6220_v10  ;;  %v6259_v29 = vmul.f32 0.6, %v6793_v33 }
 0x1a7   : > { %v3890_v54 = vmax.f32 %v3888_v22, %v3889_v26  ;;  %v4338_v62 = vsel %vm4185_vm11, %v3869_v7, %v4337_v36  ;;  %v6263_v37 = vmul.f32 0.6, %v6794_v43  ;;  %v6266_v38 = vmul.f32 0.4, %v6793_v33 }
 0x1a8   : > { %v4339_v12 = vsel %vm4187_vm12, %v3876_v46, %v4338_v62  ;;  %v6270_v48 = vadd.f32 %v506_v50, %v6223_v52  ;;  %v570_v2 = vmul.f32 0.4, %v6794_v43  ;;  %v649_v59 = vmul.f32 0.13333334, %v6793_v33 }
 0x1a9   : > { %v4340_v11 = vsel %vm4189_vm13, %v3883_v31, %v4339_v12  ;;  %v601_v24 = vrot.slane %v6266_v38, 1  ;;  %v650_v16 = vmul.f32 0.13333334, %v6794_v43  ;;  %v665_v58 = vmul.f32 0.8666667, %v6793_v33 }
 0x1aa   : > { %v4341_v28 = vsel %vm4191_vm14, %v3890_v54, %v4340_v11  ;;  %v602_v57 = vrot.slane %v570_v2, 1  ;;  %v666_v34 = vmul.f32 0.8666667, %v6794_v43  ;;  %v745_v44 = vmul.f32 0.6666667, %v6793_v33 }
 0x1ab   : > { %4376 = vrot.lane.b32.xlu0 %v4341_v28, %s4839_s27  ;;  %v6283_v47 = vadd.f32 %v601_v24, %v6259_v29  ;;  %v697_v40 = vrot.slane %v665_v58, 1  ;;  %v746_v45 = vmul.f32 0.6666667, %v6794_v43  ;;  %v761_v21 = vmul.f32 0.33333334, %v6793_v33 }
 0x1ac   : > { %v6288_v19 = vadd.f32 %v602_v57, %v6263_v37  ;;  %v698_v35 = vrot.slane %v666_v34, 1  ;;  %v762_v61 = vmul.f32 0.33333334, %v6794_v43  ;;  %v841_v5 = vmul.f32 0.2, %v6793_v33 }
 0x1ad   : > { %v6292_v27 = vadd.f32 %v697_v40, %v649_v59  ;;  %v793_v63 = vrot.slane %v761_v21, 1  ;;  %v842_v42 = vmul.f32 0.2, %v6794_v43  ;;  %v857_v6 = vmul.f32 0.8, %v6793_v33 }
 0x1ae   : > { %v6296_v55 = vadd.f32 %v698_v35, %v650_v16  ;;  %v794_v49 = vrot.slane %v762_v61, 1  ;;  %v858_v7 = vmul.f32 0.8, %v6794_v43  ;;  %v937_v13 = vmul.f32 0.73333335, %v6793_v33 }
 0x1af   : > { %v6300_v60 = vadd.f32 %v793_v63, %v745_v44  ;;  %v889_v41 = vrot.slane %v857_v6, 1  ;;  %v938_v14 = vmul.f32 0.73333335, %v6794_v43  ;;  %v953_v1 = vmul.f32 0.26666668, %v6793_v33 }
 0x1b0   : > { %v6304_v4 = vadd.f32 %v794_v49, %v746_v45  ;;  %v890_v9 = vrot.slane %v858_v7, 1  ;;  %v954_v53 = vmul.f32 0.26666668, %v6794_v43  ;;  %v1049_v22 = vrot.slane %v937_v13, 1 }
 0x1b1   : > { %v6307_v56 = vadd.f32 %v889_v41, %v841_v5  ;;  %v985_v23 = vrot.slane %v953_v1, 1  ;;  %v1050_v15 = vrot.slane %v938_v14, 1  ;;  %v1113_v46 = vrot.slane %v841_v5, 1 }
 0x1b2   : > { %v6309_v31 = vadd.f32 %v890_v9, %v842_v42  ;;  %v986_v26 = vrot.slane %v954_v53, 1  ;;  %v6311_v51 = vadd.f32 %v1049_v22, %v953_v1  ;;  %v1114_v36 = vrot.slane %v842_v42, 1 }
 0x1b3   : > { %v6313_v50 = vadd.f32 %v985_v23, %v937_v13  ;;  %v6315_v54 = vadd.f32 %v1050_v15, %v954_v53  ;;  %v6317_v62 = vadd.f32 %v1113_v46, %v857_v6  ;;  %v1177_v12 = vrot.slane %v745_v44, 1 }
 0x1b4   : > { %v6319_v11 = vadd.f32 %v986_v26, %v938_v14  ;;  %v1146_v24 = vadd.f32 %v1114_v36, %v858_v7  ;;  %v1178_v28 = vrot.slane %v746_v45, 1  ;;  %v1241_v57 = vrot.slane %v649_v59, 1 }
 0x1b5   : > { %v1209_v40 = vadd.f32 %v1177_v12, %v761_v21  ;;  %v1242_v35 = vrot.slane %v650_v16, 1  ;;  %v1305_v5 = vrot.slane %v6259_v29, 1  ;;  %v1306_v63 = vrot.slane %v6263_v37, 1 }
 0x1b6   : > { %v1210_v49 = vadd.f32 %v1178_v28, %v762_v61  ;;  %v1273_v42 = vadd.f32 %v1241_v57, %v665_v58  ;;  %v1369_v13 = vrot.slane %v6220_v10, 1  ;;  %v1370_v41 = vrot.slane %v6223_v52, 1 }
 0x1b7   : > { %v1274_v6 = vadd.f32 %v1242_v35, %v666_v34  ;;  %v1337_v44 = vadd.f32 %v1305_v5, %v6266_v38  ;;  %v1338_v14 = vadd.f32 %v1306_v63, %v570_v2  ;;  %v1433_v7 = vrot.slane %v6207_v18, 1 }
 0x1b8   : > { %v6328_v59 = vadd.f32 %v1369_v13, %v6231_v0  ;;  %v6331_v16 = vadd.f32 %v1370_v41, %v6249_v8  ;;  %v1434_v29 = vrot.slane %v6210_v17, 1  ;;  %v1481_v37 = vmul.f32 0.0, %v6793_v33  ;;  %v2456_v13 = vld [vmem:[%s6375_s9 + $0x30] sm:$0xff] }
 0x1b9   : > { %v6336_v10 = vadd.f32 %v1433_v7, %v6213_v25  ;;  %v1482_v52 = vmul.f32 0.0, %v6794_v43  ;;  %v1513_v38 = vrot.slane %v6793_v33, 1  ;;  %v1514_v2 = vrot.slane %v6794_v43, 1  ;;  %v2455_v7 = vld [vmem:[%s6375_s9 + $0x28] sm:$0xff] }
 0x1ba   : > { %v6342_v18 = vadd.f32 %v1434_v29, %v6216_v3  ;;  %v1577_v0 = vrot.slane %v6242_v30, 7  ;;  %v1578_v8 = vrot.slane %v6245_v32, 7  ;;  %v1625_v17 = vrot.slane %v6256_v39, 6 }
 0x1bb   : > { %v6347_v58 = vadd.f32 %v1513_v38, %v1481_v37  ;;  %v6349_v25 = vadd.f32 %v1514_v2, %v1482_v52  ;;  %v1626_v34 = vrot.slane %v6270_v48, 6  ;;  %v1673_v45 = vrot.slane %v6283_v47, 6  ;;  %v2451_v2 = vld [vmem:[%s6375_s9 + $0x8] sm:$0xff] }
 0x1bc   : > { %v1674_v21 = vrot.slane %v6288_v19, 6  ;;  %v1721_v3 = vrot.slane %v6292_v27, 5  ;;  %v1722_v61 = vrot.slane %v6296_v55, 5  ;;  %v1769_v30 = vrot.slane %v6300_v60, 5 }
 0x1bd   : > { %v1770_v32 = vrot.slane %v6304_v4, 5  ;;  %v1817_v39 = vrot.slane %v6307_v56, 4  ;;  %v1818_v1 = vrot.slane %v6309_v31, 4  ;;  %v1865_v9 = vrot.slane %v6313_v50, 4 }
 0x1be   : > { %v1866_v48 = vrot.slane %v6319_v11, 4  ;;  %v1913_v47 = vrot.slane %v6311_v51, 3  ;;  %v1914_v19 = vrot.slane %v6315_v54, 3  ;;  %v1961_v27 = vrot.slane %v6317_v62, 3 }
 0x1bf   : > { %v1962_v55 = vrot.slane %v1146_v24, 3  ;;  %v2009_v53 = vrot.slane %v1209_v40, 2  ;;  %v2010_v60 = vrot.slane %v1210_v49, 2  ;;  %v2057_v22 = vrot.slane %v1273_v42, 2  ;;  %v2454_v42 = vld [vmem:[%s6375_s9 + $0x20] sm:$0xff] }
 0x1c0   : > { %v2058_v4 = vrot.slane %v1274_v6, 2  ;;  %v2105_v23 = vrot.slane %v1337_v44, 1  ;;  %v2106_v56 = vrot.slane %v1338_v14, 1  ;;  %v2153_v15 = vrot.slane %v6328_v59, 1  ;;  %v2457_v59 = vld [vmem:[%s6375_s9 + $0x38] sm:$0xff] }
 0x1c1   : > { %v2154_v46 = vrot.slane %v6331_v16, 1  ;;  %v2201_v31 = vrot.slane %v6347_v58, 7  ;;  %v2202_v26 = vrot.slane %v6349_v25, 7  ;;  %v2234_v51 = vsel %vm2219_vm0, %v6793_v33, %v1577_v0  ;;  %v2450_v16 = vld [vmem:[%s6375_s9] sm:$0xff]  ;;  %v2452_v0 = vld [vmem:[%s6375_s9 + $0x10] sm:$0xff] }
 0x1c2   : > { %v2235_v36 = vsel %vm2219_vm0, %v6794_v43, %v1578_v8  ;;  %v2251_v50 = vsel %vm2236_vm1, %v2234_v51, %v1625_v17  ;;  %v2352_v54 = vsel %vm2219_vm0, %v1913_v47, %v1961_v27  ;;  %v2353_v62 = vsel %vm2219_vm0, %v1914_v19, %v1962_v55  ;;  %v2453_v8 = vld [vmem:[%s6375_s9 + $0x18] sm:$0xff] }
 0x1c3   : > { %v2252_v12 = vsel %vm2236_vm1, %v2235_v36, %v1626_v34  ;;  %v2268_v33 = vsel %vm2253_vm2, %v2251_v50, %v1673_v45  ;;  %v2368_v11 = vsel %vm2236_vm1, %v2352_v54, %v2009_v53  ;;  %v2369_v24 = vsel %vm2236_vm1, %v2353_v62, %v2010_v60 }
 0x1c4   : > { %v2269_v43 = vsel %vm2253_vm2, %v2252_v12, %v1674_v21  ;;  %v2285_v28 = vsel %vm2270_vm3, %v2268_v33, %v1721_v3  ;;  %v2384_v57 = vsel %vm2253_vm2, %v2368_v11, %v2057_v22  ;;  %v2385_v40 = vsel %vm2253_vm2, %v2369_v24, %v2058_v4 }
 0x1c5   : > { %v2286_v35 = vsel %vm2270_vm3, %v2269_v43, %v1722_v61  ;;  %v2302_v5 = vsel %vm2287_vm4, %v2285_v28, %v1769_v30  ;;  %v2400_v63 = vsel %vm2270_vm3, %v2384_v57, %v2105_v23  ;;  %v2401_v49 = vsel %vm2270_vm3, %v2385_v40, %v2106_v56 }
 0x1c6   : > { %v2303_v41 = vsel %vm2287_vm4, %v2286_v35, %v1770_v32  ;;  %v2319_v6 = vsel %vm2304_vm5, %v2302_v5, %v1817_v39  ;;  %v2416_v44 = vsel %vm2287_vm4, %v2400_v63, %v2153_v15  ;;  %v2417_v14 = vsel %vm2287_vm4, %v2401_v49, %v2154_v46 }
 0x1c7   : > { %v2320_v29 = vsel %vm2304_vm5, %v2303_v41, %v1818_v1  ;;  %v2336_v37 = vsel %vm2321_vm6, %v2319_v6, %v1865_v9  ;;  %v2432_v52 = vsel %vm2304_vm5, %v2416_v44, %v6336_v10  ;;  %v2433_v38 = vsel %vm2304_vm5, %v2417_v14, %v6342_v18 }
 0x1c8   : > { %v2337_v17 = vsel %vm2321_vm6, %v2320_v29, %v1866_v48  ;;  %v2448_v58 = vsel %vm2321_vm6, %v2432_v52, %v2201_v31  ;;  %v2449_v25 = vsel %vm2321_vm6, %v2433_v38, %v2202_v26  ;;  %v2484_v34 = vmax.f32 %v2454_v42, %v2456_v13 }
 0x1c9   : > { %v3313_v45 = vmax.f32 %v2336_v37, %v2337_v17  ;;  %v3314_v21 = vmax.f32 %v2448_v58, %v2449_v25  ;;  %v2485_v3 = vmax.f32 %v2455_v7, %v2457_v59  ;;  %v6418_v10 = vmax.f32 %v2450_v16, %v2452_v0 }
 0x1ca   : > { %v2548_v61 = vcombine.high %v2484_v34, %v2484_v34  ;;  %v6416_v30 = vrot.slane %v2484_v34, %v4913_v20  ;;  %v6420_v18 = vmax.f32 %v2451_v2, %v2453_v8  ;;  %vm4411_vm0 = vcmask 64512  }
 0x1cb   : > { %v3569_v32 = vcombine.high %v3313_v45, %v3313_v45  ;;  %v3576_v39 = vrot.slane %v3313_v45, %v4913_v20  ;;  %v3586_v1 = vcombine.high %v3314_v21, %v3314_v21  ;;  %v3593_v9 = vrot.slane %v3314_v21, %v4913_v20 }
 0x1cc   : > { %v6425_v48 = vrot.slane %v2548_v61, %v4913_v20  ;;  %v2563_v47 = vcombine.high %v6416_v30, %v6416_v30  ;;  %v2565_v19 = vcombine.high %v2485_v3, %v2485_v3  ;;  %v6430_v27 = vrot.slane %v2485_v3, %v4913_v20 }
 0x1cd   : > { %v3583_v55 = vrot.slane %v3569_v32, %v4913_v20  ;;  %v3584_v53 = vcombine.high %v3576_v39, %v3576_v39  ;;  %v3600_v60 = vrot.slane %v3586_v1, %v4913_v20  ;;  %v3601_v22 = vcombine.high %v3593_v9, %v3593_v9 }
 0x1ce   : > { %v4059_v4 = vsel %vm2850_vm7, %v3576_v39, -inf  ;;  %v4087_v23 = vsel %vm2850_vm7, %v3593_v9, -inf  ;;  %v2564_v56 = vcombine.high %v6425_v48, %v6425_v48  ;;  %v6439_v15 = vrot.slane %v2565_v19, %v4913_v20 }
 0x1cf   : > { %v3585_v46 = vcombine.high %v3583_v55, %v3583_v55  ;;  %v3602_v31 = vcombine.high %v3600_v60, %v3600_v60  ;;  %v4060_v26 = vrot.slane %v4059_v4, 4  ;;  %v4066_v51 = vsel %vm2850_vm7, %v3584_v53, -inf }
 0x1d0   : > { %v4067_v36 = vrot.slane %v4066_v51, 4  ;;  %v4073_v50 = vsel %vm2850_vm7, %v3583_v55, -inf  ;;  %v4088_v54 = vrot.slane %v4087_v23, 4  ;;  %v4094_v62 = vsel %vm2850_vm7, %v3601_v22, -inf }
 0x1d1   : > { %v4061_v12 = vmax.f32 %v4059_v4, %v4060_v26  ;;  %v4074_v33 = vrot.slane %v4073_v50, 4  ;;  %v4080_v11 = vsel %vm2850_vm7, %v3585_v46, -inf  ;;  %v4095_v24 = vrot.slane %v4094_v62, 4 }
 0x1d2   : > { %v4068_v43 = vmax.f32 %v4066_v51, %v4067_v36  ;;  %v4081_v28 = vrot.slane %v4080_v11, 4  ;;  %v4089_v57 = vmax.f32 %v4087_v23, %v4088_v54  ;;  %v4101_v40 = vsel %vm2850_vm7, %v3600_v60, -inf }
 0x1d3   : > { %v4062_v35 = vrot.slane %v4061_v12, 2  ;;  %v4075_v5 = vmax.f32 %v4073_v50, %v4074_v33  ;;  %v4096_v63 = vmax.f32 %v4094_v62, %v4095_v24  ;;  %v4102_v49 = vrot.slane %v4101_v40, 4 }
 0x1d4   : > { %v4069_v42 = vrot.slane %v4068_v43, 2  ;;  %v4082_v13 = vmax.f32 %v4080_v11, %v4081_v28  ;;  %v4090_v41 = vrot.slane %v4089_v57, 2  ;;  %v4108_v6 = vsel %vm2850_vm7, %v3602_v31, -inf }
 0x1d5   : > { %v4063_v44 = vmax.f32 %v4061_v12, %v4062_v35  ;;  %v4076_v14 = vrot.slane %v4075_v5, 2  ;;  %v4097_v7 = vrot.slane %v4096_v63, 2  ;;  %v4103_v59 = vmax.f32 %v4101_v40, %v4102_v49 }
 0x1d6   : > { %v4070_v16 = vmax.f32 %v4068_v43, %v4069_v42  ;;  %v4083_v29 = vrot.slane %v4082_v13, 2  ;;  %v4091_v37 = vmax.f32 %v4089_v57, %v4090_v41  ;;  %v4109_v52 = vrot.slane %v4108_v6, 4 }
 0x1d7   : > { %v4064_v38 = vrot.slane %v4063_v44, 1  ;;  %v4077_v2 = vmax.f32 %v4075_v5, %v4076_v14  ;;  %v4098_v0 = vmax.f32 %v4096_v63, %v4097_v7  ;;  %v4104_v8 = vrot.slane %v4103_v59, 2 }
 0x1d8   : > { %v4071_v17 = vrot.slane %v4070_v16, 1  ;;  %v4084_v58 = vmax.f32 %v4082_v13, %v4083_v29  ;;  %v4092_v25 = vrot.slane %v4091_v37, 1  ;;  %v4110_v34 = vmax.f32 %v4108_v6, %v4109_v52 }
 0x1d9   : > { %v4065_v45 = vmax.f32 %v4063_v44, %v4064_v38  ;;  %v4078_v21 = vrot.slane %v4077_v2, 1  ;;  %v4099_v3 = vrot.slane %v4098_v0, 1  ;;  %v4105_v61 = vmax.f32 %v4103_v59, %v4104_v8 }
 0x1da   : > { %v4072_v32 = vmax.f32 %v4070_v16, %v4071_v17  ;;  %v4085_v39 = vrot.slane %v4084_v58, 1  ;;  %v4093_v1 = vmax.f32 %v4091_v37, %v4092_v25  ;;  %v4111_v9 = vrot.slane %v4110_v34, 2 }
 0x1db   : > { %v4079_v19 = vmax.f32 %v4077_v2, %v4078_v21  ;;  %v4100_v55 = vmax.f32 %v4098_v0, %v4099_v3  ;;  %v4106_v53 = vrot.slane %v4105_v61, 1  ;;  %v2580_v60 = vcombine.high %v6430_v27, %v6430_v27 }
 0x1dc   : > { %v4086_v22 = vmax.f32 %v4084_v58, %v4085_v39  ;;  %v4112_v4 = vmax.f32 %v4110_v34, %v4111_v9  ;;  %v4363_v23 = vsel %vm4179_vm8, %v4072_v32, %v4065_v45  ;;  %v2581_v46 = vcombine.high %v6439_v15, %v6439_v15 }
 0x1dd   : > { %v4107_v31 = vmax.f32 %v4105_v61, %v4106_v53  ;;  %v4364_v26 = vsel %vm4181_vm9, %v4079_v19, %v4363_v23  ;;  %v2907_v51 = vsel %vm2850_vm7, %v6416_v30, -inf  ;;  %v2914_v36 = vsel %vm2850_vm7, %v2563_v47, -inf }
 0x1de   : > { %v4113_v50 = vrot.slane %v4112_v4, 1  ;;  %v4365_v54 = vsel %vm4183_vm10, %v4086_v22, %v4364_v26  ;;  %v2908_v62 = vrot.slane %v2907_v51, 4  ;;  %v2915_v12 = vrot.slane %v2914_v36, 4 }
 0x1df   : > { %v4366_v33 = vsel %vm4185_vm11, %v4093_v1, %v4365_v54  ;;  %v2921_v11 = vsel %vm2850_vm7, %v6425_v48, -inf  ;;  %v2928_v24 = vsel %vm2850_vm7, %v2564_v56, -inf  ;;  %v2935_v30 = vsel %vm2850_vm7, %v6430_v27, -inf }
 0x1e0   : > { %v4114_v43 = vmax.f32 %v4112_v4, %v4113_v50  ;;  %v4367_v47 = vsel %vm4187_vm12, %v4100_v55, %v4366_v33  ;;  %v2909_v28 = vmax.f32 %v2907_v51, %v2908_v62  ;;  %v2916_v57 = vmax.f32 %v2914_v36, %v2915_v12 }
 0x1e1   : > { %v4368_v40 = vsel %vm4189_vm13, %v4107_v31, %v4367_v47  ;;  %v2922_v35 = vrot.slane %v2921_v11, 4  ;;  %v2929_v5 = vrot.slane %v2928_v24, 4  ;;  %v2936_v63 = vrot.slane %v2935_v30, 4 }
 0x1e2   : > { %v4369_v49 = vsel %vm4191_vm14, %v4114_v43, %v4368_v40  ;;  %v2910_v42 = vrot.slane %v2909_v28, 2  ;;  %v2917_v13 = vrot.slane %v2916_v57, 2  ;;  %v2942_v48 = vsel %vm2850_vm7, %v2580_v60, -inf }
 0x1e3   : > { %4384 = vrot.lane.b32.xlu1 %v4369_v49, %s4839_s27  ;;  %v2923_v56 = vmax.f32 %v2921_v11, %v2922_v35  ;;  %v2930_v27 = vmax.f32 %v2928_v24, %v2929_v5  ;;  %v2937_v41 = vmax.f32 %v2935_v30, %v2936_v63  ;;  %v2943_v6 = vrot.slane %v2942_v48, 4  ;;  %v4373_v5 = vpop.permute.xlu1 %4372 }
 0x1e4   : > { %v2911_v44 = vmax.f32 %v2909_v28, %v2910_v42  ;;  %v2918_v14 = vmax.f32 %v2916_v57, %v2917_v13  ;;  %v2949_v7 = vsel %vm2850_vm7, %v6439_v15, -inf  ;;  %v2956_v59 = vsel %vm2850_vm7, %v2581_v46, -inf }
 0x1e5   : > { %v2924_v16 = vrot.slane %v2923_v56, 2  ;;  %v2931_v29 = vrot.slane %v2930_v27, 2  ;;  %v2938_v37 = vrot.slane %v2937_v41, 2  ;;  %v2944_v52 = vmax.f32 %v2942_v48, %v2943_v6 }
 0x1e6   : > { %v2912_v38 = vrot.slane %v2911_v44, 1  ;;  %v2919_v2 = vrot.slane %v2918_v14, 1  ;;  %v2950_v0 = vrot.slane %v2949_v7, 4  ;;  %v2957_v8 = vrot.slane %v2956_v59, 4 }
 0x1e7   : > { %v2925_v17 = vmax.f32 %v2923_v56, %v2924_v16  ;;  %v2932_v58 = vmax.f32 %v2930_v27, %v2931_v29  ;;  %v2939_v25 = vmax.f32 %v2937_v41, %v2938_v37  ;;  %v2945_v34 = vrot.slane %v2944_v52, 2 }
 0x1e8   : > { %v2913_v45 = vmax.f32 %v2911_v44, %v2912_v38  ;;  %v2920_v21 = vmax.f32 %v2918_v14, %v2919_v2  ;;  %v2951_v3 = vmax.f32 %v2949_v7, %v2950_v0  ;;  %v2958_v61 = vmax.f32 %v2956_v59, %v2957_v8 }
 0x1e9   : > { %v2926_v32 = vrot.slane %v2925_v17, 1  ;;  %v2933_v15 = vrot.slane %v2932_v58, 1  ;;  %v2940_v39 = vrot.slane %v2939_v25, 1  ;;  %v2946_v1 = vmax.f32 %v2944_v52, %v2945_v34 }
 0x1ea   : > { %v2952_v9 = vrot.slane %v2951_v3, 2  ;;  %v2959_v19 = vrot.slane %v2958_v61, 2  ;;  %v4193_v55 = vsel %vm4179_vm8, %v2920_v21, %v2913_v45  ;;  %v2514_v53 = vcombine.high %v6418_v10, %v6418_v10 }
 0x1eb   : > { %v2927_v60 = vmax.f32 %v2925_v17, %v2926_v32  ;;  %v2934_v22 = vmax.f32 %v2932_v58, %v2933_v15  ;;  %v2941_v4 = vmax.f32 %v2939_v25, %v2940_v39  ;;  %v2947_v23 = vrot.slane %v2946_v1, 1 }
 0x1ec   : > { %v2953_v46 = vmax.f32 %v2951_v3, %v2952_v9  ;;  %v2960_v31 = vmax.f32 %v2958_v61, %v2959_v19  ;;  %v2521_v26 = vrot.slane %v6418_v10, %v4913_v20  ;;  %v2528_v51 = vrot.slane %v2514_v53, %v4913_v20 }
 0x1ed   : > { %v2948_v36 = vmax.f32 %v2946_v1, %v2947_v23  ;;  %v4194_v50 = vsel %vm4181_vm9, %v2927_v60, %v4193_v55  ;;  %v2531_v54 = vcombine.high %v6420_v18, %v6420_v18  ;;  %v2538_v62 = vrot.slane %v6420_v18, %v4913_v20 }
 0x1ee   : > { %v2954_v12 = vrot.slane %v2953_v46, 1  ;;  %v2961_v33 = vrot.slane %v2960_v31, 1  ;;  %v4195_v11 = vsel %vm4183_vm10, %v2934_v22, %v4194_v50  ;;  %v2529_v24 = vcombine.high %v2521_v26, %v2521_v26 }
 0x1ef   : > { %v4196_v30 = vsel %vm4185_vm11, %v2941_v4, %v4195_v11  ;;  %v2530_v43 = vcombine.high %v2528_v51, %v2528_v51  ;;  %v2545_v10 = vrot.slane %v2531_v54, %v4913_v20  ;;  %v2546_v47 = vcombine.high %v2538_v62, %v2538_v62 }
 0x1f0   : > { %v2955_v28 = vmax.f32 %v2953_v46, %v2954_v12  ;;  %v2962_v57 = vmax.f32 %v2960_v31, %v2961_v33  ;;  %v4197_v40 = vsel %vm4187_vm12, %v2948_v36, %v4196_v30  ;;  %v2851_v35 = vsel %vm2850_vm7, %v2521_v26, -inf  ;;  %v2470_v26 = vld [vmem:[%s6375_s9 + $0xa0] sm:$0xff]  ;;  %v2471_v12 = vld [vmem:[%s6375_s9 + $0xa8] sm:$0xff]  ;;  %v2473_v33 = vld [vmem:[%s6375_s9 + $0xb8] sm:$0xff] }
 0x1f1   : > { %v2547_v63 = vcombine.high %v2545_v10, %v2545_v10  ;;  %v2852_v18 = vrot.slane %v2851_v35, 4  ;;  %v2858_v49 = vsel %vm2850_vm7, %v2529_v24, -inf  ;;  %v2865_v42 = vsel %vm2850_vm7, %v2528_v51, -inf  ;;  %v2472_v51 = vld [vmem:[%s6375_s9 + $0xb0] sm:$0xff] }
 0x1f2   : > { %v4198_v13 = vsel %vm4189_vm13, %v2955_v28, %v4197_v40  ;;  %v2859_v48 = vrot.slane %v2858_v49, 4  ;;  %v2866_v56 = vrot.slane %v2865_v42, 4  ;;  %v2872_v27 = vsel %vm2850_vm7, %v2530_v43, -inf }
 0x1f3   : > { %v4199_v41 = vsel %vm4191_vm14, %v2962_v57, %v4198_v13  ;;  %v2853_v6 = vmax.f32 %v2851_v35, %v2852_v18  ;;  %v2873_v44 = vrot.slane %v2872_v27, 4  ;;  %v2879_v14 = vsel %vm2850_vm7, %v2538_v62, -inf }
 0x1f4   : > { %v6500_v7 = vsel %vm4394_vm15, %v4199_v41, %v4373_v5  ;;  %v2860_v59 = vmax.f32 %v2858_v49, %v2859_v48  ;;  %v2867_v16 = vmax.f32 %v2865_v42, %v2866_v56  ;;  %v2880_v29 = vrot.slane %v2879_v14, 4 }
 0x1f5   : > { %v2854_v37 = vrot.slane %v2853_v6, 2  ;;  %v2874_v52 = vmax.f32 %v2872_v27, %v2873_v44  ;;  %v2886_v38 = vsel %vm2850_vm7, %v2546_v47, -inf  ;;  %v2893_v2 = vsel %vm2850_vm7, %v2545_v10, -inf }
 0x1f6   : > { %v2861_v0 = vrot.slane %v2860_v59, 2  ;;  %v2868_v8 = vrot.slane %v2867_v16, 2  ;;  %v2881_v17 = vmax.f32 %v2879_v14, %v2880_v29  ;;  %v2887_v58 = vrot.slane %v2886_v38, 4 }
 0x1f7   : > { %v2855_v25 = vmax.f32 %v2853_v6, %v2854_v37  ;;  %v2875_v34 = vrot.slane %v2874_v52, 2  ;;  %v2894_v45 = vrot.slane %v2893_v2, 4  ;;  %v2900_v21 = vsel %vm2850_vm7, %v2547_v63, -inf }
 0x1f8   : > { %v2862_v3 = vmax.f32 %v2860_v59, %v2861_v0  ;;  %v2869_v61 = vmax.f32 %v2867_v16, %v2868_v8  ;;  %v2882_v32 = vrot.slane %v2881_v17, 2  ;;  %v2888_v15 = vmax.f32 %v2886_v38, %v2887_v58  ;;  %v4371_v59 = vpop.permute.xlu0 %4370 }
 0x1f9   : > { %v2856_v39 = vrot.slane %v2855_v25, 1  ;;  %v2876_v1 = vmax.f32 %v2874_v52, %v2875_v34  ;;  %v2895_v9 = vmax.f32 %v2893_v2, %v2894_v45  ;;  %v2901_v19 = vrot.slane %v2900_v21, 4 }
 0x1fa   : > { %v2863_v55 = vrot.slane %v2862_v3, 1  ;;  %v2870_v53 = vrot.slane %v2869_v61, 1  ;;  %v2883_v60 = vmax.f32 %v2881_v17, %v2882_v32  ;;  %v2889_v22 = vrot.slane %v2888_v15, 2 }
 0x1fb   : > { %v2857_v4 = vmax.f32 %v2855_v25, %v2856_v39  ;;  %v2877_v23 = vrot.slane %v2876_v1, 1  ;;  %v2896_v46 = vrot.slane %v2895_v9, 2  ;;  %v2902_v31 = vmax.f32 %v2900_v21, %v2901_v19 }
 0x1fc   : > { %v2864_v36 = vmax.f32 %v2862_v3, %v2863_v55  ;;  %v2871_v50 = vmax.f32 %v2869_v61, %v2870_v53  ;;  %v2884_v54 = vrot.slane %v2883_v60, 1  ;;  %v2890_v62 = vmax.f32 %v2888_v15, %v2889_v22 }
 0x1fd   : > { %v2878_v11 = vmax.f32 %v2876_v1, %v2877_v23  ;;  %v2897_v24 = vmax.f32 %v2895_v9, %v2896_v46  ;;  %v2903_v30 = vrot.slane %v2902_v31, 2  ;;  %v2492_v28 = vmax.f32 %v2470_v26, %v2472_v51 }
 0x1fe   : > { %v2885_v43 = vmax.f32 %v2883_v60, %v2884_v54  ;;  %v2891_v10 = vrot.slane %v2890_v62, 1  ;;  %v4180_v47 = vsel %vm4179_vm8, %v2864_v36, %v2857_v4  ;;  %v2493_v5 = vmax.f32 %v2471_v12, %v2473_v33 }
 0x1ff   : > { %v2898_v57 = vrot.slane %v2897_v24, 1  ;;  %v2904_v40 = vmax.f32 %v2902_v31, %v2903_v30  ;;  %v4182_v35 = vsel %vm4181_vm9, %v2871_v50, %v4180_v47  ;;  %v2684_v49 = vcombine.high %v2492_v28, %v2492_v28  ;;  %v2466_v47 = vld [vmem:[%s6375_s9 + $0x80] sm:$0xff] }
 0x200   : > { %v2892_v63 = vmax.f32 %v2890_v62, %v2891_v10  ;;  %v4184_v18 = vsel %vm4183_vm10, %v2878_v11, %v4182_v35  ;;  %v2691_v42 = vrot.slane %v2492_v28, %v4913_v20  ;;  %v2701_v27 = vcombine.high %v2493_v5, %v2493_v5  ;;  %v2468_v28 = vld [vmem:[%s6375_s9 + $0x90] sm:$0xff] }
 0x201   : > { %v2899_v13 = vmax.f32 %v2897_v24, %v2898_v57  ;;  %v2905_v48 = vrot.slane %v2904_v40, 1  ;;  %v4186_v56 = vsel %vm4185_vm11, %v2885_v43, %v4184_v18  ;;  %v2698_v6 = vrot.slane %v2684_v49, %v4913_v20 }
 0x202   : > { %v4188_v41 = vsel %vm4187_vm12, %v2892_v63, %v4186_v56  ;;  %v2699_v44 = vcombine.high %v2691_v42, %v2691_v42  ;;  %v2708_v14 = vrot.slane %v2493_v5, %v4913_v20  ;;  %v2715_v37 = vrot.slane %v2701_v27, %v4913_v20 }
 0x203   : > { %v2906_v16 = vmax.f32 %v2904_v40, %v2905_v48  ;;  %v4190_v29 = vsel %vm4189_vm13, %v2899_v13, %v4188_v41  ;;  %v3131_v52 = vsel %vm2850_vm7, %v2691_v42, -inf  ;;  %v2700_v38 = vcombine.high %v2698_v6, %v2698_v6  ;;  %v2467_v13 = vld [vmem:[%s6375_s9 + $0x88] sm:$0xff]  ;;  %v2469_v48 = vld [vmem:[%s6375_s9 + $0x98] sm:$0xff] }
 0x204   : > { %v2716_v2 = vcombine.high %v2708_v14, %v2708_v14  ;;  %v3132_v0 = vrot.slane %v3131_v52, 4  ;;  %v3138_v8 = vsel %vm2850_vm7, %v2699_v44, -inf  ;;  %v2717_v58 = vcombine.high %v2715_v37, %v2715_v37 }
 0x205   : > { %v4192_v17 = vsel %vm4191_vm14, %v2906_v16, %v4190_v29  ;;  %v3139_v25 = vrot.slane %v3138_v8, 4  ;;  %v3145_v34 = vsel %vm2850_vm7, %v2698_v6, -inf  ;;  %v3152_v61 = vsel %vm2850_vm7, %v2700_v38, -inf }
 0x206   : > { %v4395_v45 = vsel %vm4394_vm15, %v4192_v17, %v4371_v59  ;;  %v3133_v21 = vmax.f32 %v3131_v52, %v3132_v0  ;;  %v3146_v3 = vrot.slane %v3145_v34, 4  ;;  %v3153_v15 = vrot.slane %v3152_v61, 4 }
 0x207   : > { %4804 = vmatprep.mubr.msk.f32.mxu0 %vm4411_vm0, %v4395_v45  ;;  %v3140_v32 = vmax.f32 %v3138_v8, %v3139_v25  ;;  %v3159_v39 = vsel %vm2850_vm7, %v2708_v14, -inf  ;;  %v3166_v1 = vsel %vm2850_vm7, %v2716_v2, -inf  ;;  %v3173_v4 = vsel %vm2850_vm7, %v2715_v37, -inf }
 0x208   : > { %4805 = vmatmul.mubr.msk.f32.vlgmr.msra.gmra.mrb[0].mxu0 %vm4411_vm0, %v6500_v7  ;;  %v3134_v9 = vrot.slane %v3133_v21, 2  ;;  %v3147_v19 = vmax.f32 %v3145_v34, %v3146_v3  ;;  %v3160_v55 = vrot.slane %v3159_v39, 4  ;;  %v3167_v53 = vrot.slane %v3166_v1, 4 }
 0x209   : > { %v3141_v60 = vrot.slane %v3140_v32, 2  ;;  %v3154_v22 = vmax.f32 %v3152_v61, %v3153_v15  ;;  %v3180_v23 = vsel %vm2850_vm7, %v2717_v58, -inf  ;;  %v3174_v54 = vrot.slane %v3173_v4, 4  ;;  %v4381_v15 = vpop.permute.xlu1 %4380 }
 0x20a   : > { %v3135_v46 = vmax.f32 %v3133_v21, %v3134_v9  ;;  %v3148_v31 = vrot.slane %v3147_v19, 2  ;;  %v3161_v26 = vmax.f32 %v3159_v39, %v3160_v55  ;;  %v3168_v51 = vmax.f32 %v3166_v1, %v3167_v53 }
 0x20b   : > { %v3142_v36 = vmax.f32 %v3140_v32, %v3141_v60  ;;  %v3155_v50 = vrot.slane %v3154_v22, 2  ;;  %v3181_v7 = vrot.slane %v3180_v23, 4  ;;  %v3175_v43 = vmax.f32 %v3173_v4, %v3174_v54 }
 0x20c   : > { %v3136_v62 = vrot.slane %v3135_v46, 1  ;;  %v3149_v12 = vmax.f32 %v3147_v19, %v3148_v31  ;;  %v3162_v33 = vrot.slane %v3161_v26, 2  ;;  %v3169_v11 = vrot.slane %v3168_v51, 2 }
 0x20d   : > { %v3143_v24 = vrot.slane %v3142_v36, 1  ;;  %v3156_v30 = vmax.f32 %v3154_v22, %v3155_v50  ;;  %v3182_v10 = vmax.f32 %v3180_v23, %v3181_v7  ;;  %v3176_v49 = vrot.slane %v3175_v43, 2 }
 0x20e   : > { %v3137_v57 = vmax.f32 %v3135_v46, %v3136_v62  ;;  %v3150_v40 = vrot.slane %v3149_v12, 1  ;;  %v3163_v35 = vmax.f32 %v3161_v26, %v3162_v33  ;;  %v3170_v5 = vmax.f32 %v3168_v51, %v3169_v11 }
 0x20f   : > { %v3144_v63 = vmax.f32 %v3142_v36, %v3143_v24  ;;  %v3157_v18 = vrot.slane %v3156_v30, 1  ;;  %v3183_v42 = vrot.slane %v3182_v10, 2  ;;  %v2490_v6 = vmax.f32 %v2466_v47, %v2468_v28 }
 0x210   : > { %v3151_v56 = vmax.f32 %v3149_v12, %v3150_v40  ;;  %v3164_v27 = vrot.slane %v3163_v35, 1  ;;  %v3171_v41 = vrot.slane %v3170_v5, 1  ;;  %v3177_v14 = vmax.f32 %v3175_v43, %v3176_v49 }
 0x211   : > { %v3158_v44 = vmax.f32 %v3156_v30, %v3157_v18  ;;  %v3184_v59 = vmax.f32 %v3182_v10, %v3183_v42  ;;  %v4221_v16 = vsel %vm4179_vm8, %v3144_v63, %v3137_v57  ;;  %v2491_v38 = vmax.f32 %v2467_v13, %v2469_v48 }
 0x212   : > { %v3165_v29 = vmax.f32 %v3163_v35, %v3164_v27  ;;  %v3172_v37 = vmax.f32 %v3170_v5, %v3171_v41  ;;  %v4222_v52 = vsel %vm4181_vm9, %v3151_v56, %v4221_v16  ;;  %v3178_v2 = vrot.slane %v3177_v14, 1  ;;  %v2460_v16 = vld [vmem:[%s6375_s9 + $0x50] sm:$0xff] }
 0x213   : > { %v3185_v0 = vrot.slane %v3184_v59, 1  ;;  %v4223_v8 = vsel %vm4183_vm10, %v3158_v44, %v4222_v52  ;;  %v2650_v17 = vcombine.high %v2490_v6, %v2490_v6  ;;  %v2657_v25 = vrot.slane %v2490_v6, %v4913_v20 }
 0x214   : > { %v4224_v58 = vsel %vm4185_vm11, %v3165_v29, %v4223_v8  ;;  %v2667_v34 = vcombine.high %v2491_v38, %v2491_v38  ;;  %v2674_v45 = vrot.slane %v2491_v38, %v4913_v20  ;;  %v3179_v21 = vmax.f32 %v3177_v14, %v3178_v2  ;;  %v2459_v2 = vld [vmem:[%s6375_s9 + $0x48] sm:$0xff] }
 0x215   : > { %v3186_v3 = vmax.f32 %v3184_v59, %v3185_v0  ;;  %v4225_v61 = vsel %vm4187_vm12, %v3172_v37, %v4224_v58  ;;  %v2664_v32 = vrot.slane %v2650_v17, %v4913_v20  ;;  %v2665_v39 = vcombine.high %v2657_v25, %v2657_v25  ;;  %v2458_v59 = vld [vmem:[%s6375_s9 + $0x40] sm:$0xff]  ;;  %v2461_v0 = vld [vmem:[%s6375_s9 + $0x58] sm:$0xff] }
 0x216   : > { %v2681_v1 = vrot.slane %v2667_v34, %v4913_v20  ;;  %v2682_v9 = vcombine.high %v2674_v45, %v2674_v45  ;;  %v3075_v19 = vsel %vm2850_vm7, %v2657_v25, -inf  ;;  %v4226_v55 = vsel %vm4189_vm13, %v3179_v21, %v4225_v61 }
 0x217   : > { %v2666_v53 = vcombine.high %v2664_v32, %v2664_v32  ;;  %v3076_v60 = vrot.slane %v3075_v19, 4  ;;  %v3089_v22 = vsel %vm2850_vm7, %v2664_v32, -inf  ;;  %v4227_v4 = vsel %vm4191_vm14, %v3186_v3, %v4226_v55 }
 0x218   : > { %v2683_v23 = vcombine.high %v2681_v1, %v2681_v1  ;;  %v3082_v46 = vsel %vm2850_vm7, %v2665_v39, -inf  ;;  %v3090_v31 = vrot.slane %v3089_v22, 4  ;;  %v6551_v26 = vsel %vm4394_vm15, %v4227_v4, %v4381_v15 }
 0x219   : > { %v3077_v51 = vmax.f32 %v3075_v19, %v3076_v60  ;;  %v3083_v36 = vrot.slane %v3082_v46, 4  ;;  %v3096_v50 = vsel %vm2850_vm7, %v2666_v53, -inf  ;;  %v3103_v62 = vsel %vm2850_vm7, %v2674_v45, -inf }
 0x21a   : > { %v3091_v54 = vmax.f32 %v3089_v22, %v3090_v31  ;;  %v3097_v7 = vrot.slane %v3096_v50, 4  ;;  %v3110_v12 = vsel %vm2850_vm7, %v2682_v9, -inf  ;;  %v3104_v24 = vrot.slane %v3103_v62, 4 }
 0x21b   : > { %v3078_v33 = vrot.slane %v3077_v51, 2  ;;  %v3084_v11 = vmax.f32 %v3082_v46, %v3083_v36  ;;  %v3111_v30 = vrot.slane %v3110_v12, 4  ;;  %v3117_v47 = vsel %vm2850_vm7, %v2681_v1, -inf }
 0x21c   : > { %v3092_v43 = vrot.slane %v3091_v54, 2  ;;  %v3098_v10 = vmax.f32 %v3096_v50, %v3097_v7  ;;  %v3124_v28 = vsel %vm2850_vm7, %v2683_v23, -inf  ;;  %v3105_v35 = vmax.f32 %v3103_v62, %v3104_v24  ;;  %v4379_v62 = vpop.permute.xlu0 %4378 }
 0x21d   : > { %v3079_v57 = vmax.f32 %v3077_v51, %v3078_v33  ;;  %v3085_v40 = vrot.slane %v3084_v11, 2  ;;  %v3112_v5 = vmax.f32 %v3110_v12, %v3111_v30  ;;  %v3118_v49 = vrot.slane %v3117_v47, 4 }
 0x21e   : > { %v3093_v63 = vmax.f32 %v3091_v54, %v3092_v43  ;;  %v3099_v18 = vrot.slane %v3098_v10, 2  ;;  %v3125_v42 = vrot.slane %v3124_v28, 4  ;;  %v3106_v56 = vrot.slane %v3105_v35, 2 }
 0x21f   : > { %v3080_v13 = vrot.slane %v3079_v57, 1  ;;  %v3086_v48 = vmax.f32 %v3084_v11, %v3085_v40  ;;  %v3113_v27 = vrot.slane %v3112_v5, 2  ;;  %v3119_v44 = vmax.f32 %v3117_v47, %v3118_v49 }
 0x220   : > { %v3094_v41 = vrot.slane %v3093_v63, 1  ;;  %v3100_v6 = vmax.f32 %v3098_v10, %v3099_v18  ;;  %v3126_v14 = vmax.f32 %v3124_v28, %v3125_v42  ;;  %v3107_v52 = vmax.f32 %v3105_v35, %v3106_v56 }
 0x221   : > { %v3081_v29 = vmax.f32 %v3079_v57, %v3080_v13  ;;  %v3087_v37 = vrot.slane %v3086_v48, 1  ;;  %v3114_v38 = vmax.f32 %v3112_v5, %v3113_v27  ;;  %v3120_v58 = vrot.slane %v3119_v44, 2 }
 0x222   : > { %v3095_v8 = vmax.f32 %v3093_v63, %v3094_v41  ;;  %v3101_v17 = vrot.slane %v3100_v6, 1  ;;  %v3127_v25 = vrot.slane %v3126_v14, 2  ;;  %v3108_v45 = vrot.slane %v3107_v52, 1 }
 0x223   : > { %v3088_v34 = vmax.f32 %v3086_v48, %v3087_v37  ;;  %v3115_v21 = vrot.slane %v3114_v38, 1  ;;  %v2486_v3 = vmax.f32 %v2458_v59, %v2460_v16  ;;  %v3121_v32 = vmax.f32 %v3119_v44, %v3120_v58 }
 0x224   : > { %v3102_v61 = vmax.f32 %v3100_v6, %v3101_v17  ;;  %v3128_v15 = vmax.f32 %v3126_v14, %v3127_v25  ;;  %v2487_v39 = vmax.f32 %v2459_v2, %v2461_v0  ;;  %v3109_v1 = vmax.f32 %v3107_v52, %v3108_v45 }
 0x225   : > { %v3116_v9 = vmax.f32 %v3114_v38, %v3115_v21  ;;  %v4214_v19 = vsel %vm4179_vm8, %v3088_v34, %v3081_v29  ;;  %v2582_v55 = vcombine.high %v2486_v3, %v2486_v3  ;;  %v3122_v53 = vrot.slane %v3121_v32, 1 }
 0x226   : > { %v3129_v60 = vrot.slane %v3128_v15, 1  ;;  %v4215_v22 = vsel %vm4181_vm9, %v3095_v8, %v4214_v19  ;;  %v2589_v4 = vrot.slane %v2486_v3, %v4913_v20  ;;  %v2599_v31 = vcombine.high %v2487_v39, %v2487_v39  ;;  %v2474_v19 = vld [vmem:[%s6375_s9 + $0xc0] sm:$0xff] }
 0x227   : > { %v4216_v23 = vsel %vm4183_vm10, %v3102_v61, %v4215_v22  ;;  %v2596_v46 = vrot.slane %v2582_v55, %v4913_v20  ;;  %v2606_v51 = vrot.slane %v2487_v39, %v4913_v20  ;;  %v3123_v36 = vmax.f32 %v3121_v32, %v3122_v53  ;;  %v2476_v55 = vld [vmem:[%s6375_s9 + $0xd0] sm:$0xff] }
 0x228   : > { %v3130_v50 = vmax.f32 %v3128_v15, %v3129_v60  ;;  %v4217_v54 = vsel %vm4185_vm11, %v3109_v1, %v4216_v23  ;;  %v2597_v7 = vcombine.high %v2589_v4, %v2589_v4  ;;  %v2613_v11 = vrot.slane %v2599_v31, %v4913_v20 }
 0x229   : > { %v4218_v12 = vsel %vm4187_vm12, %v3116_v9, %v4217_v54  ;;  %v2598_v33 = vcombine.high %v2596_v46, %v2596_v46  ;;  %v2614_v24 = vcombine.high %v2606_v51, %v2606_v51  ;;  %v2963_v43 = vsel %vm2850_vm7, %v2589_v4, -inf }
 0x22a   : > { %v4219_v30 = vsel %vm4189_vm13, %v3123_v36, %v4218_v12  ;;  %v2970_v10 = vsel %vm2850_vm7, %v2597_v7, -inf  ;;  %v2977_v47 = vsel %vm2850_vm7, %v2596_v46, -inf  ;;  %v2615_v57 = vcombine.high %v2613_v11, %v2613_v11  ;;  %v2475_v36 = vld [vmem:[%s6375_s9 + $0xc8] sm:$0xff] }
 0x22b   : > { %v4220_v28 = vsel %vm4191_vm14, %v3130_v50, %v4219_v30  ;;  %v2964_v40 = vrot.slane %v2963_v43, 4  ;;  %v2971_v35 = vrot.slane %v2970_v10, 4  ;;  %v2978_v63 = vrot.slane %v2977_v47, 4  ;;  %v2477_v50 = vld [vmem:[%s6375_s9 + $0xd8] sm:$0xff] }
 0x22c   : > { %v4399_v5 = vsel %vm4394_vm15, %v4220_v28, %v4379_v62  ;;  %v2984_v18 = vsel %vm2850_vm7, %v2598_v33, -inf  ;;  %v2991_v49 = vsel %vm2850_vm7, %v2606_v51, -inf  ;;  %v2998_v41 = vsel %vm2850_vm7, %v2614_v24, -inf }
 0x22d   : > { %4810 = vmatprep.mubr.msk.f32.mxu1 %vm4411_vm0, %v4399_v5  ;;  %v2965_v42 = vmax.f32 %v2963_v43, %v2964_v40  ;;  %v2972_v13 = vmax.f32 %v2970_v10, %v2971_v35  ;;  %v2985_v48 = vrot.slane %v2984_v18, 4  ;;  %v2992_v56 = vrot.slane %v2991_v49, 4  ;;  %v2462_v43 = vld [vmem:[%s6375_s9 + $0x60] sm:$0xff]  ;;  %v2463_v40 = vld [vmem:[%s6375_s9 + $0x68] sm:$0xff]  ;;  %v2464_v35 = vld [vmem:[%s6375_s9 + $0x70] sm:$0xff] }
 0x22e   : > { %4811 = vmatmul.mubr.msk.f32.vlgmr.msra.gmra.mrb[0].mxu1 %vm4411_vm0, %v6551_v26  ;;  %v2979_v27 = vmax.f32 %v2977_v47, %v2978_v63  ;;  %v3005_v6 = vsel %vm2850_vm7, %v2613_v11, -inf  ;;  %v3012_v44 = vsel %vm2850_vm7, %v2615_v57, -inf  ;;  %v2999_v52 = vrot.slane %v2998_v41, 4  ;;  %v2465_v5 = vld [vmem:[%s6375_s9 + $0x78] sm:$0xff] }
 0x22f   : > { %v2966_v14 = vrot.slane %v2965_v42, 2  ;;  %v2973_v59 = vrot.slane %v2972_v13, 2  ;;  %v2986_v16 = vmax.f32 %v2984_v18, %v2985_v48  ;;  %v2993_v29 = vmax.f32 %v2991_v49, %v2992_v56 }
 0x230   : > { %v2980_v37 = vrot.slane %v2979_v27, 2  ;;  %v3006_v38 = vrot.slane %v3005_v6, 4  ;;  %v3013_v2 = vrot.slane %v3012_v44, 4  ;;  %v3000_v25 = vmax.f32 %v2998_v41, %v2999_v52 }
 0x231   : > { %v2967_v0 = vmax.f32 %v2965_v42, %v2966_v14  ;;  %v2974_v8 = vmax.f32 %v2972_v13, %v2973_v59  ;;  %v2987_v26 = vrot.slane %v2986_v16, 2  ;;  %v2994_v17 = vrot.slane %v2993_v29, 2 }
 0x232   : > { %v2981_v58 = vmax.f32 %v2979_v27, %v2980_v37  ;;  %v3007_v34 = vmax.f32 %v3005_v6, %v3006_v38  ;;  %v3014_v45 = vmax.f32 %v3012_v44, %v3013_v2  ;;  %v3001_v39 = vrot.slane %v3000_v25, 2  ;;  %v4375_v6 = vpop.permute.xlu0 %4374 }
 0x233   : > { %v2968_v21 = vrot.slane %v2967_v0, 1  ;;  %v2975_v3 = vrot.slane %v2974_v8, 1  ;;  %v2988_v61 = vmax.f32 %v2986_v16, %v2987_v26  ;;  %v2995_v32 = vmax.f32 %v2993_v29, %v2994_v17 }
 0x234   : > { %v2982_v15 = vrot.slane %v2981_v58, 1  ;;  %v3008_v1 = vrot.slane %v3007_v34, 2  ;;  %v3015_v9 = vrot.slane %v3014_v45, 2  ;;  %v3002_v46 = vmax.f32 %v3000_v25, %v3001_v39 }
 0x235   : > { %v2969_v53 = vmax.f32 %v2967_v0, %v2968_v21  ;;  %v2976_v60 = vmax.f32 %v2974_v8, %v2975_v3  ;;  %v2989_v22 = vrot.slane %v2988_v61, 1  ;;  %v2996_v4 = vrot.slane %v2995_v32, 1 }
 0x236   : > { %v2983_v23 = vmax.f32 %v2981_v58, %v2982_v15  ;;  %v3009_v31 = vmax.f32 %v3007_v34, %v3008_v1  ;;  %v3016_v51 = vmax.f32 %v3014_v45, %v3015_v9  ;;  %v2494_v12 = vmax.f32 %v2474_v19, %v2476_v55 }
 0x237   : > { %v2990_v54 = vmax.f32 %v2988_v61, %v2989_v22  ;;  %v2997_v7 = vmax.f32 %v2995_v32, %v2996_v4  ;;  %v4200_v62 = vsel %vm4179_vm8, %v2976_v60, %v2969_v53  ;;  %v3003_v33 = vrot.slane %v3002_v46, 1 }
 0x238   : > { %v3010_v11 = vrot.slane %v3009_v31, 1  ;;  %v3017_v24 = vrot.slane %v3016_v51, 1  ;;  %v4201_v30 = vsel %vm4181_vm9, %v2983_v23, %v4200_v62  ;;  %v2495_v47 = vmax.f32 %v2475_v36, %v2477_v50 }
 0x239   : > { %v4202_v10 = vsel %vm4183_vm10, %v2990_v54, %v4201_v30  ;;  %v2718_v28 = vcombine.high %v2494_v12, %v2494_v12  ;;  %v2725_v57 = vrot.slane %v2494_v12, %v4913_v20  ;;  %v3004_v63 = vmax.f32 %v3002_v46, %v3003_v33 }
 0x23a   : > { %v3011_v18 = vmax.f32 %v3009_v31, %v3010_v11  ;;  %v3018_v49 = vmax.f32 %v3016_v51, %v3017_v24  ;;  %v4203_v42 = vsel %vm4185_vm11, %v2997_v7, %v4202_v10  ;;  %v2735_v56 = vcombine.high %v2495_v47, %v2495_v47 }
 0x23b   : > { %v2732_v13 = vrot.slane %v2718_v28, %v4913_v20  ;;  %v2733_v48 = vcombine.high %v2725_v57, %v2725_v57  ;;  %v2742_v27 = vrot.slane %v2495_v47, %v4913_v20  ;;  %v4204_v41 = vsel %vm4187_vm12, %v3004_v63, %v4203_v42 }
 0x23c   : > { %v3187_v44 = vsel %vm2850_vm7, %v2725_v57, -inf  ;;  %v6602_v14 = vmax.f32 %v2462_v43, %v2464_v35  ;;  %v6604_v59 = vmax.f32 %v2463_v40, %v2465_v5  ;;  %v4205_v16 = vsel %vm4189_vm13, %v3011_v18, %v4204_v41 }
 0x23d   : > { %v2734_v29 = vcombine.high %v2732_v13, %v2732_v13  ;;  %v2749_v37 = vrot.slane %v2735_v56, %v4913_v20  ;;  %v2750_v52 = vcombine.high %v2742_v27, %v2742_v27  ;;  %v4206_v38 = vsel %vm4191_vm14, %v3018_v49, %v4205_v16 }
 0x23e   : > { %v3188_v2 = vrot.slane %v3187_v44, 4  ;;  %v3194_v0 = vsel %vm2850_vm7, %v2733_v48, -inf  ;;  %v3201_v8 = vsel %vm2850_vm7, %v2732_v13, -inf  ;;  %v4397_v26 = vsel %vm4394_vm15, %v4206_v38, %v4375_v6 }
 0x23f   : > { %v2751_v17 = vcombine.high %v2749_v37, %v2749_v37  ;;  %v3195_v58 = vrot.slane %v3194_v0, 4  ;;  %v3202_v25 = vrot.slane %v3201_v8, 4  ;;  %4807 = vmatprep.mubr.msk.f32.mxu0 %vm4411_vm0, %v4397_v26  ;;  %v3208_v45 = vsel %vm2850_vm7, %v2734_v29, -inf }
 0x240   : > { %v3189_v34 = vmax.f32 %v3187_v44, %v3188_v2  ;;  %v3215_v21 = vsel %vm2850_vm7, %v2742_v27, -inf  ;;  %v3222_v3 = vsel %vm2850_vm7, %v2750_v52, -inf  ;;  %v3209_v15 = vrot.slane %v3208_v45, 4 }
 0x241   : > { %v3196_v61 = vmax.f32 %v3194_v0, %v3195_v58  ;;  %v3203_v32 = vmax.f32 %v3201_v8, %v3202_v25  ;;  %v3216_v39 = vrot.slane %v3215_v21, 4  ;;  %v3223_v9 = vrot.slane %v3222_v3, 4  ;;  %v4383_v25 = vpop.permute.xlu1 %4382 }
 0x242   : > { %v3190_v1 = vrot.slane %v3189_v34, 2  ;;  %v3229_v19 = vsel %vm2850_vm7, %v2749_v37, -inf  ;;  %v3236_v55 = vsel %vm2850_vm7, %v2751_v17, -inf  ;;  %v3210_v22 = vmax.f32 %v3208_v45, %v3209_v15 }
 0x243   : > { %v3197_v53 = vrot.slane %v3196_v61, 2  ;;  %v3204_v60 = vrot.slane %v3203_v32, 2  ;;  %v3217_v4 = vmax.f32 %v3215_v21, %v3216_v39  ;;  %v3224_v46 = vmax.f32 %v3222_v3, %v3223_v9 }
 0x244   : > { %v3191_v23 = vmax.f32 %v3189_v34, %v3190_v1  ;;  %v3230_v31 = vrot.slane %v3229_v19, 4  ;;  %v3237_v51 = vrot.slane %v3236_v55, 4  ;;  %v3211_v54 = vrot.slane %v3210_v22, 2 }
 0x245   : > { %v3198_v36 = vmax.f32 %v3196_v61, %v3197_v53  ;;  %v3205_v50 = vmax.f32 %v3203_v32, %v3204_v60  ;;  %v3218_v7 = vrot.slane %v3217_v4, 2  ;;  %v3225_v12 = vrot.slane %v3224_v46, 2 }
 0x246   : > { %v3192_v62 = vrot.slane %v3191_v23, 1  ;;  %v3231_v33 = vmax.f32 %v3229_v19, %v3230_v31  ;;  %v3238_v11 = vmax.f32 %v3236_v55, %v3237_v51  ;;  %v3212_v43 = vmax.f32 %v3210_v22, %v3211_v54 }
 0x247   : > { %v3199_v24 = vrot.slane %v3198_v36, 1  ;;  %v3206_v30 = vrot.slane %v3205_v50, 1  ;;  %v3219_v10 = vmax.f32 %v3217_v4, %v3218_v7  ;;  %v3226_v28 = vmax.f32 %v3224_v46, %v3225_v12 }
 0x248   : > { %v3193_v47 = vmax.f32 %v3191_v23, %v3192_v62  ;;  %v3232_v57 = vrot.slane %v3231_v33, 2  ;;  %v3239_v40 = vrot.slane %v3238_v11, 2  ;;  %v3213_v63 = vrot.slane %v3212_v43, 1 }
 0x249   : > { %v3200_v35 = vmax.f32 %v3198_v36, %v3199_v24  ;;  %v3207_v5 = vmax.f32 %v3205_v50, %v3206_v30  ;;  %v3220_v18 = vrot.slane %v3219_v10, 1  ;;  %v3227_v49 = vrot.slane %v3226_v28, 1 }
 0x24a   : > { %v3233_v42 = vmax.f32 %v3231_v33, %v3232_v57  ;;  %v3240_v13 = vmax.f32 %v3238_v11, %v3239_v40  ;;  %v2616_v48 = vcombine.high %v6602_v14, %v6602_v14  ;;  %v3214_v56 = vmax.f32 %v3212_v43, %v3213_v63 }
 0x24b   : > { %v3221_v27 = vmax.f32 %v3219_v10, %v3220_v18  ;;  %v4228_v41 = vsel %vm4179_vm8, %v3200_v35, %v3193_v47  ;;  %v2623_v6 = vrot.slane %v6602_v14, %v4913_v20  ;;  %v3228_v44 = vmax.f32 %v3226_v28, %v3227_v49 }
 0x24c   : > { %v3234_v16 = vrot.slane %v3233_v42, 1  ;;  %v3241_v29 = vrot.slane %v3240_v13, 1  ;;  %v4229_v37 = vsel %vm4181_vm9, %v3207_v5, %v4228_v41  ;;  %v2630_v38 = vrot.slane %v2616_v48, %v4913_v20  ;;  %v2480_v48 = vld [vmem:[%s6375_s9 + $0xf0] sm:$0xff] }
 0x24d   : > { %v4230_v52 = vsel %vm4183_vm10, %v3214_v56, %v4229_v37  ;;  %v2631_v2 = vcombine.high %v2623_v6, %v2623_v6  ;;  %v2633_v0 = vcombine.high %v6604_v59, %v6604_v59  ;;  %v2640_v14 = vrot.slane %v6604_v59, %v4913_v20 }
 0x24e   : > { %v3235_v8 = vmax.f32 %v3233_v42, %v3234_v16  ;;  %v3242_v26 = vmax.f32 %v3240_v13, %v3241_v29  ;;  %v4231_v17 = vsel %vm4185_vm11, %v3221_v27, %v4230_v52  ;;  %v2632_v34 = vcombine.high %v2630_v38, %v2630_v38  ;;  %v2478_v13 = vld [vmem:[%s6375_s9 + $0xe0] sm:$0xff]  ;;  %v2479_v52 = vld [vmem:[%s6375_s9 + $0xe8] sm:$0xff] }
 0x24f   : > { %v4232_v58 = vsel %vm4187_vm12, %v3228_v44, %v4231_v17  ;;  %v2647_v45 = vrot.slane %v2633_v0, %v4913_v20  ;;  %v3019_v21 = vsel %vm2850_vm7, %v2623_v6, -inf  ;;  %v2648_v61 = vcombine.high %v2640_v14, %v2640_v14 }
 0x250   : > { %v4233_v3 = vsel %vm4189_vm13, %v3235_v8, %v4232_v58  ;;  %v3020_v32 = vrot.slane %v3019_v21, 4  ;;  %v3026_v15 = vsel %vm2850_vm7, %v2631_v2, -inf  ;;  %v3033_v59 = vsel %vm2850_vm7, %v2630_v38, -inf  ;;  %v2481_v38 = vld [vmem:[%s6375_s9 + $0xf8] sm:$0xff] }
 0x251   : > { %v4234_v39 = vsel %vm4191_vm14, %v3242_v26, %v4233_v3  ;;  %v2649_v1 = vcombine.high %v2647_v45, %v2647_v45  ;;  %v3027_v9 = vrot.slane %v3026_v15, 4  ;;  %v3034_v53 = vrot.slane %v3033_v59, 4 }
 0x252   : > { %v4401_v19 = vsel %vm4394_vm15, %v4234_v39, %v4383_v25  ;;  %v3021_v55 = vmax.f32 %v3019_v21, %v3020_v32  ;;  %v3040_v60 = vsel %vm2850_vm7, %v2632_v34, -inf  ;;  %v3047_v23 = vsel %vm2850_vm7, %v2640_v14, -inf }
 0x253   : > { %v3028_v22 = vmax.f32 %v3026_v15, %v3027_v9  ;;  %v3041_v4 = vrot.slane %v3040_v60, 4  ;;  %v3054_v46 = vsel %vm2850_vm7, %v2648_v61, -inf  ;;  %4813 = vmatprep.mubr.msk.f32.mxu1 %vm4411_vm0, %v4401_v19  ;;  %v3035_v51 = vmax.f32 %v3033_v59, %v3034_v53 }
 0x254   : > { %v3022_v31 = vrot.slane %v3021_v55, 2  ;;  %v3048_v36 = vrot.slane %v3047_v23, 4  ;;  %v3055_v50 = vrot.slane %v3054_v46, 4  ;;  %v3061_v62 = vsel %vm2850_vm7, %v2647_v45, -inf }
 0x255   : > { %v3029_v54 = vrot.slane %v3028_v22, 2  ;;  %v3042_v7 = vmax.f32 %v3040_v60, %v3041_v4  ;;  %v3068_v12 = vsel %vm2850_vm7, %v2649_v1, -inf  ;;  %v3036_v11 = vrot.slane %v3035_v51, 2  ;;  %v4377_v4 = vpop.permute.xlu0 %4376 }
 0x256   : > { %v3023_v33 = vmax.f32 %v3021_v55, %v3022_v31  ;;  %v3049_v24 = vmax.f32 %v3047_v23, %v3048_v36  ;;  %v3056_v30 = vmax.f32 %v3054_v46, %v3055_v50  ;;  %v3062_v47 = vrot.slane %v3061_v62, 4 }
 0x257   : > { %v3030_v43 = vmax.f32 %v3028_v22, %v3029_v54  ;;  %v3043_v10 = vrot.slane %v3042_v7, 2  ;;  %v3069_v28 = vrot.slane %v3068_v12, 4  ;;  %v3037_v40 = vmax.f32 %v3035_v51, %v3036_v11 }
 0x258   : > { %v3024_v57 = vrot.slane %v3023_v33, 1  ;;  %v3050_v35 = vrot.slane %v3049_v24, 2  ;;  %v3057_v5 = vrot.slane %v3056_v30, 2  ;;  %v3063_v49 = vmax.f32 %v3061_v62, %v3062_v47 }
 0x259   : > { %v3031_v63 = vrot.slane %v3030_v43, 1  ;;  %v3044_v18 = vmax.f32 %v3042_v7, %v3043_v10  ;;  %v3070_v42 = vmax.f32 %v3068_v12, %v3069_v28  ;;  %v3038_v27 = vrot.slane %v3037_v40, 1 }
 0x25a   : > { %v3025_v56 = vmax.f32 %v3023_v33, %v3024_v57  ;;  %v3051_v41 = vmax.f32 %v3049_v24, %v3050_v35  ;;  %v3058_v6 = vmax.f32 %v3056_v30, %v3057_v5  ;;  %v3064_v29 = vrot.slane %v3063_v49, 2 }
 0x25b   : > { %v3032_v44 = vmax.f32 %v3030_v43, %v3031_v63  ;;  %v3045_v16 = vrot.slane %v3044_v18, 1  ;;  %v3071_v37 = vrot.slane %v3070_v42, 2  ;;  %v3039_v2 = vmax.f32 %v3037_v40, %v3038_v27 }
 0x25c   : > { %v3052_v0 = vrot.slane %v3051_v41, 1  ;;  %v3059_v8 = vrot.slane %v3058_v6, 1  ;;  %v2496_v26 = vmax.f32 %v2478_v13, %v2480_v48  ;;  %v3065_v14 = vmax.f32 %v3063_v49, %v3064_v29 }
 0x25d   : > { %v3046_v17 = vmax.f32 %v3044_v18, %v3045_v16  ;;  %v3072_v58 = vmax.f32 %v3070_v42, %v3071_v37  ;;  %v4207_v25 = vsel %vm4179_vm8, %v3032_v44, %v3025_v56  ;;  %v2497_v3 = vmax.f32 %v2479_v52, %v2481_v38 }
 0x25e   : > { %v3053_v34 = vmax.f32 %v3051_v41, %v3052_v0  ;;  %v3060_v45 = vmax.f32 %v3058_v6, %v3059_v8  ;;  %v4208_v21 = vsel %vm4181_vm9, %v3039_v2, %v4207_v25  ;;  %v3066_v61 = vrot.slane %v3065_v14, 1 }
 0x25f   : > { %v3073_v32 = vrot.slane %v3072_v58, 1  ;;  %v4209_v15 = vsel %vm4183_vm10, %v3046_v17, %v4208_v21  ;;  %v2752_v39 = vcombine.high %v2496_v26, %v2496_v26  ;;  %v2759_v9 = vrot.slane %v2496_v26, %v4913_v20 }
 0x260   : > { %v4210_v1 = vsel %vm4185_vm11, %v3053_v34, %v4209_v15  ;;  %v2769_v59 = vcombine.high %v2497_v3, %v2497_v3  ;;  %v2776_v19 = vrot.slane %v2497_v3, %v4913_v20  ;;  %v3067_v55 = vmax.f32 %v3065_v14, %v3066_v61 }
 0x261   : > { %v3074_v53 = vmax.f32 %v3072_v58, %v3073_v32  ;;  %v4211_v60 = vsel %vm4187_vm12, %v3060_v45, %v4210_v1  ;;  %v2766_v22 = vrot.slane %v2752_v39, %v4913_v20  ;;  %v2767_v23 = vcombine.high %v2759_v9, %v2759_v9 }
 0x262   : > { %v2783_v46 = vrot.slane %v2769_v59, %v4913_v20  ;;  %v2784_v31 = vcombine.high %v2776_v19, %v2776_v19  ;;  %v3243_v51 = vsel %vm2850_vm7, %v2759_v9, -inf  ;;  %v4212_v36 = vsel %vm4189_vm13, %v3067_v55, %v4211_v60 }
 0x263   : > { %v2768_v50 = vcombine.high %v2766_v22, %v2766_v22  ;;  %v3244_v54 = vrot.slane %v3243_v51, 4  ;;  %v3257_v7 = vsel %vm2850_vm7, %v2766_v22, -inf  ;;  %v4213_v62 = vsel %vm4191_vm14, %v3074_v53, %v4212_v36 }
 0x264   : > { %v2785_v12 = vcombine.high %v2783_v46, %v2783_v46  ;;  %v3250_v33 = vsel %vm2850_vm7, %v2767_v23, -inf  ;;  %v3258_v11 = vrot.slane %v3257_v7, 4  ;;  %v4398_v24 = vsel %vm4394_vm15, %v4213_v62, %v4377_v4 }
 0x265   : > { %v3245_v30 = vmax.f32 %v3243_v51, %v3244_v54  ;;  %v3251_v43 = vrot.slane %v3250_v33, 4  ;;  %v3264_v20 = vsel %vm2850_vm7, %v2768_v50, -inf  ;;  %4808 = vmatmul.mubr.msk.f32.gmra.mrb[2].mxu0 %vm4411_vm0, %v4398_v24  ;;  %v3271_v28 = vsel %vm2850_vm7, %v2776_v19, -inf  ;;  %v4385_v50 = vpop.permute.xlu1 %4384 }
 0x266   : > { %v3259_v10 = vmax.f32 %v3257_v7, %v3258_v11  ;;  %v3265_v47 = vrot.slane %v3264_v20, 4  ;;  %v3278_v57 = vsel %vm2850_vm7, %v2784_v31, -inf  ;;  %v3272_v5 = vrot.slane %v3271_v28, 4 }
 0x267   : > { %v3246_v40 = vrot.slane %v3245_v30, 2  ;;  %v3252_v35 = vmax.f32 %v3250_v33, %v3251_v43  ;;  %v3279_v63 = vrot.slane %v3278_v57, 4  ;;  %v3285_v42 = vsel %vm2850_vm7, %v2783_v46, -inf }
 0x268   : > { %v3260_v18 = vrot.slane %v3259_v10, 2  ;;  %v3266_v49 = vmax.f32 %v3264_v20, %v3265_v47  ;;  %v3292_v13 = vsel %vm2850_vm7, %v2785_v12, -inf  ;;  %v3273_v27 = vmax.f32 %v3271_v28, %v3272_v5  ;;  %v4777_v12 = vld [vmem:[%s6760_s3] ss:$0 sm:$0xff] }
 0x269   : > { %v3247_v48 = vmax.f32 %v3245_v30, %v3246_v40  ;;  %v3253_v56 = vrot.slane %v3252_v35, 2  ;;  %v3280_v41 = vmax.f32 %v3278_v57, %v3279_v63  ;;  %v3286_v16 = vrot.slane %v3285_v42, 4 }
 0x26a   : > { %v3261_v6 = vmax.f32 %v3259_v10, %v3260_v18  ;;  %v3267_v44 = vrot.slane %v3266_v49, 2  ;;  %v3293_v29 = vrot.slane %v3292_v13, 4  ;;  %v3274_v38 = vrot.slane %v3273_v27, 2 }
 0x26b   : > { %v3248_v37 = vrot.slane %v3247_v48, 1  ;;  %v3254_v52 = vmax.f32 %v3252_v35, %v3253_v56  ;;  %v3281_v2 = vrot.slane %v3280_v41, 2  ;;  %v3287_v26 = vmax.f32 %v3285_v42, %v3286_v16 }
 0x26c   : > { %v3262_v0 = vrot.slane %v3261_v6, 1  ;;  %v3268_v8 = vmax.f32 %v3266_v49, %v3267_v44  ;;  %v3294_v17 = vmax.f32 %v3292_v13, %v3293_v29  ;;  %v3275_v25 = vmax.f32 %v3273_v27, %v3274_v38 }
 0x26d   : > { %v3249_v14 = vmax.f32 %v3247_v48, %v3248_v37  ;;  %v3255_v58 = vrot.slane %v3254_v52, 1  ;;  %v3282_v34 = vmax.f32 %v3280_v41, %v3281_v2  ;;  %v3288_v3 = vrot.slane %v3287_v26, 2 }
 0x26e   : > { %v3263_v45 = vmax.f32 %v3261_v6, %v3262_v0  ;;  %v3269_v21 = vrot.slane %v3268_v8, 1  ;;  %v3295_v61 = vrot.slane %v3294_v17, 2  ;;  %v3276_v15 = vrot.slane %v3275_v25, 1 }
 0x26f   : > { %v3256_v32 = vmax.f32 %v3254_v52, %v3255_v58  ;;  %v3283_v39 = vrot.slane %v3282_v34, 1  ;;  %v3289_v9 = vmax.f32 %v3287_v26, %v3288_v3 }
 0x270   : > { %v3270_v1 = vmax.f32 %v3268_v8, %v3269_v21  ;;  %v3296_v59 = vmax.f32 %v3294_v17, %v3295_v61  ;;  %v3277_v19 = vmax.f32 %v3275_v25, %v3276_v15 }
 0x271   : > { %v3284_v55 = vmax.f32 %v3282_v34, %v3283_v39  ;;  %v4235_v53 = vsel %vm4179_vm8, %v3256_v32, %v3249_v14  ;;  %v3290_v60 = vrot.slane %v3289_v9, 1 }
 0x272   : > { %v3297_v22 = vrot.slane %v3296_v59, 1  ;;  %v4236_v4 = vsel %vm4181_vm9, %v3263_v45, %v4235_v53 }
 0x273   : > { %v4237_v23 = vsel %vm4183_vm10, %v3270_v1, %v4236_v4  ;;  %v3291_v46 = vmax.f32 %v3289_v9, %v3290_v60 }
 0x274   : > { %v3298_v31 = vmax.f32 %v3296_v59, %v3297_v22  ;;  %v4238_v51 = vsel %vm4185_vm11, %v3277_v19, %v4237_v23 }
 0x275   : > { %v4239_v36 = vsel %vm4187_vm12, %v3284_v55, %v4238_v51 }
 0x276   : > { %v4240_v54 = vsel %vm4189_vm13, %v3291_v46, %v4239_v36 }
 0x277   : > { %v4241_v7 = vsel %vm4191_vm14, %v3298_v31, %v4240_v54 }
 0x278   : > { %v4402_v62 = vsel %vm4394_vm15, %v4241_v7, %v4385_v50 }
 0x279   : > { %4814 = vmatmul.mubr.msk.f32.gmra.mrb[2].mxu1 %vm4411_vm0, %v4402_v62 }
 0x2db   : > { %v4806_v33 = vpop.f32.mrb[0].mxu0 }
 0x2dc   : > { %v4508_v11 = vadd.f32 %v4806_v33, %v4777_v12  ;;  %v4502_v24 = vpop.f32.mrb[1].mxu0 }
 0x2dd   : > { %v4503_v30 = vadd.f32 %v4777_v12, %v4502_v24 }
 0x2de   : > { %v4542_v43 = vmax.f32 %v4508_v11, 0.0 }
 0x2df   : > { %v4541_v20 = vmax.f32 %v4503_v30, 0.0 }
 0x2e0   : > { %4550 = vst.msk [vmem:[%s6686_s14 + $0x8] sm:$0xff] %vm4394_vm15, %v4542_v43  ;;  %4567 = vrot.lane.b32.xlu1 %v4542_v43, %s4840_s15 }
 0x2e1   : > { %4549 = vst.msk [vmem:[%s6686_s14] sm:$0xff] %vm4394_vm15, %v4541_v20  ;;  %4565 = vrot.lane.b32.xlu0 %v4541_v20, %s4840_s15 }
 0x301   : > { %v4812_v10 = vpop.f32.mrb[0].mxu1 }
 0x302   : > { %v4528_v47 = vadd.f32 %v4812_v10, %v4777_v12  ;;  %v4522_v28 = vpop.f32.mrb[1].mxu1 }
 0x303   : > { %v4523_v57 = vadd.f32 %v4777_v12, %v4522_v28 }
 0x304   : > { %v4546_v40 = vmax.f32 %v4528_v47, 0.0 }
 0x305   : > { %v4545_v35 = vmax.f32 %v4523_v57, 0.0 }
 0x306   : > { %4554 = vst.msk [vmem:[%s6686_s14 + $0x28] sm:$0xff] %vm4394_vm15, %v4546_v40  ;;  %4575 = vrot.lane.b32.xlu1 %v4546_v40, %s4840_s15 }
 0x307   : > { %4553 = vst.msk [vmem:[%s6686_s14 + $0x20] sm:$0xff] %vm4394_vm15, %v4545_v35  ;;  %4573 = vrot.lane.b32.xlu0 %v4545_v35, %s4840_s15 }
 0x30a   : > { %4599 = vrot.lane.b32.xlu1 %v4542_v43, %s4841_s16 }
 0x30b   : > { %4597 = vrot.lane.b32.xlu0 %v4541_v20, %s4841_s16 }
 0x30e   : > { %4607 = vrot.lane.b32.xlu1 %v4546_v40, %s4841_s16 }
 0x30f   : > { %4605 = vrot.lane.b32.xlu0 %v4545_v35, %s4841_s16 }
 0x338   : > { %v4809_v5 = vpop.f32.mrb[2].mxu0 }
 0x339   : > { %v4518_v63 = vadd.f32 %v4809_v5, %v4777_v12  ;;  %v4512_v18 = vpop.f32.mrb[3].mxu0 }
 0x33a   : > { %v4513_v49 = vadd.f32 %v4777_v12, %v4512_v18 }
 0x33b   : > { %v4544_v42 = vmax.f32 %v4518_v63, 0.0 }
 0x33c   : > { %v4543_v13 = vmax.f32 %v4513_v49, 0.0 }
 0x33d   : > { %4552 = vst.msk [vmem:[%s6686_s14 + $0x18] sm:$0xff] %vm4394_vm15, %v4544_v42  ;;  %4571 = vrot.lane.b32.xlu1 %v4544_v42, %s4840_s15 }
 0x33e   : > { %4551 = vst.msk [vmem:[%s6686_s14 + $0x10] sm:$0xff] %vm4394_vm15, %v4543_v13  ;;  %4569 = vrot.lane.b32.xlu0 %v4543_v13, %s4840_s15 }
 0x34c   : > { %v4815_v48 = vpop.f32.mrb[2].mxu1 }
 0x34d   : > { %v4538_v56 = vadd.f32 %v4815_v48, %v4777_v12  ;;  %v4532_v27 = vpop.f32.mrb[3].mxu1 }
 0x34e   : > { %v4533_v41 = vadd.f32 %v4777_v12, %v4532_v27 }
 0x34f   : > { %v4548_v6 = vmax.f32 %v4538_v56, 0.0 }
 0x350   : > { %v4547_v44 = vmax.f32 %v4533_v41, 0.0 }
 0x351   : > { %4556 = vst.msk [vmem:[%s6686_s14 + $0x38] sm:$0xff] %vm4394_vm15, %v4548_v6  ;;  %4579 = vrot.lane.b32.xlu1 %v4548_v6, %s4840_s15 }
 0x352   : > { %4555 = vst.msk [vmem:[%s6686_s14 + $0x30] sm:$0xff] %vm4394_vm15, %v4547_v44  ;;  %4577 = vrot.lane.b32.xlu0 %v4547_v44, %s4840_s15  ;;  %v4568_v16 = vpop.permute.xlu1 %4567 }
 0x353   : > { %4590 = vst.msk [vmem:[%s6714_s19 + $0x8] sm:$0xff] %vm4394_vm15, %v4568_v16  ;;  %v4566_v29 = vpop.permute.xlu0 %4565 }
 0x354   : > { %4589 = vst.msk [vmem:[%s6714_s19] sm:$0xff] %vm4394_vm15, %v4566_v29 }
 0x355   : > { %4603 = vrot.lane.b32.xlu1 %v4544_v42, %s4841_s16 }
 0x356   : > { %4601 = vrot.lane.b32.xlu0 %v4543_v13, %s4841_s16 }
 0x359   : > { %4611 = vrot.lane.b32.xlu1 %v4548_v6, %s4841_s16 }
 0x35a   : > { %4609 = vrot.lane.b32.xlu0 %v4547_v44, %s4841_s16 }
 0x378   : > { %v4576_v37 = vpop.permute.xlu1 %4575 }
 0x379   : > { %4594 = vst.msk [vmem:[%s6714_s19 + $0x28] sm:$0xff] %vm4394_vm15, %v4576_v37  ;;  %v4574_v52 = vpop.permute.xlu0 %4573 }
 0x37a   : > { %4593 = vst.msk [vmem:[%s6714_s19 + $0x20] sm:$0xff] %vm4394_vm15, %v4574_v52 }
 0x37c   : > { %v4600_v38 = vpop.permute.xlu1 %4599 }
 0x37d   : > { %4622 = vst.msk [vmem:[%s296_s24 + $0x8] sm:$0xff] %vm4394_vm15, %v4600_v38  ;;  %v4598_v2 = vpop.permute.xlu0 %4597 }
 0x37e   : > { %4621 = vst.msk [vmem:[%s296_s24] sm:$0xff] %vm4394_vm15, %v4598_v2 }
 0x380   : > { %v4608_v0 = vpop.permute.xlu1 %4607 }
 0x381   : > { %4626 = vst.msk [vmem:[%s296_s24 + $0x28] sm:$0xff] %vm4394_vm15, %v4608_v0  ;;  %v4606_v8 = vpop.permute.xlu0 %4605 }
 0x382   : > { %4625 = vst.msk [vmem:[%s296_s24 + $0x20] sm:$0xff] %vm4394_vm15, %v4606_v8 }
 0x3af   : > { %v4572_v26 = vpop.permute.xlu1 %4571 }
 0x3b0   : > { %4592 = vst.msk [vmem:[%s6714_s19 + $0x18] sm:$0xff] %vm4394_vm15, %v4572_v26  ;;  %v4570_v17 = vpop.permute.xlu0 %4569 }
 0x3b1   : > { %4591 = vst.msk [vmem:[%s6714_s19 + $0x10] sm:$0xff] %vm4394_vm15, %v4570_v17 }
 0x3c3   : > { %v4580_v14 = vpop.permute.xlu1 %4579 }
 0x3c4   : > { %4596 = vst.msk [vmem:[%s6714_s19 + $0x38] sm:$0xff] %vm4394_vm15, %v4580_v14  ;;  %v4578_v58 = vpop.permute.xlu0 %4577 }
 0x3c5   : > { %4595 = vst.msk [vmem:[%s6714_s19 + $0x30] sm:$0xff] %vm4394_vm15, %v4578_v58 }
 0x3c7   : > { %v4604_v25 = vpop.permute.xlu1 %4603 }
 0x3c8   : > { %4624 = vst.msk [vmem:[%s296_s24 + $0x18] sm:$0xff] %vm4394_vm15, %v4604_v25  ;;  %v4602_v34 = vpop.permute.xlu0 %4601 }
 0x3c9   : > { %4623 = vst.msk [vmem:[%s296_s24 + $0x10] sm:$0xff] %vm4394_vm15, %v4602_v34 }
 0x3cb   : > { %v4612_v45 = vpop.permute.xlu1 %4611 }
 0x3cc   : > { %4628 = vst.msk [vmem:[%s296_s24 + $0x38] sm:$0xff] %vm4394_vm15, %v4612_v45  ;;  %v4610_v21 = vpop.permute.xlu0 %4609 }
 0x3cd   : > { %4627 = vst.msk [vmem:[%s296_s24 + $0x30] sm:$0xff] %vm4394_vm15, %v4610_v21 }
 0x3ce PF: > { %s17_s21 = sadd.s32 1, %s4836_s21  }
 0x3cf   : > { %p14_p4 = scmp.ge.s32.totalorder %s17_s21, 4  }
 0x3d1   :  { %16 = sbr.rel (!%p14_p4) target bundleno = 1 (0x1), region = 93 }

</bundles_post_ra>
